<compile_context>
chip_gen: v5e
topology: v5e:2x2
jax: 0.10.0
libtpu: 0.0.40
codegen_flags: <defaults>
</compile_context>

<pallas_src>
import functools

import jax
import jax.numpy as jnp
from jax.experimental import pallas as pl
from jax.experimental.pallas import tpu as pltpu

BN_EPS = 1e-5
NEG_SLOPE = 0.1
MAX_UNROLLED_CHUNKS = 16      # bound on statically-unrolled conv chunks per grid step


# ---------------------------------------------------------------------------
# Small helpers
# ---------------------------------------------------------------------------

def _round8(c):
    return max(8, ((c + 7) // 8) * 8)


def _largest_divisor(n, cap):
    cap = max(1, min(n, cap))
    for d in range(cap, 0, -1):
        if n % d == 0:
            return d
    return 1


def _vmem_limit_bytes():
    """Generation-aware scoped-VMEM limit (~70% of physical capacity)."""
    cap = None
    try:
        cap = getattr(pltpu.get_tpu_info(), "vmem_capacity_bytes", None)
    except Exception:
        cap = None
    if not cap:
        cap = 64 * 1024 * 1024            # conservative (v7x-sized) fallback
    return int(min(0.7 * cap, 100 * 1024 * 1024))


def _cparams(vmem_limit, *semantics):
    return pltpu.CompilerParams(
        dimension_semantics=tuple(semantics),
        vmem_limit_bytes=int(vmem_limit),
    )


def _slab_bytes(sub, lane, dtype):
    """VMEM bytes of one leading-index slab of a block whose trailing dims are (sub, lane)."""
    pack = 4 // jnp.dtype(dtype).itemsize          # f32 -> 1, bf16 -> 2
    sub_tile = 8 * pack
    return (-(-sub // sub_tile)) * (-(-lane // 128)) * 4096


# ---------------------------------------------------------------------------
# Pallas kernels
# ---------------------------------------------------------------------------

def conv_stats_kernel(xf_ref, w_ref, yv_ref, stats_ref, *,
                      kh, kw, wpv, ow, chunk_oh, n_chunks):
    """Pass 1: conv via KH*KW shifted scanline matmuls + BN sum / sum-of-squares.

    xf_ref:    [1, 1, LT, CIN]  bf16   flattened spatially-padded scanlines (one OH tile)
    w_ref:     [KH*KW, CIN, COUT] bf16
    yv_ref:    [1, 1, RVT, COUT] bf16  "virtual-width" conv output for this tile
    stats_ref: [1, 2, COUT] f32        per-core-split sum / sum-of-squares accumulator
    """
    b = pl.program_id(1)
    t = pl.program_id(2)

    @pl.when((b == 0) & (t == 0))
    def _init():
        stats_ref[...] = jnp.zeros_like(stats_ref)

    cout = yv_ref.shape[-1]
    chunk = chunk_oh * wpv
    s_sum = jnp.zeros((1, cout), jnp.float32)
    s_sq = jnp.zeros((1, cout), jnp.float32)

    # vreg-resident f32 accumulation per chunk; a single store per chunk.
    for c in range(n_chunks):                          # statically unrolled (bounded)
        q0 = c * chunk
        acc = jnp.zeros((chunk, cout), jnp.float32)
        for di in range(kh):
            for dj in range(kw):
                off = q0 + di * wpv + dj
                acc = acc + jnp.dot(xf_ref[0, 0, off:off + chunk, :],
                                    w_ref[di * kw + dj],
                                    preferred_element_type=jnp.float32)
        yv_ref[0, 0, q0:q0 + chunk, :] = acc.astype(yv_ref.dtype)

        # In-kernel wrap-column mask (scanline wrap positions, col >= ow, are invalid).
        # OH tiling divides OH exactly, so no row mask is needed.
        col = (q0 + jax.lax.broadcasted_iota(jnp.int32, (chunk, cout), 0)) % wpv
        am = acc * (col < ow).astype(jnp.float32)
        s_sum = s_sum + jnp.sum(am, axis=0, keepdims=True)
        s_sq = s_sq + jnp.sum(am * acc, axis=0, keepdims=True)

    stats_ref[0, 0:1, :] += s_sum
    stats_ref[0, 1:2, :] += s_sq


def _bn_scale_shift(stats_ref, g_ref, b_ref, count):
    s = jnp.sum(stats_ref[...], axis=0)                # sum per-core partials -> [2, C]
    inv_n = 1.0 / count
    mean = s[0:1, :] * inv_n
    var = jnp.maximum(s[1:2, :] * inv_n - mean * mean, 0.0)
    scale = g_ref[...] * jax.lax.rsqrt(var + BN_EPS)
    shift = b_ref[...] - mean * scale
    return scale, shift


def bn_act_kernel(stats_ref, g_ref, b_ref, yv_ref, o_ref, *, count, ow):
    """Pass 2 (no pool): fused BN affine + LeakyReLU; drops wrap columns."""
    scale, shift = _bn_scale_shift(stats_ref, g_ref, b_ref, count)
    z = yv_ref[:, 0:ow, :].astype(jnp.float32) * scale + shift
    o_ref[...] = jnp.where(z > 0.0, z, NEG_SLOPE * z).astype(o_ref.dtype)


def bn_act_pool_kernel(stats_ref, g_ref, b_ref, yv_ref, o_ref, *, count, owp, c):
    """Pass 2 (fused 2x2 MaxPool): BN affine -> 2x2 max -> LeakyReLU.

    yv_ref: [TR, WPV//2, 2*C] bf16  (W pairs packed on the lane axis; TR even)
    o_ref:  [TR//2, OWp, C]
    """
    scale, shift = _bn_scale_shift(stats_ref, g_ref, b_ref, count)
    # Only valid pooled columns are loaded (wrap / floor-mode tail never touched).
    # BN affine stays before the max (exact for any gamma sign); LeakyReLU is monotone
    # so it commutes with max and runs after pooling, on 4x fewer elements.
    ze = yv_ref[:, 0:owp, 0:c].astype(jnp.float32) * scale + shift
    zo = yv_ref[:, 0:owp, c:2 * c].astype(jnp.float32) * scale + shift
    zw = jnp.maximum(ze, zo)                           # pool over W pairs   [TR, OWp, C]
    tr = zw.shape[0]
    zr = zw.reshape(tr // 2, 2, owp, c)                # H pairs on a leading axis (free)
    zp = jnp.maximum(zr[:, 0], zr[:, 1])               # pool over H pairs   [TR//2, OWp, C]
    o_ref[...] = jnp.where(zp > 0.0, zp, NEG_SLOPE * zp).astype(o_ref.dtype)


def maxpool_kernel(x_ref, o_ref, *, owp, c):
    """Standalone MaxPool2d(2,2).  x_ref: [TR, W//2, 2*C]; o_ref: [TR//2, OWp, C]."""
    zw = jnp.maximum(x_ref[:, 0:owp, 0:c], x_ref[:, 0:owp, c:2 * c])
    tr = zw.shape[0]
    zr = zw.reshape(tr // 2, 2, owp, c)
    o_ref[...] = jnp.maximum(zr[:, 0], zr[:, 1]).astype(o_ref.dtype)


# ---------------------------------------------------------------------------
# Block / pool wrappers
# ---------------------------------------------------------------------------

def _prep_weights(blk, cin_pad, cout_pad):
    """torch [Cout, Cin, KH, KW] -> [KH*KW, CIN_pad, COUT_pad] bf16."""
    w = blk["w"]
    cout, cin, kh, kw = w.shape
    wm = jnp.transpose(w, (2, 3, 1, 0)).reshape(kh * kw, cin, cout)
    wm = jnp.pad(wm, ((0, 0), (0, cin_pad - cin), (0, cout_pad - cout)))
    return wm.astype(jnp.bfloat16)


def cnn_block_apply(x, blk, fuse_pool, vmem_limit):
    """x: [N, H, W, CIN_pad] bf16.  Conv + train-mode BN + LeakyReLU (+ fused MaxPool)."""
    n, h, w_sp, cin_pad = x.shape
    assert cin_pad == _round8(blk["cin"])
    k = blk["ksize"]
    pad = blk["pad"]
    assert blk["stride"] == 1  # TODO(synk): stride>1 needs strided scanlines / im2col.
    cout = blk["cout"]
    cpad = _round8(cout)

    hp, wpc = h + 2 * pad, w_sp + 2 * pad
    oh, ow = hp - k + 1, wpc - k + 1
    wpv = wpc + (wpc % 2)                  # even virtual width (enables fused pooling)

    # ---- pass-1 tiling: chunk_oh rows per vreg-resident chunk, t_oh rows per grid tile
    chunk_oh = _largest_divisor(oh, max(1, 256 // wpv))
    vmem_budget = vmem_limit // 2
    cap_rows = max(chunk_oh, vmem_budget // (wpv * 1024))    # bf16 in+out, double-buffered
    n_chunks = _largest_divisor(oh // chunk_oh,
                                max(1, min(MAX_UNROLLED_CHUNKS, cap_rows // chunk_oh)))
    t_oh = chunk_oh * n_chunks             # divides oh exactly
    n_t = oh // t_oh
    t_rows = t_oh + k                      # padded-image rows needed per tile (incl. slack)
    l_t = t_rows * wpv
    rv_t = t_oh * wpv

    # spatial pad (+1 slack row) and flatten to scanlines; bf16 halves DMA bytes.
    xb = x.astype(jnp.bfloat16)
    xp = jnp.pad(xb, ((0, 0), (pad, pad + 1), (pad, pad + (wpv - wpc)), (0, 0)))
    if n_t == 1:
        xf = xp.reshape(n, 1, l_t, cin_pad)
    else:
        # overlapping OH tiles (k halo rows) built once by XLA.
        ridx = jnp.arange(n_t)[:, None] * t_oh + jnp.arange(t_rows)[None, :]
        xf = xp[:, ridx].reshape(n, n_t, l_t, cin_pad)

    wmat = _prep_weights(blk, cin_pad, cpad)

    split = 2 if (n >= 2 and n % 2 == 0) else 1     # per-TensorCore partial stats (v7x)
    n_per = n // split

    # -------- Pass 1: conv + BN statistics --------
    kern1 = functools.partial(conv_stats_kernel, kh=k, kw=k, wpv=wpv, ow=ow,
                              chunk_oh=chunk_oh, n_chunks=n_chunks)
    yv, stats = pl.pallas_call(
        kern1,
        out_shape=(jax.ShapeDtypeStruct((n, n_t, rv_t, cpad), jnp.bfloat16),
                   jax.ShapeDtypeStruct((split, 2, cpad), jnp.float32)),
        grid=(split, n_per, n_t),
        in_specs=[
            pl.BlockSpec((1, 1, l_t, cin_pad), lambda p, b, t: (p * n_per + b, t, 0, 0)),
            pl.BlockSpec((k * k, cin_pad, cpad), lambda p, b, t: (0, 0, 0)),
        ],
        out_specs=(
            pl.BlockSpec((1, 1, rv_t, cpad), lambda p, b, t: (p * n_per + b, t, 0, 0)),
            pl.BlockSpec((1, 2, cpad), lambda p, b, t: (p, 0, 0)),
        ),
        compiler_params=_cparams(vmem_limit, "parallel", "arbitrary", "arbitrary"),
    )(xf, wmat)

    gamma = jnp.pad(blk["gamma"], (0, cpad - cout)).reshape(1, cpad).astype(jnp.float32)
    beta = jnp.pad(blk["beta"], (0, cpad - cout)).reshape(1, cpad).astype(jnp.float32)
    count = float(n * oh * ow)
    small_specs = [
        pl.BlockSpec((split, 2, cpad), lambda i: (0, 0, 0)),
        pl.BlockSpec((1, cpad), lambda i: (0, 0)),
        pl.BlockSpec((1, cpad), lambda i: (0, 0)),
    ]
    out_dtype = jnp.bfloat16

    # -------- Pass 2: normalize + LeakyReLU (+ fused 2x2 MaxPool) --------
    if fuse_pool:
        ohp, owp = oh // 2, ow // 2
        oh_use = 2 * ohp
        yv_r = yv.reshape(n, oh, wpv, cpad)
        if oh_use != oh:
            yv_r = yv_r[:, :oh_use]                  # floor-mode pool on odd OH (rare)
        yv_p = yv_r.reshape(n * oh_use, wpv // 2, 2 * cpad)   # W pairs on the lane axis
        rows = n * oh_use
        per_row = (2 * _slab_bytes(wpv // 2, 2 * cpad, jnp.bfloat16)
                   + _slab_bytes(owp, cpad, out_dtype))
        tr = min(4096, max(2, vmem_budget // per_row), rows)
        tr -= tr % 2                                  # H pairs never straddle a block
        kern2 = functools.partial(bn_act_pool_kernel, count=count, owp=owp, c=cpad)
        out = pl.pallas_call(
            kern2,
            out_shape=jax.ShapeDtypeStruct((n * ohp, owp, cpad), out_dtype),
            grid=(pl.cdiv(rows, tr),),
            in_specs=small_specs + [
                pl.BlockSpec((tr, wpv // 2, 2 * cpad), lambda i: (i, 0, 0)),
            ],
            out_specs=pl.BlockSpec((tr // 2, owp, cpad), lambda i: (i, 0, 0)),
            compiler_params=_cparams(vmem_limit, "parallel"),
        )(stats, gamma, beta, yv_p)
        return out.reshape(n, ohp, owp, cpad)

    yv_rows = yv.reshape(n * oh, wpv, cpad)
    rows = n * oh
    per_row = 2 * (_slab_bytes(wpv, cpad, jnp.bfloat16) + _slab_bytes(ow, cpad, out_dtype))
    tr = min(4096, max(1, vmem_budget // per_row), rows)
    kern2 = functools.partial(bn_act_kernel, count=count, ow=ow)
    out = pl.pallas_call(
        kern2,
        out_shape=jax.ShapeDtypeStruct((n * oh, ow, cpad), out_dtype),
        grid=(pl.cdiv(rows, tr),),
        in_specs=small_specs + [pl.BlockSpec((tr, wpv, cpad), lambda i: (i, 0, 0))],
        out_specs=pl.BlockSpec((tr, ow, cpad), lambda i: (i, 0, 0)),
        compiler_params=_cparams(vmem_limit, "parallel"),
    )(stats, gamma, beta, yv_rows)
    return out.reshape(n, oh, ow, cpad)


def maxpool_apply(x, vmem_limit):
    """Standalone MaxPool2d(2,2) for 'M' entries not preceded by a conv block."""
    n, h, w_sp, c = x.shape
    ohp, owp = h // 2, w_sp // 2
    xv = x
    if (h % 2) or (w_sp % 2):
        xv = x[:, :2 * ohp, :2 * owp, :]             # floor mode
    xr = xv.reshape(n * 2 * ohp, owp, 2 * c)         # W pairs packed on the lane axis
    rows = n * 2 * ohp
    per_row = 2 * _slab_bytes(owp, 2 * c, x.dtype) + _slab_bytes(owp, c, x.dtype)
    tr = min(4096, max(2, (vmem_limit // 2) // per_row), rows)
    tr -= tr % 2
    out = pl.pallas_call(
        functools.partial(maxpool_kernel, owp=owp, c=c),
        out_shape=jax.ShapeDtypeStruct((n * ohp, owp, c), x.dtype),
        grid=(pl.cdiv(rows, tr),),
        in_specs=[pl.BlockSpec((tr, owp, 2 * c), lambda i: (i, 0, 0))],
        out_specs=pl.BlockSpec((tr // 2, owp, c), lambda i: (i, 0, 0)),
        compiler_params=_cparams(vmem_limit, "parallel"),
    )(xr)
    return out.reshape(n, ohp, owp, c)


# ---------------------------------------------------------------------------
# Parameter construction (mirrors SimpleCNN.__init__) and forward
# ---------------------------------------------------------------------------

def build_simple_cnn_params(architecture, in_channels, key):
    layers = []
    c = in_channels

    def add_block(mod, c, key):
        ksz, filters, stride, padding = mod
        key, k1, k2, k3 = jax.random.split(key, 4)
        wgt = 0.1 * jax.random.normal(k1, (filters, c, ksz, ksz), jnp.float32)
        gamma = 1.0 + 0.1 * jax.random.normal(k2, (filters,), jnp.float32)
        beta = 0.1 * jax.random.normal(k3, (filters,), jnp.float32)
        layers.append(("block", dict(w=wgt, gamma=gamma, beta=beta, ksize=ksz,
                                     stride=stride, pad=padding, cin=c, cout=filters)))
        return filters, key

    for module in architecture:
        if isinstance(module, tuple):
            c, key = add_block(module, c, key)
        elif module == "M":
            layers.append(("maxpool", None))
        elif isinstance(module, list):
            for _ in range(module[-1]):
                for j in range(len(module) - 1):
                    c, key = add_block(module[j], c, key)
    return layers, c


def simple_cnn_forward(x_nchw, layers, out_channels, vmem_limit):
    x = jnp.transpose(x_nchw, (0, 2, 3, 1))                       # NCHW -> NHWC
    cin = x.shape[-1]
    x = jnp.pad(x, ((0, 0), (0, 0), (0, 0), (0, _round8(cin) - cin)))
    x = x.astype(jnp.bfloat16)                                    # bf16 activations in HBM
    i = 0
    while i < len(layers):
        kind, blk = layers[i]
        if kind == "block":
            fuse = (i + 1 < len(layers)) and layers[i + 1][0] == "maxpool"
            x = cnn_block_apply(x, blk, fuse_pool=fuse, vmem_limit=vmem_limit)
            i += 2 if fuse else 1
        else:
            x = maxpool_apply(x, vmem_limit)
            i += 1
    x = x[..., :out_channels].astype(jnp.float32)                 # drop channel padding
    return jnp.transpose(x, (0, 3, 1, 2))                         # back to NCHW


# ---------------------------------------------------------------------------
# Demo
# ---------------------------------------------------------------------------

if __name__ == "__main__":
    key = jax.random.PRNGKey(0)
    key, xkey, pkey = jax.random.split(key, 3)

    # architecture entries: (kernel_size, filters, stride, padding) | 'M' | [block, ..., repeats]
    architecture = [
        (3, 8, 1, 1),
        "M",
        [(3, 8, 1, 1), (3, 16, 1, 1), 1],
        "M",
    ]
    in_channels = 4

    x = jax.random.normal(xkey, (2, in_channels, 16, 16), jnp.float32)  # NCHW
    layers, out_c = build_simple_cnn_params(architecture, in_channels, pkey)
    vmem_limit = _vmem_limit_bytes()

    fwd = jax.jit(lambda inp: simple_cnn_forward(inp, layers, out_c, vmem_limit))
    out = jax.block_until_ready(fwd(x))

    assert out.shape == (2, 16, 4, 4), out.shape
    assert out.dtype == jnp.float32
    assert bool(jnp.all(jnp.isfinite(out)))
    print("KERNEL_OK")
</pallas_src>

<mosaic_0001>
module attributes {stable_mosaic.version = 11 : i64} {
  func.func @bn_act_pool_kernel(%arg0: i32, %arg1: memref<2x2x8xf32, #tpu.memory_space<vmem>>, %arg2: memref<1x8xf32, #tpu.memory_space<vmem>>, %arg3: memref<1x8xf32, #tpu.memory_space<vmem>>, %arg4: memref<32x9x16xbf16, #tpu.memory_space<vmem>>, %arg5: memref<16x8x8xbf16, #tpu.memory_space<vmem>>) attributes {dimension_semantics = [#tpu.dimension_semantics<parallel>], iteration_bounds = array<i64: 1>, scalar_prefetch = 0 : i64, scratch_operands = 0 : i64, tpu.core_type = #tpu.core_type<tc>, window_params = [{pipeline_mode = #tpu.pipeline_mode<synchronous>, transform_indices = @transform_0, window_bounds = array<i64: 2, 2, 8>}, {pipeline_mode = #tpu.pipeline_mode<synchronous>, transform_indices = @transform_1, window_bounds = array<i64: 1, 8>}, {pipeline_mode = #tpu.pipeline_mode<synchronous>, transform_indices = @transform_2, window_bounds = array<i64: 1, 8>}, {transform_indices = @transform_3, window_bounds = array<i64: 32, 9, 16>}, {transform_indices = @transform_4, window_bounds = array<i64: 16, 8, 8>}]} {
    %c0 = arith.constant 0 : index
    %c0_0 = arith.constant 0 : index
    %c0_1 = arith.constant 0 : index
    %0 = vector.load %arg1[%c0, %c0_0, %c0_1] : memref<2x2x8xf32, #tpu.memory_space<vmem>>, vector<2x2x8xf32>
    %cst = arith.constant dense<0.000000e+00> : vector<2x8xf32>
    %1 = vector.multi_reduction <add>, %0, %cst [0] : vector<2x2x8xf32> to vector<2x8xf32>
    %2 = vector.extract_strided_slice %1 {offsets = [0, 0], sizes = [1, 8], strides = [1, 1]} : vector<2x8xf32> to vector<1x8xf32>
    %cst_2 = arith.constant 0.001953125 : f32
    %3 = vector.broadcast %cst_2 : f32 to vector<1x8xf32>
    %4 = arith.mulf %2, %3 : vector<1x8xf32>
    %5 = vector.extract_strided_slice %1 {offsets = [1, 0], sizes = [1, 8], strides = [1, 1]} : vector<2x8xf32> to vector<1x8xf32>
    %cst_3 = arith.constant 0.001953125 : f32
    %6 = vector.broadcast %cst_3 : f32 to vector<1x8xf32>
    %7 = arith.mulf %5, %6 : vector<1x8xf32>
    %8 = arith.mulf %4, %4 : vector<1x8xf32>
    %9 = arith.subf %7, %8 : vector<1x8xf32>
    %cst_4 = arith.constant 0.000000e+00 : f32
    %10 = vector.broadcast %cst_4 : f32 to vector<1x8xf32>
    %11 = arith.maximumf %9, %10 : vector<1x8xf32>
    %c0_5 = arith.constant 0 : index
    %c0_6 = arith.constant 0 : index
    %12 = vector.load %arg2[%c0_5, %c0_6] : memref<1x8xf32, #tpu.memory_space<vmem>>, vector<1x8xf32>
    %cst_7 = arith.constant 9.99999974E-6 : f32
    %13 = vector.broadcast %cst_7 : f32 to vector<1x8xf32>
    %14 = arith.addf %11, %13 : vector<1x8xf32>
    %15 = math.rsqrt %14 : vector<1x8xf32>
    %16 = arith.mulf %12, %15 : vector<1x8xf32>
    %c0_8 = arith.constant 0 : index
    %c0_9 = arith.constant 0 : index
    %17 = vector.load %arg3[%c0_8, %c0_9] : memref<1x8xf32, #tpu.memory_space<vmem>>, vector<1x8xf32>
    %18 = arith.mulf %4, %16 : vector<1x8xf32>
    %19 = arith.subf %17, %18 : vector<1x8xf32>
    %c0_10 = arith.constant 0 : index
    %c0_11 = arith.constant 0 : index
    %c0_12 = arith.constant 0 : index
    %20 = vector.load %arg4[%c0_10, %c0_11, %c0_12] : memref<32x9x16xbf16, #tpu.memory_space<vmem>>, vector<32x8x8xbf16>
    %21 = arith.extf %20 : vector<32x8x8xbf16> to vector<32x8x8xf32>
    %22 = vector.shape_cast %16 : vector<1x8xf32> to vector<1x1x8xf32>
    %23 = vector.broadcast %22 : vector<1x1x8xf32> to vector<32x8x8xf32>
    %24 = arith.mulf %21, %23 : vector<32x8x8xf32>
    %25 = vector.shape_cast %19 : vector<1x8xf32> to vector<1x1x8xf32>
    %26 = vector.broadcast %25 : vector<1x1x8xf32> to vector<32x8x8xf32>
    %27 = arith.addf %24, %26 : vector<32x8x8xf32>
    %c0_13 = arith.constant 0 : index
    %c0_14 = arith.constant 0 : index
    %c8 = arith.constant 8 : index
    %28 = vector.load %arg4[%c0_13, %c0_14, %c8] : memref<32x9x16xbf16, #tpu.memory_space<vmem>>, vector<32x8x8xbf16>
    %29 = arith.extf %28 : vector<32x8x8xbf16> to vector<32x8x8xf32>
    %30 = vector.shape_cast %16 : vector<1x8xf32> to vector<1x1x8xf32>
    %31 = vector.broadcast %30 : vector<1x1x8xf32> to vector<32x8x8xf32>
    %32 = arith.mulf %29, %31 : vector<32x8x8xf32>
    %33 = vector.shape_cast %19 : vector<1x8xf32> to vector<1x1x8xf32>
    %34 = vector.broadcast %33 : vector<1x1x8xf32> to vector<32x8x8xf32>
    %35 = arith.addf %32, %34 : vector<32x8x8xf32>
    %36 = arith.maximumf %27, %35 : vector<32x8x8xf32>
    %37 = vector.shape_cast %36 : vector<32x8x8xf32> to vector<16x2x8x8xf32>
    %38 = vector.extract_strided_slice %37 {offsets = [0, 0, 0, 0], sizes = [16, 1, 8, 8], strides = [1, 1, 1, 1]} : vector<16x2x8x8xf32> to vector<16x1x8x8xf32>
    %39 = vector.shape_cast %38 : vector<16x1x8x8xf32> to vector<16x8x8xf32>
    %40 = vector.extract_strided_slice %37 {offsets = [0, 1, 0, 0], sizes = [16, 1, 8, 8], strides = [1, 1, 1, 1]} : vector<16x2x8x8xf32> to vector<16x1x8x8xf32>
    %41 = vector.shape_cast %40 : vector<16x1x8x8xf32> to vector<16x8x8xf32>
    %42 = arith.maximumf %39, %41 : vector<16x8x8xf32>
    %cst_15 = arith.constant 0.000000e+00 : f32
    %43 = vector.broadcast %cst_15 : f32 to vector<16x8x8xf32>
    %44 = arith.cmpf ogt, %42, %43 : vector<16x8x8xf32>
    %cst_16 = arith.constant 1.000000e-01 : f32
    %45 = vector.broadcast %cst_16 : f32 to vector<16x8x8xf32>
    %46 = arith.mulf %45, %42 : vector<16x8x8xf32>
    %47 = arith.select %44, %42, %46 : vector<16x8x8xi1>, vector<16x8x8xf32>
    %48 = arith.truncf %47 : vector<16x8x8xf32> to vector<16x8x8xbf16>
    %c0_17 = arith.constant 0 : index
    %c0_18 = arith.constant 0 : index
    %c0_19 = arith.constant 0 : index
    %49 = vector.load %arg5[%c0_17, %c0_18, %c0_19] : memref<16x8x8xbf16, #tpu.memory_space<vmem>>, vector<16x8x8xbf16>
    tpu.vector_store %arg5[%c0_17, %c0_18, %c0_19], %48 {strides = array<i32>} : memref<16x8x8xbf16, #tpu.memory_space<vmem>>, vector<16x8x8xbf16>,
    return
  }
  func.func @transform_0(%arg0: i32) -> (i32, i32, i32) {
    %c0_i32 = arith.constant 0 : i32
    %c0_i32_0 = arith.constant 0 : i32
    %c0_i32_1 = arith.constant 0 : i32
    %c0_i32_2 = arith.constant 0 : i32
    return %c0_i32, %c0_i32_0, %c0_i32_1 : i32, i32, i32
  }
  func.func @transform_1(%arg0: i32) -> (i32, i32) {
    %c0_i32 = arith.constant 0 : i32
    %c0_i32_0 = arith.constant 0 : i32
    %c0_i32_1 = arith.constant 0 : i32
    return %c0_i32, %c0_i32_0 : i32, i32
  }
  func.func @transform_2(%arg0: i32) -> (i32, i32) {
    %c0_i32 = arith.constant 0 : i32
    %c0_i32_0 = arith.constant 0 : i32
    %c0_i32_1 = arith.constant 0 : i32
    return %c0_i32, %c0_i32_0 : i32, i32
  }
  func.func @transform_3(%arg0: i32) -> (i32, i32, i32) {
    %c0_i32 = arith.constant 0 : i32
    %c0_i32_0 = arith.constant 0 : i32
    %c0_i32_1 = arith.constant 0 : i32
    return %arg0, %c0_i32, %c0_i32_0 : i32, i32, i32
  }
  func.func @transform_4(%arg0: i32) -> (i32, i32, i32) {
    %c0_i32 = arith.constant 0 : i32
    %c0_i32_0 = arith.constant 0 : i32
    %c0_i32_1 = arith.constant 0 : i32
    return %arg0, %c0_i32, %c0_i32_0 : i32, i32, i32
  }
}

module attributes {stable_mosaic.version = 11 : i64} {
  func.func @conv_stats_kernel(%arg0: i32, %arg1: i32, %arg2: i32, %arg3: memref<1x1x342x8xbf16, #tpu.memory_space<vmem>>, %arg4: memref<9x8x8xbf16, #tpu.memory_space<vmem>>, %arg5: memref<1x1x288x8xbf16, #tpu.memory_space<vmem>>, %arg6: memref<1x2x8xf32, #tpu.memory_space<vmem>>) attributes {dimension_semantics = [#tpu.dimension_semantics<parallel>, #tpu.dimension_semantics<arbitrary>, #tpu.dimension_semantics<arbitrary>], iteration_bounds = array<i64: 2, 1, 1>, scalar_prefetch = 0 : i64, scratch_operands = 0 : i64, tpu.core_type = #tpu.core_type<tc>, window_params = [{transform_indices = @transform_0, window_bounds = array<i64: 1, 1, 342, 8>}, {pipeline_mode = #tpu.pipeline_mode<synchronous>, transform_indices = @transform_1, window_bounds = array<i64: 9, 8, 8>}, {transform_indices = @transform_2, window_bounds = array<i64: 1, 1, 288, 8>}, {transform_indices = @transform_3, window_bounds = array<i64: 1, 2, 8>}]} {
    %c0_i32 = arith.constant 0 : i32
    %0 = arith.cmpi eq, %arg1, %c0_i32 : i32
    %c0_i32_0 = arith.constant 0 : i32
    %1 = arith.cmpi eq, %arg2, %c0_i32_0 : i32
    %2 = arith.andi %0, %1 : i1
    %3 = arith.extui %2 : i1 to i32
    %c0_i32_1 = arith.constant 0 : i32
    %4 = arith.cmpi ne, %3, %c0_i32_1 : i32
    scf.if %4 {
      %cst_161 = arith.constant 0.000000e+00 : f32
      %199 = vector.broadcast %cst_161 : f32 to vector<1x2x8xf32>
      %c0_162 = arith.constant 0 : index
      %c0_163 = arith.constant 0 : index
      %c0_164 = arith.constant 0 : index
      %200 = vector.load %arg6[%c0_162, %c0_163, %c0_164] : memref<1x2x8xf32, #tpu.memory_space<vmem>>, vector<1x2x8xf32>
      tpu.vector_store %arg6[%c0_162, %c0_163, %c0_164], %199 {strides = array<i32>} : memref<1x2x8xf32, #tpu.memory_space<vmem>>, vector<1x2x8xf32>,
    } else {
    }
    %cst = arith.constant 0.000000e+00 : f32
    %5 = vector.broadcast %cst : f32 to vector<1x8xf32>
    %cst_2 = arith.constant 0.000000e+00 : f32
    %6 = vector.broadcast %cst_2 : f32 to vector<1x8xf32>
    %cst_3 = arith.constant 0.000000e+00 : f32
    %7 = vector.broadcast %cst_3 : f32 to vector<144x8xf32>
    %c0 = arith.constant 0 : index
    %c0_4 = arith.constant 0 : index
    %c0_5 = arith.constant 0 : index
    %c0_6 = arith.constant 0 : index
    %8 = vector.load %arg3[%c0, %c0_4, %c0_5, %c0_6] : memref<1x1x342x8xbf16, #tpu.memory_space<vmem>>, vector<1x1x144x8xbf16>
    %9 = vector.shape_cast %8 : vector<1x1x144x8xbf16> to vector<144x8xbf16>
    %c0_7 = arith.constant 0 : index
    %c0_8 = arith.constant 0 : index
    %c0_9 = arith.constant 0 : index
    %10 = vector.load %arg4[%c0_7, %c0_8, %c0_9] : memref<9x8x8xbf16, #tpu.memory_space<vmem>>, vector<1x8x8xbf16>
    %11 = vector.shape_cast %10 : vector<1x8x8xbf16> to vector<8x8xbf16>
    %cst_10 = arith.constant dense<0.000000e+00> : vector<144x8xf32>
    %12 = tpu.matmul %9, %11, %cst_10 {dimension_numbers = #tpu.dot_dimension_numbers<[1], [0], [0], [1], [0, 0, 1, 1], [], []>} : vector<144x8xbf16>, vector<8x8xbf16>, vector<144x8xf32> -> vector<144x8xf32>
    %13 = arith.addf %7, %12 : vector<144x8xf32>
    %c0_11 = arith.constant 0 : index
    %c0_12 = arith.constant 0 : index
    %c1 = arith.constant 1 : index
    %c0_13 = arith.constant 0 : index
    %14 = vector.load %arg3[%c0_11, %c0_12, %c1, %c0_13] : memref<1x1x342x8xbf16, #tpu.memory_space<vmem>>, vector<1x1x144x8xbf16>
    %15 = vector.shape_cast %14 : vector<1x1x144x8xbf16> to vector<144x8xbf16>
    %c1_14 = arith.constant 1 : index
    %c0_15 = arith.constant 0 : index
    %c0_16 = arith.constant 0 : index
    %16 = vector.load %arg4[%c1_14, %c0_15, %c0_16] : memref<9x8x8xbf16, #tpu.memory_space<vmem>>, vector<1x8x8xbf16>
    %17 = vector.shape_cast %16 : vector<1x8x8xbf16> to vector<8x8xbf16>
    %cst_17 = arith.constant dense<0.000000e+00> : vector<144x8xf32>
    %18 = tpu.matmul %15, %17, %cst_17 {dimension_numbers = #tpu.dot_dimension_numbers<[1], [0], [0], [1], [0, 0, 1, 1], [], []>} : vector<144x8xbf16>, vector<8x8xbf16>, vector<144x8xf32> -> vector<144x8xf32>
    %19 = arith.addf %13, %18 : vector<144x8xf32>
    %c0_18 = arith.constant 0 : index
    %c0_19 = arith.constant 0 : index
    %c2 = arith.constant 2 : index
    %c0_20 = arith.constant 0 : index
    %20 = vector.load %arg3[%c0_18, %c0_19, %c2, %c0_20] : memref<1x1x342x8xbf16, #tpu.memory_space<vmem>>, vector<1x1x144x8xbf16>
    %21 = vector.shape_cast %20 : vector<1x1x144x8xbf16> to vector<144x8xbf16>
    %c2_21 = arith.constant 2 : index
    %c0_22 = arith.constant 0 : index
    %c0_23 = arith.constant 0 : index
    %22 = vector.load %arg4[%c2_21, %c0_22, %c0_23] : memref<9x8x8xbf16, #tpu.memory_space<vmem>>, vector<1x8x8xbf16>
    %23 = vector.shape_cast %22 : vector<1x8x8xbf16> to vector<8x8xbf16>
    %cst_24 = arith.constant dense<0.000000e+00> : vector<144x8xf32>
    %24 = tpu.matmul %21, %23, %cst_24 {dimension_numbers = #tpu.dot_dimension_numbers<[1], [0], [0], [1], [0, 0, 1, 1], [], []>} : vector<144x8xbf16>, vector<8x8xbf16>, vector<144x8xf32> -> vector<144x8xf32>
    %25 = arith.addf %19, %24 : vector<144x8xf32>
    %c0_25 = arith.constant 0 : index
    %c0_26 = arith.constant 0 : index
    %c18 = arith.constant 18 : index
    %c0_27 = arith.constant 0 : index
    %26 = vector.load %arg3[%c0_25, %c0_26, %c18, %c0_27] : memref<1x1x342x8xbf16, #tpu.memory_space<vmem>>, vector<1x1x144x8xbf16>
    %27 = vector.shape_cast %26 : vector<1x1x144x8xbf16> to vector<144x8xbf16>
    %c3 = arith.constant 3 : index
    %c0_28 = arith.constant 0 : index
    %c0_29 = arith.constant 0 : index
    %28 = vector.load %arg4[%c3, %c0_28, %c0_29] : memref<9x8x8xbf16, #tpu.memory_space<vmem>>, vector<1x8x8xbf16>
    %29 = vector.shape_cast %28 : vector<1x8x8xbf16> to vector<8x8xbf16>
    %cst_30 = arith.constant dense<0.000000e+00> : vector<144x8xf32>
    %30 = tpu.matmul %27, %29, %cst_30 {dimension_numbers = #tpu.dot_dimension_numbers<[1], [0], [0], [1], [0, 0, 1, 1], [], []>} : vector<144x8xbf16>, vector<8x8xbf16>, vector<144x8xf32> -> vector<144x8xf32>
    %31 = arith.addf %25, %30 : vector<144x8xf32>
    %c0_31 = arith.constant 0 : index
    %c0_32 = arith.constant 0 : index
    %c19 = arith.constant 19 : index
    %c0_33 = arith.constant 0 : index
    %32 = vector.load %arg3[%c0_31, %c0_32, %c19, %c0_33] : memref<1x1x342x8xbf16, #tpu.memory_space<vmem>>, vector<1x1x144x8xbf16>
    %33 = vector.shape_cast %32 : vector<1x1x144x8xbf16> to vector<144x8xbf16>
    %c4 = arith.constant 4 : index
    %c0_34 = arith.constant 0 : index
    %c0_35 = arith.constant 0 : index
    %34 = vector.load %arg4[%c4, %c0_34, %c0_35] : memref<9x8x8xbf16, #tpu.memory_space<vmem>>, vector<1x8x8xbf16>
    %35 = vector.shape_cast %34 : vector<1x8x8xbf16> to vector<8x8xbf16>
    %cst_36 = arith.constant dense<0.000000e+00> : vector<144x8xf32>
    %36 = tpu.matmul %33, %35, %cst_36 {dimension_numbers = #tpu.dot_dimension_numbers<[1], [0], [0], [1], [0, 0, 1, 1], [], []>} : vector<144x8xbf16>, vector<8x8xbf16>, vector<144x8xf32> -> vector<144x8xf32>
    %37 = arith.addf %31, %36 : vector<144x8xf32>
    %c0_37 = arith.constant 0 : index
    %c0_38 = arith.constant 0 : index
    %c20 = arith.constant 20 : index
    %c0_39 = arith.constant 0 : index
    %38 = vector.load %arg3[%c0_37, %c0_38, %c20, %c0_39] : memref<1x1x342x8xbf16, #tpu.memory_space<vmem>>, vector<1x1x144x8xbf16>
    %39 = vector.shape_cast %38 : vector<1x1x144x8xbf16> to vector<144x8xbf16>
    %c5 = arith.constant 5 : index
    %c0_40 = arith.constant 0 : index
    %c0_41 = arith.constant 0 : index
    %40 = vector.load %arg4[%c5, %c0_40, %c0_41] : memref<9x8x8xbf16, #tpu.memory_space<vmem>>, vector<1x8x8xbf16>
    %41 = vector.shape_cast %40 : vector<1x8x8xbf16> to vector<8x8xbf16>
    %cst_42 = arith.constant dense<0.000000e+00> : vector<144x8xf32>
    %42 = tpu.matmul %39, %41, %cst_42 {dimension_numbers = #tpu.dot_dimension_numbers<[1], [0], [0], [1], [0, 0, 1, 1], [], []>} : vector<144x8xbf16>, vector<8x8xbf16>, vector<144x8xf32> -> vector<144x8xf32>
    %43 = arith.addf %37, %42 : vector<144x8xf32>
    %c0_43 = arith.constant 0 : index
    %c0_44 = arith.constant 0 : index
    %c36 = arith.constant 36 : index
    %c0_45 = arith.constant 0 : index
    %44 = vector.load %arg3[%c0_43, %c0_44, %c36, %c0_45] : memref<1x1x342x8xbf16, #tpu.memory_space<vmem>>, vector<1x1x144x8xbf16>
    %45 = vector.shape_cast %44 : vector<1x1x144x8xbf16> to vector<144x8xbf16>
    %c6 = arith.constant 6 : index
    %c0_46 = arith.constant 0 : index
    %c0_47 = arith.constant 0 : index
    %46 = vector.load %arg4[%c6, %c0_46, %c0_47] : memref<9x8x8xbf16, #tpu.memory_space<vmem>>, vector<1x8x8xbf16>
    %47 = vector.shape_cast %46 : vector<1x8x8xbf16> to vector<8x8xbf16>
    %cst_48 = arith.constant dense<0.000000e+00> : vector<144x8xf32>
    %48 = tpu.matmul %45, %47, %cst_48 {dimension_numbers = #tpu.dot_dimension_numbers<[1], [0], [0], [1], [0, 0, 1, 1], [], []>} : vector<144x8xbf16>, vector<8x8xbf16>, vector<144x8xf32> -> vector<144x8xf32>
    %49 = arith.addf %43, %48 : vector<144x8xf32>
    %c0_49 = arith.constant 0 : index
    %c0_50 = arith.constant 0 : index
    %c37 = arith.constant 37 : index
    %c0_51 = arith.constant 0 : index
    %50 = vector.load %arg3[%c0_49, %c0_50, %c37, %c0_51] : memref<1x1x342x8xbf16, #tpu.memory_space<vmem>>, vector<1x1x144x8xbf16>
    %51 = vector.shape_cast %50 : vector<1x1x144x8xbf16> to vector<144x8xbf16>
    %c7 = arith.constant 7 : index
    %c0_52 = arith.constant 0 : index
    %c0_53 = arith.constant 0 : index
    %52 = vector.load %arg4[%c7, %c0_52, %c0_53] : memref<9x8x8xbf16, #tpu.memory_space<vmem>>, vector<1x8x8xbf16>
    %53 = vector.shape_cast %52 : vector<1x8x8xbf16> to vector<8x8xbf16>
    %cst_54 = arith.constant dense<0.000000e+00> : vector<144x8xf32>
    %54 = tpu.matmul %51, %53, %cst_54 {dimension_numbers = #tpu.dot_dimension_numbers<[1], [0], [0], [1], [0, 0, 1, 1], [], []>} : vector<144x8xbf16>, vector<8x8xbf16>, vector<144x8xf32> -> vector<144x8xf32>
    %55 = arith.addf %49, %54 : vector<144x8xf32>
    %c0_55 = arith.constant 0 : index
    %c0_56 = arith.constant 0 : index
    %c38 = arith.constant 38 : index
    %c0_57 = arith.constant 0 : index
    %56 = vector.load %arg3[%c0_55, %c0_56, %c38, %c0_57] : memref<1x1x342x8xbf16, #tpu.memory_space<vmem>>, vector<1x1x144x8xbf16>
    %57 = vector.shape_cast %56 : vector<1x1x144x8xbf16> to vector<144x8xbf16>
    %c8 = arith.constant 8 : index
    %c0_58 = arith.constant 0 : index
    %c0_59 = arith.constant 0 : index
    %58 = vector.load %arg4[%c8, %c0_58, %c0_59] : memref<9x8x8xbf16, #tpu.memory_space<vmem>>, vector<1x8x8xbf16>
    %59 = vector.shape_cast %58 : vector<1x8x8xbf16> to vector<8x8xbf16>
    %cst_60 = arith.constant dense<0.000000e+00> : vector<144x8xf32>
    %60 = tpu.matmul %57, %59, %cst_60 {dimension_numbers = #tpu.dot_dimension_numbers<[1], [0], [0], [1], [0, 0, 1, 1], [], []>} : vector<144x8xbf16>, vector<8x8xbf16>, vector<144x8xf32> -> vector<144x8xf32>
    %61 = arith.addf %55, %60 : vector<144x8xf32>
    %62 = arith.truncf %61 : vector<144x8xf32> to vector<144x8xbf16>
    %c0_61 = arith.constant 0 : index
    %c0_62 = arith.constant 0 : index
    %c0_63 = arith.constant 0 : index
    %c0_64 = arith.constant 0 : index
    %63 = vector.load %arg5[%c0_61, %c0_62, %c0_63, %c0_64] : memref<1x1x288x8xbf16, #tpu.memory_space<vmem>>, vector<1x1x144x8xbf16>
    %64 = vector.shape_cast %63 : vector<1x1x144x8xbf16> to vector<144x8xbf16>
    %65 = vector.shape_cast %62 : vector<144x8xbf16> to vector<1x1x144x8xbf16>
    tpu.vector_store %arg5[%c0_61, %c0_62, %c0_63, %c0_64], %65 {strides = array<i32>} : memref<1x1x288x8xbf16, #tpu.memory_space<vmem>>, vector<1x1x144x8xbf16>,
    %66 = tpu.iota {dimensions = array<i32: 0>} : vector<144x8xi32>
    %c0_i32_65 = arith.constant 0 : i32
    %67 = vector.broadcast %c0_i32_65 : i32 to vector<144x8xi32>
    %68 = arith.addi %67, %66 : vector<144x8xi32>
    %c18_i32 = arith.constant 18 : i32
    %c0_i32_66 = arith.constant 0 : i32
    %69 = arith.cmpi eq, %c18_i32, %c0_i32_66 : i32
    %c1_i32 = arith.constant 1 : i32
    %70 = arith.select %69, %c1_i32, %c18_i32 : i32
    %71 = vector.broadcast %70 : i32 to vector<144x8xi32>
    %72 = arith.remsi %68, %71 : vector<144x8xi32>
    %c0_i32_67 = arith.constant 0 : i32
    %73 = vector.broadcast %c0_i32_67 : i32 to vector<144x8xi32>
    %74 = arith.cmpi ne, %72, %73 : vector<144x8xi32>
    %c0_i32_68 = arith.constant 0 : i32
    %75 = vector.broadcast %c0_i32_68 : i32 to vector<144x8xi32>
    %76 = arith.cmpi slt, %72, %75 : vector<144x8xi32>
    %c0_i32_69 = arith.constant 0 : i32
    %77 = arith.cmpi slt, %70, %c0_i32_69 : i32
    %78 = vector.broadcast %77 : i1 to vector<144x8xi1>
    %79 = vector.broadcast %78 : vector<144x8xi1> to vector<144x8xi1>
    %80 = arith.xori %76, %79 : vector<144x8xi1>
    %81 = arith.andi %80, %74 : vector<144x8xi1>
    %82 = vector.broadcast %70 : i32 to vector<144x8xi32>
    %83 = arith.addi %72, %82 : vector<144x8xi32>
    %84 = arith.select %81, %83, %72 : vector<144x8xi1>, vector<144x8xi32>
    %c16_i32 = arith.constant 16 : i32
    %85 = vector.broadcast %c16_i32 : i32 to vector<144x8xi32>
    %86 = arith.cmpi slt, %84, %85 : vector<144x8xi32>
    %87 = arith.extui %86 : vector<144x8xi1> to vector<144x8xi32>
    %88 = arith.sitofp %87 : vector<144x8xi32> to vector<144x8xf32>
    %89 = arith.mulf %61, %88 : vector<144x8xf32>
    %cst_70 = arith.constant dense<0.000000e+00> : vector<8xf32>
    %90 = vector.multi_reduction <add>, %89, %cst_70 [0] : vector<144x8xf32> to vector<8xf32>
    %91 = vector.shape_cast %90 : vector<8xf32> to vector<1x8xf32>
    %92 = arith.addf %5, %91 : vector<1x8xf32>
    %93 = arith.mulf %89, %61 : vector<144x8xf32>
    %cst_71 = arith.constant dense<0.000000e+00> : vector<8xf32>
    %94 = vector.multi_reduction <add>, %93, %cst_71 [0] : vector<144x8xf32> to vector<8xf32>
    %95 = vector.shape_cast %94 : vector<8xf32> to vector<1x8xf32>
    %96 = arith.addf %6, %95 : vector<1x8xf32>
    %cst_72 = arith.constant 0.000000e+00 : f32
    %97 = vector.broadcast %cst_72 : f32 to vector<144x8xf32>
    %c0_73 = arith.constant 0 : index
    %c0_74 = arith.constant 0 : index
    %c144 = arith.constant 144 : index
    %c0_75 = arith.constant 0 : index
    %98 = vector.load %arg3[%c0_73, %c0_74, %c144, %c0_75] : memref<1x1x342x8xbf16, #tpu.memory_space<vmem>>, vector<1x1x144x8xbf16>
    %99 = vector.shape_cast %98 : vector<1x1x144x8xbf16> to vector<144x8xbf16>
    %c0_76 = arith.constant 0 : index
    %c0_77 = arith.constant 0 : index
    %c0_78 = arith.constant 0 : index
    %100 = vector.load %arg4[%c0_76, %c0_77, %c0_78] : memref<9x8x8xbf16, #tpu.memory_space<vmem>>, vector<1x8x8xbf16>
    %101 = vector.shape_cast %100 : vector<1x8x8xbf16> to vector<8x8xbf16>
    %cst_79 = arith.constant dense<0.000000e+00> : vector<144x8xf32>
    %102 = tpu.matmul %99, %101, %cst_79 {dimension_numbers = #tpu.dot_dimension_numbers<[1], [0], [0], [1], [0, 0, 1, 1], [], []>} : vector<144x8xbf16>, vector<8x8xbf16>, vector<144x8xf32> -> vector<144x8xf32>
    %103 = arith.addf %97, %102 : vector<144x8xf32>
    %c0_80 = arith.constant 0 : index
    %c0_81 = arith.constant 0 : index
    %c145 = arith.constant 145 : index
    %c0_82 = arith.constant 0 : index
    %104 = vector.load %arg3[%c0_80, %c0_81, %c145, %c0_82] : memref<1x1x342x8xbf16, #tpu.memory_space<vmem>>, vector<1x1x144x8xbf16>
    %105 = vector.shape_cast %104 : vector<1x1x144x8xbf16> to vector<144x8xbf16>
    %c1_83 = arith.constant 1 : index
    %c0_84 = arith.constant 0 : index
    %c0_85 = arith.constant 0 : index
    %106 = vector.load %arg4[%c1_83, %c0_84, %c0_85] : memref<9x8x8xbf16, #tpu.memory_space<vmem>>, vector<1x8x8xbf16>
    %107 = vector.shape_cast %106 : vector<1x8x8xbf16> to vector<8x8xbf16>
    %cst_86 = arith.constant dense<0.000000e+00> : vector<144x8xf32>
    %108 = tpu.matmul %105, %107, %cst_86 {dimension_numbers = #tpu.dot_dimension_numbers<[1], [0], [0], [1], [0, 0, 1, 1], [], []>} : vector<144x8xbf16>, vector<8x8xbf16>, vector<144x8xf32> -> vector<144x8xf32>
    %109 = arith.addf %103, %108 : vector<144x8xf32>
    %c0_87 = arith.constant 0 : index
    %c0_88 = arith.constant 0 : index
    %c146 = arith.constant 146 : index
    %c0_89 = arith.constant 0 : index
    %110 = vector.load %arg3[%c0_87, %c0_88, %c146, %c0_89] : memref<1x1x342x8xbf16, #tpu.memory_space<vmem>>, vector<1x1x144x8xbf16>
    %111 = vector.shape_cast %110 : vector<1x1x144x8xbf16> to vector<144x8xbf16>
    %c2_90 = arith.constant 2 : index
    %c0_91 = arith.constant 0 : index
    %c0_92 = arith.constant 0 : index
    %112 = vector.load %arg4[%c2_90, %c0_91, %c0_92] : memref<9x8x8xbf16, #tpu.memory_space<vmem>>, vector<1x8x8xbf16>
    %113 = vector.shape_cast %112 : vector<1x8x8xbf16> to vector<8x8xbf16>
    %cst_93 = arith.constant dense<0.000000e+00> : vector<144x8xf32>
    %114 = tpu.matmul %111, %113, %cst_93 {dimension_numbers = #tpu.dot_dimension_numbers<[1], [0], [0], [1], [0, 0, 1, 1], [], []>} : vector<144x8xbf16>, vector<8x8xbf16>, vector<144x8xf32> -> vector<144x8xf32>
    %115 = arith.addf %109, %114 : vector<144x8xf32>
    %c0_94 = arith.constant 0 : index
    %c0_95 = arith.constant 0 : index
    %c162 = arith.constant 162 : index
    %c0_96 = arith.constant 0 : index
    %116 = vector.load %arg3[%c0_94, %c0_95, %c162, %c0_96] : memref<1x1x342x8xbf16, #tpu.memory_space<vmem>>, vector<1x1x144x8xbf16>
    %117 = vector.shape_cast %116 : vector<1x1x144x8xbf16> to vector<144x8xbf16>
    %c3_97 = arith.constant 3 : index
    %c0_98 = arith.constant 0 : index
    %c0_99 = arith.constant 0 : index
    %118 = vector.load %arg4[%c3_97, %c0_98, %c0_99] : memref<9x8x8xbf16, #tpu.memory_space<vmem>>, vector<1x8x8xbf16>
    %119 = vector.shape_cast %118 : vector<1x8x8xbf16> to vector<8x8xbf16>
    %cst_100 = arith.constant dense<0.000000e+00> : vector<144x8xf32>
    %120 = tpu.matmul %117, %119, %cst_100 {dimension_numbers = #tpu.dot_dimension_numbers<[1], [0], [0], [1], [0, 0, 1, 1], [], []>} : vector<144x8xbf16>, vector<8x8xbf16>, vector<144x8xf32> -> vector<144x8xf32>
    %121 = arith.addf %115, %120 : vector<144x8xf32>
    %c0_101 = arith.constant 0 : index
    %c0_102 = arith.constant 0 : index
    %c163 = arith.constant 163 : index
    %c0_103 = arith.constant 0 : index
    %122 = vector.load %arg3[%c0_101, %c0_102, %c163, %c0_103] : memref<1x1x342x8xbf16, #tpu.memory_space<vmem>>, vector<1x1x144x8xbf16>
    %123 = vector.shape_cast %122 : vector<1x1x144x8xbf16> to vector<144x8xbf16>
    %c4_104 = arith.constant 4 : index
    %c0_105 = arith.constant 0 : index
    %c0_106 = arith.constant 0 : index
    %124 = vector.load %arg4[%c4_104, %c0_105, %c0_106] : memref<9x8x8xbf16, #tpu.memory_space<vmem>>, vector<1x8x8xbf16>
    %125 = vector.shape_cast %124 : vector<1x8x8xbf16> to vector<8x8xbf16>
    %cst_107 = arith.constant dense<0.000000e+00> : vector<144x8xf32>
    %126 = tpu.matmul %123, %125, %cst_107 {dimension_numbers = #tpu.dot_dimension_numbers<[1], [0], [0], [1], [0, 0, 1, 1], [], []>} : vector<144x8xbf16>, vector<8x8xbf16>, vector<144x8xf32> -> vector<144x8xf32>
    %127 = arith.addf %121, %126 : vector<144x8xf32>
    %c0_108 = arith.constant 0 : index
    %c0_109 = arith.constant 0 : index
    %c164 = arith.constant 164 : index
    %c0_110 = arith.constant 0 : index
    %128 = vector.load %arg3[%c0_108, %c0_109, %c164, %c0_110] : memref<1x1x342x8xbf16, #tpu.memory_space<vmem>>, vector<1x1x144x8xbf16>
    %129 = vector.shape_cast %128 : vector<1x1x144x8xbf16> to vector<144x8xbf16>
    %c5_111 = arith.constant 5 : index
    %c0_112 = arith.constant 0 : index
    %c0_113 = arith.constant 0 : index
    %130 = vector.load %arg4[%c5_111, %c0_112, %c0_113] : memref<9x8x8xbf16, #tpu.memory_space<vmem>>, vector<1x8x8xbf16>
    %131 = vector.shape_cast %130 : vector<1x8x8xbf16> to vector<8x8xbf16>
    %cst_114 = arith.constant dense<0.000000e+00> : vector<144x8xf32>
    %132 = tpu.matmul %129, %131, %cst_114 {dimension_numbers = #tpu.dot_dimension_numbers<[1], [0], [0], [1], [0, 0, 1, 1], [], []>} : vector<144x8xbf16>, vector<8x8xbf16>, vector<144x8xf32> -> vector<144x8xf32>
    %133 = arith.addf %127, %132 : vector<144x8xf32>
    %c0_115 = arith.constant 0 : index
    %c0_116 = arith.constant 0 : index
    %c180 = arith.constant 180 : index
    %c0_117 = arith.constant 0 : index
    %134 = vector.load %arg3[%c0_115, %c0_116, %c180, %c0_117] : memref<1x1x342x8xbf16, #tpu.memory_space<vmem>>, vector<1x1x144x8xbf16>
    %135 = vector.shape_cast %134 : vector<1x1x144x8xbf16> to vector<144x8xbf16>
    %c6_118 = arith.constant 6 : index
    %c0_119 = arith.constant 0 : index
    %c0_120 = arith.constant 0 : index
    %136 = vector.load %arg4[%c6_118, %c0_119, %c0_120] : memref<9x8x8xbf16, #tpu.memory_space<vmem>>, vector<1x8x8xbf16>
    %137 = vector.shape_cast %136 : vector<1x8x8xbf16> to vector<8x8xbf16>
    %cst_121 = arith.constant dense<0.000000e+00> : vector<144x8xf32>
    %138 = tpu.matmul %135, %137, %cst_121 {dimension_numbers = #tpu.dot_dimension_numbers<[1], [0], [0], [1], [0, 0, 1, 1], [], []>} : vector<144x8xbf16>, vector<8x8xbf16>, vector<144x8xf32> -> vector<144x8xf32>
    %139 = arith.addf %133, %138 : vector<144x8xf32>
    %c0_122 = arith.constant 0 : index
    %c0_123 = arith.constant 0 : index
    %c181 = arith.constant 181 : index
    %c0_124 = arith.constant 0 : index
    %140 = vector.load %arg3[%c0_122, %c0_123, %c181, %c0_124] : memref<1x1x342x8xbf16, #tpu.memory_space<vmem>>, vector<1x1x144x8xbf16>
    %141 = vector.shape_cast %140 : vector<1x1x144x8xbf16> to vector<144x8xbf16>
    %c7_125 = arith.constant 7 : index
    %c0_126 = arith.constant 0 : index
    %c0_127 = arith.constant 0 : index
    %142 = vector.load %arg4[%c7_125, %c0_126, %c0_127] : memref<9x8x8xbf16, #tpu.memory_space<vmem>>, vector<1x8x8xbf16>
    %143 = vector.shape_cast %142 : vector<1x8x8xbf16> to vector<8x8xbf16>
    %cst_128 = arith.constant dense<0.000000e+00> : vector<144x8xf32>
    %144 = tpu.matmul %141, %143, %cst_128 {dimension_numbers = #tpu.dot_dimension_numbers<[1], [0], [0], [1], [0, 0, 1, 1], [], []>} : vector<144x8xbf16>, vector<8x8xbf16>, vector<144x8xf32> -> vector<144x8xf32>
    %145 = arith.addf %139, %144 : vector<144x8xf32>
    %c0_129 = arith.constant 0 : index
    %c0_130 = arith.constant 0 : index
    %c182 = arith.constant 182 : index
    %c0_131 = arith.constant 0 : index
    %146 = vector.load %arg3[%c0_129, %c0_130, %c182, %c0_131] : memref<1x1x342x8xbf16, #tpu.memory_space<vmem>>, vector<1x1x144x8xbf16>
    %147 = vector.shape_cast %146 : vector<1x1x144x8xbf16> to vector<144x8xbf16>
    %c8_132 = arith.constant 8 : index
    %c0_133 = arith.constant 0 : index
    %c0_134 = arith.constant 0 : index
    %148 = vector.load %arg4[%c8_132, %c0_133, %c0_134] : memref<9x8x8xbf16, #tpu.memory_space<vmem>>, vector<1x8x8xbf16>
    %149 = vector.shape_cast %148 : vector<1x8x8xbf16> to vector<8x8xbf16>
    %cst_135 = arith.constant dense<0.000000e+00> : vector<144x8xf32>
    %150 = tpu.matmul %147, %149, %cst_135 {dimension_numbers = #tpu.dot_dimension_numbers<[1], [0], [0], [1], [0, 0, 1, 1], [], []>} : vector<144x8xbf16>, vector<8x8xbf16>, vector<144x8xf32> -> vector<144x8xf32>
    %151 = arith.addf %145, %150 : vector<144x8xf32>
    %152 = arith.truncf %151 : vector<144x8xf32> to vector<144x8xbf16>
    %c0_136 = arith.constant 0 : index
    %c0_137 = arith.constant 0 : index
    %c144_138 = arith.constant 144 : index
    %c0_139 = arith.constant 0 : index
    %153 = vector.load %arg5[%c0_136, %c0_137, %c144_138, %c0_139] : memref<1x1x288x8xbf16, #tpu.memory_space<vmem>>, vector<1x1x144x8xbf16>
    %154 = vector.shape_cast %153 : vector<1x1x144x8xbf16> to vector<144x8xbf16>
    %155 = vector.shape_cast %152 : vector<144x8xbf16> to vector<1x1x144x8xbf16>
    tpu.vector_store %arg5[%c0_136, %c0_137, %c144_138, %c0_139], %155 {strides = array<i32>} : memref<1x1x288x8xbf16, #tpu.memory_space<vmem>>, vector<1x1x144x8xbf16>,
    %156 = tpu.iota {dimensions = array<i32: 0>} : vector<144x8xi32>
    %c144_i32 = arith.constant 144 : i32
    %157 = vector.broadcast %c144_i32 : i32 to vector<144x8xi32>
    %158 = arith.addi %157, %156 : vector<144x8xi32>
    %c18_i32_140 = arith.constant 18 : i32
    %c0_i32_141 = arith.constant 0 : i32
    %159 = arith.cmpi eq, %c18_i32_140, %c0_i32_141 : i32
    %c1_i32_142 = arith.constant 1 : i32
    %160 = arith.select %159, %c1_i32_142, %c18_i32_140 : i32
    %161 = vector.broadcast %160 : i32 to vector<144x8xi32>
    %162 = arith.remsi %158, %161 : vector<144x8xi32>
    %c0_i32_143 = arith.constant 0 : i32
    %163 = vector.broadcast %c0_i32_143 : i32 to vector<144x8xi32>
    %164 = arith.cmpi ne, %162, %163 : vector<144x8xi32>
    %c0_i32_144 = arith.constant 0 : i32
    %165 = vector.broadcast %c0_i32_144 : i32 to vector<144x8xi32>
    %166 = arith.cmpi slt, %162, %165 : vector<144x8xi32>
    %c0_i32_145 = arith.constant 0 : i32
    %167 = arith.cmpi slt, %160, %c0_i32_145 : i32
    %168 = vector.broadcast %167 : i1 to vector<144x8xi1>
    %169 = vector.broadcast %168 : vector<144x8xi1> to vector<144x8xi1>
    %170 = arith.xori %166, %169 : vector<144x8xi1>
    %171 = arith.andi %170, %164 : vector<144x8xi1>
    %172 = vector.broadcast %160 : i32 to vector<144x8xi32>
    %173 = arith.addi %162, %172 : vector<144x8xi32>
    %174 = arith.select %171, %173, %162 : vector<144x8xi1>, vector<144x8xi32>
    %c16_i32_146 = arith.constant 16 : i32
    %175 = vector.broadcast %c16_i32_146 : i32 to vector<144x8xi32>
    %176 = arith.cmpi slt, %174, %175 : vector<144x8xi32>
    %177 = arith.extui %176 : vector<144x8xi1> to vector<144x8xi32>
    %178 = arith.sitofp %177 : vector<144x8xi32> to vector<144x8xf32>
    %179 = arith.mulf %151, %178 : vector<144x8xf32>
    %cst_147 = arith.constant dense<0.000000e+00> : vector<8xf32>
    %180 = vector.multi_reduction <add>, %179, %cst_147 [0] : vector<144x8xf32> to vector<8xf32>
    %181 = vector.shape_cast %180 : vector<8xf32> to vector<1x8xf32>
    %182 = arith.addf %92, %181 : vector<1x8xf32>
    %183 = arith.mulf %179, %151 : vector<144x8xf32>
    %cst_148 = arith.constant dense<0.000000e+00> : vector<8xf32>
    %184 = vector.multi_reduction <add>, %183, %cst_148 [0] : vector<144x8xf32> to vector<8xf32>
    %185 = vector.shape_cast %184 : vector<8xf32> to vector<1x8xf32>
    %186 = arith.addf %96, %185 : vector<1x8xf32>
    %c0_149 = arith.constant 0 : index
    %c0_150 = arith.constant 0 : index
    %c0_151 = arith.constant 0 : index
    %187 = vector.load %arg6[%c0_149, %c0_150, %c0_151] : memref<1x2x8xf32, #tpu.memory_space<vmem>>, vector<1x1x8xf32>
    %188 = vector.shape_cast %187 : vector<1x1x8xf32> to vector<1x8xf32>
    %189 = arith.addf %188, %182 : vector<1x8xf32>
    %c0_152 = arith.constant 0 : index
    %c0_153 = arith.constant 0 : index
    %c0_154 = arith.constant 0 : index
    %190 = vector.load %arg6[%c0_152, %c0_153, %c0_154] : memref<1x2x8xf32, #tpu.memory_space<vmem>>, vector<1x1x8xf32>
    %191 = vector.shape_cast %190 : vector<1x1x8xf32> to vector<1x8xf32>
    %192 = vector.shape_cast %189 : vector<1x8xf32> to vector<1x1x8xf32>
    tpu.vector_store %arg6[%c0_152, %c0_153, %c0_154], %192 {strides = array<i32>} : memref<1x2x8xf32, #tpu.memory_space<vmem>>, vector<1x1x8xf32>,
    %c0_155 = arith.constant 0 : index
    %c1_156 = arith.constant 1 : index
    %c0_157 = arith.constant 0 : index
    %193 = vector.load %arg6[%c0_155, %c1_156, %c0_157] : memref<1x2x8xf32, #tpu.memory_space<vmem>>, vector<1x1x8xf32>
    %194 = vector.shape_cast %193 : vector<1x1x8xf32> to vector<1x8xf32>
    %195 = arith.addf %194, %186 : vector<1x8xf32>
    %c0_158 = arith.constant 0 : index
    %c1_159 = arith.constant 1 : index
    %c0_160 = arith.constant 0 : index
    %196 = vector.load %arg6[%c0_158, %c1_159, %c0_160] : memref<1x2x8xf32, #tpu.memory_space<vmem>>, vector<1x1x8xf32>
    %197 = vector.shape_cast %196 : vector<1x1x8xf32> to vector<1x8xf32>
    %198 = vector.shape_cast %195 : vector<1x8xf32> to vector<1x1x8xf32>
    tpu.vector_store %arg6[%c0_158, %c1_159, %c0_160], %198 {strides = array<i32>} : memref<1x2x8xf32, #tpu.memory_space<vmem>>, vector<1x1x8xf32>,
    return
  }
  func.func @transform_0(%arg0: i32, %arg1: i32, %arg2: i32) -> (i32, i32, i32, i32) {
    %c1_i32 = arith.constant 1 : i32
    %0 = arith.muli %arg0, %c1_i32 : i32
    %1 = arith.addi %0, %arg1 : i32
    %c0_i32 = arith.constant 0 : i32
    %c0_i32_0 = arith.constant 0 : i32
    %c0_i32_1 = arith.constant 0 : i32
    return %1, %arg2, %c0_i32, %c0_i32_0 : i32, i32, i32, i32
  }
  func.func @transform_1(%arg0: i32, %arg1: i32, %arg2: i32) -> (i32, i32, i32) {
    %c0_i32 = arith.constant 0 : i32
    %c0_i32_0 = arith.constant 0 : i32
    %c0_i32_1 = arith.constant 0 : i32
    %c0_i32_2 = arith.constant 0 : i32
    return %c0_i32, %c0_i32_0, %c0_i32_1 : i32, i32, i32
  }
  func.func @transform_2(%arg0: i32, %arg1: i32, %arg2: i32) -> (i32, i32, i32, i32) {
    %c1_i32 = arith.constant 1 : i32
    %0 = arith.muli %arg0, %c1_i32 : i32
    %1 = arith.addi %0, %arg1 : i32
    %c0_i32 = arith.constant 0 : i32
    %c0_i32_0 = arith.constant 0 : i32
    %c0_i32_1 = arith.constant 0 : i32
    return %1, %arg2, %c0_i32, %c0_i32_0 : i32, i32, i32, i32
  }
  func.func @transform_3(%arg0: i32, %arg1: i32, %arg2: i32) -> (i32, i32, i32) {
    %c0_i32 = arith.constant 0 : i32
    %c0_i32_0 = arith.constant 0 : i32
    %c0_i32_1 = arith.constant 0 : i32
    return %arg0, %c0_i32, %c0_i32_0 : i32, i32, i32
  }
}

module attributes {stable_mosaic.version = 11 : i64} {
  func.func @conv_stats_kernel(%arg0: i32, %arg1: i32, %arg2: i32, %arg3: memref<1x1x110x8xbf16, #tpu.memory_space<vmem>>, %arg4: memref<9x8x8xbf16, #tpu.memory_space<vmem>>, %arg5: memref<1x1x80x8xbf16, #tpu.memory_space<vmem>>, %arg6: memref<1x2x8xf32, #tpu.memory_space<vmem>>) attributes {dimension_semantics = [#tpu.dimension_semantics<parallel>, #tpu.dimension_semantics<arbitrary>, #tpu.dimension_semantics<arbitrary>], iteration_bounds = array<i64: 2, 1, 1>, scalar_prefetch = 0 : i64, scratch_operands = 0 : i64, tpu.core_type = #tpu.core_type<tc>, window_params = [{transform_indices = @transform_0, window_bounds = array<i64: 1, 1, 110, 8>}, {pipeline_mode = #tpu.pipeline_mode<synchronous>, transform_indices = @transform_1, window_bounds = array<i64: 9, 8, 8>}, {transform_indices = @transform_2, window_bounds = array<i64: 1, 1, 80, 8>}, {transform_indices = @transform_3, window_bounds = array<i64: 1, 2, 8>}]} {
    %c0_i32 = arith.constant 0 : i32
    %0 = arith.cmpi eq, %arg1, %c0_i32 : i32
    %c0_i32_0 = arith.constant 0 : i32
    %1 = arith.cmpi eq, %arg2, %c0_i32_0 : i32
    %2 = arith.andi %0, %1 : i1
    %3 = arith.extui %2 : i1 to i32
    %c0_i32_1 = arith.constant 0 : i32
    %4 = arith.cmpi ne, %3, %c0_i32_1 : i32
    scf.if %4 {
      %cst_84 = arith.constant 0.000000e+00 : f32
      %109 = vector.broadcast %cst_84 : f32 to vector<1x2x8xf32>
      %c0_85 = arith.constant 0 : index
      %c0_86 = arith.constant 0 : index
      %c0_87 = arith.constant 0 : index
      %110 = vector.load %arg6[%c0_85, %c0_86, %c0_87] : memref<1x2x8xf32, #tpu.memory_space<vmem>>, vector<1x2x8xf32>
      tpu.vector_store %arg6[%c0_85, %c0_86, %c0_87], %109 {strides = array<i32>} : memref<1x2x8xf32, #tpu.memory_space<vmem>>, vector<1x2x8xf32>,
    } else {
    }
    %cst = arith.constant 0.000000e+00 : f32
    %5 = vector.broadcast %cst : f32 to vector<1x8xf32>
    %cst_2 = arith.constant 0.000000e+00 : f32
    %6 = vector.broadcast %cst_2 : f32 to vector<1x8xf32>
    %cst_3 = arith.constant 0.000000e+00 : f32
    %7 = vector.broadcast %cst_3 : f32 to vector<80x8xf32>
    %c0 = arith.constant 0 : index
    %c0_4 = arith.constant 0 : index
    %c0_5 = arith.constant 0 : index
    %c0_6 = arith.constant 0 : index
    %8 = vector.load %arg3[%c0, %c0_4, %c0_5, %c0_6] : memref<1x1x110x8xbf16, #tpu.memory_space<vmem>>, vector<1x1x80x8xbf16>
    %9 = vector.shape_cast %8 : vector<1x1x80x8xbf16> to vector<80x8xbf16>
    %c0_7 = arith.constant 0 : index
    %c0_8 = arith.constant 0 : index
    %c0_9 = arith.constant 0 : index
    %10 = vector.load %arg4[%c0_7, %c0_8, %c0_9] : memref<9x8x8xbf16, #tpu.memory_space<vmem>>, vector<1x8x8xbf16>
    %11 = vector.shape_cast %10 : vector<1x8x8xbf16> to vector<8x8xbf16>
    %cst_10 = arith.constant dense<0.000000e+00> : vector<80x8xf32>
    %12 = tpu.matmul %9, %11, %cst_10 {dimension_numbers = #tpu.dot_dimension_numbers<[1], [0], [0], [1], [0, 0, 1, 1], [], []>} : vector<80x8xbf16>, vector<8x8xbf16>, vector<80x8xf32> -> vector<80x8xf32>
    %13 = arith.addf %7, %12 : vector<80x8xf32>
    %c0_11 = arith.constant 0 : index
    %c0_12 = arith.constant 0 : index
    %c1 = arith.constant 1 : index
    %c0_13 = arith.constant 0 : index
    %14 = vector.load %arg3[%c0_11, %c0_12, %c1, %c0_13] : memref<1x1x110x8xbf16, #tpu.memory_space<vmem>>, vector<1x1x80x8xbf16>
    %15 = vector.shape_cast %14 : vector<1x1x80x8xbf16> to vector<80x8xbf16>
    %c1_14 = arith.constant 1 : index
    %c0_15 = arith.constant 0 : index
    %c0_16 = arith.constant 0 : index
    %16 = vector.load %arg4[%c1_14, %c0_15, %c0_16] : memref<9x8x8xbf16, #tpu.memory_space<vmem>>, vector<1x8x8xbf16>
    %17 = vector.shape_cast %16 : vector<1x8x8xbf16> to vector<8x8xbf16>
    %cst_17 = arith.constant dense<0.000000e+00> : vector<80x8xf32>
    %18 = tpu.matmul %15, %17, %cst_17 {dimension_numbers = #tpu.dot_dimension_numbers<[1], [0], [0], [1], [0, 0, 1, 1], [], []>} : vector<80x8xbf16>, vector<8x8xbf16>, vector<80x8xf32> -> vector<80x8xf32>
    %19 = arith.addf %13, %18 : vector<80x8xf32>
    %c0_18 = arith.constant 0 : index
    %c0_19 = arith.constant 0 : index
    %c2 = arith.constant 2 : index
    %c0_20 = arith.constant 0 : index
    %20 = vector.load %arg3[%c0_18, %c0_19, %c2, %c0_20] : memref<1x1x110x8xbf16, #tpu.memory_space<vmem>>, vector<1x1x80x8xbf16>
    %21 = vector.shape_cast %20 : vector<1x1x80x8xbf16> to vector<80x8xbf16>
    %c2_21 = arith.constant 2 : index
    %c0_22 = arith.constant 0 : index
    %c0_23 = arith.constant 0 : index
    %22 = vector.load %arg4[%c2_21, %c0_22, %c0_23] : memref<9x8x8xbf16, #tpu.memory_space<vmem>>, vector<1x8x8xbf16>
    %23 = vector.shape_cast %22 : vector<1x8x8xbf16> to vector<8x8xbf16>
    %cst_24 = arith.constant dense<0.000000e+00> : vector<80x8xf32>
    %24 = tpu.matmul %21, %23, %cst_24 {dimension_numbers = #tpu.dot_dimension_numbers<[1], [0], [0], [1], [0, 0, 1, 1], [], []>} : vector<80x8xbf16>, vector<8x8xbf16>, vector<80x8xf32> -> vector<80x8xf32>
    %25 = arith.addf %19, %24 : vector<80x8xf32>
    %c0_25 = arith.constant 0 : index
    %c0_26 = arith.constant 0 : index
    %c10 = arith.constant 10 : index
    %c0_27 = arith.constant 0 : index
    %26 = vector.load %arg3[%c0_25, %c0_26, %c10, %c0_27] : memref<1x1x110x8xbf16, #tpu.memory_space<vmem>>, vector<1x1x80x8xbf16>
    %27 = vector.shape_cast %26 : vector<1x1x80x8xbf16> to vector<80x8xbf16>
    %c3 = arith.constant 3 : index
    %c0_28 = arith.constant 0 : index
    %c0_29 = arith.constant 0 : index
    %28 = vector.load %arg4[%c3, %c0_28, %c0_29] : memref<9x8x8xbf16, #tpu.memory_space<vmem>>, vector<1x8x8xbf16>
    %29 = vector.shape_cast %28 : vector<1x8x8xbf16> to vector<8x8xbf16>
    %cst_30 = arith.constant dense<0.000000e+00> : vector<80x8xf32>
    %30 = tpu.matmul %27, %29, %cst_30 {dimension_numbers = #tpu.dot_dimension_numbers<[1], [0], [0], [1], [0, 0, 1, 1], [], []>} : vector<80x8xbf16>, vector<8x8xbf16>, vector<80x8xf32> -> vector<80x8xf32>
    %31 = arith.addf %25, %30 : vector<80x8xf32>
    %c0_31 = arith.constant 0 : index
    %c0_32 = arith.constant 0 : index
    %c11 = arith.constant 11 : index
    %c0_33 = arith.constant 0 : index
    %32 = vector.load %arg3[%c0_31, %c0_32, %c11, %c0_33] : memref<1x1x110x8xbf16, #tpu.memory_space<vmem>>, vector<1x1x80x8xbf16>
    %33 = vector.shape_cast %32 : vector<1x1x80x8xbf16> to vector<80x8xbf16>
    %c4 = arith.constant 4 : index
    %c0_34 = arith.constant 0 : index
    %c0_35 = arith.constant 0 : index
    %34 = vector.load %arg4[%c4, %c0_34, %c0_35] : memref<9x8x8xbf16, #tpu.memory_space<vmem>>, vector<1x8x8xbf16>
    %35 = vector.shape_cast %34 : vector<1x8x8xbf16> to vector<8x8xbf16>
    %cst_36 = arith.constant dense<0.000000e+00> : vector<80x8xf32>
    %36 = tpu.matmul %33, %35, %cst_36 {dimension_numbers = #tpu.dot_dimension_numbers<[1], [0], [0], [1], [0, 0, 1, 1], [], []>} : vector<80x8xbf16>, vector<8x8xbf16>, vector<80x8xf32> -> vector<80x8xf32>
    %37 = arith.addf %31, %36 : vector<80x8xf32>
    %c0_37 = arith.constant 0 : index
    %c0_38 = arith.constant 0 : index
    %c12 = arith.constant 12 : index
    %c0_39 = arith.constant 0 : index
    %38 = vector.load %arg3[%c0_37, %c0_38, %c12, %c0_39] : memref<1x1x110x8xbf16, #tpu.memory_space<vmem>>, vector<1x1x80x8xbf16>
    %39 = vector.shape_cast %38 : vector<1x1x80x8xbf16> to vector<80x8xbf16>
    %c5 = arith.constant 5 : index
    %c0_40 = arith.constant 0 : index
    %c0_41 = arith.constant 0 : index
    %40 = vector.load %arg4[%c5, %c0_40, %c0_41] : memref<9x8x8xbf16, #tpu.memory_space<vmem>>, vector<1x8x8xbf16>
    %41 = vector.shape_cast %40 : vector<1x8x8xbf16> to vector<8x8xbf16>
    %cst_42 = arith.constant dense<0.000000e+00> : vector<80x8xf32>
    %42 = tpu.matmul %39, %41, %cst_42 {dimension_numbers = #tpu.dot_dimension_numbers<[1], [0], [0], [1], [0, 0, 1, 1], [], []>} : vector<80x8xbf16>, vector<8x8xbf16>, vector<80x8xf32> -> vector<80x8xf32>
    %43 = arith.addf %37, %42 : vector<80x8xf32>
    %c0_43 = arith.constant 0 : index
    %c0_44 = arith.constant 0 : index
    %c20 = arith.constant 20 : index
    %c0_45 = arith.constant 0 : index
    %44 = vector.load %arg3[%c0_43, %c0_44, %c20, %c0_45] : memref<1x1x110x8xbf16, #tpu.memory_space<vmem>>, vector<1x1x80x8xbf16>
    %45 = vector.shape_cast %44 : vector<1x1x80x8xbf16> to vector<80x8xbf16>
    %c6 = arith.constant 6 : index
    %c0_46 = arith.constant 0 : index
    %c0_47 = arith.constant 0 : index
    %46 = vector.load %arg4[%c6, %c0_46, %c0_47] : memref<9x8x8xbf16, #tpu.memory_space<vmem>>, vector<1x8x8xbf16>
    %47 = vector.shape_cast %46 : vector<1x8x8xbf16> to vector<8x8xbf16>
    %cst_48 = arith.constant dense<0.000000e+00> : vector<80x8xf32>
    %48 = tpu.matmul %45, %47, %cst_48 {dimension_numbers = #tpu.dot_dimension_numbers<[1], [0], [0], [1], [0, 0, 1, 1], [], []>} : vector<80x8xbf16>, vector<8x8xbf16>, vector<80x8xf32> -> vector<80x8xf32>
    %49 = arith.addf %43, %48 : vector<80x8xf32>
    %c0_49 = arith.constant 0 : index
    %c0_50 = arith.constant 0 : index
    %c21 = arith.constant 21 : index
    %c0_51 = arith.constant 0 : index
    %50 = vector.load %arg3[%c0_49, %c0_50, %c21, %c0_51] : memref<1x1x110x8xbf16, #tpu.memory_space<vmem>>, vector<1x1x80x8xbf16>
    %51 = vector.shape_cast %50 : vector<1x1x80x8xbf16> to vector<80x8xbf16>
    %c7 = arith.constant 7 : index
    %c0_52 = arith.constant 0 : index
    %c0_53 = arith.constant 0 : index
    %52 = vector.load %arg4[%c7, %c0_52, %c0_53] : memref<9x8x8xbf16, #tpu.memory_space<vmem>>, vector<1x8x8xbf16>
    %53 = vector.shape_cast %52 : vector<1x8x8xbf16> to vector<8x8xbf16>
    %cst_54 = arith.constant dense<0.000000e+00> : vector<80x8xf32>
    %54 = tpu.matmul %51, %53, %cst_54 {dimension_numbers = #tpu.dot_dimension_numbers<[1], [0], [0], [1], [0, 0, 1, 1], [], []>} : vector<80x8xbf16>, vector<8x8xbf16>, vector<80x8xf32> -> vector<80x8xf32>
    %55 = arith.addf %49, %54 : vector<80x8xf32>
    %c0_55 = arith.constant 0 : index
    %c0_56 = arith.constant 0 : index
    %c22 = arith.constant 22 : index
    %c0_57 = arith.constant 0 : index
    %56 = vector.load %arg3[%c0_55, %c0_56, %c22, %c0_57] : memref<1x1x110x8xbf16, #tpu.memory_space<vmem>>, vector<1x1x80x8xbf16>
    %57 = vector.shape_cast %56 : vector<1x1x80x8xbf16> to vector<80x8xbf16>
    %c8 = arith.constant 8 : index
    %c0_58 = arith.constant 0 : index
    %c0_59 = arith.constant 0 : index
    %58 = vector.load %arg4[%c8, %c0_58, %c0_59] : memref<9x8x8xbf16, #tpu.memory_space<vmem>>, vector<1x8x8xbf16>
    %59 = vector.shape_cast %58 : vector<1x8x8xbf16> to vector<8x8xbf16>
    %cst_60 = arith.constant dense<0.000000e+00> : vector<80x8xf32>
    %60 = tpu.matmul %57, %59, %cst_60 {dimension_numbers = #tpu.dot_dimension_numbers<[1], [0], [0], [1], [0, 0, 1, 1], [], []>} : vector<80x8xbf16>, vector<8x8xbf16>, vector<80x8xf32> -> vector<80x8xf32>
    %61 = arith.addf %55, %60 : vector<80x8xf32>
    %62 = arith.truncf %61 : vector<80x8xf32> to vector<80x8xbf16>
    %c0_61 = arith.constant 0 : index
    %c0_62 = arith.constant 0 : index
    %c0_63 = arith.constant 0 : index
    %c0_64 = arith.constant 0 : index
    %63 = vector.load %arg5[%c0_61, %c0_62, %c0_63, %c0_64] : memref<1x1x80x8xbf16, #tpu.memory_space<vmem>>, vector<1x1x80x8xbf16>
    %64 = vector.shape_cast %63 : vector<1x1x80x8xbf16> to vector<80x8xbf16>
    %65 = vector.shape_cast %62 : vector<80x8xbf16> to vector<1x1x80x8xbf16>
    tpu.vector_store %arg5[%c0_61, %c0_62, %c0_63, %c0_64], %65 {strides = array<i32>} : memref<1x1x80x8xbf16, #tpu.memory_space<vmem>>, vector<1x1x80x8xbf16>,
    %66 = tpu.iota {dimensions = array<i32: 0>} : vector<80x8xi32>
    %c0_i32_65 = arith.constant 0 : i32
    %67 = vector.broadcast %c0_i32_65 : i32 to vector<80x8xi32>
    %68 = arith.addi %67, %66 : vector<80x8xi32>
    %c10_i32 = arith.constant 10 : i32
    %c0_i32_66 = arith.constant 0 : i32
    %69 = arith.cmpi eq, %c10_i32, %c0_i32_66 : i32
    %c1_i32 = arith.constant 1 : i32
    %70 = arith.select %69, %c1_i32, %c10_i32 : i32
    %71 = vector.broadcast %70 : i32 to vector<80x8xi32>
    %72 = arith.remsi %68, %71 : vector<80x8xi32>
    %c0_i32_67 = arith.constant 0 : i32
    %73 = vector.broadcast %c0_i32_67 : i32 to vector<80x8xi32>
    %74 = arith.cmpi ne, %72, %73 : vector<80x8xi32>
    %c0_i32_68 = arith.constant 0 : i32
    %75 = vector.broadcast %c0_i32_68 : i32 to vector<80x8xi32>
    %76 = arith.cmpi slt, %72, %75 : vector<80x8xi32>
    %c0_i32_69 = arith.constant 0 : i32
    %77 = arith.cmpi slt, %70, %c0_i32_69 : i32
    %78 = vector.broadcast %77 : i1 to vector<80x8xi1>
    %79 = vector.broadcast %78 : vector<80x8xi1> to vector<80x8xi1>
    %80 = arith.xori %76, %79 : vector<80x8xi1>
    %81 = arith.andi %80, %74 : vector<80x8xi1>
    %82 = vector.broadcast %70 : i32 to vector<80x8xi32>
    %83 = arith.addi %72, %82 : vector<80x8xi32>
    %84 = arith.select %81, %83, %72 : vector<80x8xi1>, vector<80x8xi32>
    %c8_i32 = arith.constant 8 : i32
    %85 = vector.broadcast %c8_i32 : i32 to vector<80x8xi32>
    %86 = arith.cmpi slt, %84, %85 : vector<80x8xi32>
    %87 = arith.extui %86 : vector<80x8xi1> to vector<80x8xi32>
    %88 = arith.sitofp %87 : vector<80x8xi32> to vector<80x8xf32>
    %89 = arith.mulf %61, %88 : vector<80x8xf32>
    %cst_70 = arith.constant dense<0.000000e+00> : vector<8xf32>
    %90 = vector.multi_reduction <add>, %89, %cst_70 [0] : vector<80x8xf32> to vector<8xf32>
    %91 = vector.shape_cast %90 : vector<8xf32> to vector<1x8xf32>
    %92 = arith.addf %5, %91 : vector<1x8xf32>
    %93 = arith.mulf %89, %61 : vector<80x8xf32>
    %cst_71 = arith.constant dense<0.000000e+00> : vector<8xf32>
    %94 = vector.multi_reduction <add>, %93, %cst_71 [0] : vector<80x8xf32> to vector<8xf32>
    %95 = vector.shape_cast %94 : vector<8xf32> to vector<1x8xf32>
    %96 = arith.addf %6, %95 : vector<1x8xf32>
    %c0_72 = arith.constant 0 : index
    %c0_73 = arith.constant 0 : index
    %c0_74 = arith.constant 0 : index
    %97 = vector.load %arg6[%c0_72, %c0_73, %c0_74] : memref<1x2x8xf32, #tpu.memory_space<vmem>>, vector<1x1x8xf32>
    %98 = vector.shape_cast %97 : vector<1x1x8xf32> to vector<1x8xf32>
    %99 = arith.addf %98, %92 : vector<1x8xf32>
    %c0_75 = arith.constant 0 : index
    %c0_76 = arith.constant 0 : index
    %c0_77 = arith.constant 0 : index
    %100 = vector.load %arg6[%c0_75, %c0_76, %c0_77] : memref<1x2x8xf32, #tpu.memory_space<vmem>>, vector<1x1x8xf32>
    %101 = vector.shape_cast %100 : vector<1x1x8xf32> to vector<1x8xf32>
    %102 = vector.shape_cast %99 : vector<1x8xf32> to vector<1x1x8xf32>
    tpu.vector_store %arg6[%c0_75, %c0_76, %c0_77], %102 {strides = array<i32>} : memref<1x2x8xf32, #tpu.memory_space<vmem>>, vector<1x1x8xf32>,
    %c0_78 = arith.constant 0 : index
    %c1_79 = arith.constant 1 : index
    %c0_80 = arith.constant 0 : index
    %103 = vector.load %arg6[%c0_78, %c1_79, %c0_80] : memref<1x2x8xf32, #tpu.memory_space<vmem>>, vector<1x1x8xf32>
    %104 = vector.shape_cast %103 : vector<1x1x8xf32> to vector<1x8xf32>
    %105 = arith.addf %104, %96 : vector<1x8xf32>
    %c0_81 = arith.constant 0 : index
    %c1_82 = arith.constant 1 : index
    %c0_83 = arith.constant 0 : index
    %106 = vector.load %arg6[%c0_81, %c1_82, %c0_83] : memref<1x2x8xf32, #tpu.memory_space<vmem>>, vector<1x1x8xf32>
    %107 = vector.shape_cast %106 : vector<1x1x8xf32> to vector<1x8xf32>
    %108 = vector.shape_cast %105 : vector<1x8xf32> to vector<1x1x8xf32>
    tpu.vector_store %arg6[%c0_81, %c1_82, %c0_83], %108 {strides = array<i32>} : memref<1x2x8xf32, #tpu.memory_space<vmem>>, vector<1x1x8xf32>,
    return
  }
  func.func @transform_0(%arg0: i32, %arg1: i32, %arg2: i32) -> (i32, i32, i32, i32) {
    %c1_i32 = arith.constant 1 : i32
    %0 = arith.muli %arg0, %c1_i32 : i32
    %1 = arith.addi %0, %arg1 : i32
    %c0_i32 = arith.constant 0 : i32
    %c0_i32_0 = arith.constant 0 : i32
    %c0_i32_1 = arith.constant 0 : i32
    return %1, %arg2, %c0_i32, %c0_i32_0 : i32, i32, i32, i32
  }
  func.func @transform_1(%arg0: i32, %arg1: i32, %arg2: i32) -> (i32, i32, i32) {
    %c0_i32 = arith.constant 0 : i32
    %c0_i32_0 = arith.constant 0 : i32
    %c0_i32_1 = arith.constant 0 : i32
    %c0_i32_2 = arith.constant 0 : i32
    return %c0_i32, %c0_i32_0, %c0_i32_1 : i32, i32, i32
  }
  func.func @transform_2(%arg0: i32, %arg1: i32, %arg2: i32) -> (i32, i32, i32, i32) {
    %c1_i32 = arith.constant 1 : i32
    %0 = arith.muli %arg0, %c1_i32 : i32
    %1 = arith.addi %0, %arg1 : i32
    %c0_i32 = arith.constant 0 : i32
    %c0_i32_0 = arith.constant 0 : i32
    %c0_i32_1 = arith.constant 0 : i32
    return %1, %arg2, %c0_i32, %c0_i32_0 : i32, i32, i32, i32
  }
  func.func @transform_3(%arg0: i32, %arg1: i32, %arg2: i32) -> (i32, i32, i32) {
    %c0_i32 = arith.constant 0 : i32
    %c0_i32_0 = arith.constant 0 : i32
    %c0_i32_1 = arith.constant 0 : i32
    return %arg0, %c0_i32, %c0_i32_0 : i32, i32, i32
  }
}

module attributes {stable_mosaic.version = 11 : i64} {
  func.func @bn_act_kernel(%arg0: i32, %arg1: memref<2x2x8xf32, #tpu.memory_space<vmem>>, %arg2: memref<1x8xf32, #tpu.memory_space<vmem>>, %arg3: memref<1x8xf32, #tpu.memory_space<vmem>>, %arg4: memref<16x10x8xbf16, #tpu.memory_space<vmem>>, %arg5: memref<16x8x8xbf16, #tpu.memory_space<vmem>>) attributes {dimension_semantics = [#tpu.dimension_semantics<parallel>], iteration_bounds = array<i64: 1>, scalar_prefetch = 0 : i64, scratch_operands = 0 : i64, tpu.core_type = #tpu.core_type<tc>, window_params = [{pipeline_mode = #tpu.pipeline_mode<synchronous>, transform_indices = @transform_0, window_bounds = array<i64: 2, 2, 8>}, {pipeline_mode = #tpu.pipeline_mode<synchronous>, transform_indices = @transform_1, window_bounds = array<i64: 1, 8>}, {pipeline_mode = #tpu.pipeline_mode<synchronous>, transform_indices = @transform_2, window_bounds = array<i64: 1, 8>}, {transform_indices = @transform_3, window_bounds = array<i64: 16, 10, 8>}, {transform_indices = @transform_4, window_bounds = array<i64: 16, 8, 8>}]} {
    %c0 = arith.constant 0 : index
    %c0_0 = arith.constant 0 : index
    %c0_1 = arith.constant 0 : index
    %0 = vector.load %arg1[%c0, %c0_0, %c0_1] : memref<2x2x8xf32, #tpu.memory_space<vmem>>, vector<2x2x8xf32>
    %cst = arith.constant dense<0.000000e+00> : vector<2x8xf32>
    %1 = vector.multi_reduction <add>, %0, %cst [0] : vector<2x2x8xf32> to vector<2x8xf32>
    %2 = vector.extract_strided_slice %1 {offsets = [0, 0], sizes = [1, 8], strides = [1, 1]} : vector<2x8xf32> to vector<1x8xf32>
    %cst_2 = arith.constant 7.812500e-03 : f32
    %3 = vector.broadcast %cst_2 : f32 to vector<1x8xf32>
    %4 = arith.mulf %2, %3 : vector<1x8xf32>
    %5 = vector.extract_strided_slice %1 {offsets = [1, 0], sizes = [1, 8], strides = [1, 1]} : vector<2x8xf32> to vector<1x8xf32>
    %cst_3 = arith.constant 7.812500e-03 : f32
    %6 = vector.broadcast %cst_3 : f32 to vector<1x8xf32>
    %7 = arith.mulf %5, %6 : vector<1x8xf32>
    %8 = arith.mulf %4, %4 : vector<1x8xf32>
    %9 = arith.subf %7, %8 : vector<1x8xf32>
    %cst_4 = arith.constant 0.000000e+00 : f32
    %10 = vector.broadcast %cst_4 : f32 to vector<1x8xf32>
    %11 = arith.maximumf %9, %10 : vector<1x8xf32>
    %c0_5 = arith.constant 0 : index
    %c0_6 = arith.constant 0 : index
    %12 = vector.load %arg2[%c0_5, %c0_6] : memref<1x8xf32, #tpu.memory_space<vmem>>, vector<1x8xf32>
    %cst_7 = arith.constant 9.99999974E-6 : f32
    %13 = vector.broadcast %cst_7 : f32 to vector<1x8xf32>
    %14 = arith.addf %11, %13 : vector<1x8xf32>
    %15 = math.rsqrt %14 : vector<1x8xf32>
    %16 = arith.mulf %12, %15 : vector<1x8xf32>
    %c0_8 = arith.constant 0 : index
    %c0_9 = arith.constant 0 : index
    %17 = vector.load %arg3[%c0_8, %c0_9] : memref<1x8xf32, #tpu.memory_space<vmem>>, vector<1x8xf32>
    %18 = arith.mulf %4, %16 : vector<1x8xf32>
    %19 = arith.subf %17, %18 : vector<1x8xf32>
    %c0_10 = arith.constant 0 : index
    %c0_11 = arith.constant 0 : index
    %c0_12 = arith.constant 0 : index
    %20 = vector.load %arg4[%c0_10, %c0_11, %c0_12] : memref<16x10x8xbf16, #tpu.memory_space<vmem>>, vector<16x8x8xbf16>
    %21 = arith.extf %20 : vector<16x8x8xbf16> to vector<16x8x8xf32>
    %22 = vector.shape_cast %16 : vector<1x8xf32> to vector<1x1x8xf32>
    %23 = vector.broadcast %22 : vector<1x1x8xf32> to vector<16x8x8xf32>
    %24 = arith.mulf %21, %23 : vector<16x8x8xf32>
    %25 = vector.shape_cast %19 : vector<1x8xf32> to vector<1x1x8xf32>
    %26 = vector.broadcast %25 : vector<1x1x8xf32> to vector<16x8x8xf32>
    %27 = arith.addf %24, %26 : vector<16x8x8xf32>
    %cst_13 = arith.constant 0.000000e+00 : f32
    %28 = vector.broadcast %cst_13 : f32 to vector<16x8x8xf32>
    %29 = arith.cmpf ogt, %27, %28 : vector<16x8x8xf32>
    %cst_14 = arith.constant 1.000000e-01 : f32
    %30 = vector.broadcast %cst_14 : f32 to vector<16x8x8xf32>
    %31 = arith.mulf %30, %27 : vector<16x8x8xf32>
    %32 = arith.select %29, %27, %31 : vector<16x8x8xi1>, vector<16x8x8xf32>
    %33 = arith.truncf %32 : vector<16x8x8xf32> to vector<16x8x8xbf16>
    %c0_15 = arith.constant 0 : index
    %c0_16 = arith.constant 0 : index
    %c0_17 = arith.constant 0 : index
    %34 = vector.load %arg5[%c0_15, %c0_16, %c0_17] : memref<16x8x8xbf16, #tpu.memory_space<vmem>>, vector<16x8x8xbf16>
    tpu.vector_store %arg5[%c0_15, %c0_16, %c0_17], %33 {strides = array<i32>} : memref<16x8x8xbf16, #tpu.memory_space<vmem>>, vector<16x8x8xbf16>,
    return
  }
  func.func @transform_0(%arg0: i32) -> (i32, i32, i32) {
    %c0_i32 = arith.constant 0 : i32
    %c0_i32_0 = arith.constant 0 : i32
    %c0_i32_1 = arith.constant 0 : i32
    %c0_i32_2 = arith.constant 0 : i32
    return %c0_i32, %c0_i32_0, %c0_i32_1 : i32, i32, i32
  }
  func.func @transform_1(%arg0: i32) -> (i32, i32) {
    %c0_i32 = arith.constant 0 : i32
    %c0_i32_0 = arith.constant 0 : i32
    %c0_i32_1 = arith.constant 0 : i32
    return %c0_i32, %c0_i32_0 : i32, i32
  }
  func.func @transform_2(%arg0: i32) -> (i32, i32) {
    %c0_i32 = arith.constant 0 : i32
    %c0_i32_0 = arith.constant 0 : i32
    %c0_i32_1 = arith.constant 0 : i32
    return %c0_i32, %c0_i32_0 : i32, i32
  }
  func.func @transform_3(%arg0: i32) -> (i32, i32, i32) {
    %c0_i32 = arith.constant 0 : i32
    %c0_i32_0 = arith.constant 0 : i32
    %c0_i32_1 = arith.constant 0 : i32
    return %arg0, %c0_i32, %c0_i32_0 : i32, i32, i32
  }
  func.func @transform_4(%arg0: i32) -> (i32, i32, i32) {
    %c0_i32 = arith.constant 0 : i32
    %c0_i32_0 = arith.constant 0 : i32
    %c0_i32_1 = arith.constant 0 : i32
    return %arg0, %c0_i32, %c0_i32_0 : i32, i32, i32
  }
}

module attributes {stable_mosaic.version = 11 : i64} {
  func.func @conv_stats_kernel(%arg0: i32, %arg1: i32, %arg2: i32, %arg3: memref<1x1x110x8xbf16, #tpu.memory_space<vmem>>, %arg4: memref<9x8x16xbf16, #tpu.memory_space<vmem>>, %arg5: memref<1x1x80x16xbf16, #tpu.memory_space<vmem>>, %arg6: memref<1x2x16xf32, #tpu.memory_space<vmem>>) attributes {dimension_semantics = [#tpu.dimension_semantics<parallel>, #tpu.dimension_semantics<arbitrary>, #tpu.dimension_semantics<arbitrary>], iteration_bounds = array<i64: 2, 1, 1>, scalar_prefetch = 0 : i64, scratch_operands = 0 : i64, tpu.core_type = #tpu.core_type<tc>, window_params = [{transform_indices = @transform_0, window_bounds = array<i64: 1, 1, 110, 8>}, {pipeline_mode = #tpu.pipeline_mode<synchronous>, transform_indices = @transform_1, window_bounds = array<i64: 9, 8, 16>}, {transform_indices = @transform_2, window_bounds = array<i64: 1, 1, 80, 16>}, {transform_indices = @transform_3, window_bounds = array<i64: 1, 2, 16>}]} {
    %c0_i32 = arith.constant 0 : i32
    %0 = arith.cmpi eq, %arg1, %c0_i32 : i32
    %c0_i32_0 = arith.constant 0 : i32
    %1 = arith.cmpi eq, %arg2, %c0_i32_0 : i32
    %2 = arith.andi %0, %1 : i1
    %3 = arith.extui %2 : i1 to i32
    %c0_i32_1 = arith.constant 0 : i32
    %4 = arith.cmpi ne, %3, %c0_i32_1 : i32
    scf.if %4 {
      %cst_84 = arith.constant 0.000000e+00 : f32
      %109 = vector.broadcast %cst_84 : f32 to vector<1x2x16xf32>
      %c0_85 = arith.constant 0 : index
      %c0_86 = arith.constant 0 : index
      %c0_87 = arith.constant 0 : index
      %110 = vector.load %arg6[%c0_85, %c0_86, %c0_87] : memref<1x2x16xf32, #tpu.memory_space<vmem>>, vector<1x2x16xf32>
      tpu.vector_store %arg6[%c0_85, %c0_86, %c0_87], %109 {strides = array<i32>} : memref<1x2x16xf32, #tpu.memory_space<vmem>>, vector<1x2x16xf32>,
    } else {
    }
    %cst = arith.constant 0.000000e+00 : f32
    %5 = vector.broadcast %cst : f32 to vector<1x16xf32>
    %cst_2 = arith.constant 0.000000e+00 : f32
    %6 = vector.broadcast %cst_2 : f32 to vector<1x16xf32>
    %cst_3 = arith.constant 0.000000e+00 : f32
    %7 = vector.broadcast %cst_3 : f32 to vector<80x16xf32>
    %c0 = arith.constant 0 : index
    %c0_4 = arith.constant 0 : index
    %c0_5 = arith.constant 0 : index
    %c0_6 = arith.constant 0 : index
    %8 = vector.load %arg3[%c0, %c0_4, %c0_5, %c0_6] : memref<1x1x110x8xbf16, #tpu.memory_space<vmem>>, vector<1x1x80x8xbf16>
    %9 = vector.shape_cast %8 : vector<1x1x80x8xbf16> to vector<80x8xbf16>
    %c0_7 = arith.constant 0 : index
    %c0_8 = arith.constant 0 : index
    %c0_9 = arith.constant 0 : index
    %10 = vector.load %arg4[%c0_7, %c0_8, %c0_9] : memref<9x8x16xbf16, #tpu.memory_space<vmem>>, vector<1x8x16xbf16>
    %11 = vector.shape_cast %10 : vector<1x8x16xbf16> to vector<8x16xbf16>
    %cst_10 = arith.constant dense<0.000000e+00> : vector<80x16xf32>
    %12 = tpu.matmul %9, %11, %cst_10 {dimension_numbers = #tpu.dot_dimension_numbers<[1], [0], [0], [1], [0, 0, 1, 1], [], []>} : vector<80x8xbf16>, vector<8x16xbf16>, vector<80x16xf32> -> vector<80x16xf32>
    %13 = arith.addf %7, %12 : vector<80x16xf32>
    %c0_11 = arith.constant 0 : index
    %c0_12 = arith.constant 0 : index
    %c1 = arith.constant 1 : index
    %c0_13 = arith.constant 0 : index
    %14 = vector.load %arg3[%c0_11, %c0_12, %c1, %c0_13] : memref<1x1x110x8xbf16, #tpu.memory_space<vmem>>, vector<1x1x80x8xbf16>
    %15 = vector.shape_cast %14 : vector<1x1x80x8xbf16> to vector<80x8xbf16>
    %c1_14 = arith.constant 1 : index
    %c0_15 = arith.constant 0 : index
    %c0_16 = arith.constant 0 : index
    %16 = vector.load %arg4[%c1_14, %c0_15, %c0_16] : memref<9x8x16xbf16, #tpu.memory_space<vmem>>, vector<1x8x16xbf16>
    %17 = vector.shape_cast %16 : vector<1x8x16xbf16> to vector<8x16xbf16>
    %cst_17 = arith.constant dense<0.000000e+00> : vector<80x16xf32>
    %18 = tpu.matmul %15, %17, %cst_17 {dimension_numbers = #tpu.dot_dimension_numbers<[1], [0], [0], [1], [0, 0, 1, 1], [], []>} : vector<80x8xbf16>, vector<8x16xbf16>, vector<80x16xf32> -> vector<80x16xf32>
    %19 = arith.addf %13, %18 : vector<80x16xf32>
    %c0_18 = arith.constant 0 : index
    %c0_19 = arith.constant 0 : index
    %c2 = arith.constant 2 : index
    %c0_20 = arith.constant 0 : index
    %20 = vector.load %arg3[%c0_18, %c0_19, %c2, %c0_20] : memref<1x1x110x8xbf16, #tpu.memory_space<vmem>>, vector<1x1x80x8xbf16>
    %21 = vector.shape_cast %20 : vector<1x1x80x8xbf16> to vector<80x8xbf16>
    %c2_21 = arith.constant 2 : index
    %c0_22 = arith.constant 0 : index
    %c0_23 = arith.constant 0 : index
    %22 = vector.load %arg4[%c2_21, %c0_22, %c0_23] : memref<9x8x16xbf16, #tpu.memory_space<vmem>>, vector<1x8x16xbf16>
    %23 = vector.shape_cast %22 : vector<1x8x16xbf16> to vector<8x16xbf16>
    %cst_24 = arith.constant dense<0.000000e+00> : vector<80x16xf32>
    %24 = tpu.matmul %21, %23, %cst_24 {dimension_numbers = #tpu.dot_dimension_numbers<[1], [0], [0], [1], [0, 0, 1, 1], [], []>} : vector<80x8xbf16>, vector<8x16xbf16>, vector<80x16xf32> -> vector<80x16xf32>
    %25 = arith.addf %19, %24 : vector<80x16xf32>
    %c0_25 = arith.constant 0 : index
    %c0_26 = arith.constant 0 : index
    %c10 = arith.constant 10 : index
    %c0_27 = arith.constant 0 : index
    %26 = vector.load %arg3[%c0_25, %c0_26, %c10, %c0_27] : memref<1x1x110x8xbf16, #tpu.memory_space<vmem>>, vector<1x1x80x8xbf16>
    %27 = vector.shape_cast %26 : vector<1x1x80x8xbf16> to vector<80x8xbf16>
    %c3 = arith.constant 3 : index
    %c0_28 = arith.constant 0 : index
    %c0_29 = arith.constant 0 : index
    %28 = vector.load %arg4[%c3, %c0_28, %c0_29] : memref<9x8x16xbf16, #tpu.memory_space<vmem>>, vector<1x8x16xbf16>
    %29 = vector.shape_cast %28 : vector<1x8x16xbf16> to vector<8x16xbf16>
    %cst_30 = arith.constant dense<0.000000e+00> : vector<80x16xf32>
    %30 = tpu.matmul %27, %29, %cst_30 {dimension_numbers = #tpu.dot_dimension_numbers<[1], [0], [0], [1], [0, 0, 1, 1], [], []>} : vector<80x8xbf16>, vector<8x16xbf16>, vector<80x16xf32> -> vector<80x16xf32>
    %31 = arith.addf %25, %30 : vector<80x16xf32>
    %c0_31 = arith.constant 0 : index
    %c0_32 = arith.constant 0 : index
    %c11 = arith.constant 11 : index
    %c0_33 = arith.constant 0 : index
    %32 = vector.load %arg3[%c0_31, %c0_32, %c11, %c0_33] : memref<1x1x110x8xbf16, #tpu.memory_space<vmem>>, vector<1x1x80x8xbf16>
    %33 = vector.shape_cast %32 : vector<1x1x80x8xbf16> to vector<80x8xbf16>
    %c4 = arith.constant 4 : index
    %c0_34 = arith.constant 0 : index
    %c0_35 = arith.constant 0 : index
    %34 = vector.load %arg4[%c4, %c0_34, %c0_35] : memref<9x8x16xbf16, #tpu.memory_space<vmem>>, vector<1x8x16xbf16>
    %35 = vector.shape_cast %34 : vector<1x8x16xbf16> to vector<8x16xbf16>
    %cst_36 = arith.constant dense<0.000000e+00> : vector<80x16xf32>
    %36 = tpu.matmul %33, %35, %cst_36 {dimension_numbers = #tpu.dot_dimension_numbers<[1], [0], [0], [1], [0, 0, 1, 1], [], []>} : vector<80x8xbf16>, vector<8x16xbf16>, vector<80x16xf32> -> vector<80x16xf32>
    %37 = arith.addf %31, %36 : vector<80x16xf32>
    %c0_37 = arith.constant 0 : index
    %c0_38 = arith.constant 0 : index
    %c12 = arith.constant 12 : index
    %c0_39 = arith.constant 0 : index
    %38 = vector.load %arg3[%c0_37, %c0_38, %c12, %c0_39] : memref<1x1x110x8xbf16, #tpu.memory_space<vmem>>, vector<1x1x80x8xbf16>
    %39 = vector.shape_cast %38 : vector<1x1x80x8xbf16> to vector<80x8xbf16>
    %c5 = arith.constant 5 : index
    %c0_40 = arith.constant 0 : index
    %c0_41 = arith.constant 0 : index
    %40 = vector.load %arg4[%c5, %c0_40, %c0_41] : memref<9x8x16xbf16, #tpu.memory_space<vmem>>, vector<1x8x16xbf16>
    %41 = vector.shape_cast %40 : vector<1x8x16xbf16> to vector<8x16xbf16>
    %cst_42 = arith.constant dense<0.000000e+00> : vector<80x16xf32>
    %42 = tpu.matmul %39, %41, %cst_42 {dimension_numbers = #tpu.dot_dimension_numbers<[1], [0], [0], [1], [0, 0, 1, 1], [], []>} : vector<80x8xbf16>, vector<8x16xbf16>, vector<80x16xf32> -> vector<80x16xf32>
    %43 = arith.addf %37, %42 : vector<80x16xf32>
    %c0_43 = arith.constant 0 : index
    %c0_44 = arith.constant 0 : index
    %c20 = arith.constant 20 : index
    %c0_45 = arith.constant 0 : index
    %44 = vector.load %arg3[%c0_43, %c0_44, %c20, %c0_45] : memref<1x1x110x8xbf16, #tpu.memory_space<vmem>>, vector<1x1x80x8xbf16>
    %45 = vector.shape_cast %44 : vector<1x1x80x8xbf16> to vector<80x8xbf16>
    %c6 = arith.constant 6 : index
    %c0_46 = arith.constant 0 : index
    %c0_47 = arith.constant 0 : index
    %46 = vector.load %arg4[%c6, %c0_46, %c0_47] : memref<9x8x16xbf16, #tpu.memory_space<vmem>>, vector<1x8x16xbf16>
    %47 = vector.shape_cast %46 : vector<1x8x16xbf16> to vector<8x16xbf16>
    %cst_48 = arith.constant dense<0.000000e+00> : vector<80x16xf32>
    %48 = tpu.matmul %45, %47, %cst_48 {dimension_numbers = #tpu.dot_dimension_numbers<[1], [0], [0], [1], [0, 0, 1, 1], [], []>} : vector<80x8xbf16>, vector<8x16xbf16>, vector<80x16xf32> -> vector<80x16xf32>
    %49 = arith.addf %43, %48 : vector<80x16xf32>
    %c0_49 = arith.constant 0 : index
    %c0_50 = arith.constant 0 : index
    %c21 = arith.constant 21 : index
    %c0_51 = arith.constant 0 : index
    %50 = vector.load %arg3[%c0_49, %c0_50, %c21, %c0_51] : memref<1x1x110x8xbf16, #tpu.memory_space<vmem>>, vector<1x1x80x8xbf16>
    %51 = vector.shape_cast %50 : vector<1x1x80x8xbf16> to vector<80x8xbf16>
    %c7 = arith.constant 7 : index
    %c0_52 = arith.constant 0 : index
    %c0_53 = arith.constant 0 : index
    %52 = vector.load %arg4[%c7, %c0_52, %c0_53] : memref<9x8x16xbf16, #tpu.memory_space<vmem>>, vector<1x8x16xbf16>
    %53 = vector.shape_cast %52 : vector<1x8x16xbf16> to vector<8x16xbf16>
    %cst_54 = arith.constant dense<0.000000e+00> : vector<80x16xf32>
    %54 = tpu.matmul %51, %53, %cst_54 {dimension_numbers = #tpu.dot_dimension_numbers<[1], [0], [0], [1], [0, 0, 1, 1], [], []>} : vector<80x8xbf16>, vector<8x16xbf16>, vector<80x16xf32> -> vector<80x16xf32>
    %55 = arith.addf %49, %54 : vector<80x16xf32>
    %c0_55 = arith.constant 0 : index
    %c0_56 = arith.constant 0 : index
    %c22 = arith.constant 22 : index
    %c0_57 = arith.constant 0 : index
    %56 = vector.load %arg3[%c0_55, %c0_56, %c22, %c0_57] : memref<1x1x110x8xbf16, #tpu.memory_space<vmem>>, vector<1x1x80x8xbf16>
    %57 = vector.shape_cast %56 : vector<1x1x80x8xbf16> to vector<80x8xbf16>
    %c8 = arith.constant 8 : index
    %c0_58 = arith.constant 0 : index
    %c0_59 = arith.constant 0 : index
    %58 = vector.load %arg4[%c8, %c0_58, %c0_59] : memref<9x8x16xbf16, #tpu.memory_space<vmem>>, vector<1x8x16xbf16>
    %59 = vector.shape_cast %58 : vector<1x8x16xbf16> to vector<8x16xbf16>
    %cst_60 = arith.constant dense<0.000000e+00> : vector<80x16xf32>
    %60 = tpu.matmul %57, %59, %cst_60 {dimension_numbers = #tpu.dot_dimension_numbers<[1], [0], [0], [1], [0, 0, 1, 1], [], []>} : vector<80x8xbf16>, vector<8x16xbf16>, vector<80x16xf32> -> vector<80x16xf32>
    %61 = arith.addf %55, %60 : vector<80x16xf32>
    %62 = arith.truncf %61 : vector<80x16xf32> to vector<80x16xbf16>
    %c0_61 = arith.constant 0 : index
    %c0_62 = arith.constant 0 : index
    %c0_63 = arith.constant 0 : index
    %c0_64 = arith.constant 0 : index
    %63 = vector.load %arg5[%c0_61, %c0_62, %c0_63, %c0_64] : memref<1x1x80x16xbf16, #tpu.memory_space<vmem>>, vector<1x1x80x16xbf16>
    %64 = vector.shape_cast %63 : vector<1x1x80x16xbf16> to vector<80x16xbf16>
    %65 = vector.shape_cast %62 : vector<80x16xbf16> to vector<1x1x80x16xbf16>
    tpu.vector_store %arg5[%c0_61, %c0_62, %c0_63, %c0_64], %65 {strides = array<i32>} : memref<1x1x80x16xbf16, #tpu.memory_space<vmem>>, vector<1x1x80x16xbf16>,
    %66 = tpu.iota {dimensions = array<i32: 0>} : vector<80x16xi32>
    %c0_i32_65 = arith.constant 0 : i32
    %67 = vector.broadcast %c0_i32_65 : i32 to vector<80x16xi32>
    %68 = arith.addi %67, %66 : vector<80x16xi32>
    %c10_i32 = arith.constant 10 : i32
    %c0_i32_66 = arith.constant 0 : i32
    %69 = arith.cmpi eq, %c10_i32, %c0_i32_66 : i32
    %c1_i32 = arith.constant 1 : i32
    %70 = arith.select %69, %c1_i32, %c10_i32 : i32
    %71 = vector.broadcast %70 : i32 to vector<80x16xi32>
    %72 = arith.remsi %68, %71 : vector<80x16xi32>
    %c0_i32_67 = arith.constant 0 : i32
    %73 = vector.broadcast %c0_i32_67 : i32 to vector<80x16xi32>
    %74 = arith.cmpi ne, %72, %73 : vector<80x16xi32>
    %c0_i32_68 = arith.constant 0 : i32
    %75 = vector.broadcast %c0_i32_68 : i32 to vector<80x16xi32>
    %76 = arith.cmpi slt, %72, %75 : vector<80x16xi32>
    %c0_i32_69 = arith.constant 0 : i32
    %77 = arith.cmpi slt, %70, %c0_i32_69 : i32
    %78 = vector.broadcast %77 : i1 to vector<80x16xi1>
    %79 = vector.broadcast %78 : vector<80x16xi1> to vector<80x16xi1>
    %80 = arith.xori %76, %79 : vector<80x16xi1>
    %81 = arith.andi %80, %74 : vector<80x16xi1>
    %82 = vector.broadcast %70 : i32 to vector<80x16xi32>
    %83 = arith.addi %72, %82 : vector<80x16xi32>
    %84 = arith.select %81, %83, %72 : vector<80x16xi1>, vector<80x16xi32>
    %c8_i32 = arith.constant 8 : i32
    %85 = vector.broadcast %c8_i32 : i32 to vector<80x16xi32>
    %86 = arith.cmpi slt, %84, %85 : vector<80x16xi32>
    %87 = arith.extui %86 : vector<80x16xi1> to vector<80x16xi32>
    %88 = arith.sitofp %87 : vector<80x16xi32> to vector<80x16xf32>
    %89 = arith.mulf %61, %88 : vector<80x16xf32>
    %cst_70 = arith.constant dense<0.000000e+00> : vector<16xf32>
    %90 = vector.multi_reduction <add>, %89, %cst_70 [0] : vector<80x16xf32> to vector<16xf32>
    %91 = vector.shape_cast %90 : vector<16xf32> to vector<1x16xf32>
    %92 = arith.addf %5, %91 : vector<1x16xf32>
    %93 = arith.mulf %89, %61 : vector<80x16xf32>
    %cst_71 = arith.constant dense<0.000000e+00> : vector<16xf32>
    %94 = vector.multi_reduction <add>, %93, %cst_71 [0] : vector<80x16xf32> to vector<16xf32>
    %95 = vector.shape_cast %94 : vector<16xf32> to vector<1x16xf32>
    %96 = arith.addf %6, %95 : vector<1x16xf32>
    %c0_72 = arith.constant 0 : index
    %c0_73 = arith.constant 0 : index
    %c0_74 = arith.constant 0 : index
    %97 = vector.load %arg6[%c0_72, %c0_73, %c0_74] : memref<1x2x16xf32, #tpu.memory_space<vmem>>, vector<1x1x16xf32>
    %98 = vector.shape_cast %97 : vector<1x1x16xf32> to vector<1x16xf32>
    %99 = arith.addf %98, %92 : vector<1x16xf32>
    %c0_75 = arith.constant 0 : index
    %c0_76 = arith.constant 0 : index
    %c0_77 = arith.constant 0 : index
    %100 = vector.load %arg6[%c0_75, %c0_76, %c0_77] : memref<1x2x16xf32, #tpu.memory_space<vmem>>, vector<1x1x16xf32>
    %101 = vector.shape_cast %100 : vector<1x1x16xf32> to vector<1x16xf32>
    %102 = vector.shape_cast %99 : vector<1x16xf32> to vector<1x1x16xf32>
    tpu.vector_store %arg6[%c0_75, %c0_76, %c0_77], %102 {strides = array<i32>} : memref<1x2x16xf32, #tpu.memory_space<vmem>>, vector<1x1x16xf32>,
    %c0_78 = arith.constant 0 : index
    %c1_79 = arith.constant 1 : index
    %c0_80 = arith.constant 0 : index
    %103 = vector.load %arg6[%c0_78, %c1_79, %c0_80] : memref<1x2x16xf32, #tpu.memory_space<vmem>>, vector<1x1x16xf32>
    %104 = vector.shape_cast %103 : vector<1x1x16xf32> to vector<1x16xf32>
    %105 = arith.addf %104, %96 : vector<1x16xf32>
    %c0_81 = arith.constant 0 : index
    %c1_82 = arith.constant 1 : index
    %c0_83 = arith.constant 0 : index
    %106 = vector.load %arg6[%c0_81, %c1_82, %c0_83] : memref<1x2x16xf32, #tpu.memory_space<vmem>>, vector<1x1x16xf32>
    %107 = vector.shape_cast %106 : vector<1x1x16xf32> to vector<1x16xf32>
    %108 = vector.shape_cast %105 : vector<1x16xf32> to vector<1x1x16xf32>
    tpu.vector_store %arg6[%c0_81, %c1_82, %c0_83], %108 {strides = array<i32>} : memref<1x2x16xf32, #tpu.memory_space<vmem>>, vector<1x1x16xf32>,
    return
  }
  func.func @transform_0(%arg0: i32, %arg1: i32, %arg2: i32) -> (i32, i32, i32, i32) {
    %c1_i32 = arith.constant 1 : i32
    %0 = arith.muli %arg0, %c1_i32 : i32
    %1 = arith.addi %0, %arg1 : i32
    %c0_i32 = arith.constant 0 : i32
    %c0_i32_0 = arith.constant 0 : i32
    %c0_i32_1 = arith.constant 0 : i32
    return %1, %arg2, %c0_i32, %c0_i32_0 : i32, i32, i32, i32
  }
  func.func @transform_1(%arg0: i32, %arg1: i32, %arg2: i32) -> (i32, i32, i32) {
    %c0_i32 = arith.constant 0 : i32
    %c0_i32_0 = arith.constant 0 : i32
    %c0_i32_1 = arith.constant 0 : i32
    %c0_i32_2 = arith.constant 0 : i32
    return %c0_i32, %c0_i32_0, %c0_i32_1 : i32, i32, i32
  }
  func.func @transform_2(%arg0: i32, %arg1: i32, %arg2: i32) -> (i32, i32, i32, i32) {
    %c1_i32 = arith.constant 1 : i32
    %0 = arith.muli %arg0, %c1_i32 : i32
    %1 = arith.addi %0, %arg1 : i32
    %c0_i32 = arith.constant 0 : i32
    %c0_i32_0 = arith.constant 0 : i32
    %c0_i32_1 = arith.constant 0 : i32
    return %1, %arg2, %c0_i32, %c0_i32_0 : i32, i32, i32, i32
  }
  func.func @transform_3(%arg0: i32, %arg1: i32, %arg2: i32) -> (i32, i32, i32) {
    %c0_i32 = arith.constant 0 : i32
    %c0_i32_0 = arith.constant 0 : i32
    %c0_i32_1 = arith.constant 0 : i32
    return %arg0, %c0_i32, %c0_i32_0 : i32, i32, i32
  }
}

module attributes {stable_mosaic.version = 11 : i64} {
  func.func @bn_act_pool_kernel(%arg0: i32, %arg1: memref<2x2x16xf32, #tpu.memory_space<vmem>>, %arg2: memref<1x16xf32, #tpu.memory_space<vmem>>, %arg3: memref<1x16xf32, #tpu.memory_space<vmem>>, %arg4: memref<16x5x32xbf16, #tpu.memory_space<vmem>>, %arg5: memref<8x4x16xbf16, #tpu.memory_space<vmem>>) attributes {dimension_semantics = [#tpu.dimension_semantics<parallel>], iteration_bounds = array<i64: 1>, scalar_prefetch = 0 : i64, scratch_operands = 0 : i64, tpu.core_type = #tpu.core_type<tc>, window_params = [{pipeline_mode = #tpu.pipeline_mode<synchronous>, transform_indices = @transform_0, window_bounds = array<i64: 2, 2, 16>}, {pipeline_mode = #tpu.pipeline_mode<synchronous>, transform_indices = @transform_1, window_bounds = array<i64: 1, 16>}, {pipeline_mode = #tpu.pipeline_mode<synchronous>, transform_indices = @transform_2, window_bounds = array<i64: 1, 16>}, {transform_indices = @transform_3, window_bounds = array<i64: 16, 5, 32>}, {transform_indices = @transform_4, window_bounds = array<i64: 8, 4, 16>}]} {
    %c0 = arith.constant 0 : index
    %c0_0 = arith.constant 0 : index
    %c0_1 = arith.constant 0 : index
    %0 = vector.load %arg1[%c0, %c0_0, %c0_1] : memref<2x2x16xf32, #tpu.memory_space<vmem>>, vector<2x2x16xf32>
    %cst = arith.constant dense<0.000000e+00> : vector<2x16xf32>
    %1 = vector.multi_reduction <add>, %0, %cst [0] : vector<2x2x16xf32> to vector<2x16xf32>
    %2 = vector.extract_strided_slice %1 {offsets = [0, 0], sizes = [1, 16], strides = [1, 1]} : vector<2x16xf32> to vector<1x16xf32>
    %cst_2 = arith.constant 7.812500e-03 : f32
    %3 = vector.broadcast %cst_2 : f32 to vector<1x16xf32>
    %4 = arith.mulf %2, %3 : vector<1x16xf32>
    %5 = vector.extract_strided_slice %1 {offsets = [1, 0], sizes = [1, 16], strides = [1, 1]} : vector<2x16xf32> to vector<1x16xf32>
    %cst_3 = arith.constant 7.812500e-03 : f32
    %6 = vector.broadcast %cst_3 : f32 to vector<1x16xf32>
    %7 = arith.mulf %5, %6 : vector<1x16xf32>
    %8 = arith.mulf %4, %4 : vector<1x16xf32>
    %9 = arith.subf %7, %8 : vector<1x16xf32>
    %cst_4 = arith.constant 0.000000e+00 : f32
    %10 = vector.broadcast %cst_4 : f32 to vector<1x16xf32>
    %11 = arith.maximumf %9, %10 : vector<1x16xf32>
    %c0_5 = arith.constant 0 : index
    %c0_6 = arith.constant 0 : index
    %12 = vector.load %arg2[%c0_5, %c0_6] : memref<1x16xf32, #tpu.memory_space<vmem>>, vector<1x16xf32>
    %cst_7 = arith.constant 9.99999974E-6 : f32
    %13 = vector.broadcast %cst_7 : f32 to vector<1x16xf32>
    %14 = arith.addf %11, %13 : vector<1x16xf32>
    %15 = math.rsqrt %14 : vector<1x16xf32>
    %16 = arith.mulf %12, %15 : vector<1x16xf32>
    %c0_8 = arith.constant 0 : index
    %c0_9 = arith.constant 0 : index
    %17 = vector.load %arg3[%c0_8, %c0_9] : memref<1x16xf32, #tpu.memory_space<vmem>>, vector<1x16xf32>
    %18 = arith.mulf %4, %16 : vector<1x16xf32>
    %19 = arith.subf %17, %18 : vector<1x16xf32>
    %c0_10 = arith.constant 0 : index
    %c0_11 = arith.constant 0 : index
    %c0_12 = arith.constant 0 : index
    %20 = vector.load %arg4[%c0_10, %c0_11, %c0_12] : memref<16x5x32xbf16, #tpu.memory_space<vmem>>, vector<16x4x16xbf16>
    %21 = arith.extf %20 : vector<16x4x16xbf16> to vector<16x4x16xf32>
    %22 = vector.shape_cast %16 : vector<1x16xf32> to vector<1x1x16xf32>
    %23 = vector.broadcast %22 : vector<1x1x16xf32> to vector<16x4x16xf32>
    %24 = arith.mulf %21, %23 : vector<16x4x16xf32>
    %25 = vector.shape_cast %19 : vector<1x16xf32> to vector<1x1x16xf32>
    %26 = vector.broadcast %25 : vector<1x1x16xf32> to vector<16x4x16xf32>
    %27 = arith.addf %24, %26 : vector<16x4x16xf32>
    %c0_13 = arith.constant 0 : index
    %c0_14 = arith.constant 0 : index
    %c16 = arith.constant 16 : index
    %28 = vector.load %arg4[%c0_13, %c0_14, %c16] : memref<16x5x32xbf16, #tpu.memory_space<vmem>>, vector<16x4x16xbf16>
    %29 = arith.extf %28 : vector<16x4x16xbf16> to vector<16x4x16xf32>
    %30 = vector.shape_cast %16 : vector<1x16xf32> to vector<1x1x16xf32>
    %31 = vector.broadcast %30 : vector<1x1x16xf32> to vector<16x4x16xf32>
    %32 = arith.mulf %29, %31 : vector<16x4x16xf32>
    %33 = vector.shape_cast %19 : vector<1x16xf32> to vector<1x1x16xf32>
    %34 = vector.broadcast %33 : vector<1x1x16xf32> to vector<16x4x16xf32>
    %35 = arith.addf %32, %34 : vector<16x4x16xf32>
    %36 = arith.maximumf %27, %35 : vector<16x4x16xf32>
    %37 = vector.shape_cast %36 : vector<16x4x16xf32> to vector<8x2x4x16xf32>
    %38 = vector.extract_strided_slice %37 {offsets = [0, 0, 0, 0], sizes = [8, 1, 4, 16], strides = [1, 1, 1, 1]} : vector<8x2x4x16xf32> to vector<8x1x4x16xf32>
    %39 = vector.shape_cast %38 : vector<8x1x4x16xf32> to vector<8x4x16xf32>
    %40 = vector.extract_strided_slice %37 {offsets = [0, 1, 0, 0], sizes = [8, 1, 4, 16], strides = [1, 1, 1, 1]} : vector<8x2x4x16xf32> to vector<8x1x4x16xf32>
    %41 = vector.shape_cast %40 : vector<8x1x4x16xf32> to vector<8x4x16xf32>
    %42 = arith.maximumf %39, %41 : vector<8x4x16xf32>
    %cst_15 = arith.constant 0.000000e+00 : f32
    %43 = vector.broadcast %cst_15 : f32 to vector<8x4x16xf32>
    %44 = arith.cmpf ogt, %42, %43 : vector<8x4x16xf32>
    %cst_16 = arith.constant 1.000000e-01 : f32
    %45 = vector.broadcast %cst_16 : f32 to vector<8x4x16xf32>
    %46 = arith.mulf %45, %42 : vector<8x4x16xf32>
    %47 = arith.select %44, %42, %46 : vector<8x4x16xi1>, vector<8x4x16xf32>
    %48 = arith.truncf %47 : vector<8x4x16xf32> to vector<8x4x16xbf16>
    %c0_17 = arith.constant 0 : index
    %c0_18 = arith.constant 0 : index
    %c0_19 = arith.constant 0 : index
    %49 = vector.load %arg5[%c0_17, %c0_18, %c0_19] : memref<8x4x16xbf16, #tpu.memory_space<vmem>>, vector<8x4x16xbf16>
    tpu.vector_store %arg5[%c0_17, %c0_18, %c0_19], %48 {strides = array<i32>} : memref<8x4x16xbf16, #tpu.memory_space<vmem>>, vector<8x4x16xbf16>,
    return
  }
  func.func @transform_0(%arg0: i32) -> (i32, i32, i32) {
    %c0_i32 = arith.constant 0 : i32
    %c0_i32_0 = arith.constant 0 : i32
    %c0_i32_1 = arith.constant 0 : i32
    %c0_i32_2 = arith.constant 0 : i32
    return %c0_i32, %c0_i32_0, %c0_i32_1 : i32, i32, i32
  }
  func.func @transform_1(%arg0: i32) -> (i32, i32) {
    %c0_i32 = arith.constant 0 : i32
    %c0_i32_0 = arith.constant 0 : i32
    %c0_i32_1 = arith.constant 0 : i32
    return %c0_i32, %c0_i32_0 : i32, i32
  }
  func.func @transform_2(%arg0: i32) -> (i32, i32) {
    %c0_i32 = arith.constant 0 : i32
    %c0_i32_0 = arith.constant 0 : i32
    %c0_i32_1 = arith.constant 0 : i32
    return %c0_i32, %c0_i32_0 : i32, i32
  }
  func.func @transform_3(%arg0: i32) -> (i32, i32, i32) {
    %c0_i32 = arith.constant 0 : i32
    %c0_i32_0 = arith.constant 0 : i32
    %c0_i32_1 = arith.constant 0 : i32
    return %arg0, %c0_i32, %c0_i32_0 : i32, i32, i32
  }
  func.func @transform_4(%arg0: i32) -> (i32, i32, i32) {
    %c0_i32 = arith.constant 0 : i32
    %c0_i32_0 = arith.constant 0 : i32
    %c0_i32_1 = arith.constant 0 : i32
    return %arg0, %c0_i32, %c0_i32_0 : i32, i32, i32
  }
}

</mosaic_0001>

<bundles_post_ra>
// kernel: _lambda_.7
= control target key start
LH: loop header
LB: loop body
LE: loop exit
PB: predicated region body
PF: predicated region fallthrough
CT: control target
= control target key end

     0   :  { %vm19_vm0 = vcmask 58368   ;;  %s520_s22 = smov 8   ;;  %s521_s7 = smov 120   ;;  %vm495_vm5 = vcmask 60416   ;;  %s1116_s0 = inlined_call_operand.vmem [shape: f32[2,2,8], index: 0, kind: input, shape index: {}]   ;;  %s1117_s1 = inlined_call_operand.vmem [shape: f32[1,8], index: 1, kind: input, shape index: {}]   ;;  %s1118_s2 = inlined_call_operand.vmem [shape: f32[1,8], index: 2, kind: input, shape index: {}]   ;;  %s1119_s3 = inlined_call_operand.vmem [shape: bf16[32,9,16], index: 3, kind: input, shape index: {}]   ;;  %s1120_s4 = inlined_call_operand.vmem [shape: bf16[16,8,8], index: 4, kind: output, shape index: {}]  }
   0x1   :  { %v17_v0 = vld [vmem:[%s1116_s0] sm:$0x3]  ;;  %v18_v1 = vld [vmem:[%s1116_s0 + $0x2] sm:$0x3]  ;;  %v575_v28 = vld [vmem:[%s1119_s3 + $0x10] sm:$0xf] }
   0x2   :  { %v20_v2 = vsel %vm19_vm0, %v17_v0, 0.0  ;;  %v21_v3 = vsel %vm19_vm0, %v18_v1, 0.0  ;;  %v30_v18 = vld [vmem:[%s1117_s1] sm:$0x1]  ;;  %v85_v31 = vunpack.c.l.bf16 %v575_v28  ;;  %v599_v37 = vld [vmem:[%s1119_s3 + $0x38] sm:$0xf] }
   0x3   :  { %v22_v4 = vadd.f32 %v21_v3, %v20_v2  ;;  %v48_v21 = vld [vmem:[%s1118_s2] sm:$0x1]  ;;  %v604_v38 = vld [vmem:[%s1119_s3 + $0x18] sm:$0xf]  ;;  %v612_v42 = vld [vmem:[%s1119_s3 + $0x8] sm:$0xf]  ;;  %v90_v43 = vunpack.c.l.bf16 %v599_v37 }
   0x4   :  { %v570_v27 = vld [vmem:[%s1119_s3 + $0x20] sm:$0xf]  ;;  %v86_v44 = vunpack.c.l.bf16 %v604_v38  ;;  %v84_v45 = vunpack.c.l.bf16 %v612_v42  ;;  %v632_v49 = vld [vmem:[%s1119_s3 + $0x50] sm:$0xf]  ;;  %v644_v53 = vld [vmem:[%s1119_s3 + $0x28] sm:$0xf] }
   0x5   :  { %v23_v5 = vmul.f32 0.001953125, %v22_v4  ;;  %v580_v29 = vld [vmem:[%s1119_s3] sm:$0xf]  ;;  %v87_v30 = vunpack.c.l.bf16 %v570_v27  ;;  %v637_v50 = vld [vmem:[%s1119_s3 + $0x30] sm:$0xf]  ;;  %v93_v55 = vunpack.c.l.bf16 %v632_v49  ;;  %v88_v57 = vunpack.c.l.bf16 %v644_v53 }
   0x6   :  { %v83_v32 = vunpack.c.l.bf16 %v580_v29  ;;  %v89_v56 = vunpack.c.l.bf16 %v637_v50  ;;  %v665_v61 = vld [vmem:[%s1119_s3 + $0x68] sm:$0xf]  ;;  %v677_v1 = vld [vmem:[%s1119_s3 + $0x40] sm:$0xf] }
   0x7   :  { %v24_v6 = vmul.f32 %v23_v5, %v23_v5  ;;  %v670_v62 = vld [vmem:[%s1119_s3 + $0x48] sm:$0xf]  ;;  %v96_v3 = vunpack.c.l.bf16 %v665_v61 }
   0x8   :  { %v92_v4 = vunpack.c.l.bf16 %v670_v62 }
   0x9   :  { %v26_v7 = vrot.slane %v24_v6, 7 }
   0xb   :  { %v28_v8 = vsub.f32 %v23_v5, %v26_v7 }
   0xd   :  { %v29_v9 = vmax.f32 %v28_v8, 0.0 }
   0xf   :  { %v31_v10 = vadd.f32 1e-05, %v29_v9  ;;  %v698_v9 = vld [vmem:[%s1119_s3 + $0x80] sm:$0xf] }
  0x11   :  { %518 = vrsqrt.f32 %v31_v10  ;;  %vm38_vm1 = vweird.f32 %v31_v10 }
  0x17   :  { %v519_v11 = vpop.eup %518 }
  0x18   :  { %v33_v12 = vmul.f32 %v519_v11, %v31_v10  ;;  %vm39_vm2 = vweird.f32 %v519_v11  ;;  %v703_v10 = vld [vmem:[%s1119_s3 + $0x60] sm:$0xf] }
  0x19   :  { %vm40_vm3 = vmor %vm38_vm1, %vm39_vm2 }
  0x1a   :  { %v34_v13 = vmul.f32 %v519_v11, %v33_v12 }
  0x1c   :  { %v35_v14 = vmul.f32 0.5, %v34_v13  ;;  %v710_v13 = vld [vmem:[%s1119_s3 + $0x58] sm:$0xf] }
  0x1e   :  { %v36_v15 = vsub.f32 1.5, %v35_v14 }
  0x20   :  { %v37_v16 = vmul.f32 %v519_v11, %v36_v15  ;;  %v1134_v15 = vunpack.c.l.bf16 %v698_v9 }
  0x22   :  { %v41_v17 = vsel %vm40_vm3, %v519_v11, %v37_v16  ;;  %v95_v16 = vunpack.c.l.bf16 %v703_v10 }
  0x23   :  { %43 = vst [vmem:[#allocation1] sm:$0xff] %v41_v17  ;;  %v94_v17 = vunpack.c.l.bf16 %v710_v13 }
  0x2a   :  { %v45_v19 = vld [vmem:[#allocation1 + $0x1] ss:$9 sm:$0xff] }
  0x2b   :  { %v47_v20 = vmul.f32 %v45_v19, %v30_v18 }
  0x2d   :  { %v559_v22 = vperm.slane %v47_v20, 0  ;;  %v49_v23 = vmul.f32 %v47_v20, %v23_v5  ;;  %v91_v5 = vunpack.c.l.bf16 %v677_v1 }
  0x2f   :  { %185 = vrot.lane.b32.xlu0 %v559_v22, %s520_s22  ;;  %v50_v24 = vsub.f32 %v48_v21, %v49_v23  ;;  %v731_v21 = vld [vmem:[%s1119_s3 + $0x98] sm:$0xf]  ;;  %v122_v29 = vmul.f32 %v559_v22, %v87_v30  ;;  %v130_v53 = vmul.f32 %v559_v22, %v95_v16  ;;  %v126_v10 = vmul.f32 %v559_v22, %v91_v5 }
  0x30   :  { %v736_v23 = vld [vmem:[%s1119_s3 + $0x78] sm:$0xf] }
  0x31   :  { %v562_v25 = vperm.slane %v50_v24, 0 }
  0x33   :  { %v161_v1 = vadd.f32 %v562_v25, %v126_v10 }
  0x37   :  { %220 = vrot.lane.b32.xlu0 %v562_v25, %s520_s22 }
  0xa1   :  { %v565_v26 = vpop.permute.xlu0 %185 }
  0xa2   :  { %v192_v33 = vmul.f32 %v565_v26, %v87_v30  ;;  %v190_v34 = vmul.f32 %v565_v26, %v85_v31  ;;  %v188_v35 = vmul.f32 %v565_v26, %v83_v32  ;;  %v195_v46 = vmul.f32 %v565_v26, %v90_v43 }
  0xa3   :  { %v191_v47 = vmul.f32 %v565_v26, %v86_v44  ;;  %v189_v48 = vmul.f32 %v565_v26, %v84_v45  ;;  %v198_v58 = vmul.f32 %v565_v26, %v93_v55  ;;  %v194_v59 = vmul.f32 %v565_v26, %v89_v56 }
  0xa4   :  { %v193_v60 = vmul.f32 %v565_v26, %v88_v57  ;;  %v201_v6 = vmul.f32 %v565_v26, %v96_v3  ;;  %v197_v7 = vmul.f32 %v565_v26, %v92_v4  ;;  %v196_v8 = vmul.f32 %v565_v26, %v91_v5 }
  0xa5   :  { %v204_v18 = vmul.f32 %v565_v26, %v1134_v15  ;;  %v200_v19 = vmul.f32 %v565_v26, %v95_v16  ;;  %v199_v20 = vmul.f32 %v565_v26, %v94_v17 }
  0xa9   :  { %v594_v36 = vpop.permute.xlu0 %220 }
  0xaa   :  { %v227_v39 = vadd.f32 %v594_v36, %v192_v33  ;;  %v225_v40 = vadd.f32 %v594_v36, %v190_v34  ;;  %v223_v41 = vadd.f32 %v594_v36, %v188_v35  ;;  %v230_v51 = vadd.f32 %v594_v36, %v195_v46  ;;  %v743_v34 = vld [vmem:[%s1119_s3 + $0x70] sm:$0xf] }
  0xab   :  { %v226_v52 = vadd.f32 %v594_v36, %v191_v47  ;;  %v224_v54 = vadd.f32 %v594_v36, %v189_v48  ;;  %v233_v63 = vadd.f32 %v594_v36, %v198_v58  ;;  %v229_v0 = vadd.f32 %v594_v36, %v194_v59  ;;  %v776_v59 = vld [vmem:[%s1119_s3 + $0x88] sm:$0xf] }
  0xac   :  { %295 = vrot.lane.b32.xlu0 %v227_v39, %s521_s7  ;;  %291 = vrot.lane.b32.xlu2 %v225_v40, %s521_s7  ;;  %v228_v2 = vadd.f32 %v594_v36, %v193_v60  ;;  %v236_v11 = vadd.f32 %v594_v36, %v201_v6  ;;  %v232_v12 = vadd.f32 %v594_v36, %v197_v7  ;;  %v102_v39 = vunpack.c.l.bf16 %v731_v21 }
  0xad   :  { %287 = vrot.lane.b32.xlu1 %v223_v41, %s521_s7  ;;  %v231_v14 = vadd.f32 %v594_v36, %v196_v8  ;;  %v239_v24 = vadd.f32 %v594_v36, %v204_v18  ;;  %v235_v33 = vadd.f32 %v594_v36, %v200_v19  ;;  %v234_v35 = vadd.f32 %v594_v36, %v199_v20  ;;  %v809_v19 = vld [vmem:[%s1119_s3 + $0xa0] sm:$0xf] }
  0xae   :  { %v98_v40 = vunpack.c.l.bf16 %v736_v23  ;;  %v97_v41 = vunpack.c.l.bf16 %v743_v34  ;;  %v207_v46 = vmul.f32 %v565_v26, %v102_v39 }
  0xb0   :  { %v203_v47 = vmul.f32 %v565_v26, %v98_v40  ;;  %v202_v48 = vmul.f32 %v565_v26, %v97_v41 }
  0xb2   :  { %v238_v58 = vadd.f32 %v594_v36, %v203_v47  ;;  %v237_v60 = vadd.f32 %v594_v36, %v202_v48 }
  0xb4   :  { %301 = vrot.lane.b32.xlu0 %v230_v51, %s521_s7  ;;  %293 = vrot.lane.b32.xlu2 %v226_v52, %s521_s7  ;;  %v764_v51 = vld [vmem:[%s1119_s3 + $0xb0] sm:$0xf] }
  0xb5   :  { %289 = vrot.lane.b32.xlu1 %v224_v54, %s521_s7  ;;  %v769_v52 = vld [vmem:[%s1119_s3 + $0x90] sm:$0xf]  ;;  %v242_v54 = vadd.f32 %v594_v36, %v207_v46 }
  0xbc   :  { %307 = vrot.lane.b32.xlu0 %v233_v63, %s521_s7  ;;  %299 = vrot.lane.b32.xlu2 %v229_v0, %s521_s7  ;;  %v1122_v63 = vunpack.c.l.bf16 %v764_v51  ;;  %v101_v0 = vunpack.c.l.bf16 %v769_v52  ;;  %v132_v52 = vmul.f32 %v559_v22, %v97_v41 }
  0xbd   :  { %297 = vrot.lane.b32.xlu1 %v228_v2, %s521_s7  ;;  %v1132_v2 = vunpack.c.l.bf16 %v776_v59 }
  0xbe   :  { %v210_v6 = vmul.f32 %v565_v26, %v1122_v63  ;;  %v206_v7 = vmul.f32 %v565_v26, %v101_v0  ;;  %v875_v63 = vld [vmem:[%s1119_s3 + $0xd0] sm:$0xf] }
  0xbf   :  { %v205_v8 = vmul.f32 %v565_v26, %v1132_v2 }
  0xc0   :  { %v241_v18 = vadd.f32 %v594_v36, %v206_v7  ;;  %v842_v7 = vld [vmem:[%s1119_s3 + $0xb8] sm:$0xf] }
  0xc1   :  { %v240_v20 = vadd.f32 %v594_v36, %v205_v8 }
  0xc4   :  { %313 = vrot.lane.b32.xlu0 %v236_v11, %s521_s7  ;;  %305 = vrot.lane.b32.xlu2 %v232_v12, %s521_s7  ;;  %v797_v11 = vld [vmem:[%s1119_s3 + $0xc8] sm:$0xf] }
  0xc5   :  { %303 = vrot.lane.b32.xlu1 %v231_v14, %s521_s7  ;;  %v802_v12 = vld [vmem:[%s1119_s3 + $0xa8] sm:$0xf]  ;;  %v245_v14 = vadd.f32 %v594_v36, %v210_v6 }
  0xcc   :  { %319 = vrot.lane.b32.xlu0 %v239_v24, %s521_s7  ;;  %311 = vrot.lane.b32.xlu2 %v235_v33, %s521_s7  ;;  %v1126_v24 = vunpack.c.l.bf16 %v797_v11  ;;  %v1125_v33 = vunpack.c.l.bf16 %v802_v12 }
  0xcd   :  { %309 = vrot.lane.b32.xlu1 %v234_v35, %s521_s7  ;;  %v1124_v35 = vunpack.c.l.bf16 %v809_v19 }
  0xce   :  { %v213_v46 = vmul.f32 %v565_v26, %v1126_v24  ;;  %v209_v47 = vmul.f32 %v565_v26, %v1125_v33 }
  0xcf   :  { %v208_v48 = vmul.f32 %v565_v26, %v1124_v35 }
  0xd0   :  { %v244_v6 = vadd.f32 %v594_v36, %v209_v47 }
  0xd1   :  { %v243_v8 = vadd.f32 %v594_v36, %v208_v48 }
  0xd4   :  { %325 = vrot.lane.b32.xlu0 %v242_v54, %s521_s7  ;;  %317 = vrot.lane.b32.xlu2 %v238_v58, %s521_s7  ;;  %v830_v54 = vld [vmem:[%s1119_s3 + $0xe0] sm:$0xf] }
  0xd5   :  { %315 = vrot.lane.b32.xlu1 %v237_v60, %s521_s7  ;;  %v835_v58 = vld [vmem:[%s1119_s3 + $0xc0] sm:$0xf]  ;;  %v248_v60 = vadd.f32 %v594_v36, %v213_v46 }
  0xdc   :  { %331 = vrot.lane.b32.xlu0 %v245_v14, %s521_s7  ;;  %323 = vrot.lane.b32.xlu2 %v241_v18, %s521_s7  ;;  %v1121_v14 = vunpack.c.l.bf16 %v830_v54  ;;  %v1130_v18 = vunpack.c.l.bf16 %v835_v58 }
  0xdd   :  { %321 = vrot.lane.b32.xlu1 %v240_v20, %s521_s7  ;;  %v1123_v20 = vunpack.c.l.bf16 %v842_v7 }
  0xde   :  { %v216_v46 = vmul.f32 %v565_v26, %v1121_v14  ;;  %v212_v47 = vmul.f32 %v565_v26, %v1130_v18 }
  0xdf   :  { %v211_v48 = vmul.f32 %v565_v26, %v1123_v20 }
  0xe0   :  { %v247_v14 = vadd.f32 %v594_v36, %v212_v47 }
  0xe1   :  { %v246_v20 = vadd.f32 %v594_v36, %v211_v48 }
  0xe4   :  { %337 = vrot.lane.b32.xlu0 %v248_v60, %s521_s7  ;;  %329 = vrot.lane.b32.xlu2 %v244_v6, %s521_s7  ;;  %v863_v60 = vld [vmem:[%s1119_s3 + $0xf8] sm:$0xf] }
  0xe5   :  { %327 = vrot.lane.b32.xlu1 %v243_v8, %s521_s7  ;;  %v868_v6 = vld [vmem:[%s1119_s3 + $0xd8] sm:$0xf]  ;;  %v251_v8 = vadd.f32 %v594_v36, %v216_v46  ;;  %v1127_v35 = vunpack.c.l.bf16 %v863_v60  ;;  %v1129_v46 = vunpack.c.l.bf16 %v875_v63 }
  0xe6   :  { %v1128_v33 = vunpack.c.l.bf16 %v868_v6 }
  0xe7   :  { %v219_v47 = vmul.f32 %v565_v26, %v1127_v35  ;;  %v903_v35 = vld [vmem:[%s1119_s3 + $0xe8] sm:$0xf] }
  0xe8   :  { %v215_v48 = vmul.f32 %v565_v26, %v1128_v33  ;;  %v1133_v18 = vunpack.c.l.bf16 %v903_v35 }
  0xea   :  { %v250_v24 = vadd.f32 %v594_v36, %v215_v48  ;;  %v217_v48 = vmul.f32 %v565_v26, %v1133_v18 }
  0xec   :  { %343 = vrot.lane.b32.xlu0 %v251_v8, %s521_s7  ;;  %335 = vrot.lane.b32.xlu2 %v247_v14, %s521_s7  ;;  %v214_v14 = vmul.f32 %v565_v26, %v1129_v46  ;;  %v896_v8 = vld [vmem:[%s1119_s3 + $0xf0] sm:$0xf] }
  0xed   :  { %333 = vrot.lane.b32.xlu1 %v246_v20, %s521_s7  ;;  %v254_v20 = vadd.f32 %v594_v36, %v219_v47  ;;  %v1131_v46 = vunpack.c.l.bf16 %v896_v8 }
  0xee   :  { %v249_v33 = vadd.f32 %v594_v36, %v214_v14 }
  0xef   :  { %v218_v47 = vmul.f32 %v565_v26, %v1131_v46  ;;  %v121_v46 = vmul.f32 %v559_v22, %v86_v44  ;;  %v124_v44 = vmul.f32 %v559_v22, %v89_v56 }
  0xf1   :  { %v253_v14 = vadd.f32 %v594_v36, %v218_v47  ;;  %v156_v26 = vadd.f32 %v562_v25, %v121_v46  ;;  %v118_v46 = vmul.f32 %v559_v22, %v83_v32 }
  0xf3   :  { %v153_v50 = vadd.f32 %v562_v25, %v118_v46 }
  0xf4   :  { %349 = vrot.lane.b32.xlu0 %v254_v20, %s521_s7  ;;  %341 = vrot.lane.b32.xlu2 %v250_v24, %s521_s7  ;;  %v252_v20 = vadd.f32 %v594_v36, %v217_v48 }
  0xf5   :  { %339 = vrot.lane.b32.xlu1 %v249_v33, %s521_s7  ;;  %v120_v33 = vmul.f32 %v559_v22, %v85_v31 }
  0xf7   :  { %v155_v2 = vadd.f32 %v562_v25, %v120_v33 }
  0xfc   :  { %347 = vrot.lane.b32.xlu2 %v253_v14, %s521_s7 }
  0xfd   :  { %345 = vrot.lane.b32.xlu1 %v252_v20, %s521_s7 }
 0x106   :  { %v292_v24 = vpop.permute.xlu2 %291 }
 0x107   :  { %v385_v18 = vmax.f32 %v155_v2, %v292_v24  ;;  %v119_v24 = vmul.f32 %v559_v22, %v84_v45  ;;  %v123_v45 = vmul.f32 %v559_v22, %v88_v57 }
 0x109   :  { %v154_v56 = vadd.f32 %v562_v25, %v119_v24 }
 0x10e   :  { %v294_v47 = vpop.permute.xlu2 %293 }
 0x10f   :  { %v386_v36 = vmax.f32 %v156_v26, %v294_v47 }
 0x111   :  { %v416_v48 = vmax.f32 %v385_v18, %v386_v36  ;;  %v125_v18 = vmul.f32 %v559_v22, %v90_v43 }
 0x113   :  { %vm432_vm4 = vcmp.gt.f32.partialorder %v416_v48, 0.0  ;;  %v448_v14 = vmul.f32 0.1, %v416_v48  ;;  %v160_v33 = vadd.f32 %v562_v25, %v125_v18  ;;  %v158_v18 = vadd.f32 %v562_v25, %v123_v45 }
 0x115   :  { %v464_v20 = vsel %vm432_vm4, %v416_v48, %v448_v14 }
 0x116   :  { %v480_v15 = vpack.c.bf16 %v464_v20, %v464_v20  ;;  %v300_v28 = vpop.permute.xlu2 %299 }
 0x118   :  { %497 = vst.msk [vmem:[%s1120_s4 + $0x4] sm:$0xf] %vm495_vm5, %v480_v15  ;;  %v159_v15 = vadd.f32 %v562_v25, %v124_v44  ;;  %v157_v44 = vadd.f32 %v562_v25, %v122_v29 }
 0x11a   :  { %v389_v37 = vmax.f32 %v159_v15, %v300_v28  ;;  %v131_v15 = vmul.f32 %v559_v22, %v96_v3  ;;  %v165_v3 = vadd.f32 %v562_v25, %v130_v53  ;;  %v137_v53 = vmul.f32 %v559_v22, %v102_v39 }
 0x11c   :  { %v172_v39 = vadd.f32 %v562_v25, %v137_v53 }
 0x11e   :  { %v296_v31 = vpop.permute.xlu0 %295  ;;  %v306_v38 = vpop.permute.xlu2 %305 }
 0x11f   :  { %v288_v2 = vpop.permute.xlu1 %287 }
 0x120   :  { %v383_v32 = vmax.f32 %v153_v50, %v288_v2  ;;  %v127_v50 = vmul.f32 %v559_v22, %v92_v4  ;;  %v166_v4 = vadd.f32 %v562_v25, %v131_v15 }
 0x122   :  { %v162_v16 = vadd.f32 %v562_v25, %v127_v50 }
 0x126   :  { %v302_v26 = vpop.permute.xlu0 %301  ;;  %v312_v42 = vpop.permute.xlu2 %311 }
 0x127   :  { %v390_v47 = vmax.f32 %v160_v33, %v302_v26  ;;  %v290_v43 = vpop.permute.xlu1 %289  ;;  %v387_v33 = vmax.f32 %v157_v44, %v296_v31 }
 0x128   :  { %v384_v36 = vmax.f32 %v154_v56, %v290_v43 }
 0x129   :  { %v418_v48 = vmax.f32 %v389_v37, %v390_v47  ;;  %v395_v37 = vmax.f32 %v165_v3, %v312_v42 }
 0x12a   :  { %v415_v14 = vmax.f32 %v383_v32, %v384_v36  ;;  %v392_v32 = vmax.f32 %v162_v16, %v306_v38  ;;  %v128_v36 = vmul.f32 %v559_v22, %v93_v55 }
 0x12b   :  { %vm434_vm6 = vcmp.gt.f32.partialorder %v418_v48, 0.0  ;;  %v450_v20 = vmul.f32 0.1, %v418_v48 }
 0x12c   :  { %vm431_vm7 = vcmp.gt.f32.partialorder %v415_v14, 0.0  ;;  %v447_v28 = vmul.f32 0.1, %v415_v14  ;;  %v163_v38 = vadd.f32 %v562_v25, %v128_v36 }
 0x12d   :  { %v466_v27 = vsel %vm434_vm6, %v418_v48, %v450_v20  ;;  %v129_v48 = vmul.f32 %v559_v22, %v94_v17 }
 0x12e   :  { %v482_v46 = vpack.c.bf16 %v466_v27, %v466_v27  ;;  %v463_v30 = vsel %vm431_vm7, %v415_v14, %v447_v28  ;;  %v308_v2 = vpop.permute.xlu0 %307  ;;  %v977_v61 = vpop.permute.xlu2 %317  ;;  %v136_v27 = vmul.f32 %v559_v22, %v101_v0 }
 0x12f   :  { %v479_v24 = vpack.c.bf16 %v463_v30, %v463_v30  ;;  %v298_v57 = vpop.permute.xlu1 %297  ;;  %v164_v55 = vadd.f32 %v562_v25, %v129_v48 }
 0x130   :  { %499 = vst.msk [vmem:[%s1120_s4 + $0xc] sm:$0xf] %vm495_vm5, %v482_v46  ;;  %v388_v56 = vmax.f32 %v158_v18, %v298_v57  ;;  %v133_v57 = vmul.f32 %v559_v22, %v98_v40  ;;  %v171_v23 = vadd.f32 %v562_v25, %v136_v27 }
 0x131   :  { %496 = vst.msk [vmem:[%s1120_s4] sm:$0xf] %vm495_vm5, %v479_v24  ;;  %v393_v24 = vmax.f32 %v163_v38, %v308_v2  ;;  %v167_v2 = vadd.f32 %v562_v25, %v132_v52 }
 0x132   :  { %v417_v62 = vmax.f32 %v387_v33, %v388_v56  ;;  %v168_v40 = vadd.f32 %v562_v25, %v133_v57 }
 0x134   :  { %vm433_vm8 = vcmp.gt.f32.partialorder %v417_v62, 0.0  ;;  %v449_v31 = vmul.f32 0.1, %v417_v62  ;;  %v398_v3 = vmax.f32 %v168_v40, %v977_v61 }
 0x136   :  { %v465_v26 = vsel %vm433_vm8, %v417_v62, %v449_v31  ;;  %v314_v5 = vpop.permute.xlu0 %313  ;;  %v324_v44 = vpop.permute.xlu2 %323 }
 0x137   :  { %v481_v47 = vpack.c.bf16 %v465_v26, %v465_v26  ;;  %v396_v43 = vmax.f32 %v166_v4, %v314_v5  ;;  %v304_v29 = vpop.permute.xlu1 %303  ;;  %v401_v41 = vmax.f32 %v171_v23, %v324_v44  ;;  %v1135_v4 = vunpack.c.l.bf16 %v698_v9 }
 0x138   :  { %v391_v45 = vmax.f32 %v161_v1, %v304_v29  ;;  %v1136_v1 = vunpack.c.l.bf16 %v776_v59  ;;  %v1141_v23 = vunpack.c.l.bf16 %v764_v51 }
 0x139   :  { %498 = vst.msk [vmem:[%s1120_s4 + $0x8] sm:$0xf] %vm495_vm5, %v481_v47  ;;  %v421_v14 = vmax.f32 %v395_v37, %v396_v43  ;;  %v134_v16 = vmul.f32 %v559_v22, %v1135_v4 }
 0x13a   :  { %v419_v42 = vmax.f32 %v391_v45, %v392_v32  ;;  %v135_v26 = vmul.f32 %v559_v22, %v1136_v1  ;;  %v1137_v45 = vunpack.c.l.bf16 %v835_v58 }
 0x13b   :  { %vm437_vm9 = vcmp.gt.f32.partialorder %v421_v14, 0.0  ;;  %v453_v20 = vmul.f32 0.1, %v421_v14  ;;  %v169_v61 = vadd.f32 %v562_v25, %v134_v16  ;;  %v1143_v16 = vunpack.c.l.bf16 %v896_v8 }
 0x13c   :  { %vm435_vm10 = vcmp.gt.f32.partialorder %v419_v42, 0.0  ;;  %v451_v49 = vmul.f32 0.1, %v419_v42  ;;  %v170_v43 = vadd.f32 %v562_v25, %v135_v26  ;;  %v142_v48 = vmul.f32 %v559_v22, %v1137_v45 }
 0x13d   :  { %v469_v28 = vsel %vm437_vm9, %v421_v14, %v453_v20  ;;  %v1138_v20 = vunpack.c.l.bf16 %v797_v11  ;;  %v1146_v8 = vunpack.c.l.bf16 %v875_v63 }
 0x13e   :  { %v485_v13 = vpack.c.bf16 %v469_v28, %v469_v28  ;;  %v467_v18 = vsel %vm435_vm10, %v419_v42, %v451_v49  ;;  %v320_v17 = vpop.permute.xlu0 %319  ;;  %v330_v33 = vpop.permute.xlu2 %329  ;;  %v1139_v49 = vunpack.c.l.bf16 %v802_v12  ;;  %v177_v12 = vadd.f32 %v562_v25, %v142_v48 }
 0x13f   :  { %v483_v46 = vpack.c.bf16 %v467_v18, %v467_v18  ;;  %v310_v30 = vpop.permute.xlu1 %309  ;;  %v143_v38 = vmul.f32 %v559_v22, %v1138_v20  ;;  %v399_v44 = vmax.f32 %v169_v61, %v320_v17  ;;  %v1145_v61 = vunpack.c.l.bf16 %v868_v6 }
 0x140   :  { %502 = vst.msk [vmem:[%s1120_s4 + $0x18] sm:$0xf] %vm495_vm5, %v485_v13  ;;  %v394_v15 = vmax.f32 %v164_v55, %v310_v30  ;;  %v139_v55 = vmul.f32 %v559_v22, %v1139_v49  ;;  %v1140_v13 = vunpack.c.l.bf16 %v809_v19 }
 0x141   :  { %500 = vst.msk [vmem:[%s1120_s4 + $0x10] sm:$0xf] %vm495_vm5, %v483_v46  ;;  %v178_v17 = vadd.f32 %v562_v25, %v143_v38 }
 0x142   :  { %v420_v21 = vmax.f32 %v393_v24, %v394_v15  ;;  %v138_v18 = vmul.f32 %v559_v22, %v1140_v13  ;;  %v174_v27 = vadd.f32 %v562_v25, %v139_v55  ;;  %v1147_v55 = vunpack.c.l.bf16 %v830_v54 }
 0x143   :  { %v1148_v13 = vunpack.c.l.bf16 %v903_v35 }
 0x144   :  { %vm436_vm11 = vcmp.gt.f32.partialorder %v420_v21, 0.0  ;;  %v452_v0 = vmul.f32 0.1, %v420_v21  ;;  %v173_v30 = vadd.f32 %v562_v25, %v138_v18 }
 0x145   :  { %v147_v18 = vmul.f32 %v559_v22, %v1148_v13 }
 0x146   :  { %v468_v34 = vsel %vm436_vm11, %v420_v21, %v452_v0  ;;  %v326_v50 = vpop.permute.xlu0 %325  ;;  %v336_v28 = vpop.permute.xlu2 %335  ;;  %v404_v21 = vmax.f32 %v174_v27, %v330_v33  ;;  %v1142_v0 = vunpack.c.l.bf16 %v842_v7 }
 0x147   :  { %v484_v56 = vpack.c.bf16 %v468_v34, %v468_v34  ;;  %v402_v10 = vmax.f32 %v172_v39, %v326_v50  ;;  %v316_v62 = vpop.permute.xlu1 %315  ;;  %v407_v24 = vmax.f32 %v177_v12, %v336_v28  ;;  %v140_v39 = vmul.f32 %v559_v22, %v1141_v23 }
 0x148   :  { %v397_v31 = vmax.f32 %v167_v2, %v316_v62  ;;  %v141_v2 = vmul.f32 %v559_v22, %v1142_v0  ;;  %v146_v28 = vmul.f32 %v559_v22, %v1147_v55 }
 0x149   :  { %501 = vst.msk [vmem:[%s1120_s4 + $0x14] sm:$0xf] %vm495_vm5, %v484_v56  ;;  %v424_v5 = vmax.f32 %v401_v41, %v402_v10  ;;  %v175_v33 = vadd.f32 %v562_v25, %v140_v39 }
 0x14a   :  { %v422_v37 = vmax.f32 %v397_v31, %v398_v3  ;;  %v176_v10 = vadd.f32 %v562_v25, %v141_v2  ;;  %v148_v31 = vmul.f32 %v559_v22, %v1143_v16  ;;  %v181_v27 = vadd.f32 %v562_v25, %v146_v28 }
 0x14b   :  { %vm440_vm12 = vcmp.gt.f32.partialorder %v424_v5, 0.0  ;;  %v456_v47 = vmul.f32 0.1, %v424_v5 }
 0x14c   :  { %vm438_vm13 = vcmp.gt.f32.partialorder %v422_v37, 0.0  ;;  %v454_v9 = vmul.f32 0.1, %v422_v37  ;;  %v183_v6 = vadd.f32 %v562_v25, %v148_v31 }
 0x14d   :  { %v472_v29 = vsel %vm440_vm12, %v424_v5, %v456_v47  ;;  %v1144_v5 = vunpack.c.l.bf16 %v863_v60 }
 0x14e   :  { %v488_v32 = vpack.c.bf16 %v472_v29, %v472_v29  ;;  %v470_v59 = vsel %vm438_vm13, %v422_v37, %v454_v9  ;;  %v332_v36 = vpop.permute.xlu0 %331  ;;  %v342_v50 = vpop.permute.xlu2 %341  ;;  %v145_v9 = vmul.f32 %v559_v22, %v1145_v61  ;;  %v144_v29 = vmul.f32 %v559_v22, %v1146_v8 }
 0x14f   :  { %v486_v14 = vpack.c.bf16 %v470_v59, %v470_v59  ;;  %v322_v42 = vpop.permute.xlu1 %321  ;;  %v149_v37 = vmul.f32 %v559_v22, %v1144_v5  ;;  %v405_v47 = vmax.f32 %v175_v33, %v332_v36 }
 0x150   :  { %505 = vst.msk [vmem:[%s1120_s4 + $0x24] sm:$0xf] %vm495_vm5, %v488_v32  ;;  %v400_v58 = vmax.f32 %v170_v43, %v322_v42  ;;  %v180_v59 = vadd.f32 %v562_v25, %v145_v9  ;;  %v179_v48 = vadd.f32 %v562_v25, %v144_v29 }
 0x151   :  { %503 = vst.msk [vmem:[%s1120_s4 + $0x1c] sm:$0xf] %vm495_vm5, %v486_v14  ;;  %v184_v32 = vadd.f32 %v562_v25, %v149_v37 }
 0x152   :  { %v423_v11 = vmax.f32 %v399_v44, %v400_v58  ;;  %v410_v49 = vmax.f32 %v180_v59, %v342_v50 }
 0x154   :  { %vm439_vm14 = vcmp.gt.f32.partialorder %v423_v11, 0.0  ;;  %v455_v46 = vmul.f32 0.1, %v423_v11 }
 0x156   :  { %v471_v53 = vsel %vm439_vm14, %v423_v11, %v455_v46  ;;  %v338_v19 = vpop.permute.xlu0 %337  ;;  %v348_v36 = vpop.permute.xlu2 %347  ;;  %v182_v46 = vadd.f32 %v562_v25, %v147_v18 }
 0x157   :  { %v487_v57 = vpack.c.bf16 %v471_v53, %v471_v53  ;;  %v408_v15 = vmax.f32 %v178_v17, %v338_v19  ;;  %v328_v52 = vpop.permute.xlu1 %327  ;;  %v413_v42 = vmax.f32 %v183_v6, %v348_v36 }
 0x158   :  { %v403_v40 = vmax.f32 %v173_v30, %v328_v52 }
 0x159   :  { %504 = vst.msk [vmem:[%s1120_s4 + $0x20] sm:$0xf] %vm495_vm5, %v487_v57  ;;  %v427_v34 = vmax.f32 %v407_v24, %v408_v15 }
 0x15a   :  { %v425_v41 = vmax.f32 %v403_v40, %v404_v21 }
 0x15b   :  { %vm443_vm15 = vcmp.gt.f32.partialorder %v427_v34, 0.0  ;;  %v459_v56 = vmul.f32 0.1, %v427_v34 }
 0x15c   :  { %vm441_vm0 = vcmp.gt.f32.partialorder %v425_v41, 0.0  ;;  %v457_v51 = vmul.f32 0.1, %v425_v41 }
 0x15d   :  { %v475_v62 = vsel %vm443_vm15, %v427_v34, %v459_v56 }
 0x15e   :  { %v491_v7 = vpack.c.bf16 %v475_v62, %v475_v62  ;;  %v473_v3 = vsel %vm441_vm0, %v425_v41, %v457_v51  ;;  %v344_v4 = vpop.permute.xlu0 %343 }
 0x15f   :  { %v489_v1 = vpack.c.bf16 %v473_v3, %v473_v3  ;;  %v334_v26 = vpop.permute.xlu1 %333  ;;  %v411_v24 = vmax.f32 %v181_v27, %v344_v4 }
 0x160   :  { %508 = vst.msk [vmem:[%s1120_s4 + $0x30] sm:$0xf] %vm495_vm5, %v491_v7  ;;  %v406_v43 = vmax.f32 %v176_v10, %v334_v26 }
 0x161   :  { %506 = vst.msk [vmem:[%s1120_s4 + $0x28] sm:$0xf] %vm495_vm5, %v489_v1 }
 0x162   :  { %v426_v60 = vmax.f32 %v405_v47, %v406_v43 }
 0x164   :  { %vm442_vm1 = vcmp.gt.f32.partialorder %v426_v60, 0.0  ;;  %v458_v45 = vmul.f32 0.1, %v426_v60 }
 0x166   :  { %v474_v63 = vsel %vm442_vm1, %v426_v60, %v458_v45  ;;  %v350_v14 = vpop.permute.xlu0 %349 }
 0x167   :  { %v490_v20 = vpack.c.bf16 %v474_v63, %v474_v63  ;;  %v414_v38 = vmax.f32 %v184_v32, %v350_v14  ;;  %v340_v44 = vpop.permute.xlu1 %339 }
 0x168   :  { %v409_v58 = vmax.f32 %v179_v48, %v340_v44 }
 0x169   :  { %507 = vst.msk [vmem:[%s1120_s4 + $0x2c] sm:$0xf] %vm495_vm5, %v490_v20  ;;  %v430_v11 = vmax.f32 %v413_v42, %v414_v38 }
 0x16a   :  { %v428_v12 = vmax.f32 %v409_v58, %v410_v49 }
 0x16b   :  { %vm446_vm2 = vcmp.gt.f32.partialorder %v430_v11, 0.0  ;;  %v462_v17 = vmul.f32 0.1, %v430_v11 }
 0x16c   :  { %vm444_vm3 = vcmp.gt.f32.partialorder %v428_v12, 0.0  ;;  %v460_v54 = vmul.f32 0.1, %v428_v12 }
 0x16d   :  { %v478_v30 = vsel %vm446_vm2, %v430_v11, %v462_v17 }
 0x16e   :  { %v494_v53 = vpack.c.bf16 %v478_v30, %v478_v30  ;;  %v476_v35 = vsel %vm444_vm3, %v428_v12, %v460_v54 }
 0x16f   :  { %v492_v19 = vpack.c.bf16 %v476_v35, %v476_v35  ;;  %v346_v22 = vpop.permute.xlu1 %345 }
 0x170   :  { %511 = vst.msk [vmem:[%s1120_s4 + $0x3c] sm:$0xf] %vm495_vm5, %v494_v53  ;;  %v412_v57 = vmax.f32 %v182_v46, %v346_v22 }
 0x171   :  { %509 = vst.msk [vmem:[%s1120_s4 + $0x34] sm:$0xf] %vm495_vm5, %v492_v19 }
 0x172   :  { %v429_v15 = vmax.f32 %v411_v24, %v412_v57 }
 0x174   :  { %vm445_vm4 = vcmp.gt.f32.partialorder %v429_v15, 0.0  ;;  %v461_v25 = vmul.f32 0.1, %v429_v15 }
 0x176   :  { %v477_v52 = vsel %vm445_vm4, %v429_v15, %v461_v25 }
 0x177   :  { %v493_v21 = vpack.c.bf16 %v477_v52, %v477_v52 }
 0x179   :  { %510 = vst.msk [vmem:[%s1120_s4 + $0x38] sm:$0xf] %vm495_vm5, %v493_v21 }

// kernel: _lambda_.9
= control target key start
LH: loop header
LB: loop body
LE: loop exit
PB: predicated region body
PF: predicated region fallthrough
CT: control target
= control target key end

     0   :  { %vm19_vm0 = vcmask 58368   ;;  %vm185_vm4 = vcmask 60416   ;;  %s403_s0 = inlined_call_operand.vmem [shape: f32[2,2,8], index: 0, kind: input, shape index: {}]   ;;  %s404_s1 = inlined_call_operand.vmem [shape: f32[1,8], index: 1, kind: input, shape index: {}]   ;;  %s405_s3 = inlined_call_operand.vmem [shape: bf16[16,10,8], index: 3, kind: input, shape index: {}]   ;;  %s406_s2 = inlined_call_operand.vmem [shape: f32[1,8], index: 2, kind: input, shape index: {}]   ;;  %s407_s4 = inlined_call_operand.vmem [shape: bf16[16,8,8], index: 4, kind: output, shape index: {}]  }
   0x1   :  { %v17_v0 = vld [vmem:[%s403_s0] sm:$0x3]  ;;  %v18_v1 = vld [vmem:[%s403_s0 + $0x2] sm:$0x3]  ;;  %v52_v20 = vld [vmem:[%s405_s3 + $0x8] sm:$0xf] }
   0x2   :  { %v20_v2 = vsel %vm19_vm0, %v17_v0, 0.0  ;;  %v21_v3 = vsel %vm19_vm0, %v18_v1, 0.0  ;;  %v30_v18 = vld [vmem:[%s404_s1] sm:$0x1]  ;;  %v53_v21 = vld [vmem:[%s405_s3 + $0x10] sm:$0xf]  ;;  %v68_v32 = vunpack.c.l.bf16 %v52_v20 }
   0x3   :  { %v22_v4 = vadd.f32 %v21_v3, %v20_v2  ;;  %v51_v19 = vld [vmem:[%s405_s3] sm:$0xf]  ;;  %v54_v22 = vld [vmem:[%s405_s3 + $0x18] sm:$0xf]  ;;  %v56_v24 = vld [vmem:[%s405_s3 + $0x28] sm:$0xf]  ;;  %v69_v33 = vunpack.c.l.bf16 %v53_v21 }
   0x4   :  { %v55_v23 = vld [vmem:[%s405_s3 + $0x20] sm:$0xf]  ;;  %v57_v25 = vld [vmem:[%s405_s3 + $0x30] sm:$0xf]  ;;  %v58_v26 = vld [vmem:[%s405_s3 + $0x38] sm:$0xf]  ;;  %v67_v31 = vunpack.c.l.bf16 %v51_v19  ;;  %v70_v37 = vunpack.c.l.bf16 %v54_v22  ;;  %v72_v39 = vunpack.c.l.bf16 %v56_v24 }
   0x5   :  { %v23_v5 = vmul.f32 0.0078125, %v22_v4  ;;  %v59_v27 = vld [vmem:[%s405_s3 + $0x40] sm:$0xf]  ;;  %v60_v28 = vld [vmem:[%s405_s3 + $0x48] sm:$0xf]  ;;  %v71_v38 = vunpack.c.l.bf16 %v55_v23  ;;  %v73_v44 = vunpack.c.l.bf16 %v57_v25  ;;  %v74_v45 = vunpack.c.l.bf16 %v58_v26 }
   0x6   :  { %v61_v29 = vld [vmem:[%s405_s3 + $0x50] sm:$0xf]  ;;  %v62_v34 = vld [vmem:[%s405_s3 + $0x58] sm:$0xf]  ;;  %v63_v35 = vld [vmem:[%s405_s3 + $0x60] sm:$0xf]  ;;  %v75_v46 = vunpack.c.l.bf16 %v59_v27  ;;  %v76_v47 = vunpack.c.l.bf16 %v60_v28 }
   0x7   :  { %v24_v6 = vmul.f32 %v23_v5, %v23_v5  ;;  %v64_v40 = vld [vmem:[%s405_s3 + $0x68] sm:$0xf]  ;;  %v287_v41 = vld [vmem:[%s405_s3 + $0x70] sm:$0xf]  ;;  %v292_v42 = vld [vmem:[%s405_s3 + $0x78] sm:$0xf]  ;;  %v77_v50 = vunpack.c.l.bf16 %v61_v29  ;;  %v78_v51 = vunpack.c.l.bf16 %v62_v34  ;;  %v79_v52 = vunpack.c.l.bf16 %v63_v35 }
   0x8   :  { %v48_v43 = vld [vmem:[%s406_s2] sm:$0x1]  ;;  %v80_v53 = vunpack.c.l.bf16 %v64_v40  ;;  %v81_v54 = vunpack.c.l.bf16 %v287_v41  ;;  %v82_v55 = vunpack.c.l.bf16 %v292_v42 }
   0x9   :  { %v26_v7 = vrot.slane %v24_v6, 7 }
   0xb   :  { %v28_v8 = vsub.f32 %v23_v5, %v26_v7 }
   0xd   :  { %v29_v9 = vmax.f32 %v28_v8, 0.0 }
   0xf   :  { %v31_v10 = vadd.f32 1e-05, %v29_v9 }
  0x11   :  { %206 = vrsqrt.f32 %v31_v10  ;;  %vm38_vm1 = vweird.f32 %v31_v10 }
  0x17   :  { %v207_v11 = vpop.eup %206 }
  0x18   :  { %v33_v12 = vmul.f32 %v207_v11, %v31_v10  ;;  %vm39_vm2 = vweird.f32 %v207_v11 }
  0x19   :  { %vm40_vm3 = vmor %vm38_vm1, %vm39_vm2 }
  0x1a   :  { %v34_v13 = vmul.f32 %v207_v11, %v33_v12 }
  0x1c   :  { %v35_v14 = vmul.f32 0.5, %v34_v13 }
  0x1e   :  { %v36_v15 = vsub.f32 1.5, %v35_v14 }
  0x20   :  { %v37_v16 = vmul.f32 %v207_v11, %v36_v15 }
  0x22   :  { %v41_v17 = vsel %vm40_vm3, %v207_v11, %v37_v16 }
  0x23   :  { %43 = vst [vmem:[#allocation1] sm:$0xff] %v41_v17 }
  0x2a   :  { %v45_v30 = vld [vmem:[#allocation1 + $0x1] ss:$9 sm:$0xff] }
  0x2b   :  { %v47_v36 = vmul.f32 %v45_v30, %v30_v18 }
  0x2d   :  { %v49_v48 = vmul.f32 %v47_v36, %v23_v5  ;;  %v297_v49 = vperm.slane %v47_v36, 0 }
  0x2f   :  { %v50_v56 = vsub.f32 %v48_v43, %v49_v48  ;;  %v86_v57 = vmul.f32 %v297_v49, %v67_v31  ;;  %v87_v58 = vmul.f32 %v297_v49, %v68_v32  ;;  %v88_v59 = vmul.f32 %v297_v49, %v69_v33 }
  0x30   :  { %v89_v60 = vmul.f32 %v297_v49, %v70_v37  ;;  %v90_v61 = vmul.f32 %v297_v49, %v71_v38  ;;  %v91_v62 = vmul.f32 %v297_v49, %v72_v39  ;;  %v92_v63 = vmul.f32 %v297_v49, %v73_v44 }
  0x31   :  { %v308_v0 = vperm.slane %v50_v56, 0  ;;  %v93_v1 = vmul.f32 %v297_v49, %v74_v45  ;;  %v94_v2 = vmul.f32 %v297_v49, %v75_v46  ;;  %v95_v3 = vmul.f32 %v297_v49, %v76_v47 }
  0x32   :  { %v96_v4 = vmul.f32 %v297_v49, %v77_v50  ;;  %v97_v5 = vmul.f32 %v297_v49, %v78_v51  ;;  %v98_v6 = vmul.f32 %v297_v49, %v79_v52  ;;  %v99_v7 = vmul.f32 %v297_v49, %v80_v53 }
  0x33   :  { %v105_v8 = vadd.f32 %v308_v0, %v86_v57  ;;  %v106_v9 = vadd.f32 %v308_v0, %v87_v58  ;;  %v107_v10 = vadd.f32 %v308_v0, %v88_v59  ;;  %v108_v11 = vadd.f32 %v308_v0, %v89_v60 }
  0x34   :  { %v109_v12 = vadd.f32 %v308_v0, %v90_v61  ;;  %v110_v13 = vadd.f32 %v308_v0, %v91_v62  ;;  %v111_v14 = vadd.f32 %v308_v0, %v92_v63  ;;  %v112_v15 = vadd.f32 %v308_v0, %v93_v1 }
  0x35   :  { %vm121_vm5 = vcmp.gt.f32.partialorder %v105_v8, 0.0  ;;  %v137_v16 = vmul.f32 0.1, %v105_v8  ;;  %vm122_vm6 = vcmp.gt.f32.partialorder %v106_v9, 0.0  ;;  %v138_v17 = vmul.f32 0.1, %v106_v9 }
  0x36   :  { %vm123_vm7 = vcmp.gt.f32.partialorder %v107_v10, 0.0  ;;  %v139_v18 = vmul.f32 0.1, %v107_v10  ;;  %vm124_vm8 = vcmp.gt.f32.partialorder %v108_v11, 0.0  ;;  %v140_v19 = vmul.f32 0.1, %v108_v11 }
  0x37   :  { %v153_v20 = vsel %vm121_vm5, %v105_v8, %v137_v16  ;;  %v154_v21 = vsel %vm122_vm6, %v106_v9, %v138_v17  ;;  %vm125_vm9 = vcmp.gt.f32.partialorder %v109_v12, 0.0  ;;  %v141_v22 = vmul.f32 0.1, %v109_v12 }
  0x38   :  { %v169_v23 = vpack.c.bf16 %v153_v20, %v153_v20  ;;  %v170_v24 = vpack.c.bf16 %v154_v21, %v154_v21  ;;  %v155_v25 = vsel %vm123_vm7, %v107_v10, %v139_v18  ;;  %v156_v26 = vsel %vm124_vm8, %v108_v11, %v140_v19 }
  0x39   :  { %v171_v27 = vpack.c.bf16 %v155_v25, %v155_v25  ;;  %v172_v28 = vpack.c.bf16 %v156_v26, %v156_v26  ;;  %v157_v29 = vsel %vm125_vm9, %v109_v12, %v141_v22  ;;  %vm126_vm10 = vcmp.gt.f32.partialorder %v110_v13, 0.0 }
  0x3a   :  { %186 = vst.msk [vmem:[%s407_s4] sm:$0xf] %vm185_vm4, %v169_v23  ;;  %v173_v30 = vpack.c.bf16 %v157_v29, %v157_v29  ;;  %v142_v31 = vmul.f32 0.1, %v110_v13  ;;  %vm127_vm11 = vcmp.gt.f32.partialorder %v111_v14, 0.0  ;;  %vm128_vm12 = vcmp.gt.f32.partialorder %v112_v15, 0.0 }
  0x3b   :  { %187 = vst.msk [vmem:[%s407_s4 + $0x4] sm:$0xf] %vm185_vm4, %v170_v24  ;;  %v143_v32 = vmul.f32 0.1, %v111_v14  ;;  %v144_v33 = vmul.f32 0.1, %v112_v15  ;;  %v113_v34 = vadd.f32 %v308_v0, %v94_v2  ;;  %v114_v35 = vadd.f32 %v308_v0, %v95_v3 }
  0x3c   :  { %188 = vst.msk [vmem:[%s407_s4 + $0x8] sm:$0xf] %vm185_vm4, %v171_v27  ;;  %v158_v36 = vsel %vm126_vm10, %v110_v13, %v142_v31  ;;  %v115_v37 = vadd.f32 %v308_v0, %v96_v4  ;;  %v116_v38 = vadd.f32 %v308_v0, %v97_v5  ;;  %v117_v39 = vadd.f32 %v308_v0, %v98_v6 }
  0x3d   :  { %189 = vst.msk [vmem:[%s407_s4 + $0xc] sm:$0xf] %vm185_vm4, %v172_v28  ;;  %v174_v40 = vpack.c.bf16 %v158_v36, %v158_v36  ;;  %v159_v43 = vsel %vm127_vm11, %v111_v14, %v143_v32  ;;  %v160_v44 = vsel %vm128_vm12, %v112_v15, %v144_v33  ;;  %vm129_vm13 = vcmp.gt.f32.partialorder %v113_v34, 0.0 }
  0x3e   :  { %190 = vst.msk [vmem:[%s407_s4 + $0x10] sm:$0xf] %vm185_vm4, %v173_v30  ;;  %v175_v45 = vpack.c.bf16 %v159_v43, %v159_v43  ;;  %v176_v46 = vpack.c.bf16 %v160_v44, %v160_v44  ;;  %v145_v47 = vmul.f32 0.1, %v113_v34  ;;  %vm130_vm14 = vcmp.gt.f32.partialorder %v114_v35, 0.0 }
  0x3f   :  { %191 = vst.msk [vmem:[%s407_s4 + $0x14] sm:$0xf] %vm185_vm4, %v174_v40  ;;  %v146_v48 = vmul.f32 0.1, %v114_v35  ;;  %vm131_vm15 = vcmp.gt.f32.partialorder %v115_v37, 0.0  ;;  %vm132_vm0 = vcmp.gt.f32.partialorder %v116_v38, 0.0  ;;  %v118_v50 = vadd.f32 %v308_v0, %v99_v7 }
  0x40   :  { %192 = vst.msk [vmem:[%s407_s4 + $0x18] sm:$0xf] %vm185_vm4, %v175_v45  ;;  %v161_v51 = vsel %vm129_vm13, %v113_v34, %v145_v47  ;;  %v147_v52 = vmul.f32 0.1, %v115_v37  ;;  %v148_v53 = vmul.f32 0.1, %v116_v38  ;;  %v100_v56 = vmul.f32 %v297_v49, %v81_v54 }
  0x41   :  { %193 = vst.msk [vmem:[%s407_s4 + $0x1c] sm:$0xf] %vm185_vm4, %v176_v46  ;;  %v177_v57 = vpack.c.bf16 %v161_v51, %v161_v51  ;;  %v162_v58 = vsel %vm130_vm14, %v114_v35, %v146_v48  ;;  %vm133_vm1 = vcmp.gt.f32.partialorder %v117_v39, 0.0  ;;  %v149_v59 = vmul.f32 0.1, %v117_v39 }
  0x42   :  { %v178_v60 = vpack.c.bf16 %v162_v58, %v162_v58  ;;  %v163_v61 = vsel %vm131_vm15, %v115_v37, %v147_v52  ;;  %v164_v62 = vsel %vm132_vm0, %v116_v38, %v148_v53  ;;  %vm134_vm2 = vcmp.gt.f32.partialorder %v118_v50, 0.0 }
  0x43   :  { %194 = vst.msk [vmem:[%s407_s4 + $0x20] sm:$0xf] %vm185_vm4, %v177_v57  ;;  %v179_v41 = vpack.c.bf16 %v163_v61, %v163_v61  ;;  %v180_v54 = vpack.c.bf16 %v164_v62, %v164_v62  ;;  %v165_v63 = vsel %vm133_vm1, %v117_v39, %v149_v59  ;;  %v150_v1 = vmul.f32 0.1, %v118_v50 }
  0x44   :  { %195 = vst.msk [vmem:[%s407_s4 + $0x24] sm:$0xf] %vm185_vm4, %v178_v60  ;;  %v181_v2 = vpack.c.bf16 %v165_v63, %v165_v63  ;;  %v119_v3 = vadd.f32 %v308_v0, %v100_v56  ;;  %v101_v4 = vmul.f32 %v297_v49, %v82_v55 }
  0x45   :  { %196 = vst.msk [vmem:[%s407_s4 + $0x28] sm:$0xf] %vm185_vm4, %v179_v41  ;;  %v166_v5 = vsel %vm134_vm2, %v118_v50, %v150_v1 }
  0x46   :  { %197 = vst.msk [vmem:[%s407_s4 + $0x2c] sm:$0xf] %vm185_vm4, %v180_v54  ;;  %v182_v6 = vpack.c.bf16 %v166_v5, %v166_v5  ;;  %vm135_vm3 = vcmp.gt.f32.partialorder %v119_v3, 0.0  ;;  %v151_v7 = vmul.f32 0.1, %v119_v3  ;;  %v120_v8 = vadd.f32 %v308_v0, %v101_v4 }
  0x47   :  { %198 = vst.msk [vmem:[%s407_s4 + $0x30] sm:$0xf] %vm185_vm4, %v181_v2 }
  0x48   :  { %199 = vst.msk [vmem:[%s407_s4 + $0x34] sm:$0xf] %vm185_vm4, %v182_v6  ;;  %v167_v42 = vsel %vm135_vm3, %v119_v3, %v151_v7  ;;  %vm136_vm5 = vcmp.gt.f32.partialorder %v120_v8, 0.0  ;;  %v152_v49 = vmul.f32 0.1, %v120_v8 }
  0x49   :  { %v183_v55 = vpack.c.bf16 %v167_v42, %v167_v42 }
  0x4a   :  { %v168_v9 = vsel %vm136_vm5, %v120_v8, %v152_v49 }
  0x4b   :  { %200 = vst.msk [vmem:[%s407_s4 + $0x38] sm:$0xf] %vm185_vm4, %v183_v55  ;;  %v184_v0 = vpack.c.bf16 %v168_v9, %v168_v9 }
  0x4d   :  { %201 = vst.msk [vmem:[%s407_s4 + $0x3c] sm:$0xf] %vm185_vm4, %v184_v0 }

// kernel: _lambda_.8
= control target key start
LH: loop header
LB: loop body
LE: loop exit
PB: predicated region body
PF: predicated region fallthrough
CT: control target
= control target key end

     0   :  { %s1974_s12 = smov 0   ;;  %s1976_s13 = smov 0   ;;  %s2672_s0 = inlined_call_operand.vmem [shape: bf16[2,1,110,8], index: 0, kind: input, shape index: {}]   ;;  %s2673_s1 = inlined_call_operand.vmem [shape: bf16[9,8,8], index: 1, kind: input, shape index: {}]   ;;  %s2674_s2 = inlined_call_operand.vmem [shape: bf16[2,1,80,8], index: 2, kind: output, shape index: {0}]   ;;  %s2675_s3 = inlined_call_operand.vmem [shape: f32[2,2,8], index: 3, kind: output, shape index: {1}]  }
   0x1   :  { %s1978_s14 = smov 0  }
   0x2 LB: > { %s33_s15 = sadd.s32 1, %s1946_s13  ;;  %p1761_p0 = scmp.ge.s32.totalorder %s1950_s14, 1  ;;  %s1950_s14 = sphi %s1978_s14, %s14_s14   ;;  %s1946_s13 = sphi %s1976_s13, %s2709_s13   ;;  %s1942_s12 = sphi %s1974_s12, %s2708_s12  }
   0x3   : > { %p35_p1 = scmp.ge.s32.totalorder %s33_s15, 2  ;;  %p173_p2 = scmp.lt.s32.totalorder %s1950_s14, 3 }
   0x5   : > { %s2711_s15 = smov (%p35_p1, %s33_s15), 0  ;;  %p174_p3 = pnand %p1761_p0, %p173_p2 }
   0x6   : > { %p212_p4 = scmp.lt.s32.totalorder (!%p174_p3), %s1942_s12, 1 }
   0x7   : > { %177 = sbr.rel (%p174_p3) target bundleno = 369 (0x171), region = 28 }
   0xc   : > { %v1765_v0 = vld [vmem:[%s2673_s1 + $0x4] sm:$0xf]  ;;  %vm349_vm0 = vcmask 1043456   ;;  %v1792_v2 = vld [vmem:[%s2673_s1 + $0x8] sm:$0xf]  ;;  %s2713_s12 = smov (!%p212_p4, %s1942_s12), 1 }
   0xd   : > { %v351_v1 = vsel %vm349_vm0, %v1765_v0, 0  ;;  %v256_v3 = vld [vmem:[%s2673_s1] sm:$0xf]  ;;  %v468_v4 = vsel %vm349_vm0, %v1792_v2, 0  ;;  %v1798_v6 = vld [vmem:[%s2673_s1 + $0xc] sm:$0xf] }
   0xe   : > { %1897 = vmatpush.bf16.msra.mxu1 %v351_v1  ;;  %1898 = vmatpush.bf16.msra.mxu2 %v351_v1  ;;  %v398_v5 = vsel %vm349_vm0, %v256_v3, 0  ;;  %v582_v7 = vsel %vm349_vm0, %v1798_v6, 0  ;;  %v1820_v8 = vld [vmem:[%s2673_s1 + $0x10] sm:$0xf]  ;;  %s1900_s26 = smul.u32 56, %s2713_s12  ;;  %vm333_vm2 = vcmask 64512  }
   0xf   : > { %1899 = vmatpush.bf16.msra.mxu3 %v351_v1  ;;  %360 = vmatpush.bf16.msra.mxu0 %v351_v1  ;;  %v704_v9 = vsel %vm349_vm0, %v1820_v8, 0  ;;  %vm288_vm1 = vsmask.f32 7424  ;;  %v1832_v44 = vld [vmem:[%s2673_s1 + $0x18] sm:$0xf]  ;;  %vm440_vm3 = vcmask 1046528  }
  0x10   : > { %s2018_s29 = scalar_lea.vmem %s2672_s0, %s1900_s26  ;;  %v898_v46 = vsel %vm349_vm0, %v1832_v44, 0  ;;  %v1854_v47 = vld [vmem:[%s2673_s1 + $0x1c] sm:$0xf]  ;;  %v1826_v51 = vld [vmem:[%s2673_s1 + $0x14] sm:$0xf]  ;;  %vm756_vm5 = vcmask 1045504  }
  0x11   : > { %v2021_v10 = vld [vmem:[%s2018_s29 + $0x8] sm:$0xff]  ;;  %v2024_v11 = vld [vmem:[%s2018_s29 + $0x10] sm:$0xff]  ;;  %v2027_v12 = vld [vmem:[%s2018_s29 + $0x18] sm:$0xff]  ;;  %v1020_v57 = vsel %vm349_vm0, %v1854_v47, 0  ;;  %v784_v58 = vsel %vm349_vm0, %v1826_v51, 0  ;;  %vm1072_vm7 = vcmask 1044480  }
  0x12   : > { %477 = vmatpush.bf16.msrb.mxu2 %v468_v4  ;;  %407 = vmatpush.bf16.msrb.mxu1 %v398_v5  ;;  %v2030_v13 = vld [vmem:[%s2018_s29 + $0x20] sm:$0xff]  ;;  %v257_v14 = vld [vmem:[%s2018_s29 + $0x28] sm:$0x1]  ;;  %v297_v15 = vshll.u32 %v2021_v10, 16  ;;  %v301_v16 = vshrl.u32 %v2021_v10, 16  ;;  %v305_v17 = vshll.u32 %v2024_v11, 16 }
  0x13   : > { %591 = vmatpush.bf16.msrb.mxu3 %v582_v7  ;;  %713 = vmatpush.bf16.msrb.mxu0 %v704_v9  ;;  %v309_v18 = vshrl.u32 %v2024_v11, 16  ;;  %v2038_v19 = vld [vmem:[%s2018_s29] sm:$0xff]   ;;  %v313_v20 = vshll.u32 %v2027_v12, 16  ;;  %v281_v21 = vunpack.c.l.b16 %v257_v14  ;;  %v321_v22 = vshll.u32 %v2030_v13, 16  ;;  %v2045_v25 = vld [vmem:[%s2018_s29 + $0x8] sm:$0xff]   ;;  %s1901_s11 = smul.u32 40, %s2713_s12 }
  0x14   : > { %v325_v23 = vshrl.u32 %v2030_v13, 16  ;;  %v514_v24 = vld [vmem:[%s2018_s29 + $0x4] sm:$0xe]  ;;  %v299_v26 = vrot.slane %v297_v15, 1  ;;  %v307_v27 = vrot.slane %v305_v17, 1  ;;  %v290_v28 = vshrl.u32 %v2038_v19, 16 }
  0x15   : > { %v315_v29 = vrot.slane %v313_v20, 1  ;;  %v2048_v30 = vpack.c.b16 %v281_v21, %v281_v21  ;;  %v323_v31 = vrot.slane %v321_v22, 1  ;;  %v292_v32 = vshll.u32 %v2038_v19, 16  ;;  %v2069_v50 = vld [vmem:[%s2018_s29 + $0xc] sm:$0xff]  ;;  %v1860_v54 = vld [vmem:[%s2673_s1 + $0x20] sm:$0xf]  ;;  %s2443_s18 = scalar_lea.vmem %s2674_s2, %s1901_s11 }
  0x16   : > { %v303_v33 = vor.u32 %v301_v16, %v299_v26  ;;  %v311_v34 = vor.u32 %v309_v18, %v307_v27  ;;  %v538_v35 = vunpack.c.l.b16 %v514_v24  ;;  %v539_v36 = vunpack.c.l.b16 %v2045_v25  ;;  %v1894_v9 = vld [vmem:[%s2018_s29] sm:$0xf0]  ;;  %v1895_v14 = vld [vmem:[%s2018_s29] sm:$0xe]  ;;  %v2095_v15 = vld [vmem:[%s2018_s29 + $0x14] sm:$0xff]  ;;  %s1764_s19 = sshll.u32 %s2713_s12, 1 }
  0x17   : > { %v327_v37 = vor.u32 %v325_v23, %v323_v31  ;;  %v329_v38 = vshll.u32 %v2048_v30, 16  ;;  %v294_v39 = vrot.slane %v292_v32, 1  ;;  %v644_v55 = vshrl.u32 %v2069_v50, 16  ;;  %s2597_s21 = scalar_lea.vmem %s2675_s3, %s1764_s19 }
  0x18   : > { %v308_v40 = vsel %vm288_vm1, %v303_v33, %v307_v27  ;;  %v316_v41 = vsel %vm288_vm1, %v311_v34, %v315_v29  ;;  %v549_v45 = vpack.c.b16 %v539_v36, %v538_v35  ;;  %v647_v56 = vshll.u32 %v2069_v50, 16 }
  0x19   : > { %1783 = vmatmul.msk.bf16.vlgmr.msra.gmra.mxu1 %vm333_vm2, %v308_v40  ;;  %1784 = vmatmul.msk.bf16.vlgmr.msra.gmra.mxu2 %vm333_vm2, %v316_v41  ;;  %v331_v42 = vrot.slane %v329_v38, 1  ;;  %v295_v43 = vor.u32 %v294_v39, %v290_v28  ;;  %v317_v59 = vshrl.u32 %v2027_v12, 16  ;;  %v1100_v60 = vsel %vm349_vm0, %v1860_v54, 0  ;;  %v2125_v41 = vld [vmem:[%s2018_s29 + $0x24] sm:$0xff] }
  0x1a   : > { %907 = vmatpush.bf16.msra.mxu2 %v898_v46  ;;  %v636_v52 = vshrl.u32 %v549_v45, 16  ;;  %v639_v53 = vshll.u32 %v549_v45, 16  ;;  %793 = vmatpush.bf16.msra.mxu1 %v784_v58  ;;  %v646_v63 = vrot.slane %v644_v55, 1  ;;  %v649_v0 = vrot.slane %v647_v56, 2 }
  0x1b   : > { %v332_v48 = vsel %vm288_vm1, %v327_v37, %v331_v42  ;;  %v300_v49 = vsel %vm288_vm1, %v295_v43, %v299_v26  ;;  %v319_v1 = vor.u32 %v317_v59, %v315_v29  ;;  %v555_v2 = vrot.slane %v549_v45, 1  ;;  %v2110_v29 = vld [vmem:[%s2018_s29 + $0x1c] sm:$0xff] }
  0x1c   : > { %1786 = vmatmul.msk.bf16.vlgmr.msra.gmra.mxu3 %vm333_vm2, %v332_v48  ;;  %1782 = vmatmul.msk.bf16.vlgmr.msra.gmra.mxu0 %vm333_vm2, %v300_v49  ;;  %v638_v61 = vrot.slane %v636_v52, 1  ;;  %v641_v62 = vrot.slane %v639_v53, 2  ;;  %v556_v3 = vrot.slane %v2069_v50, 1  ;;  %v650_v5 = vor.u32 %v649_v0, %v646_v63  ;;  %v750_v48 = vld [vmem:[%s2018_s29 + $0x4] sm:$0xc] }
  0x1d   : > { %1029 = vmatpush.bf16.msra.mxu3 %v1020_v57  ;;  %1109 = vmatpush.bf16.msra.mxu0 %v1100_v60  ;;  %v324_v6 = vsel %vm288_vm1, %v319_v1, %v323_v31  ;;  %vm634_vm4 = vsmask.f32 6400  ;;  %v653_v16 = vshrl.u32 %v2095_v15, 16  ;;  %v656_v17 = vshll.u32 %v2095_v15, 16  ;;  %v628_v52 = vld [vmem:[%s2018_s29 + $0x2c] sm:$0x3] }
  0x1e   : > { %v642_v4 = vor.u32 %v641_v62, %v638_v61  ;;  %v557_v7 = vsel %vm440_vm3, %v555_v2, %v556_v3  ;;  %v1896_v18 = vor.u32 %v1895_v14, %v1894_v9  ;;  %v442_v22 = vrot.slane %v2021_v10, 1  ;;  %v524_v62 = vld [vmem:[%s2018_s29 + $0x2c] sm:$0x1] }
  0x1f   : > { %v655_v20 = vrot.slane %v653_v16, 1  ;;  %v558_v23 = vrot.slane %v2095_v15, 1  ;;  %v662_v31 = vshrl.u32 %v2110_v29, 16  ;;  %v665_v32 = vshll.u32 %v2110_v29, 16  ;;  %v1886_v16 = vld [vmem:[%s2018_s29 + $0x10] sm:$0xff] }
  0x20   : > { %v651_v8 = vsel %vm634_vm4, %v642_v4, %v650_v5  ;;  %v441_v21 = vrot.slane %v1896_v18, 1  ;;  %v560_v35 = vrot.slane %v2110_v29, 1  ;;  %v448_v42 = vrot.slane %v2030_v13, 1 }
  0x21   : > { %v559_v27 = vsel %vm440_vm3, %v556_v3, %v558_v23  ;;  %v664_v33 = vrot.slane %v662_v31, 1  ;;  %v667_v34 = vrot.slane %v665_v32, 2  ;;  %v450_v43 = vrot.slane %v2048_v30, 1 }
  0x22   : > { %v443_v26 = vsel %vm440_vm3, %v441_v21, %v442_v22  ;;  %v561_v39 = vsel %vm440_vm3, %v558_v23, %v560_v35  ;;  %v671_v44 = vshrl.u32 %v2125_v41, 16  ;;  %v446_v49 = vrot.slane %v2027_v12, 1 }
  0x23   : > { %v668_v37 = vor.u32 %v667_v34, %v664_v33  ;;  %v2134_v45 = vsel %vm440_vm3, %v448_v42, %v450_v43  ;;  %v754_v51 = vunpack.c.l.b16 %v750_v48  ;;  %v562_v30 = vrot.slane %v2125_v41, 1 }
  0x24   : > { %v673_v46 = vrot.slane %v671_v44, 1  ;;  %v632_v55 = vunpack.c.l.b16 %v628_v52  ;;  %v758_v58 = vrot.slane %v2069_v50, 2  ;;  %v760_v50 = vrot.slane %v2095_v15, 2 }
  0x25   : > { %v755_v53 = vpack.c.b16 %v539_v36, %v754_v51  ;;  %v563_v36 = vsel %vm440_vm3, %v560_v35, %v562_v30  ;;  %v548_v63 = vunpack.c.l.b16 %v524_v62  ;;  %v855_v9 = vunpack.c.h.b16 %v2045_v25  ;;  %v2187_v51 = vld [vmem:[%s2018_s29 + $0x20] sm:$0xff] }
  0x26   : > { %v2150_v61 = vpack.c.b16 %v632_v55, %v632_v55  ;;  %v761_v1 = vsel %vm756_vm5, %v758_v58, %v760_v50  ;;  %v449_v14 = vsel %vm440_vm3, %v446_v49, %v448_v42  ;;  %v960_v21 = vshrl.u32 %v1886_v16, 16 }
  0x27   : > { %v757_v57 = vrot.slane %v755_v53, 2  ;;  %v554_v2 = vpack.c.b16 %v548_v63, %v548_v63  ;;  %v963_v23 = vshll.u32 %v1886_v16, 16  ;;  %vm950_vm6 = vsmask.f32 5376 }
  0x28   : > { %v683_v0 = vshll.u32 %v2150_v61, 16  ;;  %v978_v52 = vshrl.u32 %v2187_v51, 16  ;;  %v981_v53 = vshll.u32 %v2187_v51, 16  ;;  %v762_v55 = vrot.slane %v2110_v29, 2 }
  0x29   : > { %1785 = vmatmul.msk.bf16.gmra.mxu2 %vm333_vm2, %v324_v6  ;;  %1787 = vmatmul.msk.bf16.vlgmr.msrb.gmra.mxu1 %vm333_vm2, %v2038_v19  ;;  %v658_v19 = vrot.slane %v656_v17, 2  ;;  %v759_v59 = vsel %vm756_vm5, %v757_v57, %v758_v58  ;;  %v564_v6 = vrot.slane %v554_v2, 1  ;;  %v1078_v58 = vrot.slane %v2187_v51, 3 }
  0x2a   : > { %v685_v4 = vrot.slane %v683_v0, 2 }
  0x2b   : > { %v659_v24 = vor.u32 %v658_v19, %v655_v20  ;;  %v565_v17 = vsel %vm440_vm3, %v562_v30, %v564_v6  ;;  %v1066_v19 = vld [vmem:[%s2018_s29 + $0x8] sm:$0x8]  ;;  %v980_v30 = vrot.slane %v978_v52, 2  ;;  %v764_v6 = vrot.slane %v2125_v41, 2 }
  0x2c   : > { %1815 = vmatmul.msk.bf16.vlgmr.msrb.gmra.mxu3 %vm333_vm2, %v557_v7  ;;  %1821 = vmatmul.msk.bf16.vlgmr.msrb.gmra.mxu0 %vm333_vm2, %v651_v8 }
  0x2d   : > { %v660_v28 = vsel %vm634_vm4, %v650_v5, %v659_v24  ;;  %v669_v40 = vsel %vm634_vm4, %v659_v24, %v668_v37  ;;  %v830_v5 = vld [vmem:[%s2018_s29 + $0x8] sm:$0xc]  ;;  %v1070_v24 = vunpack.c.l.b16 %v1066_v19 }
  0x2e   : > { %v854_v8 = vunpack.c.l.b16 %v830_v5 }
  0x2f   : > { %v1071_v31 = vpack.c.b16 %v855_v9, %v1070_v24 }
  0x30   : > { %v865_v20 = vpack.c.b16 %v855_v9, %v854_v8  ;;  %v944_v8 = vld [vmem:[%s2018_s29 + $0x30] sm:$0x7] }
  0x31   : > { %v1073_v34 = vrot.slane %v1071_v31, 3 }
  0x32   : > { %v952_v25 = vshrl.u32 %v865_v20, 16  ;;  %v871_v44 = vrot.slane %v865_v20, 2 }
  0x39   : > { %1788 = vmatmul.msk.bf16.gmra.mxu1 %vm333_vm2, %v2021_v10  ;;  %1793 = vmatmul.msk.bf16.vlgmr.msrb.gmra.mxu2 %vm333_vm2, %v443_v26  ;;  %v444_v10 = vrot.slane %v2024_v11, 1  ;;  %v962_v26 = vrot.slane %v960_v21, 2 }
  0x3b   : > { %v445_v38 = vsel %vm440_vm3, %v442_v22, %v444_v10  ;;  %v447_v56 = vsel %vm440_vm3, %v444_v10, %v446_v49  ;;  %v955_v22 = vshll.u32 %v865_v20, 16  ;;  %v1074_v10 = vrot.slane %v1886_v16, 3 }
  0x3c   : > { %1816 = vmatmul.msk.bf16.gmra.mxu3 %vm333_vm2, %v559_v27  ;;  %1822 = vmatmul.msk.bf16.gmra.mxu0 %vm333_vm2, %v660_v28  ;;  %v965_v28 = vrot.slane %v963_v23, 3  ;;  %v765_v20 = vsel %vm756_vm5, %v762_v55, %v764_v6 }
  0x3d   : > { %v957_v27 = vrot.slane %v955_v22, 3 }
  0x3e   : > { %v966_v33 = vor.u32 %v965_v28, %v962_v26 }
  0x49   : > { %1789 = vmatmul.msk.bf16.gmra.mxu1 %vm333_vm2, %v2024_v11  ;;  %1794 = vmatmul.msk.bf16.gmra.mxu2 %vm333_vm2, %v445_v38  ;;  %v674_v11 = vshll.u32 %v2125_v41, 16  ;;  %v1887_v38 = vld [vmem:[%s2018_s29 + $0x18] sm:$0xff] }
  0x4b   : > { %v676_v47 = vrot.slane %v674_v11, 2  ;;  %v872_v11 = vrot.slane %v1886_v16, 2 }
  0x4c   : > { %1817 = vmatmul.msk.bf16.gmra.mxu3 %vm333_vm2, %v561_v39  ;;  %1823 = vmatmul.msk.bf16.gmra.mxu0 %vm333_vm2, %v669_v40  ;;  %v969_v39 = vshrl.u32 %v1887_v38, 16  ;;  %v972_v40 = vshll.u32 %v1887_v38, 16 }
  0x4d   : > { %v677_v54 = vor.u32 %v676_v47, %v673_v46  ;;  %v873_v47 = vsel %vm756_vm5, %v871_v44, %v872_v11 }
  0x4e   : > { %v971_v42 = vrot.slane %v969_v39, 2  ;;  %v974_v43 = vrot.slane %v972_v40, 3 }
  0x4f   : > { %v678_v60 = vsel %vm634_vm4, %v668_v37, %v677_v54  ;;  %v1075_v37 = vsel %vm1072_vm7, %v1073_v34, %v1074_v10 }
  0x50   : > { %v975_v46 = vor.u32 %v974_v43, %v971_v42 }
  0x52   : > { %v976_v48 = vsel %vm950_vm6, %v966_v33, %v975_v46 }
  0x59   : > { %1790 = vmatmul.msk.bf16.gmra.mxu1 %vm333_vm2, %v2027_v12  ;;  %1795 = vmatmul.msk.bf16.gmra.mxu2 %vm333_vm2, %v447_v56  ;;  %v680_v12 = vshrl.u32 %v2150_v61, 16  ;;  %v874_v56 = vrot.slane %v1887_v38, 2 }
  0x5b   : > { %v682_v3 = vrot.slane %v680_v12, 1  ;;  %v2204_v12 = vld [vmem:[%s2018_s29 + $0x28] sm:$0xff] }
  0x5c   : > { %1818 = vmatmul.msk.bf16.gmra.mxu3 %vm333_vm2, %v563_v36  ;;  %1824 = vmatmul.msk.bf16.gmra.mxu0 %vm333_vm2, %v678_v60  ;;  %v763_v36 = vsel %vm756_vm5, %v760_v50, %v762_v55  ;;  %v875_v60 = vsel %vm756_vm5, %v872_v11, %v874_v56  ;;  %v987_v15 = vshrl.u32 %v2204_v12, 16  ;;  %v990_v50 = vshll.u32 %v2204_v12, 16 }
  0x5d   : > { %v686_v7 = vor.u32 %v685_v4, %v682_v3  ;;  %v1080_v16 = vrot.slane %v2204_v12, 3 }
  0x5e   : > { %v989_v4 = vrot.slane %v987_v15, 2  ;;  %v992_v5 = vrot.slane %v990_v50, 3 }
  0x5f   : > { %v687_v18 = vsel %vm634_vm4, %v677_v54, %v686_v7  ;;  %v983_v54 = vrot.slane %v981_v53, 3  ;;  %v876_v7 = vrot.slane %v2187_v51, 2  ;;  %v1081_v23 = vsel %vm1072_vm7, %v1078_v58, %v1080_v16 }
  0x61   : > { %v984_v57 = vor.u32 %v983_v54, %v980_v30  ;;  %v877_v19 = vsel %vm756_vm5, %v874_v56, %v876_v7 }
  0x63   : > { %v985_v62 = vsel %vm950_vm6, %v975_v46, %v984_v57 }
  0x69   : > { %1791 = vmatmul.msk.bf16.gmra.mxu1 %vm333_vm2, %v2030_v13  ;;  %1796 = vmatmul.msk.bf16.gmra.mxu2 %vm333_vm2, %v449_v14  ;;  %v954_v13 = vrot.slane %v952_v25, 2  ;;  %v993_v14 = vor.u32 %v992_v5, %v989_v4 }
  0x6b   : > { %v958_v32 = vor.u32 %v957_v27, %v954_v13  ;;  %v994_v41 = vsel %vm950_vm6, %v984_v57, %v993_v14 }
  0x6c   : > { %1819 = vmatmul.msk.bf16.gmra.mxu3 %vm333_vm2, %v565_v17  ;;  %1825 = vmatmul.msk.bf16.gmra.mxu0 %vm333_vm2, %v687_v18  ;;  %v948_v17 = vunpack.c.l.b16 %v944_v8 }
  0x6d   : > { %v967_v35 = vsel %vm950_vm6, %v958_v32, %v966_v33 }
  0x6e   : > { %v949_v24 = vpack.c.b16 %v948_v17, %v948_v17 }
  0x70   : > { %v996_v13 = vshrl.u32 %v949_v24, 16  ;;  %v999_v27 = vshll.u32 %v949_v24, 16  ;;  %v1082_v40 = vrot.slane %v949_v24, 3 }
  0x72   : > { %v998_v34 = vrot.slane %v996_v13, 2 }
  0x79   : > { %1797 = vmatmul.msk.bf16.gmra.mxu2 %vm333_vm2, %v2134_v45  ;;  %1827 = vmatmul.msk.bf16.vlgmr.msra.gmra.mxu1 %vm333_vm2, %v759_v59  ;;  %v1076_v45 = vrot.slane %v1887_v38, 3 }
  0x7b   : > { %v1077_v49 = vsel %vm1072_vm7, %v1074_v10, %v1076_v45  ;;  %v1079_v29 = vsel %vm1072_vm7, %v1076_v45, %v1078_v58  ;;  %v1001_v10 = vrot.slane %v999_v27, 3  ;;  %v840_v45 = vld [vmem:[%s2018_s29 + $0x30] sm:$0x3] }
  0x7c   : > { %1855 = vmatmul.msk.bf16.vlgmr.msra.gmra.mxu3 %vm333_vm2, %v967_v35  ;;  %1861 = vmatmul.msk.bf16.vlgmr.msra.gmra.mxu0 %vm333_vm2, %v1075_v37  ;;  %v766_v35 = vrot.slane %v2150_v61, 2  ;;  %v878_v37 = vrot.slane %v2204_v12, 2 }
  0x7d   : > { %v1002_v39 = vor.u32 %v1001_v10, %v998_v34 }
  0x7e   : > { %v767_v43 = vsel %vm756_vm5, %v764_v6, %v766_v35  ;;  %v879_v44 = vsel %vm756_vm5, %v876_v7, %v878_v37 }
  0x7f   : > { %v1003_v61 = vsel %vm950_vm6, %v993_v14, %v1002_v39 }
  0x89   : > { %1828 = vmatmul.msk.bf16.gmra.mxu1 %vm333_vm2, %v761_v1  ;;  %1849 = vmatmul.msk.bf16.vlgmr.msra.gmra.mxu2 %vm333_vm2, %v873_v47 }
  0x8c   : > { %1856 = vmatmul.msk.bf16.gmra.mxu3 %vm333_vm2, %v976_v48  ;;  %1862 = vmatmul.msk.bf16.gmra.mxu0 %vm333_vm2, %v1077_v49  ;;  %v1083_v48 = vsel %vm1072_vm7, %v1080_v16, %v1082_v40  ;;  %v864_v49 = vunpack.c.l.b16 %v840_v45 }
  0x8e   : > { %v870_v30 = vpack.c.b16 %v864_v49, %v864_v49 }
  0x96   : > { %v367_v59 = vpop.f32.mrf.mxu1 }
  0x99   : > { %1829 = vmatmul.msk.bf16.gmra.mxu1 %vm333_vm2, %v763_v36  ;;  %1850 = vmatmul.msk.bf16.gmra.mxu2 %vm333_vm2, %v875_v60  ;;  %v362_v63 = vpop.f32.mrf.mxu0 }
  0x9c   : > { %v2206_v0 = vpop.f32.mrf.mxu2  ;;  %1857 = vmatmul.msk.bf16.gmra.mxu3 %vm333_vm2, %v985_v62  ;;  %1863 = vmatmul.msk.bf16.gmra.mxu0 %vm333_vm2, %v1079_v29 }
  0x9e   : > { %v369_v1 = vpop.f32.mrf.mxu1 }
  0x9f   : > { %v2212_v2 = vpop.f32.mrf.mxu3 }
  0xa1   : > { %v364_v3 = vpop.f32.mrf.mxu0 }
  0xa4   : > { %v2217_v9 = vpop.f32.mrf.mxu2 }
  0xa6   : > { %v409_v18 = vpop.f32.mrf.mxu1 }
  0xa7   : > { %v410_v21 = vadd.f32 %v409_v18, %v362_v63  ;;  %v2222_v25 = vpop.f32.mrf.mxu3  ;;  %v1167_v18 = vlaneseq }
  0xa9   : > { %1830 = vmatmul.msk.bf16.gmra.mxu1 %vm333_vm2, %v765_v20  ;;  %1851 = vmatmul.msk.bf16.gmra.mxu2 %vm333_vm2, %v877_v19  ;;  %v715_v22 = vpop.f32.mrf.mxu0  ;;  %v2255_v19 = vshrl.u32 %v1167_v18, 7 }
  0xab   : > { %v1182_v13 = vshrl.u32 %v2255_v19, 16 }
  0xac   : > { %v2228_v26 = vpop.f32.mrf.mxu2  ;;  %1858 = vmatmul.msk.bf16.gmra.mxu3 %vm333_vm2, %v994_v41  ;;  %1864 = vmatmul.msk.bf16.gmra.mxu0 %vm333_vm2, %v1081_v23  ;;  %v1181_v23 = vand.u32 65535, %v2255_v19 }
  0xad   : > { %v1187_v35 = vmul.u32 52428, %v1182_v13 }
  0xae   : > { %v411_v28 = vpop.f32.mrf.mxu1  ;;  %v1185_v27 = vmul.u32 52428, %v1181_v23 }
  0xaf   : > { %v412_v31 = vadd.f32 %v411_v28, %v364_v3  ;;  %v593_v32 = vpop.f32.mrf.mxu3 }
  0xb0   : > { %v1189_v49 = vshrl.u32 %v1185_v27, 16 }
  0xb1   : > { %v717_v33 = vpop.f32.mrf.mxu0 }
  0xb4   : > { %v2234_v38 = vpop.f32.mrf.mxu2 }
  0xb6   : > { %v414_v42 = vpop.f32.mrf.mxu1 }
  0xb7   : > { %v415_v11 = vadd.f32 %v414_v42, %v367_v59  ;;  %v595_v46 = vpop.f32.mrf.mxu3  ;;  %v880_v59 = vrot.slane %v870_v30, 2  ;;  %v1952_v42 = vmov 0  }
  0xb9   : > { %1831 = vmatmul.msk.bf16.gmra.mxu1 %vm333_vm2, %v767_v43  ;;  %1852 = vmatmul.msk.bf16.gmra.mxu2 %vm333_vm2, %v879_v44  ;;  %v720_v47 = vpop.f32.mrf.mxu0  ;;  %v881_v63 = vsel %vm756_vm5, %v878_v37, %v880_v59 }
  0xbc   : > { %v479_v51 = vpop.f32.mrf.mxu2  ;;  %1859 = vmatmul.msk.bf16.gmra.mxu3 %vm333_vm2, %v1003_v61  ;;  %1865 = vmatmul.msk.bf16.gmra.mxu0 %vm333_vm2, %v1083_v48 }
  0xbd   : > { %v504_v52 = vadd.f32 %v479_v51, %v410_v21 }
  0xbe   : > { %v416_v53 = vpop.f32.mrf.mxu1 }
  0xbf   : > { %v618_v54 = vadd.f32 %v593_v32, %v504_v52  ;;  %v417_v55 = vadd.f32 %v416_v53, %v369_v1  ;;  %v598_v56 = vpop.f32.mrf.mxu3  ;;  %v1186_v32 = vmul.u32 52429, %v1182_v13 }
  0xc1   : > { %v722_v57 = vpop.f32.mrf.mxu0  ;;  %v2245_v58 = vadd.f32 %v715_v22, %v618_v54  ;;  %v1190_v37 = vshll.u32 %v1186_v32, 16 }
  0xc4   : > { %v481_v36 = vpop.f32.mrf.mxu2 }
  0xc5   : > { %v505_v60 = vadd.f32 %v481_v36, %v412_v31  ;;  %v1184_v31 = vmul.u32 52429, %v1181_v23 }
  0xc6   : > { %v419_v62 = vpop.f32.mrf.mxu1 }
  0xc7   : > { %v619_v29 = vadd.f32 %v595_v46, %v505_v60  ;;  %v420_v12 = vadd.f32 %v419_v62, %v2206_v0  ;;  %v600_v15 = vpop.f32.mrf.mxu3  ;;  %v2271_v46 = vadd.s32 8, %v2255_v19  ;;  %v2281_v60 = vadd.s32 16, %v2255_v19 }
  0xc9   : > { %1853 = vmatmul.msk.bf16.gmra.mxu2 %vm333_vm2, %v881_v63  ;;  %v725_v50 = vpop.f32.mrf.mxu0  ;;  %v2250_v3 = vadd.f32 %v717_v33, %v619_v29  ;;  %v1188_v33 = vshll.u32 %v1185_v27, 16  ;;  %v1210_v48 = vand.u32 65535, %v2271_v46 }
  0xcb   : > { %vm1192_vm8 = vc.u32 %v1184_v31, %v1188_v33  ;;  %v1194_v44 = vadd.s32 %v1188_v33, %v1184_v31  ;;  %v1213_v53 = vmul.u32 52429, %v1210_v48  ;;  %v1214_v30 = vmul.u32 52428, %v1210_v48 }
  0xcc   : > { %v484_v1 = vpop.f32.mrf.mxu2  ;;  %v1193_v43 = vsel %vm1192_vm8, 1, %v1952_v42  ;;  %v2296_v33 = vadd.s32 24, %v2255_v19 }
  0xcd   : > { %v506_v4 = vadd.f32 %v484_v1, %v415_v11  ;;  %v1195_v11 = vadd.s32 %v1193_v43, %v1187_v35  ;;  %vm1196_vm9 = vc.u32 %v1194_v44, %v1190_v37  ;;  %v1217_v59 = vshll.u32 %v1214_v30, 16 }
  0xce   : > { %v421_v5 = vpop.f32.mrf.mxu1  ;;  %v1239_v1 = vand.u32 65535, %v2281_v60 }
  0xcf   : > { %v620_v6 = vadd.f32 %v598_v56, %v506_v4  ;;  %v422_v7 = vadd.f32 %v421_v5, %v2217_v9  ;;  %v603_v8 = vpop.f32.mrf.mxu3  ;;  %vm1221_vm10 = vc.u32 %v1213_v53, %v1217_v59 }
  0xd0   : > { %v1222_v4 = vsel %vm1221_vm10, 1, %v1952_v42  ;;  %v1242_v23 = vmul.u32 52429, %v1239_v1 }
  0xd1   : > { %v727_v14 = vpop.f32.mrf.mxu0  ;;  %v2253_v16 = vadd.f32 %v720_v47, %v620_v6  ;;  %v1197_v47 = vsel %vm1196_vm9, 1, %v1952_v42 }
  0xd2   : > { %v1199_v51 = vadd.s32 %v1197_v47, %v1195_v11 }
  0xd4   : > { %v486_v17 = vpop.f32.mrf.mxu2 }
  0xd5   : > { %v507_v20 = vadd.f32 %v486_v17, %v417_v55  ;;  %v1240_v17 = vshrl.u32 %v2281_v60, 16 }
  0xd6   : > { %v424_v0 = vpop.f32.mrf.mxu1 }
  0xd7   : > { %v621_v21 = vadd.f32 %v600_v15, %v507_v20  ;;  %v2258_v41 = vadd.f32 %v424_v0, %v2228_v26  ;;  %v605_v22 = vpop.f32.mrf.mxu3  ;;  %v1200_v15 = vadd.s32 %v1199_v51, %v1189_v49  ;;  %v1243_v20 = vmul.u32 52428, %v1239_v1 }
  0xd8   : > { %v1244_v13 = vmul.u32 52429, %v1240_v17 }
  0xd9   : > { %v2261_v24 = vpop.f32.mrf.mxu0  ;;  %v2263_v9 = vadd.f32 %v722_v57, %v621_v21 }
  0xda   : > { %v1248_v37 = vshll.u32 %v1244_v13, 16 }
  0xdc   : > { %v489_v28 = vpop.f32.mrf.mxu2 }
  0xdd   : > { %v508_v34 = vadd.f32 %v489_v28, %v420_v12  ;;  %v1191_v12 = vshrl.u32 %v1186_v32, 16  ;;  %v1245_v32 = vmul.u32 52428, %v1240_v17 }
  0xde   : > { %v426_v10 = vpop.f32.mrf.mxu1 }
  0xdf   : > { %v622_v26 = vadd.f32 %v603_v8, %v508_v34  ;;  %v2267_v39 = vadd.f32 %v426_v10, %v2234_v38  ;;  %v608_v40 = vpop.f32.mrf.mxu3  ;;  %v1211_v38 = vshrl.u32 %v2271_v46, 16 }
  0xe1   : > { %v2273_v45 = vpop.f32.mrf.mxu0  ;;  %v2275_v61 = vadd.f32 %v725_v50, %v622_v26  ;;  %v1215_v54 = vmul.u32 52429, %v1211_v38  ;;  %v1216_v57 = vmul.u32 52428, %v1211_v38  ;;  %v1223_v50 = vadd.s32 %v1217_v59, %v1213_v53 }
  0xe2   : > { %v1247_v38 = vshrl.u32 %v1243_v20, 16  ;;  %v1249_v53 = vshrl.u32 %v1244_v13, 16 }
  0xe3   : > { %v1219_v36 = vshll.u32 %v1215_v54, 16  ;;  %v1224_v8 = vadd.s32 %v1222_v4, %v1216_v57  ;;  %v1220_v21 = vshrl.u32 %v1215_v54, 16 }
  0xe4   : > { %v491_v52 = vpop.f32.mrf.mxu2 }
  0xe5   : > { %v509_v55 = vadd.f32 %v491_v52, %v422_v7  ;;  %v1218_v7 = vshrl.u32 %v1214_v30, 16  ;;  %vm1225_vm11 = vc.u32 %v1223_v50, %v1219_v36  ;;  %v2314_v36 = vadd.s32 32, %v2255_v19 }
  0xe6   : > { %v429_v56 = vpop.f32.mrf.mxu1  ;;  %v1226_v18 = vsel %vm1225_vm11, 1, %v1952_v42 }
  0xe7   : > { %v623_v62 = vadd.f32 %v605_v22, %v509_v55  ;;  %v2284_v63 = vadd.f32 %v429_v56, %v2212_v2  ;;  %v610_v29 = vpop.f32.mrf.mxu3  ;;  %v1201_v2 = vadd.s32 %v1200_v15, %v1191_v12  ;;  %v1228_v22 = vadd.s32 %v1226_v18, %v1224_v8 }
  0xe9   : > { %v2288_v5 = vadd.f32 %v727_v14, %v623_v62  ;;  %v2290_v6 = vpop.f32.mrf.mxu0  ;;  %v1246_v14 = vshll.u32 %v1243_v20, 16  ;;  %v1229_v31 = vadd.s32 %v1228_v22, %v1218_v7  ;;  %v1202_v26 = vshrl.u32 %v1201_v2, 3 }
  0xea   : > { %v1297_v2 = vand.u32 65535, %v2314_v36  ;;  %v1298_v20 = vshrl.u32 %v2314_v36, 16 }
  0xeb   : > { %v1230_v43 = vadd.s32 %v1229_v31, %v1220_v21  ;;  %vm1250_vm12 = vc.u32 %v1242_v23, %v1246_v14  ;;  %v1252_v44 = vadd.s32 %v1246_v14, %v1242_v23  ;;  %v1203_v51 = vmul.u32 10, %v1202_v26 }
  0xec   : > { %v494_v0 = vpop.f32.mrf.mxu2  ;;  %v1251_v11 = vsel %vm1250_vm12, 1, %v1952_v42  ;;  %v1301_v31 = vmul.u32 52428, %v1297_v2  ;;  %vm1156_vm12 = vcmask 60416  }
  0xed   : > { %v510_v27 = vadd.f32 %v494_v0, %v2258_v41  ;;  %v1268_v41 = vand.u32 65535, %v2296_v33  ;;  %v1253_v48 = vadd.s32 %v1251_v11, %v1245_v32  ;;  %vm1254_vm13 = vc.u32 %v1252_v44, %v1248_v37 }
  0xee   : > { %v431_v28 = vpop.f32.mrf.mxu1  ;;  %v1231_v52 = vshrl.u32 %v1230_v43, 3  ;;  %v1255_v30 = vsel %vm1254_vm13, 1, %v1952_v42  ;;  %v2319_v4 = vsub.s32 %v2255_v19, %v1203_v51  ;;  %v1302_v37 = vmul.u32 52429, %v1298_v20 }
  0xef   : > { %v624_v34 = vadd.f32 %v608_v40, %v510_v27  ;;  %v2299_v10 = vadd.f32 %v431_v28, %v2222_v25  ;;  %v613_v35 = vpop.f32.mrf.mxu3  ;;  %v1269_v40 = vshrl.u32 %v2296_v33, 16  ;;  %v1257_v55 = vadd.s32 %v1255_v30, %v1253_v48 }
  0xf0   : > { %v1271_v56 = vmul.u32 52429, %v1268_v41  ;;  %v1272_v57 = vmul.u32 52428, %v1268_v41  ;;  %v1232_v7 = vmul.u32 10, %v1231_v52  ;;  %vm1468_vm0 = vcmp.ne.s32.totalorder %v2319_v4, 0 }
  0xf1   : > { %v2304_v47 = vadd.f32 %v2261_v24, %v624_v34  ;;  %v2307_v49 = vpop.f32.mrf.mxu0  ;;  %v1273_v59 = vmul.u32 52429, %v1269_v40  ;;  %v1258_v15 = vadd.s32 %v1257_v55, %v1247_v38  ;;  %v1274_v50 = vmul.u32 52428, %v1269_v40 }
  0xf2   : > { %v1275_v1 = vshll.u32 %v1272_v57, 16  ;;  %v1276_v0 = vshrl.u32 %v1272_v57, 16  ;;  %v2326_v23 = vsub.s32 %v2271_v46, %v1232_v7  ;;  %vm1478_vm1 = vcmp.lt.s32.totalorder %v2319_v4, 0 }
  0xf3   : > { %v1259_v8 = vadd.s32 %v1258_v15, %v1249_v53  ;;  %v1278_v14 = vshrl.u32 %v1273_v59, 16  ;;  %v1300_v34 = vmul.u32 52429, %v1297_v2  ;;  %v1303_v48 = vmul.u32 52428, %v1298_v20  ;;  %vm2343_vm3 = vmand %vm1478_vm1, %vm1468_vm0 }
  0xf4   : > { %v496_v25 = vpop.f32.mrf.mxu2  ;;  %vm1279_vm14 = vc.u32 %v1271_v56, %v1275_v1  ;;  %v1281_v17 = vadd.s32 %v1275_v1, %v1271_v56  ;;  %v1304_v38 = vshll.u32 %v1301_v31, 16  ;;  %v1306_v40 = vshll.u32 %v1302_v37, 16 }
  0xf5   : > { %v511_v54 = vadd.f32 %v496_v25, %v2267_v39  ;;  %v1277_v39 = vshll.u32 %v1273_v59, 16  ;;  %v1280_v18 = vsel %vm1279_vm14, 1, %v1952_v42  ;;  %vm1469_vm4 = vcmp.ne.s32.totalorder %v2326_v23, 0 }
  0xf6   : > { %v2311_v24 = vpop.f32.mrf.mxu1  ;;  %v1282_v21 = vadd.s32 %v1280_v18, %v1274_v50  ;;  %vm1479_vm5 = vcmp.lt.s32.totalorder %v2326_v23, 0  ;;  %vm1308_vm6 = vc.u32 %v1300_v34, %v1304_v38  ;;  %v1305_v57 = vshrl.u32 %v1301_v31, 16 }
  0xf7   : > { %v625_v62 = vadd.f32 %v610_v29, %v511_v54  ;;  %v2316_v12 = vpop.f32.mrf.mxu3  ;;  %v1260_v29 = vshrl.u32 %v1259_v8, 3  ;;  %vm1283_vm15 = vc.u32 %v1281_v17, %v1277_v39  ;;  %v1309_v30 = vsel %vm1308_vm6, 1, %v1952_v42  ;;  %vm2369_vm8 = vmand %vm1479_vm5, %vm1469_vm4 }
  0xf8   : > { %v1284_v13 = vsel %vm1283_vm15, 1, %v1952_v42  ;;  %v2357_v54 = vadd.s32 40, %v2255_v19  ;;  %v1311_v59 = vadd.s32 %v1309_v30, %v1303_v48  ;;  %v1307_v1 = vshrl.u32 %v1302_v37, 16 }
  0xf9   : > { %v1286_v28 = vadd.s32 %v1284_v13, %v1282_v21  ;;  %v2330_v32 = vpop.f32.mrf.mxu0  ;;  %v2334_v26 = vadd.f32 %v2273_v45, %v625_v62  ;;  %v1261_v46 = vmul.u32 10, %v1260_v29  ;;  %v1499_v62 = vadd.s32 10, %v2326_v23 }
  0xfa   : > { %v1326_v7 = vand.u32 65535, %v2357_v54  ;;  %v1327_v8 = vshrl.u32 %v2357_v54, 16  ;;  %v1953_v31 = vmov 0.0  }
  0xfb   : > { %v1287_v11 = vadd.s32 %v1286_v28, %v1276_v0  ;;  %v2353_v52 = vsub.s32 %v2281_v60, %v1261_v46 }
  0xfc   : > { %v499_v22 = vpop.f32.mrf.mxu2  ;;  %v1330_v20 = vmul.u32 52428, %v1326_v7  ;;  %v1329_v21 = vmul.u32 52429, %v1326_v7  ;;  %v1332_v37 = vmul.u32 52428, %v1327_v8 }
  0xfd   : > { %v512_v27 = vadd.f32 %v499_v22, %v2284_v63  ;;  %v1498_v63 = vadd.s32 10, %v2319_v4  ;;  %v1288_v45 = vadd.s32 %v1287_v11, %v1278_v14  ;;  %vm1470_vm9 = vcmp.ne.s32.totalorder %v2353_v52, 0 }
  0xfe   : > { %v2338_v41 = vpop.f32.mrf.mxu1  ;;  %vm1480_vm10 = vcmp.lt.s32.totalorder %v2353_v52, 0  ;;  %v1500_v29 = vadd.s32 10, %v2353_v52  ;;  %v2399_v14 = vmul.u32 52429, %v1327_v8  ;;  %v1333_v28 = vshll.u32 %v1330_v20, 16 }
  0xff   : > { %v626_v43 = vadd.f32 %v613_v35, %v512_v27  ;;  %v2336_v44 = vpop.f32.mrf.mxu3  ;;  %v1310_v35 = vadd.s32 %v1304_v38, %v1300_v34  ;;  %v1289_v53 = vshrl.u32 %v1288_v45, 3  ;;  %v1508_v56 = vsel %vm2343_vm3, %v1498_v63, %v2319_v4  ;;  %vm2395_vm13 = vmand %vm1480_vm10, %vm1470_vm9 }
 0x100   : > { %vm2380_vm11 = vcmp.lt.s32.totalorder %v1508_v56, 8  ;;  %vm1337_vm15 = vc.u32 %v1329_v21, %v1333_v28  ;;  %v1339_v38 = vadd.s32 %v1333_v28, %v1329_v21 }
 0x101   : > { %v2350_v51 = vadd.f32 %v2290_v6, %v626_v43  ;;  %vm1312_vm7 = vc.u32 %v1310_v35, %v1306_v40  ;;  %v1290_v60 = vmul.u32 10, %v1289_v53  ;;  %v2384_v2 = vpop.f32.mrf.mxu0  ;;  %v1866_v34 = vsel %vm2380_vm11, 1.0, %v1953_v31 }
 0x102   : > { %v1313_v15 = vsel %vm1312_vm7, 1, %v1952_v42  ;;  %v2410_v43 = vadd.s32 48, %v2255_v19  ;;  %v1334_v53 = vshrl.u32 %v1330_v20, 16  ;;  %v2463_v20 = vadd.s32 56, %v2255_v19 }
 0x103   : > { %v1315_v4 = vadd.s32 %v1313_v15, %v1311_v59  ;;  %v2391_v0 = vsub.s32 %v2296_v33, %v1290_v60  ;;  %v820_v33 = vadd.f32 %v2311_v24, %v2245_v58  ;;  %v1510_v58 = vsel %vm2395_vm13, %v1500_v29, %v2353_v52 }
 0x104   : > { %v501_v55 = vpop.f32.mrf.mxu2  ;;  %v1338_v24 = vsel %vm1337_vm15, 1, %v1952_v42  ;;  %v1355_v45 = vand.u32 65535, %v2410_v43  ;;  %v1356_v56 = vshrl.u32 %v2410_v43, 16  ;;  %v821_v59 = vadd.f32 %v2338_v41, %v2250_v3 }
 0x105   : > { %v513_v6 = vadd.f32 %v501_v55, %v2299_v10  ;;  %v1316_v18 = vadd.s32 %v1315_v4, %v1305_v57  ;;  %vm1471_vm0 = vcmp.ne.s32.totalorder %v2391_v0, 0  ;;  %v1340_v25 = vadd.s32 %v1338_v24, %v1332_v37 }
 0x106   : > { %v2393_v22 = vpop.f32.mrf.mxu1  ;;  %vm1481_vm1 = vcmp.lt.s32.totalorder %v2391_v0, 0  ;;  %v2431_v57 = vmul.u32 52428, %v1355_v45  ;;  %vm2436_vm4 = vcmp.lt.s32.totalorder %v1510_v58, 8  ;;  %v1358_v60 = vmul.u32 52429, %v1355_v45 }
 0x107   : > { %v627_v39 = vadd.f32 %v2316_v12, %v513_v6  ;;  %v2375_v10 = vpop.f32.mrf.mxu3  ;;  %v1509_v12 = vsel %vm2369_vm8, %v1499_v62, %v2326_v23  ;;  %v1317_v27 = vadd.s32 %v1316_v18, %v1307_v1  ;;  %v1360_v15 = vmul.u32 52429, %v1356_v56  ;;  %vm2451_vm7 = vmand %vm1481_vm1, %vm1471_vm0 }
 0x108   : > { %vm2412_vm14 = vcmp.lt.s32.totalorder %v1509_v12, 8  ;;  %v1501_v41 = vadd.s32 10, %v2391_v0  ;;  %v1336_v1 = vshrl.u32 %v2399_v14, 16  ;;  %v1362_v17 = vshll.u32 %v2431_v57, 16 }
 0x109   : > { %v2402_v23 = vadd.f32 %v2307_v49, %v627_v39  ;;  %v1318_v63 = vshrl.u32 %v1317_v27, 3  ;;  %v1335_v49 = vshll.u32 %v2399_v14, 16  ;;  %v1364_v18 = vshll.u32 %v1360_v15, 16 }
 0x10a   : > { %v1867_v29 = vsel %vm2412_vm14, 1.0, %v1953_v31  ;;  %v1361_v21 = vmul.u32 52428, %v1356_v56  ;;  %v1868_v27 = vsel %vm2436_vm4, 1.0, %v1953_v31  ;;  %vm1366_vm9 = vc.u32 %v1358_v60, %v1362_v17 }
 0x10b   : > { %v1319_v40 = vmul.u32 10, %v1318_v63  ;;  %vm1341_vm3 = vc.u32 %v1339_v38, %v1335_v49  ;;  %v1368_v14 = vadd.s32 %v1362_v17, %v1358_v60  ;;  %v822_v28 = vadd.f32 %v2393_v22, %v2253_v16 }
 0x10c   : > { %v909_v46 = vpop.f32.mrf.mxu2  ;;  %v1342_v55 = vsel %vm1341_vm3, 1, %v1952_v42  ;;  %v1511_v37 = vsel %vm2451_vm7, %v1501_v41, %v2391_v0  ;;  %v1384_v63 = vand.u32 65535, %v2463_v20  ;;  %v1385_v24 = vshrl.u32 %v2463_v20, 16 }
 0x10d   : > { %v934_v48 = vadd.f32 %v909_v46, %v820_v33  ;;  %v1320_v52 = vsub.s32 %v2314_v36, %v1319_v40  ;;  %v1344_v62 = vadd.s32 %v1342_v55, %v1340_v25  ;;  %v2445_v36 = vpop.f32.mrf.mxu0  ;;  %vm1370_vm10 = vc.u32 %v1368_v14, %v1364_v18 }
 0x10e   : > { %v802_v4 = vpop.f32.mrf.mxu1  ;;  %vm2486_vm11 = vcmp.lt.s32.totalorder %v1511_v37, 8  ;;  %v2491_v38 = vmul.u32 52428, %v1384_v63  ;;  %v1365_v45 = vshrl.u32 %v1360_v15, 16  ;;  %v2505_v41 = vadd.s32 64, %v2255_v19 }
 0x10f   : > { %v1056_v35 = vadd.f32 %v2336_v44, %v934_v48  ;;  %v2426_v30 = vpop.f32.mrf.mxu3  ;;  %vm1472_vm5 = vcmp.ne.s32.totalorder %v1320_v52, 0  ;;  %vm1482_vm6 = vcmp.lt.s32.totalorder %v1320_v52, 0  ;;  %v1502_v50 = vadd.s32 10, %v1320_v52 }
 0x110   : > { %vm2457_vm8 = vmand %vm1482_vm6, %vm1472_vm5  ;;  %v1345_v8 = vadd.s32 %v1344_v62, %v1334_v53  ;;  %v1363_v48 = vshrl.u32 %v2431_v57, 16  ;;  %v2498_v57 = vmul.u32 52429, %v1385_v24  ;;  %v1390_v18 = vmul.u32 52428, %v1385_v24 }
 0x111   : > { %v1136_v6 = vadd.f32 %v2330_v32, %v1056_v35  ;;  %v1512_v46 = vsel %vm2457_vm8, %v1502_v50, %v1320_v52  ;;  %v1391_v32 = vshll.u32 %v2491_v38, 16 }
 0x112   : > { %v1346_v11 = vadd.s32 %v1345_v8, %v1336_v1  ;;  %vm2494_vm13 = vcmp.lt.s32.totalorder %v1512_v46, 8 }
 0x113   : > { %v1146_v3 = vpack.c.bf16 %v1136_v6, %v1136_v6  ;;  %v1548_v13 = vmul.f32 %v1866_v34, %v1136_v6  ;;  %v1367_v34 = vsel %vm1366_vm9, 1, %v1952_v42 }
 0x114   : > { %v911_v7 = vpop.f32.mrf.mxu2  ;;  %v1369_v16 = vadd.s32 %v1367_v34, %v1361_v21  ;;  %v1347_v56 = vshrl.u32 %v1346_v11, 3 }
 0x115   : > { %1157 = vst.msk [vmem:[%s2443_s18] sm:$0xf] %vm1156_vm12, %v1146_v3  ;;  %v935_v12 = vadd.f32 %v911_v7, %v821_v59  ;;  %v1584_v22 = vmul.f32 %v1548_v13, %v1136_v6  ;;  %v1558_v35 = vsel %vm333_vm2, %v1548_v13, 0.0  ;;  %v1118_v52 = vpop.f32.mrf.mxu0  ;;  %v1387_v3 = vmul.u32 52429, %v1384_v63 }
 0x116   : > { %v805_v15 = vpop.f32.mrf.mxu1  ;;  %v1348_v17 = vmul.u32 10, %v1347_v56  ;;  %v1869_v13 = vsel %vm2486_vm11, 1.0, %v1953_v31 }
 0x117   : > { %v1057_v33 = vadd.f32 %v2375_v10, %v935_v12  ;;  %v1371_v10 = vsel %vm1370_vm10, 1, %v1952_v42  ;;  %v1038_v58 = vpop.f32.mrf.mxu3  ;;  %v1594_v50 = vsel %vm333_vm2, %v1584_v22, 0.0  ;;  %v1393_v12 = vshll.u32 %v2498_v57, 16 }
 0x118   : > { %vm1395_vm14 = vc.u32 %v1387_v3, %v1391_v32  ;;  %v2524_v34 = vsub.s32 %v2357_v54, %v1348_v17  ;;  %vm244_vm10 = vcmask 58368  }
 0x119   : > { %v1137_v49 = vadd.f32 %v2384_v2, %v1057_v33  ;;  %v1373_v2 = vadd.s32 %v1371_v10, %v1369_v16  ;;  %v1413_v33 = vand.u32 65535, %v2505_v41  ;;  %245 = vst.msk [vmem:[%s2597_s21] sm:$0x3] %vm244_vm10, %v1953_v31 }
 0x11a   : > { %vm1473_vm0 = vcmp.ne.s32.totalorder %v2524_v34, 0  ;;  %vm1483_vm1 = vcmp.lt.s32.totalorder %v2524_v34, 0 }
 0x11b   : > { %v1147_v40 = vpack.c.bf16 %v1137_v49, %v1137_v49  ;;  %v1549_v25 = vmul.f32 %v1867_v29, %v1137_v49  ;;  %v1374_v62 = vadd.s32 %v1373_v2, %v1363_v48  ;;  %v823_v29 = vadd.f32 %v802_v4, %v2263_v9  ;;  %vm2554_vm6 = vmand %vm1483_vm1, %vm1473_vm0 }
 0x11c   : > { %v914_v53 = vpop.f32.mrf.mxu2 }
 0x11d   : > { %1158 = vst.msk [vmem:[%s2443_s18 + $0x4] sm:$0xf] %vm1156_vm12, %v1147_v40  ;;  %v1559_v59 = vsel %vm333_vm2, %v1549_v25, 0.0  ;;  %v1585_v6 = vmul.f32 %v1549_v25, %v1137_v49  ;;  %v936_v44 = vadd.f32 %v914_v53, %v822_v28  ;;  %v1375_v39 = vadd.s32 %v1374_v62, %v1365_v45  ;;  %v1121_v0 = vpop.f32.mrf.mxu0 }
 0x11e   : > { %v1560_v60 = vadd.f32 %v1559_v59, %v1558_v35  ;;  %v1397_v28 = vadd.s32 %v1391_v32, %v1387_v3  ;;  %v1414_v49 = vshrl.u32 %v2505_v41, 16  ;;  %v1417_v40 = vmul.u32 52428, %v1413_v33  ;;  %v807_v56 = vpop.f32.mrf.mxu1 }
 0x11f   : > { %v1595_v1 = vsel %vm333_vm2, %v1585_v6, 0.0  ;;  %v1058_v7 = vadd.f32 %v2426_v30, %v936_v44  ;;  %v1376_v14 = vshrl.u32 %v1375_v39, 3  ;;  %v2519_v30 = vsel %vm2494_vm13, 1.0, %v1953_v31  ;;  %v1041_v11 = vpop.f32.mrf.mxu3 }
 0x120   : > { %v1596_v8 = vadd.f32 %v1595_v1, %v1594_v50  ;;  %vm1399_vm15 = vc.u32 %v1397_v28, %v1393_v12  ;;  %v2532_v25 = vmul.u32 52429, %v1414_v49  ;;  %v1416_v35 = vmul.u32 52429, %v1413_v33 }
 0x121   : > { %v1138_v21 = vadd.f32 %v2445_v36, %v1058_v7  ;;  %v1377_v9 = vmul.u32 10, %v1376_v14  ;;  %v1396_v36 = vsel %vm1395_vm14, 1, %v1952_v42  ;;  %v1400_v24 = vsel %vm1399_vm15, 1, %v1952_v42 }
 0x122   : > { %v1398_v63 = vadd.s32 %v1396_v36, %v1390_v18  ;;  %v824_v53 = vadd.f32 %v805_v15, %v2275_v61  ;;  %v1419_v44 = vmul.u32 52428, %v1414_v49  ;;  %v1420_v62 = vshll.u32 %v1417_v40, 16 }
 0x123   : > { %v1148_v37 = vpack.c.bf16 %v1138_v21, %v1138_v21  ;;  %v1550_v46 = vmul.f32 %v1868_v27, %v1138_v21  ;;  %v1392_v27 = vshrl.u32 %v2491_v38, 16  ;;  %v2536_v2 = vsub.s32 %v2410_v43, %v1377_v9 }
 0x124   : > { %v916_v4 = vpop.f32.mrf.mxu2  ;;  %v1394_v38 = vshrl.u32 %v2498_v57, 16  ;;  %v1402_v59 = vadd.s32 %v1400_v24, %v1398_v63  ;;  %vm1424_vm4 = vc.u32 %v1416_v35, %v1420_v62  ;;  %v1426_v32 = vadd.s32 %v1420_v62, %v1416_v35 }
 0x125   : > { %1159 = vst.msk [vmem:[%s2443_s18 + $0x8] sm:$0xf] %vm1156_vm12, %v1148_v37  ;;  %v1561_v48 = vsel %vm333_vm2, %v1550_v46, 0.0  ;;  %v1586_v16 = vmul.f32 %v1550_v46, %v1138_v21  ;;  %v937_v10 = vadd.f32 %v916_v4, %v823_v29  ;;  %vm1474_vm3 = vcmp.ne.s32.totalorder %v2536_v2, 0  ;;  %v1123_v37 = vpop.f32.mrf.mxu0 }
 0x126   : > { %v1562_v22 = vadd.f32 %v1561_v48, %v1560_v60  ;;  %v1403_v43 = vadd.s32 %v1402_v59, %v1392_v27  ;;  %v1422_v60 = vshll.u32 %v2532_v25, 16  ;;  %vm1484_vm5 = vcmp.lt.s32.totalorder %v2536_v2, 0 }
 0x127   : > { %v1597_v54 = vsel %vm333_vm2, %v1586_v16, 0.0  ;;  %v1059_v45 = vadd.f32 %v1038_v58, %v937_v10  ;;  %v1503_v58 = vadd.s32 10, %v2524_v34  ;;  %v1425_v15 = vsel %vm1424_vm4, 1, %v1952_v42  ;;  %v1043_v17 = vpop.f32.mrf.mxu3  ;;  %vm2578_vm8 = vmand %vm1484_vm5, %vm1474_vm3 }
 0x128   : > { %v1598_v55 = vadd.f32 %v1597_v54, %v1596_v8  ;;  %v1427_v39 = vadd.s32 %v1425_v15, %v1419_v44  ;;  %v1421_v12 = vshrl.u32 %v1417_v40, 16  ;;  %vm1428_vm7 = vc.u32 %v1426_v32, %v1422_v60 }
 0x129   : > { %v1139_v6 = vadd.f32 %v1118_v52, %v1059_v45  ;;  %v1404_v52 = vadd.s32 %v1403_v43, %v1394_v38  ;;  %v2559_v29 = vadd.s32 72, %v2255_v19  ;;  %v1429_v28 = vsel %vm1428_vm7, 1, %v1952_v42 }
 0x12a   : > { %v1423_v46 = vshrl.u32 %v2532_v25, 16  ;;  %v1431_v9 = vadd.s32 %v1429_v28, %v1427_v39  ;;  %v1513_v19 = vsel %vm2554_vm6, %v1503_v58, %v2524_v34  ;;  %v1504_v49 = vadd.s32 10, %v2536_v2 }
 0x12b   : > { %v1149_v3 = vpack.c.bf16 %v1139_v6, %v1139_v6  ;;  %v1551_v61 = vmul.f32 %v1869_v13, %v1139_v6  ;;  %v1405_v14 = vshrl.u32 %v1404_v52, 3  ;;  %v1442_v36 = vand.u32 65535, %v2559_v29 }
 0x12c   : > { %v919_v57 = vpop.f32.mrf.mxu2  ;;  %v1443_v63 = vshrl.u32 %v2559_v29, 16  ;;  %v1432_v48 = vadd.s32 %v1431_v9, %v1421_v12  ;;  %v825_v10 = vadd.f32 %v807_v56, %v2288_v5  ;;  %vm2583_vm9 = vcmp.lt.s32.totalorder %v1513_v19, 8 }
 0x12d   : > { %1160 = vst.msk [vmem:[%s2443_s18 + $0xc] sm:$0xf] %vm1156_vm12, %v1149_v3  ;;  %v1563_v50 = vsel %vm333_vm2, %v1551_v61, 0.0  ;;  %v1587_v1 = vmul.f32 %v1551_v61, %v1139_v6  ;;  %v938_v7 = vadd.f32 %v919_v57, %v824_v53  ;;  %v2570_v16 = vmul.u32 52428, %v1442_v36  ;;  %v1126_v57 = vpop.f32.mrf.mxu0 }
 0x12e   : > { %v1564_v8 = vadd.f32 %v1563_v50, %v1562_v22  ;;  %v1433_v25 = vadd.s32 %v1432_v48, %v1423_v46  ;;  %v1445_v5 = vmul.u32 52429, %v1442_v36  ;;  %v1447_v54 = vmul.u32 52429, %v1443_v63 }
 0x12f   : > { %v1599_v21 = vsel %vm333_vm2, %v1587_v1, 0.0  ;;  %v1060_v13 = vadd.f32 %v1041_v11, %v938_v7  ;;  %v810_v11 = vpop.f32.mrf.mxu1  ;;  %v1449_v53 = vshll.u32 %v2570_v16, 16  ;;  %v1514_v56 = vsel %vm2578_vm8, %v1504_v49, %v2536_v2  ;;  %v1046_v43 = vpop.f32.mrf.mxu3 }
 0x130   : > { %v1600_v33 = vadd.f32 %v1599_v21, %v1598_v55  ;;  %v1448_v44 = vmul.u32 52428, %v1443_v63  ;;  %v1871_v58 = vsel %vm2583_vm9, 1.0, %v1953_v31  ;;  %v1434_v60 = vshrl.u32 %v1433_v25, 3 }
 0x131   : > { %v1140_v4 = vadd.f32 %v1121_v0, %v1060_v13  ;;  %v1406_v0 = vmul.u32 10, %v1405_v14  ;;  %v1451_v3 = vshll.u32 %v1447_v54, 16  ;;  %vm1453_vm11 = vc.u32 %v1445_v5, %v1449_v53 }
 0x132   : > { %v826_v61 = vadd.f32 %v810_v11, %v2304_v47  ;;  %vm2607_vm13 = vcmp.lt.s32.totalorder %v1514_v56, 8  ;;  %v1454_v52 = vsel %vm1453_vm11, 1, %v1952_v42  ;;  %v1455_v15 = vadd.s32 %v1449_v53, %v1445_v5 }
 0x133   : > { %v1150_v27 = vpack.c.bf16 %v1140_v4, %v1140_v4  ;;  %v1552_v22 = vmul.f32 %v2519_v30, %v1140_v4  ;;  %v1407_v6 = vsub.s32 %v2463_v20, %v1406_v0  ;;  %v1456_v1 = vadd.s32 %v1454_v52, %v1448_v44 }
 0x134   : > { %v921_v24 = vpop.f32.mrf.mxu2  ;;  %vm1457_vm0 = vc.u32 %v1455_v15, %v1451_v3  ;;  %v1452_v28 = vshrl.u32 %v1447_v54, 16 }
 0x135   : > { %1161 = vst.msk [vmem:[%s2443_s18 + $0x10] sm:$0xf] %vm1156_vm12, %v1150_v27  ;;  %v1565_v30 = vsel %vm333_vm2, %v1552_v22, 0.0  ;;  %v1588_v45 = vmul.f32 %v1552_v22, %v1140_v4  ;;  %v939_v35 = vadd.f32 %v921_v24, %v825_v10  ;;  %vm1475_vm14 = vcmp.ne.s32.totalorder %v1407_v6, 0  ;;  %v1128_v22 = vpop.f32.mrf.mxu0 }
 0x136   : > { %v1566_v55 = vadd.f32 %v1565_v30, %v1564_v8  ;;  %vm1485_vm15 = vcmp.lt.s32.totalorder %v1407_v6, 0  ;;  %v1435_v8 = vmul.u32 10, %v1434_v60  ;;  %v1458_v21 = vsel %vm1457_vm0, 1, %v1952_v42 }
 0x137   : > { %v1601_v38 = vsel %vm333_vm2, %v1588_v45, 0.0  ;;  %v1061_v59 = vadd.f32 %v1043_v17, %v939_v35  ;;  %v812_v7 = vpop.f32.mrf.mxu1  ;;  %v1450_v17 = vshrl.u32 %v2570_v16, 16  ;;  %v1505_v14 = vadd.s32 10, %v1407_v6  ;;  %vm2620_vm1 = vmand %vm1485_vm15, %vm1475_vm14  ;;  %v1048_v11 = vpop.f32.mrf.mxu3 }
 0x138   : > { %v1602_v62 = vadd.f32 %v1601_v38, %v1600_v33  ;;  %v1460_v33 = vadd.s32 %v1458_v21, %v1456_v1  ;;  %v1872_v4 = vsel %vm2607_vm13, 1.0, %v1953_v31  ;;  %v1436_v42 = vsub.s32 %v2505_v41, %v1435_v8 }
 0x139   : > { %v1141_v2 = vadd.f32 %v1123_v37, %v1061_v59  ;;  %v1515_v49 = vsel %vm2620_vm1, %v1505_v14, %v1407_v6  ;;  %v827_v16 = vadd.f32 %v812_v7, %v2334_v26 }
 0x13a   : > { %v1461_v19 = vadd.s32 %v1460_v33, %v1450_v17  ;;  %vm1476_vm3 = vcmp.ne.s32.totalorder %v1436_v42, 0  ;;  %vm1486_vm4 = vcmp.lt.s32.totalorder %v1436_v42, 0  ;;  %vm1525_vm5 = vcmp.lt.s32.totalorder %v1515_v49, 8 }
 0x13b   : > { %v1151_v32 = vpack.c.bf16 %v1141_v2, %v1141_v2  ;;  %v1553_v50 = vmul.f32 %v1871_v58, %v1141_v2  ;;  %v1506_v54 = vadd.s32 10, %v1436_v42  ;;  %vm2635_vm6 = vmand %vm1486_vm4, %vm1476_vm3 }
 0x13c   : > { %v924_v39 = vpop.f32.mrf.mxu2  ;;  %v1462_v48 = vadd.s32 %v1461_v19, %v1452_v28 }
 0x13d   : > { %1162 = vst.msk [vmem:[%s2443_s18 + $0x14] sm:$0xf] %vm1156_vm12, %v1151_v32  ;;  %v1567_v47 = vsel %vm333_vm2, %v1553_v50, 0.0  ;;  %v1589_v18 = vmul.f32 %v1553_v50, %v1141_v2  ;;  %v940_v12 = vadd.f32 %v924_v39, %v826_v61  ;;  %v1516_v59 = vsel %vm2635_vm6, %v1506_v54, %v1436_v42  ;;  %v1131_v61 = vpop.f32.mrf.mxu0 }
 0x13e   : > { %v1568_v13 = vadd.f32 %v1567_v47, %v1566_v55  ;;  %v1463_v0 = vshrl.u32 %v1462_v48, 3  ;;  %v1873_v55 = vsel %vm1525_vm5, 1.0, %v1953_v31  ;;  %vm1526_vm9 = vcmp.lt.s32.totalorder %v1516_v59, 8 }
 0x13f   : > { %v1603_v37 = vsel %vm333_vm2, %v1589_v18, 0.0  ;;  %v1062_v46 = vadd.f32 %v1046_v43, %v940_v12  ;;  %v815_v25 = vpop.f32.mrf.mxu1  ;;  %v1051_v58 = vpop.f32.mrf.mxu3  ;;  %v1874_v32 = vsel %vm1526_vm9, 1.0, %v1953_v31 }
 0x140   : > { %v1604_v36 = vadd.f32 %v1603_v37, %v1602_v62  ;;  %v1464_v30 = vmul.u32 10, %v1463_v0  ;;  %v828_v6 = vadd.f32 %v815_v25, %v2350_v51  ;;  %v1624_v25 = vld [vmem:[%s2597_s21 + $0x1] sm:$0x1] }
 0x141   : > { %v1142_v63 = vadd.f32 %v1126_v57, %v1062_v46 }
 0x142   : > { %v1465_v56 = vsub.s32 %v2559_v29, %v1464_v30 }
 0x143   : > { %v1152_v10 = vpack.c.bf16 %v1142_v63, %v1142_v63  ;;  %v1554_v27 = vmul.f32 %v1872_v4, %v1142_v63 }
 0x144   : > { %v926_v34 = vpop.f32.mrf.mxu2  ;;  %vm1477_vm7 = vcmp.ne.s32.totalorder %v1465_v56, 0  ;;  %vm1487_vm8 = vcmp.lt.s32.totalorder %v1465_v56, 0  ;;  %v1507_v57 = vadd.s32 10, %v1465_v56 }
 0x145   : > { %1163 = vst.msk [vmem:[%s2443_s18 + $0x18] sm:$0xf] %vm1156_vm12, %v1152_v10  ;;  %v1569_v41 = vsel %vm333_vm2, %v1554_v27, 0.0  ;;  %v1590_v24 = vmul.f32 %v1554_v27, %v1142_v63  ;;  %v941_v40 = vadd.f32 %v926_v34, %v827_v16  ;;  %vm1497_vm10 = vmand %vm1487_vm8, %vm1477_vm7  ;;  %v1133_v37 = vpop.f32.mrf.mxu0 }
 0x146   : > { %v1570_v5 = vadd.f32 %v1569_v41, %v1568_v13  ;;  %v1517_v1 = vsel %vm1497_vm10, %v1507_v57, %v1465_v56  ;;  %v1620_v41 = vld [vmem:[%s2597_s21] sm:$0x1] }
 0x147   : > { %v1605_v26 = vsel %vm333_vm2, %v1590_v24, 0.0  ;;  %v1063_v45 = vadd.f32 %v1048_v11, %v941_v40  ;;  %v817_v52 = vpop.f32.mrf.mxu1  ;;  %vm1527_vm11 = vcmp.lt.s32.totalorder %v1517_v1, 8  ;;  %v1053_v13 = vpop.f32.mrf.mxu3 }
 0x148   : > { %v1606_v53 = vadd.f32 %v1605_v26, %v1604_v36  ;;  %v829_v7 = vadd.f32 %v817_v52, %v2402_v23  ;;  %v1875_v23 = vsel %vm1527_vm11, 1.0, %v1953_v31 }
 0x149   : > { %v1143_v38 = vadd.f32 %v1128_v22, %v1063_v45 }
 0x14b   : > { %v1153_v44 = vpack.c.bf16 %v1143_v38, %v1143_v38  ;;  %v1555_v62 = vmul.f32 %v1873_v55, %v1143_v38 }
 0x14c   : > { %v929_v43 = vpop.f32.mrf.mxu2 }
 0x14d   : > { %1164 = vst.msk [vmem:[%s2443_s18 + $0x1c] sm:$0xf] %vm1156_vm12, %v1153_v44  ;;  %v1571_v60 = vsel %vm333_vm2, %v1555_v62, 0.0  ;;  %v1591_v2 = vmul.f32 %v1555_v62, %v1143_v38  ;;  %v942_v3 = vadd.f32 %v929_v43, %v828_v6 }
 0x14e   : > { %v1572_v29 = vadd.f32 %v1571_v60, %v1570_v5 }
 0x14f   : > { %v1607_v20 = vsel %vm333_vm2, %v1591_v2, 0.0  ;;  %v1064_v51 = vadd.f32 %v1051_v58, %v942_v3 }
 0x150   : > { %v1608_v15 = vadd.f32 %v1607_v20, %v1606_v53 }
 0x151   : > { %v1144_v50 = vadd.f32 %v1131_v61, %v1064_v51 }
 0x153   : > { %v1154_v39 = vpack.c.bf16 %v1144_v50, %v1144_v50  ;;  %v1556_v8 = vmul.f32 %v1874_v32, %v1144_v50 }
 0x154   : > { %v931_v17 = vpop.f32.mrf.mxu2 }
 0x155   : > { %1165 = vst.msk [vmem:[%s2443_s18 + $0x20] sm:$0xf] %vm1156_vm12, %v1154_v39  ;;  %v1573_v47 = vsel %vm333_vm2, %v1556_v8, 0.0  ;;  %v1592_v18 = vmul.f32 %v1556_v8, %v1144_v50  ;;  %v943_v12 = vadd.f32 %v931_v17, %v829_v7 }
 0x156   : > { %v1574_v21 = vadd.f32 %v1573_v47, %v1572_v29 }
 0x157   : > { %v1609_v14 = vsel %vm333_vm2, %v1592_v18, 0.0  ;;  %v1065_v28 = vadd.f32 %v1053_v13, %v943_v12 }
 0x158   : > { %v1610_v33 = vadd.f32 %v1609_v14, %v1608_v15 }
 0x159   : > { %v1145_v46 = vadd.f32 %v1133_v37, %v1065_v28 }
 0x15b   : > { %v1155_v9 = vpack.c.bf16 %v1145_v46, %v1145_v46  ;;  %v1557_v36 = vmul.f32 %v1875_v23, %v1145_v46 }
 0x15d   : > { %1166 = vst.msk [vmem:[%s2443_s18 + $0x24] sm:$0xf] %vm1156_vm12, %v1155_v9  ;;  %v1575_v4 = vsel %vm333_vm2, %v1557_v36, 0.0  ;;  %v1593_v42 = vmul.f32 %v1557_v36, %v1145_v46  ;;  %vm1622_vm12 = vcmask 57344  }
 0x15e   : > { %v1576_v19 = vadd.f32 %v1575_v4, %v1574_v21 }
 0x15f   : > { %v1611_v63 = vsel %vm333_vm2, %v1593_v42, 0.0 }
 0x160   : > { %v1577_v11 = vrot.slane %v1576_v19, 4  ;;  %v1612_v49 = vadd.f32 %v1611_v63, %v1610_v33 }
 0x162   : > { %v1578_v48 = vadd.f32 %v1577_v11, %v1576_v19  ;;  %v1613_v16 = vrot.slane %v1612_v49, 4 }
 0x164   : > { %v1579_v31 = vrot.slane %v1578_v48, 2  ;;  %v1614_v10 = vadd.f32 %v1613_v16, %v1612_v49 }
 0x166   : > { %v1580_v27 = vadd.f32 %v1579_v31, %v1578_v48  ;;  %v1615_v22 = vrot.slane %v1614_v10, 2 }
 0x168   : > { %v1581_v34 = vrot.slane %v1580_v27, 1  ;;  %v1616_v0 = vadd.f32 %v1615_v22, %v1614_v10 }
 0x16a   : > { %v1582_v24 = vadd.f32 %v1581_v34, %v1580_v27  ;;  %v1617_v40 = vrot.slane %v1616_v0, 1 }
 0x16c   : > { %v1618_v5 = vadd.f32 %v1617_v40, %v1616_v0  ;;  %v1621_v54 = vadd.f32 %v1620_v41, %v1582_v24 }
 0x16e   : > { %1623 = vst.msk [vmem:[%s2597_s21] sm:$0x1] %vm1622_vm12, %v1621_v54  ;;  %v1625_v30 = vadd.f32 %v1624_v25, %v1618_v5 }
 0x170   : > { %1626 = vst.msk [vmem:[%s2597_s21 + $0x1] sm:$0x1] %vm1622_vm12, %v1625_v30 }
 0x171 PF: > { %s14_s14 = sadd.s32 1, %s1950_s14   ;;  %s2708_s12 = smov %s1946_s13 }
 0x172   : > { %p11_p5 = scmp.ge.s32.totalorder %s14_s14, 4   ;;  %s2709_s13 = smov %s2711_s15 }
 0x174   :  { %13 = sbr.rel (!%p11_p5) target bundleno = 2 (0x2), region = 82 }

// kernel: _lambda_.11
= control target key start
LH: loop header
LB: loop body
LE: loop exit
PB: predicated region body
PF: predicated region fallthrough
CT: control target
= control target key end

     0   :  { %vm19_vm0 = vcmask 123904   ;;  %s295_s22 = smov 16   ;;  %s296_s7 = smov 112   ;;  %s618_s0 = inlined_call_operand.vmem [shape: f32[2,2,16], index: 0, kind: input, shape index: {}]   ;;  %s619_s1 = inlined_call_operand.vmem [shape: f32[1,16], index: 1, kind: input, shape index: {}]   ;;  %s620_s2 = inlined_call_operand.vmem [shape: f32[1,16], index: 2, kind: input, shape index: {}]   ;;  %s621_s3 = inlined_call_operand.vmem [shape: bf16[16,5,32], index: 3, kind: input, shape index: {}]   ;;  %s622_s4 = inlined_call_operand.vmem [shape: bf16[8,4,16], index: 4, kind: output, shape index: {}]  }
   0x1   :  { %v17_v0 = vld [vmem:[%s618_s0] sm:$0x3]  ;;  %v18_v1 = vld [vmem:[%s618_s0 + $0x2] sm:$0x3]  ;;  %v347_v27 = vld [vmem:[%s621_s3 + $0x10] sm:$0x3] }
   0x2   :  { %v20_v2 = vsel %vm19_vm0, %v17_v0, 0.0  ;;  %v21_v3 = vsel %vm19_vm0, %v18_v1, 0.0  ;;  %v30_v18 = vld [vmem:[%s619_s1] sm:$0x1]  ;;  %v352_v28 = vld [vmem:[%s621_s3 + $0x8] sm:$0x3]  ;;  %v71_v30 = vunpack.c.l.bf16 %v347_v27 }
   0x3   :  { %v22_v4 = vadd.f32 %v21_v3, %v20_v2  ;;  %v48_v21 = vld [vmem:[%s620_s2] sm:$0x1]  ;;  %v69_v31 = vunpack.c.l.bf16 %v352_v28  ;;  %v376_v37 = vld [vmem:[%s621_s3 + $0x1c] sm:$0x3]  ;;  %v381_v38 = vld [vmem:[%s621_s3 + $0xc] sm:$0x3] }
   0x4   :  { %v357_v29 = vld [vmem:[%s621_s3] sm:$0x3]  ;;  %v389_v42 = vld [vmem:[%s621_s3 + $0x4] sm:$0x3]  ;;  %v74_v43 = vunpack.c.l.bf16 %v376_v37  ;;  %v70_v44 = vunpack.c.l.bf16 %v381_v38  ;;  %v409_v49 = vld [vmem:[%s621_s3 + $0x28] sm:$0x3] }
   0x5   :  { %v23_v5 = vmul.f32 0.0078125, %v22_v4  ;;  %v67_v32 = vunpack.c.l.bf16 %v357_v29  ;;  %v68_v45 = vunpack.c.l.bf16 %v389_v42  ;;  %v414_v50 = vld [vmem:[%s621_s3 + $0x18] sm:$0x3]  ;;  %v421_v53 = vld [vmem:[%s621_s3 + $0x14] sm:$0x3]  ;;  %v77_v55 = vunpack.c.l.bf16 %v409_v49 }
   0x6   :  { %v73_v56 = vunpack.c.l.bf16 %v414_v50  ;;  %v72_v57 = vunpack.c.l.bf16 %v421_v53  ;;  %v442_v61 = vld [vmem:[%s621_s3 + $0x34] sm:$0x3]  ;;  %v447_v62 = vld [vmem:[%s621_s3 + $0x24] sm:$0x3]  ;;  %v454_v1 = vld [vmem:[%s621_s3 + $0x20] sm:$0x3] }
   0x7   :  { %v24_v6 = vmul.f32 %v23_v5, %v23_v5  ;;  %v80_v3 = vunpack.c.l.bf16 %v442_v61  ;;  %v76_v4 = vunpack.c.l.bf16 %v447_v62 }
   0x9   :  { %v26_v7 = vrot.slane %v24_v6, 7 }
   0xb   :  { %v28_v8 = vsub.f32 %v23_v5, %v26_v7 }
   0xd   :  { %v29_v9 = vmax.f32 %v28_v8, 0.0 }
   0xf   :  { %v31_v10 = vadd.f32 1e-05, %v29_v9  ;;  %v475_v9 = vld [vmem:[%s621_s3 + $0x30] sm:$0x3] }
  0x11   :  { %293 = vrsqrt.f32 %v31_v10  ;;  %vm38_vm1 = vweird.f32 %v31_v10 }
  0x17   :  { %v294_v11 = vpop.eup %293 }
  0x18   :  { %v33_v12 = vmul.f32 %v294_v11, %v31_v10  ;;  %vm39_vm2 = vweird.f32 %v294_v11 }
  0x19   :  { %vm40_vm3 = vmor %vm38_vm1, %vm39_vm2 }
  0x1a   :  { %v34_v13 = vmul.f32 %v294_v11, %v33_v12  ;;  %v482_v12 = vld [vmem:[%s621_s3 + $0x2c] sm:$0x3] }
  0x1c   :  { %v35_v14 = vmul.f32 0.5, %v34_v13 }
  0x1e   :  { %v36_v15 = vsub.f32 1.5, %v35_v14  ;;  %v79_v14 = vunpack.c.l.bf16 %v475_v9 }
  0x20   :  { %v37_v16 = vmul.f32 %v294_v11, %v36_v15  ;;  %v78_v15 = vunpack.c.l.bf16 %v482_v12 }
  0x22   :  { %v41_v17 = vsel %vm40_vm3, %v294_v11, %v37_v16 }
  0x23   :  { %43 = vst [vmem:[#allocation1] sm:$0xff] %v41_v17 }
  0x2a   :  { %v45_v19 = vld [vmem:[#allocation1 + $0x1] ss:$9 sm:$0xff] }
  0x2b   :  { %v47_v20 = vmul.f32 %v45_v19, %v30_v18  ;;  %v499_v18 = vld [vmem:[%s621_s3 + $0x3c] sm:$0x3] }
  0x2d   :  { %v336_v22 = vperm.slane %v47_v20, 0  ;;  %v49_v23 = vmul.f32 %v47_v20, %v23_v5  ;;  %v75_v5 = vunpack.c.l.bf16 %v454_v1  ;;  %v505_v20 = vld [vmem:[%s621_s3 + $0x38] sm:$0x3] }
  0x2f   :  { %121 = vrot.lane.b32.xlu0 %v336_v22, %s295_s22  ;;  %v50_v24 = vsub.f32 %v48_v21, %v49_v23  ;;  %v82_v23 = vunpack.c.l.bf16 %v499_v18  ;;  %v90_v29 = vmul.f32 %v336_v22, %v71_v30  ;;  %v98_v53 = vmul.f32 %v336_v22, %v79_v14 }
  0x30   :  { %v94_v9 = vmul.f32 %v336_v22, %v75_v5 }
  0x31   :  { %v339_v25 = vperm.slane %v50_v24, 0  ;;  %v81_v24 = vunpack.c.l.bf16 %v505_v20 }
  0x33   :  { %v117_v62 = vadd.f32 %v339_v25, %v98_v53 }
  0x37   :  { %140 = vrot.lane.b32.xlu0 %v339_v25, %s295_s22 }
  0xa1   :  { %v342_v26 = vpop.permute.xlu0 %121 }
  0xa2   :  { %v128_v33 = vmul.f32 %v342_v26, %v71_v30  ;;  %v126_v34 = vmul.f32 %v342_v26, %v69_v31  ;;  %v124_v35 = vmul.f32 %v342_v26, %v67_v32  ;;  %v131_v46 = vmul.f32 %v342_v26, %v74_v43 }
  0xa3   :  { %v127_v47 = vmul.f32 %v342_v26, %v70_v44  ;;  %v125_v48 = vmul.f32 %v342_v26, %v68_v45  ;;  %v134_v58 = vmul.f32 %v342_v26, %v77_v55  ;;  %v130_v59 = vmul.f32 %v342_v26, %v73_v56 }
  0xa4   :  { %v129_v60 = vmul.f32 %v342_v26, %v72_v57  ;;  %v137_v6 = vmul.f32 %v342_v26, %v80_v3  ;;  %v133_v7 = vmul.f32 %v342_v26, %v76_v4  ;;  %v132_v8 = vmul.f32 %v342_v26, %v75_v5 }
  0xa5   :  { %v136_v16 = vmul.f32 %v342_v26, %v79_v14  ;;  %v135_v17 = vmul.f32 %v342_v26, %v78_v15 }
  0xa9   :  { %v371_v36 = vpop.permute.xlu0 %140 }
  0xaa   :  { %v147_v39 = vadd.f32 %v371_v36, %v128_v33  ;;  %v145_v40 = vadd.f32 %v371_v36, %v126_v34  ;;  %v143_v41 = vadd.f32 %v371_v36, %v124_v35  ;;  %v150_v51 = vadd.f32 %v371_v36, %v131_v46 }
  0xab   :  { %v146_v52 = vadd.f32 %v371_v36, %v127_v47  ;;  %v144_v54 = vadd.f32 %v371_v36, %v125_v48  ;;  %v153_v63 = vadd.f32 %v371_v36, %v134_v58  ;;  %v149_v0 = vadd.f32 %v371_v36, %v130_v59 }
  0xac   :  { %183 = vrot.lane.b32.xlu0 %v147_v39, %s296_s7  ;;  %179 = vrot.lane.b32.xlu2 %v145_v40, %s296_s7  ;;  %v148_v2 = vadd.f32 %v371_v36, %v129_v60  ;;  %v156_v10 = vadd.f32 %v371_v36, %v137_v6  ;;  %v152_v11 = vadd.f32 %v371_v36, %v133_v7 }
  0xad   :  { %175 = vrot.lane.b32.xlu1 %v143_v41, %s296_s7  ;;  %v151_v13 = vadd.f32 %v371_v36, %v132_v8  ;;  %v155_v19 = vadd.f32 %v371_v36, %v136_v16  ;;  %v154_v21 = vadd.f32 %v371_v36, %v135_v17  ;;  %v139_v33 = vmul.f32 %v342_v26, %v82_v23 }
  0xae   :  { %v138_v34 = vmul.f32 %v342_v26, %v81_v24  ;;  %v88_v41 = vmul.f32 %v336_v22, %v69_v31  ;;  %v89_v46 = vmul.f32 %v336_v22, %v70_v44  ;;  %v92_v31 = vmul.f32 %v336_v22, %v73_v56 }
  0xaf   :  { %v158_v35 = vadd.f32 %v371_v36, %v139_v33  ;;  %v93_v44 = vmul.f32 %v336_v22, %v74_v43  ;;  %v109_v17 = vadd.f32 %v339_v25, %v90_v29 }
  0xb0   :  { %v157_v39 = vadd.f32 %v371_v36, %v138_v34  ;;  %v107_v47 = vadd.f32 %v339_v25, %v88_v41  ;;  %v108_v26 = vadd.f32 %v339_v25, %v89_v46  ;;  %v95_v41 = vmul.f32 %v336_v22, %v76_v4 }
  0xb1   :  { %v112_v50 = vadd.f32 %v339_v25, %v93_v44 }
  0xb2   :  { %v114_v4 = vadd.f32 %v339_v25, %v95_v41 }
  0xb4   :  { %189 = vrot.lane.b32.xlu0 %v150_v51, %s296_s7  ;;  %181 = vrot.lane.b32.xlu2 %v146_v52, %s296_s7 }
  0xb5   :  { %177 = vrot.lane.b32.xlu1 %v144_v54, %s296_s7 }
  0xbc   :  { %195 = vrot.lane.b32.xlu0 %v153_v63, %s296_s7  ;;  %187 = vrot.lane.b32.xlu2 %v149_v0, %s296_s7  ;;  %v86_v63 = vmul.f32 %v336_v22, %v67_v32  ;;  %v87_v0 = vmul.f32 %v336_v22, %v68_v45  ;;  %v91_v45 = vmul.f32 %v336_v22, %v72_v57 }
  0xbd   :  { %185 = vrot.lane.b32.xlu1 %v148_v2, %s296_s7  ;;  %v111_v2 = vadd.f32 %v339_v25, %v92_v31 }
  0xbe   :  { %v105_v56 = vadd.f32 %v339_v25, %v86_v63  ;;  %v106_v6 = vadd.f32 %v339_v25, %v87_v0 }
  0xc4   :  { %201 = vrot.lane.b32.xlu0 %v156_v10, %s296_s7  ;;  %193 = vrot.lane.b32.xlu2 %v152_v11, %s296_s7 }
  0xc5   :  { %191 = vrot.lane.b32.xlu1 %v151_v13, %s296_s7 }
  0xcc   :  { %199 = vrot.lane.b32.xlu2 %v155_v19, %s296_s7 }
  0xcd   :  { %197 = vrot.lane.b32.xlu1 %v154_v21, %s296_s7  ;;  %v110_v21 = vadd.f32 %v339_v25, %v91_v45 }
  0xd4   :  { %205 = vrot.lane.b32.xlu2 %v158_v35, %s296_s7 }
  0xd5   :  { %203 = vrot.lane.b32.xlu1 %v157_v39, %s296_s7  ;;  %v99_v39 = vmul.f32 %v336_v22, %v80_v3 }
  0xd7   :  { %v118_v3 = vadd.f32 %v339_v25, %v99_v39 }
 0x106   :  { %v180_v40 = vpop.permute.xlu2 %179 }
 0x107   :  { %v225_v51 = vmax.f32 %v107_v47, %v180_v40 }
 0x10e   :  { %v182_v48 = vpop.permute.xlu2 %181 }
 0x10f   :  { %v226_v36 = vmax.f32 %v108_v26, %v182_v48  ;;  %v113_v26 = vadd.f32 %v339_v25, %v94_v9 }
 0x111   :  { %v240_v52 = vmax.f32 %v225_v51, %v226_v36 }
 0x113   :  { %vm248_vm4 = vcmp.gt.f32.partialorder %v240_v52, 0.0  ;;  %v256_v54 = vmul.f32 0.1, %v240_v52 }
 0x115   :  { %v264_v58 = vsel %vm248_vm4, %v240_v52, %v256_v54 }
 0x116   :  { %v272_v59 = vpack.c.bf16 %v264_v58, %v264_v58  ;;  %v188_v60 = vpop.permute.xlu2 %187  ;;  %v96_v58 = vmul.f32 %v336_v22, %v77_v55 }
 0x117   :  { %v229_v7 = vmax.f32 %v111_v2, %v188_v60 }
 0x118   :  { %280 = vst.msk [vmem:[%s622_s4 + $0x2] sm:$0x3] %vm19_vm0, %v272_v59  ;;  %v115_v60 = vadd.f32 %v339_v25, %v96_v58 }
 0x11e   :  { %v184_v28 = vpop.permute.xlu0 %183  ;;  %v194_v11 = vpop.permute.xlu2 %193 }
 0x11f   :  { %v176_v38 = vpop.permute.xlu1 %175  ;;  %v227_v40 = vmax.f32 %v109_v17, %v184_v28  ;;  %v232_v54 = vmax.f32 %v114_v4, %v194_v11  ;;  %v97_v28 = vmul.f32 %v336_v22, %v78_v15 }
 0x120   :  { %v223_v32 = vmax.f32 %v105_v56, %v176_v38  ;;  %v101_v56 = vmul.f32 %v336_v22, %v82_v23 }
 0x121   :  { %v116_v55 = vadd.f32 %v339_v25, %v97_v28 }
 0x122   :  { %v120_v18 = vadd.f32 %v339_v25, %v101_v56 }
 0x126   :  { %v190_v37 = vpop.permute.xlu0 %189  ;;  %v200_v14 = vpop.permute.xlu2 %199 }
 0x127   :  { %v230_v43 = vmax.f32 %v112_v50, %v190_v37  ;;  %v178_v8 = vpop.permute.xlu1 %177  ;;  %v235_v5 = vmax.f32 %v117_v62, %v200_v14  ;;  %v100_v37 = vmul.f32 %v336_v22, %v81_v24 }
 0x128   :  { %v224_v42 = vmax.f32 %v106_v6, %v178_v8 }
 0x129   :  { %v242_v10 = vmax.f32 %v229_v7, %v230_v43  ;;  %v119_v43 = vadd.f32 %v339_v25, %v100_v37 }
 0x12a   :  { %v239_v13 = vmax.f32 %v223_v32, %v224_v42 }
 0x12b   :  { %vm250_vm5 = vcmp.gt.f32.partialorder %v242_v10, 0.0  ;;  %v258_v16 = vmul.f32 0.1, %v242_v10 }
 0x12c   :  { %vm247_vm6 = vcmp.gt.f32.partialorder %v239_v13, 0.0  ;;  %v255_v19 = vmul.f32 0.1, %v239_v13 }
 0x12d   :  { %v266_v27 = vsel %vm250_vm5, %v242_v10, %v258_v16 }
 0x12e   :  { %v274_v33 = vpack.c.bf16 %v266_v27, %v266_v27  ;;  %v263_v30 = vsel %vm247_vm6, %v239_v13, %v255_v19  ;;  %v196_v34 = vpop.permute.xlu0 %195  ;;  %v206_v8 = vpop.permute.xlu2 %205 }
 0x12f   :  { %v271_v57 = vpack.c.bf16 %v263_v30, %v263_v30  ;;  %v186_v35 = vpop.permute.xlu1 %185  ;;  %v233_v50 = vmax.f32 %v115_v60, %v196_v34  ;;  %v238_v45 = vmax.f32 %v120_v18, %v206_v8 }
 0x130   :  { %282 = vst.msk [vmem:[%s622_s4 + $0x6] sm:$0x3] %vm19_vm0, %v274_v33  ;;  %v228_v46 = vmax.f32 %v110_v21, %v186_v35 }
 0x131   :  { %279 = vst.msk [vmem:[%s622_s4] sm:$0x3] %vm19_vm0, %v271_v57 }
 0x132   :  { %v241_v61 = vmax.f32 %v227_v40, %v228_v46 }
 0x134   :  { %vm249_vm7 = vcmp.gt.f32.partialorder %v241_v61, 0.0  ;;  %v257_v47 = vmul.f32 0.1, %v241_v61 }
 0x136   :  { %v265_v1 = vsel %vm249_vm7, %v241_v61, %v257_v47  ;;  %v202_v48 = vpop.permute.xlu0 %201 }
 0x137   :  { %v273_v51 = vpack.c.bf16 %v265_v1, %v265_v1  ;;  %v236_v36 = vmax.f32 %v118_v3, %v202_v48  ;;  %v192_v52 = vpop.permute.xlu1 %191 }
 0x138   :  { %v231_v59 = vmax.f32 %v113_v26, %v192_v52 }
 0x139   :  { %281 = vst.msk [vmem:[%s622_s4 + $0x4] sm:$0x3] %vm19_vm0, %v273_v51  ;;  %v245_v31 = vmax.f32 %v235_v5, %v236_v36 }
 0x13a   :  { %v243_v38 = vmax.f32 %v231_v59, %v232_v54 }
 0x13b   :  { %vm253_vm8 = vcmp.gt.f32.partialorder %v245_v31, 0.0  ;;  %v261_v44 = vmul.f32 0.1, %v245_v31 }
 0x13c   :  { %vm251_vm9 = vcmp.gt.f32.partialorder %v243_v38, 0.0  ;;  %v259_v49 = vmul.f32 0.1, %v243_v38 }
 0x13d   :  { %v269_v63 = vsel %vm253_vm8, %v245_v31, %v261_v44 }
 0x13e   :  { %v277_v0 = vpack.c.bf16 %v269_v63, %v269_v63  ;;  %v267_v12 = vsel %vm251_vm9, %v243_v38, %v259_v49 }
 0x13f   :  { %v275_v2 = vpack.c.bf16 %v267_v12, %v267_v12  ;;  %v198_v15 = vpop.permute.xlu1 %197 }
 0x140   :  { %285 = vst.msk [vmem:[%s622_s4 + $0xc] sm:$0x3] %vm19_vm0, %v277_v0  ;;  %v234_v6 = vmax.f32 %v116_v55, %v198_v15 }
 0x141   :  { %283 = vst.msk [vmem:[%s622_s4 + $0x8] sm:$0x3] %vm19_vm0, %v275_v2 }
 0x142   :  { %v244_v7 = vmax.f32 %v233_v50, %v234_v6 }
 0x144   :  { %vm252_vm10 = vcmp.gt.f32.partialorder %v244_v7, 0.0  ;;  %v260_v23 = vmul.f32 0.1, %v244_v7 }
 0x146   :  { %v268_v29 = vsel %vm252_vm10, %v244_v7, %v260_v23 }
 0x147   :  { %v276_v32 = vpack.c.bf16 %v268_v29, %v268_v29  ;;  %v204_v42 = vpop.permute.xlu1 %203 }
 0x148   :  { %v237_v20 = vmax.f32 %v119_v43, %v204_v42 }
 0x149   :  { %284 = vst.msk [vmem:[%s622_s4 + $0xa] sm:$0x3] %vm19_vm0, %v276_v32 }
 0x14a   :  { %v246_v22 = vmax.f32 %v237_v20, %v238_v45 }
 0x14c   :  { %vm254_vm11 = vcmp.gt.f32.partialorder %v246_v22, 0.0  ;;  %v262_v24 = vmul.f32 0.1, %v246_v22 }
 0x14e   :  { %v270_v10 = vsel %vm254_vm11, %v246_v22, %v262_v24 }
 0x14f   :  { %v278_v11 = vpack.c.bf16 %v270_v10, %v270_v10 }
 0x151   :  { %286 = vst.msk [vmem:[%s622_s4 + $0xe] sm:$0x3] %vm19_vm0, %v278_v11 }

// kernel: _lambda_.10
= control target key start
LH: loop header
LB: loop body
LE: loop exit
PB: predicated region body
PF: predicated region fallthrough
CT: control target
= control target key end

     0   :  { %s1975_s12 = smov 0   ;;  %s1977_s13 = smov 0   ;;  %s2671_s0 = inlined_call_operand.vmem [shape: bf16[2,1,110,8], index: 0, kind: input, shape index: {}]   ;;  %s2672_s1 = inlined_call_operand.vmem [shape: bf16[9,8,16], index: 1, kind: input, shape index: {}]   ;;  %s2673_s2 = inlined_call_operand.vmem [shape: bf16[2,1,80,16], index: 2, kind: output, shape index: {0}]   ;;  %s2674_s3 = inlined_call_operand.vmem [shape: f32[2,2,16], index: 3, kind: output, shape index: {1}]  }
   0x1   :  { %s1979_s14 = smov 0  }
   0x2 LB: > { %s33_s15 = sadd.s32 1, %s1947_s13  ;;  %p1762_p0 = scmp.ge.s32.totalorder %s1951_s14, 1  ;;  %s1951_s14 = sphi %s1979_s14, %s14_s14   ;;  %s1947_s13 = sphi %s1977_s13, %s2708_s13   ;;  %s1943_s12 = sphi %s1975_s12, %s2707_s12  }
   0x3   : > { %p35_p1 = scmp.ge.s32.totalorder %s33_s15, 2  ;;  %p173_p2 = scmp.lt.s32.totalorder %s1951_s14, 3 }
   0x5   : > { %s2710_s15 = smov (%p35_p1, %s33_s15), 0  ;;  %p174_p3 = pnand %p1762_p0, %p173_p2 }
   0x6   : > { %p212_p4 = scmp.lt.s32.totalorder (!%p174_p3), %s1943_s12, 1 }
   0x7   : > { %177 = sbr.rel (%p174_p3) target bundleno = 369 (0x171), region = 28 }
   0xc   : > { %v1766_v0 = vld [vmem:[%s2672_s1 + $0x4] sm:$0xf]  ;;  %vm349_vm0 = vcmask 1043456   ;;  %v1793_v2 = vld [vmem:[%s2672_s1 + $0x8] sm:$0xf]  ;;  %s2712_s12 = smov (!%p212_p4, %s1943_s12), 1 }
   0xd   : > { %v351_v1 = vsel %vm349_vm0, %v1766_v0, 0  ;;  %v256_v3 = vld [vmem:[%s2672_s1] sm:$0xf]  ;;  %v468_v4 = vsel %vm349_vm0, %v1793_v2, 0  ;;  %v1799_v6 = vld [vmem:[%s2672_s1 + $0xc] sm:$0xf] }
   0xe   : > { %1898 = vmatpush.bf16.msra.mxu1 %v351_v1  ;;  %1899 = vmatpush.bf16.msra.mxu2 %v351_v1  ;;  %v398_v5 = vsel %vm349_vm0, %v256_v3, 0  ;;  %v582_v7 = vsel %vm349_vm0, %v1799_v6, 0  ;;  %v1821_v8 = vld [vmem:[%s2672_s1 + $0x10] sm:$0xf]  ;;  %s1901_s26 = smul.u32 56, %s2712_s12  ;;  %vm333_vm2 = vcmask 64512  }
   0xf   : > { %1900 = vmatpush.bf16.msra.mxu3 %v351_v1  ;;  %360 = vmatpush.bf16.msra.mxu0 %v351_v1  ;;  %v704_v9 = vsel %vm349_vm0, %v1821_v8, 0  ;;  %vm288_vm1 = vsmask.f32 7424  ;;  %v1833_v44 = vld [vmem:[%s2672_s1 + $0x18] sm:$0xf]  ;;  %vm440_vm3 = vcmask 1046528  }
  0x10   : > { %s2019_s29 = scalar_lea.vmem %s2671_s0, %s1901_s26  ;;  %v898_v46 = vsel %vm349_vm0, %v1833_v44, 0  ;;  %v1855_v47 = vld [vmem:[%s2672_s1 + $0x1c] sm:$0xf]  ;;  %v1827_v51 = vld [vmem:[%s2672_s1 + $0x14] sm:$0xf]  ;;  %vm756_vm5 = vcmask 1045504  }
  0x11   : > { %v2022_v10 = vld [vmem:[%s2019_s29 + $0x8] sm:$0xff]  ;;  %v2025_v11 = vld [vmem:[%s2019_s29 + $0x10] sm:$0xff]  ;;  %v2028_v12 = vld [vmem:[%s2019_s29 + $0x18] sm:$0xff]  ;;  %v1020_v57 = vsel %vm349_vm0, %v1855_v47, 0  ;;  %v784_v58 = vsel %vm349_vm0, %v1827_v51, 0  ;;  %vm1072_vm7 = vcmask 1044480  }
  0x12   : > { %477 = vmatpush.bf16.msrb.mxu2 %v468_v4  ;;  %407 = vmatpush.bf16.msrb.mxu1 %v398_v5  ;;  %v2031_v13 = vld [vmem:[%s2019_s29 + $0x20] sm:$0xff]  ;;  %v257_v14 = vld [vmem:[%s2019_s29 + $0x28] sm:$0x1]  ;;  %v297_v15 = vshll.u32 %v2022_v10, 16  ;;  %v301_v16 = vshrl.u32 %v2022_v10, 16  ;;  %v305_v17 = vshll.u32 %v2025_v11, 16 }
  0x13   : > { %591 = vmatpush.bf16.msrb.mxu3 %v582_v7  ;;  %713 = vmatpush.bf16.msrb.mxu0 %v704_v9  ;;  %v309_v18 = vshrl.u32 %v2025_v11, 16  ;;  %v2039_v19 = vld [vmem:[%s2019_s29] sm:$0xff]   ;;  %v313_v20 = vshll.u32 %v2028_v12, 16  ;;  %v281_v21 = vunpack.c.l.b16 %v257_v14  ;;  %v321_v22 = vshll.u32 %v2031_v13, 16  ;;  %v2046_v25 = vld [vmem:[%s2019_s29 + $0x8] sm:$0xff]   ;;  %s1902_s11 = smul.u32 40, %s2712_s12 }
  0x14   : > { %v325_v23 = vshrl.u32 %v2031_v13, 16  ;;  %v514_v24 = vld [vmem:[%s2019_s29 + $0x4] sm:$0xe]  ;;  %v299_v26 = vrot.slane %v297_v15, 1  ;;  %v307_v27 = vrot.slane %v305_v17, 1  ;;  %v290_v28 = vshrl.u32 %v2039_v19, 16 }
  0x15   : > { %v315_v29 = vrot.slane %v313_v20, 1  ;;  %v2049_v30 = vpack.c.b16 %v281_v21, %v281_v21  ;;  %v323_v31 = vrot.slane %v321_v22, 1  ;;  %v292_v32 = vshll.u32 %v2039_v19, 16  ;;  %v2070_v50 = vld [vmem:[%s2019_s29 + $0xc] sm:$0xff]  ;;  %v1861_v54 = vld [vmem:[%s2672_s1 + $0x20] sm:$0xf]  ;;  %s2438_s18 = scalar_lea.vmem %s2673_s2, %s1902_s11 }
  0x16   : > { %v303_v33 = vor.u32 %v301_v16, %v299_v26  ;;  %v311_v34 = vor.u32 %v309_v18, %v307_v27  ;;  %v538_v35 = vunpack.c.l.b16 %v514_v24  ;;  %v539_v36 = vunpack.c.l.b16 %v2046_v25  ;;  %v1895_v9 = vld [vmem:[%s2019_s29] sm:$0xf0]  ;;  %v1896_v14 = vld [vmem:[%s2019_s29] sm:$0xe]  ;;  %v2096_v15 = vld [vmem:[%s2019_s29 + $0x14] sm:$0xff]  ;;  %s1765_s19 = sshll.u32 %s2712_s12, 1 }
  0x17   : > { %v327_v37 = vor.u32 %v325_v23, %v323_v31  ;;  %v329_v38 = vshll.u32 %v2049_v30, 16  ;;  %v294_v39 = vrot.slane %v292_v32, 1  ;;  %v644_v55 = vshrl.u32 %v2070_v50, 16  ;;  %s2596_s21 = scalar_lea.vmem %s2674_s3, %s1765_s19 }
  0x18   : > { %v308_v40 = vsel %vm288_vm1, %v303_v33, %v307_v27  ;;  %v316_v41 = vsel %vm288_vm1, %v311_v34, %v315_v29  ;;  %v549_v45 = vpack.c.b16 %v539_v36, %v538_v35  ;;  %v647_v56 = vshll.u32 %v2070_v50, 16 }
  0x19   : > { %1784 = vmatmul.msk.bf16.vlgmr.msra.gmra.mxu1 %vm333_vm2, %v308_v40  ;;  %1785 = vmatmul.msk.bf16.vlgmr.msra.gmra.mxu2 %vm333_vm2, %v316_v41  ;;  %v331_v42 = vrot.slane %v329_v38, 1  ;;  %v295_v43 = vor.u32 %v294_v39, %v290_v28  ;;  %v317_v59 = vshrl.u32 %v2028_v12, 16  ;;  %v1100_v60 = vsel %vm349_vm0, %v1861_v54, 0  ;;  %v2126_v41 = vld [vmem:[%s2019_s29 + $0x24] sm:$0xff] }
  0x1a   : > { %907 = vmatpush.bf16.msra.mxu2 %v898_v46  ;;  %v636_v52 = vshrl.u32 %v549_v45, 16  ;;  %v639_v53 = vshll.u32 %v549_v45, 16  ;;  %793 = vmatpush.bf16.msra.mxu1 %v784_v58  ;;  %v646_v63 = vrot.slane %v644_v55, 1  ;;  %v649_v0 = vrot.slane %v647_v56, 2 }
  0x1b   : > { %v332_v48 = vsel %vm288_vm1, %v327_v37, %v331_v42  ;;  %v300_v49 = vsel %vm288_vm1, %v295_v43, %v299_v26  ;;  %v319_v1 = vor.u32 %v317_v59, %v315_v29  ;;  %v555_v2 = vrot.slane %v549_v45, 1  ;;  %v2111_v29 = vld [vmem:[%s2019_s29 + $0x1c] sm:$0xff] }
  0x1c   : > { %1787 = vmatmul.msk.bf16.vlgmr.msra.gmra.mxu3 %vm333_vm2, %v332_v48  ;;  %1783 = vmatmul.msk.bf16.vlgmr.msra.gmra.mxu0 %vm333_vm2, %v300_v49  ;;  %v638_v61 = vrot.slane %v636_v52, 1  ;;  %v641_v62 = vrot.slane %v639_v53, 2  ;;  %v556_v3 = vrot.slane %v2070_v50, 1  ;;  %v650_v5 = vor.u32 %v649_v0, %v646_v63  ;;  %v750_v48 = vld [vmem:[%s2019_s29 + $0x4] sm:$0xc] }
  0x1d   : > { %1029 = vmatpush.bf16.msra.mxu3 %v1020_v57  ;;  %1109 = vmatpush.bf16.msra.mxu0 %v1100_v60  ;;  %v324_v6 = vsel %vm288_vm1, %v319_v1, %v323_v31  ;;  %vm634_vm4 = vsmask.f32 6400  ;;  %v653_v16 = vshrl.u32 %v2096_v15, 16  ;;  %v656_v17 = vshll.u32 %v2096_v15, 16  ;;  %v628_v52 = vld [vmem:[%s2019_s29 + $0x2c] sm:$0x3] }
  0x1e   : > { %v642_v4 = vor.u32 %v641_v62, %v638_v61  ;;  %v557_v7 = vsel %vm440_vm3, %v555_v2, %v556_v3  ;;  %v1897_v18 = vor.u32 %v1896_v14, %v1895_v9  ;;  %v442_v22 = vrot.slane %v2022_v10, 1  ;;  %v524_v62 = vld [vmem:[%s2019_s29 + $0x2c] sm:$0x1] }
  0x1f   : > { %v655_v20 = vrot.slane %v653_v16, 1  ;;  %v558_v23 = vrot.slane %v2096_v15, 1  ;;  %v662_v31 = vshrl.u32 %v2111_v29, 16  ;;  %v665_v32 = vshll.u32 %v2111_v29, 16  ;;  %v1887_v16 = vld [vmem:[%s2019_s29 + $0x10] sm:$0xff] }
  0x20   : > { %v651_v8 = vsel %vm634_vm4, %v642_v4, %v650_v5  ;;  %v441_v21 = vrot.slane %v1897_v18, 1  ;;  %v560_v35 = vrot.slane %v2111_v29, 1  ;;  %v448_v42 = vrot.slane %v2031_v13, 1 }
  0x21   : > { %v559_v27 = vsel %vm440_vm3, %v556_v3, %v558_v23  ;;  %v664_v33 = vrot.slane %v662_v31, 1  ;;  %v667_v34 = vrot.slane %v665_v32, 2  ;;  %v450_v43 = vrot.slane %v2049_v30, 1 }
  0x22   : > { %v443_v26 = vsel %vm440_vm3, %v441_v21, %v442_v22  ;;  %v561_v39 = vsel %vm440_vm3, %v558_v23, %v560_v35  ;;  %v671_v44 = vshrl.u32 %v2126_v41, 16  ;;  %v446_v49 = vrot.slane %v2028_v12, 1 }
  0x23   : > { %v668_v37 = vor.u32 %v667_v34, %v664_v33  ;;  %v2135_v45 = vsel %vm440_vm3, %v448_v42, %v450_v43  ;;  %v754_v51 = vunpack.c.l.b16 %v750_v48  ;;  %v562_v30 = vrot.slane %v2126_v41, 1 }
  0x24   : > { %v673_v46 = vrot.slane %v671_v44, 1  ;;  %v632_v55 = vunpack.c.l.b16 %v628_v52  ;;  %v758_v58 = vrot.slane %v2070_v50, 2  ;;  %v760_v50 = vrot.slane %v2096_v15, 2 }
  0x25   : > { %v755_v53 = vpack.c.b16 %v539_v36, %v754_v51  ;;  %v563_v36 = vsel %vm440_vm3, %v560_v35, %v562_v30  ;;  %v548_v63 = vunpack.c.l.b16 %v524_v62  ;;  %v855_v9 = vunpack.c.h.b16 %v2046_v25  ;;  %v2188_v51 = vld [vmem:[%s2019_s29 + $0x20] sm:$0xff] }
  0x26   : > { %v2151_v61 = vpack.c.b16 %v632_v55, %v632_v55  ;;  %v761_v1 = vsel %vm756_vm5, %v758_v58, %v760_v50  ;;  %v449_v14 = vsel %vm440_vm3, %v446_v49, %v448_v42  ;;  %v960_v21 = vshrl.u32 %v1887_v16, 16 }
  0x27   : > { %v757_v57 = vrot.slane %v755_v53, 2  ;;  %v554_v2 = vpack.c.b16 %v548_v63, %v548_v63  ;;  %v963_v23 = vshll.u32 %v1887_v16, 16  ;;  %vm950_vm6 = vsmask.f32 5376 }
  0x28   : > { %v683_v0 = vshll.u32 %v2151_v61, 16  ;;  %v978_v52 = vshrl.u32 %v2188_v51, 16  ;;  %v981_v53 = vshll.u32 %v2188_v51, 16  ;;  %v762_v55 = vrot.slane %v2111_v29, 2 }
  0x29   : > { %1786 = vmatmul.msk.bf16.gmra.mxu2 %vm333_vm2, %v324_v6  ;;  %1788 = vmatmul.msk.bf16.vlgmr.msrb.gmra.mxu1 %vm333_vm2, %v2039_v19  ;;  %v658_v19 = vrot.slane %v656_v17, 2  ;;  %v759_v59 = vsel %vm756_vm5, %v757_v57, %v758_v58  ;;  %v564_v6 = vrot.slane %v554_v2, 1  ;;  %v1078_v58 = vrot.slane %v2188_v51, 3 }
  0x2a   : > { %v685_v4 = vrot.slane %v683_v0, 2 }
  0x2b   : > { %v659_v24 = vor.u32 %v658_v19, %v655_v20  ;;  %v565_v17 = vsel %vm440_vm3, %v562_v30, %v564_v6  ;;  %v1066_v19 = vld [vmem:[%s2019_s29 + $0x8] sm:$0x8]  ;;  %v980_v30 = vrot.slane %v978_v52, 2  ;;  %v764_v6 = vrot.slane %v2126_v41, 2 }
  0x2c   : > { %1816 = vmatmul.msk.bf16.vlgmr.msrb.gmra.mxu3 %vm333_vm2, %v557_v7  ;;  %1822 = vmatmul.msk.bf16.vlgmr.msrb.gmra.mxu0 %vm333_vm2, %v651_v8 }
  0x2d   : > { %v660_v28 = vsel %vm634_vm4, %v650_v5, %v659_v24  ;;  %v669_v40 = vsel %vm634_vm4, %v659_v24, %v668_v37  ;;  %v830_v5 = vld [vmem:[%s2019_s29 + $0x8] sm:$0xc]  ;;  %v1070_v24 = vunpack.c.l.b16 %v1066_v19 }
  0x2e   : > { %v854_v8 = vunpack.c.l.b16 %v830_v5 }
  0x2f   : > { %v1071_v31 = vpack.c.b16 %v855_v9, %v1070_v24 }
  0x30   : > { %v865_v20 = vpack.c.b16 %v855_v9, %v854_v8  ;;  %v944_v8 = vld [vmem:[%s2019_s29 + $0x30] sm:$0x7] }
  0x31   : > { %v1073_v34 = vrot.slane %v1071_v31, 3 }
  0x32   : > { %v952_v25 = vshrl.u32 %v865_v20, 16  ;;  %v871_v44 = vrot.slane %v865_v20, 2 }
  0x39   : > { %1789 = vmatmul.msk.bf16.gmra.mxu1 %vm333_vm2, %v2022_v10  ;;  %1794 = vmatmul.msk.bf16.vlgmr.msrb.gmra.mxu2 %vm333_vm2, %v443_v26  ;;  %v444_v10 = vrot.slane %v2025_v11, 1  ;;  %v962_v26 = vrot.slane %v960_v21, 2 }
  0x3b   : > { %v445_v38 = vsel %vm440_vm3, %v442_v22, %v444_v10  ;;  %v447_v56 = vsel %vm440_vm3, %v444_v10, %v446_v49  ;;  %v955_v22 = vshll.u32 %v865_v20, 16  ;;  %v1074_v10 = vrot.slane %v1887_v16, 3 }
  0x3c   : > { %1817 = vmatmul.msk.bf16.gmra.mxu3 %vm333_vm2, %v559_v27  ;;  %1823 = vmatmul.msk.bf16.gmra.mxu0 %vm333_vm2, %v660_v28  ;;  %v965_v28 = vrot.slane %v963_v23, 3  ;;  %v765_v20 = vsel %vm756_vm5, %v762_v55, %v764_v6 }
  0x3d   : > { %v957_v27 = vrot.slane %v955_v22, 3 }
  0x3e   : > { %v966_v33 = vor.u32 %v965_v28, %v962_v26 }
  0x49   : > { %1790 = vmatmul.msk.bf16.gmra.mxu1 %vm333_vm2, %v2025_v11  ;;  %1795 = vmatmul.msk.bf16.gmra.mxu2 %vm333_vm2, %v445_v38  ;;  %v674_v11 = vshll.u32 %v2126_v41, 16  ;;  %v1888_v38 = vld [vmem:[%s2019_s29 + $0x18] sm:$0xff] }
  0x4b   : > { %v676_v47 = vrot.slane %v674_v11, 2  ;;  %v872_v11 = vrot.slane %v1887_v16, 2 }
  0x4c   : > { %1818 = vmatmul.msk.bf16.gmra.mxu3 %vm333_vm2, %v561_v39  ;;  %1824 = vmatmul.msk.bf16.gmra.mxu0 %vm333_vm2, %v669_v40  ;;  %v969_v39 = vshrl.u32 %v1888_v38, 16  ;;  %v972_v40 = vshll.u32 %v1888_v38, 16 }
  0x4d   : > { %v677_v54 = vor.u32 %v676_v47, %v673_v46  ;;  %v873_v47 = vsel %vm756_vm5, %v871_v44, %v872_v11 }
  0x4e   : > { %v971_v42 = vrot.slane %v969_v39, 2  ;;  %v974_v43 = vrot.slane %v972_v40, 3 }
  0x4f   : > { %v678_v60 = vsel %vm634_vm4, %v668_v37, %v677_v54  ;;  %v1075_v37 = vsel %vm1072_vm7, %v1073_v34, %v1074_v10 }
  0x50   : > { %v975_v46 = vor.u32 %v974_v43, %v971_v42 }
  0x52   : > { %v976_v48 = vsel %vm950_vm6, %v966_v33, %v975_v46 }
  0x59   : > { %1791 = vmatmul.msk.bf16.gmra.mxu1 %vm333_vm2, %v2028_v12  ;;  %1796 = vmatmul.msk.bf16.gmra.mxu2 %vm333_vm2, %v447_v56  ;;  %v680_v12 = vshrl.u32 %v2151_v61, 16  ;;  %v874_v56 = vrot.slane %v1888_v38, 2 }
  0x5b   : > { %v682_v3 = vrot.slane %v680_v12, 1  ;;  %v2205_v12 = vld [vmem:[%s2019_s29 + $0x28] sm:$0xff] }
  0x5c   : > { %1819 = vmatmul.msk.bf16.gmra.mxu3 %vm333_vm2, %v563_v36  ;;  %1825 = vmatmul.msk.bf16.gmra.mxu0 %vm333_vm2, %v678_v60  ;;  %v763_v36 = vsel %vm756_vm5, %v760_v50, %v762_v55  ;;  %v875_v60 = vsel %vm756_vm5, %v872_v11, %v874_v56  ;;  %v987_v15 = vshrl.u32 %v2205_v12, 16  ;;  %v990_v50 = vshll.u32 %v2205_v12, 16 }
  0x5d   : > { %v686_v7 = vor.u32 %v685_v4, %v682_v3  ;;  %v1080_v16 = vrot.slane %v2205_v12, 3 }
  0x5e   : > { %v989_v4 = vrot.slane %v987_v15, 2  ;;  %v992_v5 = vrot.slane %v990_v50, 3 }
  0x5f   : > { %v687_v18 = vsel %vm634_vm4, %v677_v54, %v686_v7  ;;  %v983_v54 = vrot.slane %v981_v53, 3  ;;  %v876_v7 = vrot.slane %v2188_v51, 2  ;;  %v1081_v23 = vsel %vm1072_vm7, %v1078_v58, %v1080_v16 }
  0x61   : > { %v984_v57 = vor.u32 %v983_v54, %v980_v30  ;;  %v877_v19 = vsel %vm756_vm5, %v874_v56, %v876_v7 }
  0x63   : > { %v985_v62 = vsel %vm950_vm6, %v975_v46, %v984_v57 }
  0x69   : > { %1792 = vmatmul.msk.bf16.gmra.mxu1 %vm333_vm2, %v2031_v13  ;;  %1797 = vmatmul.msk.bf16.gmra.mxu2 %vm333_vm2, %v449_v14  ;;  %v954_v13 = vrot.slane %v952_v25, 2  ;;  %v993_v14 = vor.u32 %v992_v5, %v989_v4 }
  0x6b   : > { %v958_v32 = vor.u32 %v957_v27, %v954_v13  ;;  %v994_v41 = vsel %vm950_vm6, %v984_v57, %v993_v14 }
  0x6c   : > { %1820 = vmatmul.msk.bf16.gmra.mxu3 %vm333_vm2, %v565_v17  ;;  %1826 = vmatmul.msk.bf16.gmra.mxu0 %vm333_vm2, %v687_v18  ;;  %v948_v17 = vunpack.c.l.b16 %v944_v8 }
  0x6d   : > { %v967_v35 = vsel %vm950_vm6, %v958_v32, %v966_v33 }
  0x6e   : > { %v949_v24 = vpack.c.b16 %v948_v17, %v948_v17 }
  0x70   : > { %v996_v13 = vshrl.u32 %v949_v24, 16  ;;  %v999_v27 = vshll.u32 %v949_v24, 16  ;;  %v1082_v40 = vrot.slane %v949_v24, 3 }
  0x72   : > { %v998_v34 = vrot.slane %v996_v13, 2 }
  0x79   : > { %1798 = vmatmul.msk.bf16.gmra.mxu2 %vm333_vm2, %v2135_v45  ;;  %1828 = vmatmul.msk.bf16.vlgmr.msra.gmra.mxu1 %vm333_vm2, %v759_v59  ;;  %v1076_v45 = vrot.slane %v1888_v38, 3 }
  0x7b   : > { %v1077_v49 = vsel %vm1072_vm7, %v1074_v10, %v1076_v45  ;;  %v1079_v29 = vsel %vm1072_vm7, %v1076_v45, %v1078_v58  ;;  %v1001_v10 = vrot.slane %v999_v27, 3  ;;  %v840_v45 = vld [vmem:[%s2019_s29 + $0x30] sm:$0x3] }
  0x7c   : > { %1856 = vmatmul.msk.bf16.vlgmr.msra.gmra.mxu3 %vm333_vm2, %v967_v35  ;;  %1862 = vmatmul.msk.bf16.vlgmr.msra.gmra.mxu0 %vm333_vm2, %v1075_v37  ;;  %v766_v35 = vrot.slane %v2151_v61, 2  ;;  %v878_v37 = vrot.slane %v2205_v12, 2 }
  0x7d   : > { %v1002_v39 = vor.u32 %v1001_v10, %v998_v34 }
  0x7e   : > { %v767_v43 = vsel %vm756_vm5, %v764_v6, %v766_v35  ;;  %v879_v44 = vsel %vm756_vm5, %v876_v7, %v878_v37 }
  0x7f   : > { %v1003_v61 = vsel %vm950_vm6, %v993_v14, %v1002_v39 }
  0x89   : > { %1829 = vmatmul.msk.bf16.gmra.mxu1 %vm333_vm2, %v761_v1  ;;  %1850 = vmatmul.msk.bf16.vlgmr.msra.gmra.mxu2 %vm333_vm2, %v873_v47 }
  0x8c   : > { %1857 = vmatmul.msk.bf16.gmra.mxu3 %vm333_vm2, %v976_v48  ;;  %1863 = vmatmul.msk.bf16.gmra.mxu0 %vm333_vm2, %v1077_v49  ;;  %v1083_v48 = vsel %vm1072_vm7, %v1080_v16, %v1082_v40  ;;  %v864_v49 = vunpack.c.l.b16 %v840_v45 }
  0x8e   : > { %v870_v30 = vpack.c.b16 %v864_v49, %v864_v49 }
  0x96   : > { %v367_v59 = vpop.f32.mrf.mxu1 }
  0x99   : > { %1830 = vmatmul.msk.bf16.gmra.mxu1 %vm333_vm2, %v763_v36  ;;  %1851 = vmatmul.msk.bf16.gmra.mxu2 %vm333_vm2, %v875_v60  ;;  %v362_v63 = vpop.f32.mrf.mxu0 }
  0x9c   : > { %v2207_v0 = vpop.f32.mrf.mxu2  ;;  %1858 = vmatmul.msk.bf16.gmra.mxu3 %vm333_vm2, %v985_v62  ;;  %1864 = vmatmul.msk.bf16.gmra.mxu0 %vm333_vm2, %v1079_v29 }
  0x9e   : > { %v369_v1 = vpop.f32.mrf.mxu1 }
  0x9f   : > { %v2213_v2 = vpop.f32.mrf.mxu3 }
  0xa1   : > { %v364_v3 = vpop.f32.mrf.mxu0 }
  0xa4   : > { %v2218_v9 = vpop.f32.mrf.mxu2 }
  0xa6   : > { %v409_v18 = vpop.f32.mrf.mxu1 }
  0xa7   : > { %v410_v21 = vadd.f32 %v409_v18, %v362_v63  ;;  %v2223_v25 = vpop.f32.mrf.mxu3  ;;  %v1167_v18 = vlaneseq }
  0xa9   : > { %1831 = vmatmul.msk.bf16.gmra.mxu1 %vm333_vm2, %v765_v20  ;;  %1852 = vmatmul.msk.bf16.gmra.mxu2 %vm333_vm2, %v877_v19  ;;  %v715_v22 = vpop.f32.mrf.mxu0  ;;  %v2256_v19 = vshrl.u32 %v1167_v18, 7 }
  0xab   : > { %v1182_v13 = vshrl.u32 %v2256_v19, 16 }
  0xac   : > { %v2229_v26 = vpop.f32.mrf.mxu2  ;;  %1859 = vmatmul.msk.bf16.gmra.mxu3 %vm333_vm2, %v994_v41  ;;  %1865 = vmatmul.msk.bf16.gmra.mxu0 %vm333_vm2, %v1081_v23  ;;  %v1181_v23 = vand.u32 65535, %v2256_v19 }
  0xad   : > { %v1187_v35 = vmul.u32 52428, %v1182_v13 }
  0xae   : > { %v411_v28 = vpop.f32.mrf.mxu1  ;;  %v1185_v27 = vmul.u32 52428, %v1181_v23 }
  0xaf   : > { %v412_v31 = vadd.f32 %v411_v28, %v364_v3  ;;  %v593_v32 = vpop.f32.mrf.mxu3 }
  0xb1   : > { %v717_v33 = vpop.f32.mrf.mxu0 }
  0xb4   : > { %v2235_v38 = vpop.f32.mrf.mxu2 }
  0xb6   : > { %v414_v42 = vpop.f32.mrf.mxu1 }
  0xb7   : > { %v415_v11 = vadd.f32 %v414_v42, %v367_v59  ;;  %v595_v46 = vpop.f32.mrf.mxu3  ;;  %v880_v59 = vrot.slane %v870_v30, 2  ;;  %v1953_v42 = vmov 0  }
  0xb9   : > { %1832 = vmatmul.msk.bf16.gmra.mxu1 %vm333_vm2, %v767_v43  ;;  %1853 = vmatmul.msk.bf16.gmra.mxu2 %vm333_vm2, %v879_v44  ;;  %v720_v47 = vpop.f32.mrf.mxu0  ;;  %v881_v63 = vsel %vm756_vm5, %v878_v37, %v880_v59 }
  0xbc   : > { %v479_v51 = vpop.f32.mrf.mxu2  ;;  %1860 = vmatmul.msk.bf16.gmra.mxu3 %vm333_vm2, %v1003_v61  ;;  %1866 = vmatmul.msk.bf16.gmra.mxu0 %vm333_vm2, %v1083_v48 }
  0xbd   : > { %v504_v52 = vadd.f32 %v479_v51, %v410_v21 }
  0xbe   : > { %v416_v53 = vpop.f32.mrf.mxu1 }
  0xbf   : > { %v618_v54 = vadd.f32 %v593_v32, %v504_v52  ;;  %v417_v55 = vadd.f32 %v416_v53, %v369_v1  ;;  %v598_v56 = vpop.f32.mrf.mxu3  ;;  %v1186_v32 = vmul.u32 52429, %v1182_v13 }
  0xc1   : > { %v722_v57 = vpop.f32.mrf.mxu0  ;;  %v2246_v58 = vadd.f32 %v715_v22, %v618_v54  ;;  %v1190_v37 = vshll.u32 %v1186_v32, 16  ;;  %v1191_v53 = vshrl.u32 %v1186_v32, 16 }
  0xc4   : > { %v481_v36 = vpop.f32.mrf.mxu2 }
  0xc5   : > { %v505_v60 = vadd.f32 %v481_v36, %v412_v31  ;;  %v1184_v31 = vmul.u32 52429, %v1181_v23 }
  0xc6   : > { %v419_v62 = vpop.f32.mrf.mxu1 }
  0xc7   : > { %v619_v29 = vadd.f32 %v595_v46, %v505_v60  ;;  %v420_v12 = vadd.f32 %v419_v62, %v2207_v0  ;;  %v600_v15 = vpop.f32.mrf.mxu3  ;;  %v2272_v46 = vadd.s32 8, %v2256_v19 }
  0xc9   : > { %1854 = vmatmul.msk.bf16.gmra.mxu2 %vm333_vm2, %v881_v63  ;;  %v725_v50 = vpop.f32.mrf.mxu0  ;;  %v2251_v3 = vadd.f32 %v717_v33, %v619_v29  ;;  %v1188_v33 = vshll.u32 %v1185_v27, 16  ;;  %v1211_v49 = vshrl.u32 %v2272_v46, 16  ;;  %v2282_v63 = vadd.s32 16, %v2256_v19 }
  0xcb   : > { %vm1192_vm8 = vc.u32 %v1184_v31, %v1188_v33  ;;  %v1194_v44 = vadd.s32 %v1188_v33, %v1184_v31  ;;  %v1216_v36 = vmul.u32 52428, %v1211_v49  ;;  %v1240_v18 = vshrl.u32 %v2282_v63, 16 }
  0xcc   : > { %v484_v1 = vpop.f32.mrf.mxu2  ;;  %v1193_v43 = vsel %vm1192_vm8, 1, %v1953_v42 }
  0xcd   : > { %v506_v4 = vadd.f32 %v484_v1, %v415_v11  ;;  %v1195_v11 = vadd.s32 %v1193_v43, %v1187_v35  ;;  %vm1196_vm9 = vc.u32 %v1194_v44, %v1190_v37  ;;  %v1244_v13 = vmul.u32 52429, %v1240_v18 }
  0xce   : > { %v421_v5 = vpop.f32.mrf.mxu1  ;;  %v1197_v48 = vsel %vm1196_vm9, 1, %v1953_v42  ;;  %v1245_v33 = vmul.u32 52428, %v1240_v18 }
  0xcf   : > { %v620_v6 = vadd.f32 %v598_v56, %v506_v4  ;;  %v422_v7 = vadd.f32 %v421_v5, %v2218_v9  ;;  %v603_v8 = vpop.f32.mrf.mxu3  ;;  %v1199_v51 = vadd.s32 %v1197_v48, %v1195_v11  ;;  %v1239_v4 = vand.u32 65535, %v2282_v63 }
  0xd1   : > { %v727_v14 = vpop.f32.mrf.mxu0  ;;  %v2254_v16 = vadd.f32 %v720_v47, %v620_v6  ;;  %v1189_v47 = vshrl.u32 %v1185_v27, 16  ;;  %v1242_v23 = vmul.u32 52429, %v1239_v4 }
  0xd4   : > { %v486_v17 = vpop.f32.mrf.mxu2 }
  0xd5   : > { %v507_v20 = vadd.f32 %v486_v17, %v417_v55  ;;  %v1215_v55 = vmul.u32 52429, %v1211_v49 }
  0xd6   : > { %v424_v0 = vpop.f32.mrf.mxu1 }
  0xd7   : > { %v621_v21 = vadd.f32 %v600_v15, %v507_v20  ;;  %v2259_v41 = vadd.f32 %v424_v0, %v2229_v26  ;;  %v605_v22 = vpop.f32.mrf.mxu3  ;;  %v1219_v62 = vshll.u32 %v1215_v55, 16  ;;  %v1243_v20 = vmul.u32 52428, %v1239_v4 }
  0xd8   : > { %v1220_v31 = vshrl.u32 %v1215_v55, 16 }
  0xd9   : > { %v2262_v24 = vpop.f32.mrf.mxu0  ;;  %v2264_v9 = vadd.f32 %v722_v57, %v621_v21  ;;  %v1200_v57 = vadd.s32 %v1199_v51, %v1189_v47 }
  0xdc   : > { %v489_v28 = vpop.f32.mrf.mxu2 }
  0xdd   : > { %v508_v34 = vadd.f32 %v489_v28, %v420_v12  ;;  %v1246_v28 = vshll.u32 %v1243_v20, 16 }
  0xde   : > { %v426_v10 = vpop.f32.mrf.mxu1 }
  0xdf   : > { %v622_v26 = vadd.f32 %v603_v8, %v508_v34  ;;  %v2268_v39 = vadd.f32 %v426_v10, %v2235_v38  ;;  %v608_v40 = vpop.f32.mrf.mxu3  ;;  %v1210_v38 = vand.u32 65535, %v2272_v46  ;;  %v2297_v34 = vadd.s32 24, %v2256_v19 }
  0xe0   : > { %vm1250_vm12 = vc.u32 %v1242_v23, %v1246_v28  ;;  %v1252_v44 = vadd.s32 %v1246_v28, %v1242_v23 }
  0xe1   : > { %v2274_v45 = vpop.f32.mrf.mxu0  ;;  %v2276_v61 = vadd.f32 %v725_v50, %v622_v26  ;;  %v1213_v30 = vmul.u32 52429, %v1210_v38  ;;  %v1214_v54 = vmul.u32 52428, %v1210_v38  ;;  %v1201_v50 = vadd.s32 %v1200_v57, %v1191_v53 }
  0xe2   : > { %v1248_v26 = vshll.u32 %v1244_v13, 16  ;;  %v1251_v11 = vsel %vm1250_vm12, 1, %v1953_v42  ;;  %v1249_v57 = vshrl.u32 %v1244_v13, 16 }
  0xe3   : > { %v1217_v60 = vshll.u32 %v1214_v54, 16  ;;  %v1218_v8 = vshrl.u32 %v1214_v54, 16  ;;  %v1202_v21 = vshrl.u32 %v1201_v50, 3  ;;  %v1253_v38 = vadd.s32 %v1251_v11, %v1245_v33 }
  0xe4   : > { %v491_v52 = vpop.f32.mrf.mxu2  ;;  %vm1254_vm13 = vc.u32 %v1252_v44, %v1248_v26 }
  0xe5   : > { %v509_v56 = vadd.f32 %v491_v52, %v422_v7  ;;  %vm1221_vm10 = vc.u32 %v1213_v30, %v1217_v60  ;;  %v1223_v1 = vadd.s32 %v1217_v60, %v1213_v30  ;;  %v1203_v43 = vmul.u32 10, %v1202_v21 }
  0xe6   : > { %v429_v59 = vpop.f32.mrf.mxu1  ;;  %v1222_v5 = vsel %vm1221_vm10, 1, %v1953_v42  ;;  %v1247_v52 = vshrl.u32 %v1243_v20, 16  ;;  %v1255_v30 = vsel %vm1254_vm13, 1, %v1953_v42 }
  0xe7   : > { %v623_v29 = vadd.f32 %v605_v22, %v509_v56  ;;  %v2285_v12 = vadd.f32 %v429_v59, %v2213_v2  ;;  %v610_v15 = vpop.f32.mrf.mxu3  ;;  %v1224_v17 = vadd.s32 %v1222_v5, %v1216_v36  ;;  %vm1225_vm11 = vc.u32 %v1223_v1, %v1219_v62 }
  0xe8   : > { %v1226_v2 = vsel %vm1225_vm11, 1, %v1953_v42  ;;  %v2311_v51 = vsub.s32 %v2256_v19, %v1203_v43  ;;  %v1257_v59 = vadd.s32 %v1255_v30, %v1253_v38  ;;  %v2320_v1 = vadd.s32 32, %v2256_v19 }
  0xe9   : > { %v2289_v6 = vadd.f32 %v727_v14, %v623_v29  ;;  %v2291_v7 = vpop.f32.mrf.mxu0  ;;  %v1228_v22 = vadd.s32 %v1226_v2, %v1224_v17  ;;  %vm1156_vm11 = vcmask 125952  }
  0xea   : > { %v1258_v4 = vadd.s32 %v1257_v59, %v1247_v52  ;;  %vm1468_vm15 = vcmp.ne.s32.totalorder %v2311_v51, 0  ;;  %vm1478_vm1 = vcmp.lt.s32.totalorder %v2311_v51, 0 }
  0xeb   : > { %v1229_v32 = vadd.s32 %v1228_v22, %v1218_v8  ;;  %v1297_v8 = vand.u32 65535, %v2320_v1  ;;  %vm2344_vm2 = vmand %vm1478_vm1, %vm1468_vm15 }
  0xec   : > { %v494_v0 = vpop.f32.mrf.mxu2  ;;  %v1259_v18 = vadd.s32 %v1258_v4, %v1249_v57 }
  0xed   : > { %v510_v27 = vadd.f32 %v494_v0, %v2259_v41  ;;  %v1268_v41 = vand.u32 65535, %v2297_v34  ;;  %v1230_v48 = vadd.s32 %v1229_v32, %v1220_v31  ;;  %v1298_v0 = vshrl.u32 %v2320_v1, 16 }
  0xee   : > { %v431_v14 = vpop.f32.mrf.mxu1  ;;  %v1260_v22 = vshrl.u32 %v1259_v18, 3  ;;  %v1301_v31 = vmul.u32 52428, %v1297_v8 }
  0xef   : > { %v624_v10 = vadd.f32 %v608_v40, %v510_v27  ;;  %v2300_v35 = vadd.f32 %v431_v14, %v2223_v25  ;;  %v613_v37 = vpop.f32.mrf.mxu3  ;;  %v1269_v40 = vshrl.u32 %v2297_v34, 16  ;;  %v1271_v54 = vmul.u32 52429, %v1268_v41 }
  0xf0   : > { %v1272_v55 = vmul.u32 52428, %v1268_v41  ;;  %v1231_v56 = vshrl.u32 %v1230_v48, 3  ;;  %v1300_v14 = vmul.u32 52429, %v1297_v8  ;;  %v1302_v26 = vmul.u32 52429, %v1298_v0 }
  0xf1   : > { %v2305_v47 = vadd.f32 %v2262_v24, %v624_v10  ;;  %v2308_v25 = vpop.f32.mrf.mxu0  ;;  %v1273_v36 = vmul.u32 52429, %v1269_v40  ;;  %v1274_v29 = vmul.u32 52428, %v1269_v40  ;;  %v1261_v10 = vmul.u32 10, %v1260_v22 }
  0xf2   : > { %v1275_v50 = vshll.u32 %v1272_v55, 16  ;;  %v1232_v17 = vmul.u32 10, %v1231_v56  ;;  %v1304_v48 = vshll.u32 %v1301_v31, 16  ;;  %v1303_v40 = vmul.u32 52428, %v1298_v0 }
  0xf3   : > { %v1278_v23 = vshrl.u32 %v1273_v36, 16  ;;  %v1305_v59 = vshrl.u32 %v1301_v31, 16  ;;  %v1954_v31 = vmov 0.0  }
  0xf4   : > { %v496_v49 = vpop.f32.mrf.mxu2  ;;  %vm1279_vm14 = vc.u32 %v1271_v54, %v1275_v50  ;;  %v1281_v5 = vadd.s32 %v1275_v50, %v1271_v54  ;;  %v1233_v33 = vsub.s32 %v2272_v46, %v1232_v17  ;;  %vm1308_vm3 = vc.u32 %v1300_v14, %v1304_v48 }
  0xf5   : > { %v511_v53 = vadd.f32 %v496_v49, %v2268_v39  ;;  %v1277_v39 = vshll.u32 %v1273_v36, 16  ;;  %v1280_v2 = vsel %vm1279_vm14, 1, %v1953_v42  ;;  %v1306_v49 = vshll.u32 %v1302_v26, 16 }
  0xf6   : > { %v2315_v24 = vpop.f32.mrf.mxu1  ;;  %v1282_v20 = vadd.s32 %v1280_v2, %v1274_v29  ;;  %vm1469_vm4 = vcmp.ne.s32.totalorder %v1233_v33, 0  ;;  %vm1479_vm5 = vcmp.lt.s32.totalorder %v1233_v33, 0  ;;  %v1309_v54 = vsel %vm1308_vm3, 1, %v1953_v42 }
  0xf7   : > { %v625_v60 = vadd.f32 %v610_v15, %v511_v53  ;;  %v2317_v62 = vpop.f32.mrf.mxu3  ;;  %v1276_v15 = vshrl.u32 %v1272_v55, 16  ;;  %vm1283_vm0 = vc.u32 %v1281_v5, %v1277_v39  ;;  %v2352_v53 = vsub.s32 %v2282_v63, %v1261_v10  ;;  %vm2366_vm7 = vmand %vm1479_vm5, %vm1469_vm4 }
  0xf8   : > { %v1284_v13 = vsel %vm1283_vm0, 1, %v1953_v42  ;;  %v2356_v55 = vadd.s32 40, %v2256_v19  ;;  %v1499_v63 = vadd.s32 10, %v1233_v33  ;;  %v1307_v39 = vshrl.u32 %v1302_v26, 16 }
  0xf9   : > { %v1286_v28 = vadd.s32 %v1284_v13, %v1282_v20  ;;  %v2329_v32 = vpop.f32.mrf.mxu0  ;;  %v2333_v43 = vadd.f32 %v2274_v45, %v625_v60  ;;  %vm1470_vm8 = vcmp.ne.s32.totalorder %v2352_v53, 0  ;;  %vm1480_vm9 = vcmp.lt.s32.totalorder %v2352_v53, 0 }
  0xfa   : > { %v1326_v50 = vand.u32 65535, %v2356_v55  ;;  %v1509_v20 = vsel %vm2366_vm7, %v1499_v63, %v1233_v33  ;;  %vm2390_vm12 = vmand %vm1480_vm9, %vm1470_vm8  ;;  %v2405_v26 = vadd.s32 48, %v2256_v19  ;;  %vm1558_vm7 = vcmask 130048  }
  0xfb   : > { %v1287_v41 = vadd.s32 %v1286_v28, %v1276_v15  ;;  %vm2407_vm13 = vcmp.lt.s32.totalorder %v1509_v20, 8 }
  0xfc   : > { %v499_v21 = vpop.f32.mrf.mxu2  ;;  %v1330_v15 = vmul.u32 52428, %v1326_v50 }
  0xfd   : > { %v512_v27 = vadd.f32 %v499_v21, %v2285_v12  ;;  %v1498_v12 = vadd.s32 10, %v2311_v51  ;;  %v1288_v45 = vadd.s32 %v1287_v41, %v1278_v23  ;;  %v1329_v21 = vmul.u32 52429, %v1326_v50 }
  0xfe   : > { %v2337_v38 = vpop.f32.mrf.mxu1  ;;  %v1333_v28 = vshll.u32 %v1330_v15, 16 }
  0xff   : > { %v626_v44 = vadd.f32 %v613_v37, %v512_v27  ;;  %v2335_v11 = vpop.f32.mrf.mxu3  ;;  %v1310_v37 = vadd.s32 %v1304_v48, %v1300_v14  ;;  %v1289_v30 = vshrl.u32 %v1288_v45, 3  ;;  %v1508_v57 = vsel %vm2344_vm2, %v1498_v12, %v2311_v51 }
 0x100   : > { %vm2376_vm10 = vcmp.lt.s32.totalorder %v1508_v57, 8  ;;  %vm1337_vm14 = vc.u32 %v1329_v21, %v1333_v28  ;;  %v1355_v45 = vand.u32 65535, %v2405_v26  ;;  %v1356_v57 = vshrl.u32 %v2405_v26, 16 }
 0x101   : > { %v2349_v52 = vadd.f32 %v2291_v7, %v626_v44  ;;  %vm1312_vm6 = vc.u32 %v1310_v37, %v1306_v49  ;;  %v1311_v7 = vadd.s32 %v1309_v54, %v1303_v40  ;;  %v1290_v29 = vmul.u32 10, %v1289_v30  ;;  %v2380_v18 = vpop.f32.mrf.mxu0 }
 0x102   : > { %v1313_v36 = vsel %vm1312_vm6, 1, %v1953_v42  ;;  %v1867_v33 = vsel %vm2376_vm10, 1.0, %v1954_v31  ;;  %v1339_v40 = vadd.s32 %v1333_v28, %v1329_v21  ;;  %v1334_v30 = vshrl.u32 %v1330_v15, 16 }
 0x103   : > { %v1315_v5 = vadd.s32 %v1313_v36, %v1311_v7  ;;  %v2386_v0 = vsub.s32 %v2297_v34, %v1290_v29  ;;  %v820_v34 = vadd.f32 %v2315_v24, %v2246_v58  ;;  %v1338_v24 = vsel %vm1337_vm14, 1, %v1953_v42 }
 0x104   : > { %v501_v56 = vpop.f32.mrf.mxu2  ;;  %v821_v7 = vadd.f32 %v2337_v38, %v2251_v3  ;;  %v1358_v63 = vmul.u32 52429, %v1355_v45  ;;  %v2442_v29 = vmul.u32 52429, %v1356_v57  ;;  %v2461_v15 = vadd.s32 56, %v2256_v19 }
 0x105   : > { %v513_v60 = vadd.f32 %v501_v56, %v2300_v35  ;;  %v1327_v35 = vshrl.u32 %v2356_v55, 16  ;;  %v1316_v2 = vadd.s32 %v1315_v5, %v1305_v59  ;;  %vm1471_vm15 = vcmp.ne.s32.totalorder %v2386_v0, 0 }
 0x106   : > { %v2388_v22 = vpop.f32.mrf.mxu1  ;;  %vm1481_vm0 = vcmp.lt.s32.totalorder %v2386_v0, 0  ;;  %v2426_v59 = vmul.u32 52428, %v1355_v45  ;;  %v1501_v38 = vadd.s32 10, %v2386_v0  ;;  %v1361_v21 = vmul.u32 52428, %v1356_v57 }
 0x107   : > { %v627_v51 = vadd.f32 %v2317_v62, %v513_v60  ;;  %v2371_v8 = vpop.f32.mrf.mxu3  ;;  %v1500_v62 = vadd.s32 10, %v2352_v53  ;;  %v1317_v13 = vadd.s32 %v1316_v2, %v1307_v39  ;;  %v2394_v27 = vmul.u32 52429, %v1327_v35  ;;  %vm2448_vm5 = vmand %vm1481_vm0, %vm1471_vm15 }
 0x108   : > { %v1332_v10 = vmul.u32 52428, %v1327_v35  ;;  %v1362_v17 = vshll.u32 %v2426_v59, 16  ;;  %v1364_v2 = vshll.u32 %v2442_v29, 16  ;;  %v822_v28 = vadd.f32 %v2388_v22, %v2254_v16 }
 0x109   : > { %v2397_v14 = vadd.f32 %v2308_v25, %v627_v51  ;;  %v1318_v48 = vshrl.u32 %v1317_v13, 3  ;;  %v1335_v25 = vshll.u32 %v2394_v27, 16  ;;  %v1510_v58 = vsel %vm2390_vm12, %v1500_v62, %v2352_v53 }
 0x10a   : > { %v1340_v46 = vadd.s32 %v1338_v24, %v1332_v10  ;;  %vm2431_vm2 = vcmp.lt.s32.totalorder %v1510_v58, 8  ;;  %v1336_v4 = vshrl.u32 %v2394_v27, 16  ;;  %v1868_v62 = vsel %vm2407_vm13, 1.0, %v1954_v31 }
 0x10b   : > { %v1319_v49 = vmul.u32 10, %v1318_v48  ;;  %vm1341_vm1 = vc.u32 %v1339_v40, %v1335_v25  ;;  %v1869_v13 = vsel %vm2431_vm2, 1.0, %v1954_v31  ;;  %vm1366_vm8 = vc.u32 %v1358_v63, %v1362_v17 }
 0x10c   : > { %v909_v44 = vpop.f32.mrf.mxu2  ;;  %v1342_v56 = vsel %vm1341_vm1, 1, %v1953_v42  ;;  %v1368_v27 = vadd.s32 %v1362_v17, %v1358_v63  ;;  %v1511_v10 = vsel %vm2448_vm5, %v1501_v38, %v2386_v0  ;;  %v1384_v48 = vand.u32 65535, %v2461_v15 }
 0x10d   : > { %v934_v12 = vadd.f32 %v909_v44, %v820_v34  ;;  %v1320_v53 = vsub.s32 %v2320_v1, %v1319_v49  ;;  %v1344_v60 = vadd.s32 %v1342_v56, %v1340_v46  ;;  %v2440_v1 = vpop.f32.mrf.mxu0  ;;  %vm2484_vm10 = vcmp.lt.s32.totalorder %v1511_v10, 8 }
 0x10e   : > { %v802_v39 = vpop.f32.mrf.mxu1  ;;  %vm1370_vm9 = vc.u32 %v1368_v27, %v1364_v2  ;;  %v1385_v24 = vshrl.u32 %v2461_v15, 16  ;;  %v2489_v40 = vmul.u32 52428, %v1384_v48  ;;  %v2504_v38 = vadd.s32 64, %v2256_v19 }
 0x10f   : > { %v1056_v37 = vadd.f32 %v2335_v11, %v934_v12  ;;  %v2421_v54 = vpop.f32.mrf.mxu3  ;;  %vm1472_vm3 = vcmp.ne.s32.totalorder %v1320_v53, 0  ;;  %vm1482_vm4 = vcmp.lt.s32.totalorder %v1320_v53, 0  ;;  %v1502_v50 = vadd.s32 10, %v1320_v53 }
 0x110   : > { %vm2454_vm6 = vmand %vm1482_vm4, %vm1472_vm3  ;;  %v1345_v35 = vadd.s32 %v1344_v60, %v1334_v30  ;;  %v1363_v12 = vshrl.u32 %v2426_v59, 16  ;;  %v2497_v59 = vmul.u32 52429, %v1385_v24  ;;  %v1390_v2 = vmul.u32 52428, %v1385_v24 }
 0x111   : > { %v1136_v36 = vadd.f32 %v2329_v32, %v1056_v37  ;;  %v1512_v44 = vsel %vm2454_vm6, %v1502_v50, %v1320_v53  ;;  %v1391_v32 = vshll.u32 %v2489_v40, 16 }
 0x112   : > { %v1346_v41 = vadd.s32 %v1345_v35, %v1336_v4  ;;  %vm2493_vm12 = vcmp.lt.s32.totalorder %v1512_v44, 8 }
 0x113   : > { %v1146_v3 = vpack.c.bf16 %v1136_v36, %v1136_v36  ;;  %v1548_v23 = vmul.f32 %v1867_v33, %v1136_v36  ;;  %v1367_v33 = vsel %vm1366_vm8, 1, %v1953_v42 }
 0x114   : > { %v911_v5 = vpop.f32.mrf.mxu2  ;;  %v1369_v16 = vadd.s32 %v1367_v33, %v1361_v21  ;;  %v1347_v57 = vshrl.u32 %v1346_v41, 3 }
 0x115   : > { %1157 = vst.msk [vmem:[%s2438_s18] sm:$0xf] %vm1156_vm11, %v1146_v3  ;;  %v935_v20 = vadd.f32 %v911_v5, %v821_v7  ;;  %v1585_v22 = vmul.f32 %v1548_v23, %v1136_v36  ;;  %v1559_v37 = vsel %vm1558_vm7, %v1548_v23, 0.0  ;;  %v1118_v53 = vpop.f32.mrf.mxu0  ;;  %v1387_v3 = vmul.u32 52429, %v1384_v48 }
 0x116   : > { %v1348_v17 = vmul.u32 10, %v1347_v57  ;;  %v1870_v23 = vsel %vm2484_vm10, 1.0, %v1954_v31 }
 0x117   : > { %v1057_v34 = vadd.f32 %v2371_v8, %v935_v20  ;;  %v1371_v8 = vsel %vm1370_vm9, 1, %v1953_v42  ;;  %v1038_v58 = vpop.f32.mrf.mxu3  ;;  %v1595_v50 = vsel %vm1558_vm7, %v1585_v22, 0.0  ;;  %v1393_v20 = vshll.u32 %v2497_v59, 16 }
 0x118   : > { %v1373_v45 = vadd.s32 %v1371_v8, %v1369_v16  ;;  %vm1395_vm13 = vc.u32 %v1387_v3, %v1391_v32  ;;  %v2523_v33 = vsub.s32 %v2356_v55, %v1348_v17  ;;  %vm244_vm9 = vcmask 123904  }
 0x119   : > { %v1137_v25 = vadd.f32 %v2380_v18, %v1057_v34  ;;  %v1365_v18 = vshrl.u32 %v2442_v29, 16  ;;  %v805_v29 = vpop.f32.mrf.mxu1  ;;  %v1413_v34 = vand.u32 65535, %v2504_v38  ;;  %245 = vst.msk [vmem:[%s2596_s21] sm:$0x3] %vm244_vm9, %v1954_v31 }
 0x11a   : > { %v1374_v60 = vadd.s32 %v1373_v45, %v1363_v12  ;;  %vm1473_vm15 = vcmp.ne.s32.totalorder %v2523_v33, 0  ;;  %vm1483_vm0 = vcmp.lt.s32.totalorder %v2523_v33, 0 }
 0x11b   : > { %v1147_v49 = vpack.c.bf16 %v1137_v25, %v1137_v25  ;;  %v1549_v46 = vmul.f32 %v1868_v62, %v1137_v25  ;;  %v823_v62 = vadd.f32 %v802_v39, %v2264_v9  ;;  %vm2553_vm4 = vmand %vm1483_vm0, %vm1473_vm15 }
 0x11c   : > { %v914_v30 = vpop.f32.mrf.mxu2  ;;  %v1375_v51 = vadd.s32 %v1374_v60, %v1365_v18 }
 0x11d   : > { %1158 = vst.msk [vmem:[%s2438_s18 + $0x4] sm:$0xf] %vm1156_vm11, %v1147_v49  ;;  %v1560_v7 = vsel %vm1558_vm7, %v1549_v46, 0.0  ;;  %v1586_v36 = vmul.f32 %v1549_v46, %v1137_v25  ;;  %v936_v11 = vadd.f32 %v914_v30, %v822_v28  ;;  %v1397_v28 = vadd.s32 %v1391_v32, %v1387_v3  ;;  %v1121_v0 = vpop.f32.mrf.mxu0 }
 0x11e   : > { %v1561_v63 = vadd.f32 %v1560_v7, %v1559_v37  ;;  %v1376_v27 = vshrl.u32 %v1375_v51, 3  ;;  %v1414_v25 = vshrl.u32 %v2504_v38, 16  ;;  %v1417_v49 = vmul.u32 52428, %v1413_v34 }
 0x11f   : > { %v1596_v4 = vsel %vm1558_vm7, %v1586_v36, 0.0  ;;  %v1058_v5 = vadd.f32 %v2421_v54, %v936_v11  ;;  %v2518_v54 = vsel %vm2493_vm12, 1.0, %v1954_v31  ;;  %v1041_v41 = vpop.f32.mrf.mxu3  ;;  %vm1399_vm14 = vc.u32 %v1397_v28, %v1393_v20 }
 0x120   : > { %v1597_v35 = vadd.f32 %v1596_v4, %v1595_v50  ;;  %v1377_v9 = vmul.u32 10, %v1376_v27  ;;  %v1400_v24 = vsel %vm1399_vm14, 1, %v1953_v42  ;;  %v2531_v46 = vmul.u32 52429, %v1414_v25 }
 0x121   : > { %v1138_v21 = vadd.f32 %v2440_v1, %v1058_v5  ;;  %v1396_v1 = vsel %vm1395_vm13, 1, %v1953_v42  ;;  %v1416_v37 = vmul.u32 52429, %v1413_v34  ;;  %v824_v30 = vadd.f32 %v805_v29, %v2276_v61  ;;  %v807_v57 = vpop.f32.mrf.mxu1 }
 0x122   : > { %v1398_v48 = vadd.s32 %v1396_v1, %v1390_v2  ;;  %v2535_v45 = vsub.s32 %v2405_v26, %v1377_v9  ;;  %v1419_v11 = vmul.u32 52428, %v1414_v25  ;;  %v1420_v60 = vshll.u32 %v1417_v49, 16 }
 0x123   : > { %v1148_v10 = vpack.c.bf16 %v1138_v21, %v1138_v21  ;;  %v1550_v44 = vmul.f32 %v1869_v13, %v1138_v21  ;;  %v1392_v13 = vshrl.u32 %v2489_v40, 16  ;;  %v1394_v40 = vshrl.u32 %v2497_v59, 16 }
 0x124   : > { %v916_v39 = vpop.f32.mrf.mxu2  ;;  %v1402_v7 = vadd.s32 %v1400_v24, %v1398_v48  ;;  %vm1474_vm1 = vcmp.ne.s32.totalorder %v2535_v45, 0  ;;  %vm1424_vm2 = vc.u32 %v1416_v37, %v1420_v60  ;;  %vm1484_vm3 = vcmp.lt.s32.totalorder %v2535_v45, 0 }
 0x125   : > { %1159 = vst.msk [vmem:[%s2438_s18 + $0x8] sm:$0xf] %vm1156_vm11, %v1148_v10  ;;  %v1562_v12 = vsel %vm1558_vm7, %v1550_v44, 0.0  ;;  %v1587_v16 = vmul.f32 %v1550_v44, %v1138_v21  ;;  %v937_v8 = vadd.f32 %v916_v39, %v823_v62  ;;  %v1425_v29 = vsel %vm1424_vm2, 1, %v1953_v42  ;;  %v1123_v10 = vpop.f32.mrf.mxu0  ;;  %vm2577_vm6 = vmand %vm1484_vm3, %vm1474_vm1 }
 0x126   : > { %v1563_v22 = vadd.f32 %v1562_v12, %v1561_v63  ;;  %v1403_v26 = vadd.s32 %v1402_v7, %v1392_v13  ;;  %v1422_v63 = vshll.u32 %v2531_v46, 16  ;;  %v1426_v32 = vadd.s32 %v1420_v60, %v1416_v37 }
 0x127   : > { %v1598_v55 = vsel %vm1558_vm7, %v1587_v16, 0.0  ;;  %v1059_v18 = vadd.f32 %v1038_v58, %v937_v8  ;;  %v1503_v58 = vadd.s32 10, %v2523_v33  ;;  %v1427_v51 = vadd.s32 %v1425_v29, %v1419_v11  ;;  %v1043_v17 = vpop.f32.mrf.mxu3 }
 0x128   : > { %v1599_v56 = vadd.f32 %v1598_v55, %v1597_v35  ;;  %v1421_v20 = vshrl.u32 %v1417_v49, 16  ;;  %vm1428_vm5 = vc.u32 %v1426_v32, %v1422_v63  ;;  %v2558_v62 = vadd.s32 72, %v2256_v19 }
 0x129   : > { %v1139_v36 = vadd.f32 %v1118_v53, %v1059_v18  ;;  %v1404_v53 = vadd.s32 %v1403_v26, %v1394_v40  ;;  %v1429_v28 = vsel %vm1428_vm5, 1, %v1953_v42  ;;  %v1423_v44 = vshrl.u32 %v2531_v46, 16 }
 0x12a   : > { %v1431_v9 = vadd.s32 %v1429_v28, %v1427_v51  ;;  %v1442_v1 = vand.u32 65535, %v2558_v62  ;;  %v1513_v19 = vsel %vm2553_vm4, %v1503_v58, %v2523_v33  ;;  %v1443_v48 = vshrl.u32 %v2558_v62, 16 }
 0x12b   : > { %v1149_v3 = vpack.c.bf16 %v1139_v36, %v1139_v36  ;;  %v1551_v61 = vmul.f32 %v1870_v23, %v1139_v36  ;;  %v1405_v27 = vshrl.u32 %v1404_v53, 3  ;;  %v1504_v25 = vadd.s32 10, %v2535_v45 }
 0x12c   : > { %v919_v59 = vpop.f32.mrf.mxu2  ;;  %v1432_v12 = vadd.s32 %v1431_v9, %v1421_v20  ;;  %v2569_v16 = vmul.u32 52428, %v1442_v1  ;;  %v825_v8 = vadd.f32 %v807_v57, %v2289_v6  ;;  %vm2582_vm8 = vcmp.lt.s32.totalorder %v1513_v19, 8 }
 0x12d   : > { %1160 = vst.msk [vmem:[%s2438_s18 + $0xc] sm:$0xf] %vm1156_vm11, %v1149_v3  ;;  %v1564_v50 = vsel %vm1558_vm7, %v1551_v61, 0.0  ;;  %v1588_v4 = vmul.f32 %v1551_v61, %v1139_v36  ;;  %v938_v5 = vadd.f32 %v919_v59, %v824_v30  ;;  %v1445_v6 = vmul.u32 52429, %v1442_v1  ;;  %v1126_v59 = vpop.f32.mrf.mxu0 }
 0x12e   : > { %v1565_v35 = vadd.f32 %v1564_v50, %v1563_v22  ;;  %v1433_v46 = vadd.s32 %v1432_v12, %v1423_v44  ;;  %v1447_v55 = vmul.u32 52429, %v1443_v48  ;;  %v1449_v30 = vshll.u32 %v2569_v16, 16 }
 0x12f   : > { %v1600_v21 = vsel %vm1558_vm7, %v1588_v4, 0.0  ;;  %v1060_v23 = vadd.f32 %v1041_v41, %v938_v5  ;;  %v810_v41 = vpop.f32.mrf.mxu1  ;;  %v1514_v57 = vsel %vm2577_vm6, %v1504_v25, %v2535_v45  ;;  %v1448_v11 = vmul.u32 52428, %v1443_v48  ;;  %v1046_v26 = vpop.f32.mrf.mxu3 }
 0x130   : > { %v1601_v34 = vadd.f32 %v1600_v21, %v1599_v56  ;;  %v1872_v58 = vsel %vm2582_vm8, 1.0, %v1954_v31  ;;  %v1434_v63 = vshrl.u32 %v1433_v46, 3  ;;  %v1451_v3 = vshll.u32 %v1447_v55, 16 }
 0x131   : > { %v1140_v39 = vadd.f32 %v1121_v0, %v1060_v23  ;;  %v1406_v0 = vmul.u32 10, %v1405_v27  ;;  %vm1453_vm10 = vc.u32 %v1445_v6, %v1449_v30  ;;  %v826_v61 = vadd.f32 %v810_v41, %v2305_v47 }
 0x132   : > { %vm2606_vm12 = vcmp.lt.s32.totalorder %v1514_v57, 8  ;;  %v1454_v53 = vsel %vm1453_vm10, 1, %v1953_v42  ;;  %v1455_v29 = vadd.s32 %v1449_v30, %v1445_v6  ;;  %v1452_v28 = vshrl.u32 %v1447_v55, 16 }
 0x133   : > { %v1150_v13 = vpack.c.bf16 %v1140_v39, %v1140_v39  ;;  %v1552_v22 = vmul.f32 %v2518_v54, %v1140_v39  ;;  %v1407_v36 = vsub.s32 %v2461_v15, %v1406_v0  ;;  %v1456_v4 = vadd.s32 %v1454_v53, %v1448_v11 }
 0x134   : > { %v921_v24 = vpop.f32.mrf.mxu2  ;;  %vm1457_vm15 = vc.u32 %v1455_v29, %v1451_v3 }
 0x135   : > { %1161 = vst.msk [vmem:[%s2438_s18 + $0x10] sm:$0xf] %vm1156_vm11, %v1150_v13  ;;  %v1566_v54 = vsel %vm1558_vm7, %v1552_v22, 0.0  ;;  %v1589_v18 = vmul.f32 %v1552_v22, %v1140_v39  ;;  %v939_v37 = vadd.f32 %v921_v24, %v825_v8  ;;  %vm1475_vm13 = vcmp.ne.s32.totalorder %v1407_v36, 0  ;;  %v1128_v22 = vpop.f32.mrf.mxu0 }
 0x136   : > { %v1567_v56 = vadd.f32 %v1566_v54, %v1565_v35  ;;  %vm1485_vm14 = vcmp.lt.s32.totalorder %v1407_v36, 0  ;;  %v1435_v35 = vmul.u32 10, %v1434_v63  ;;  %v1458_v21 = vsel %vm1457_vm15, 1, %v1953_v42 }
 0x137   : > { %v1602_v40 = vsel %vm1558_vm7, %v1589_v18, 0.0  ;;  %v1061_v7 = vadd.f32 %v1043_v17, %v939_v37  ;;  %v812_v5 = vpop.f32.mrf.mxu1  ;;  %v1450_v17 = vshrl.u32 %v2569_v16, 16  ;;  %v1505_v27 = vadd.s32 10, %v1407_v36  ;;  %vm2619_vm0 = vmand %vm1485_vm14, %vm1475_vm13  ;;  %v1048_v41 = vpop.f32.mrf.mxu3 }
 0x138   : > { %v1603_v60 = vadd.f32 %v1602_v40, %v1601_v34  ;;  %v1460_v34 = vadd.s32 %v1458_v21, %v1456_v4  ;;  %v1873_v39 = vsel %vm2606_vm12, 1.0, %v1954_v31  ;;  %v1436_v42 = vsub.s32 %v2504_v38, %v1435_v35 }
 0x139   : > { %v1141_v45 = vadd.f32 %v1123_v10, %v1061_v7  ;;  %v1515_v25 = vsel %vm2619_vm0, %v1505_v27, %v1407_v36  ;;  %v827_v16 = vadd.f32 %v812_v5, %v2333_v43 }
 0x13a   : > { %v1461_v19 = vadd.s32 %v1460_v34, %v1450_v17  ;;  %vm1476_vm1 = vcmp.ne.s32.totalorder %v1436_v42, 0  ;;  %vm1486_vm2 = vcmp.lt.s32.totalorder %v1436_v42, 0  ;;  %vm1525_vm3 = vcmp.lt.s32.totalorder %v1515_v25, 8 }
 0x13b   : > { %v1151_v32 = vpack.c.bf16 %v1141_v45, %v1141_v45  ;;  %v1553_v50 = vmul.f32 %v1872_v58, %v1141_v45  ;;  %v1506_v55 = vadd.s32 10, %v1436_v42  ;;  %vm2634_vm4 = vmand %vm1486_vm2, %vm1476_vm1 }
 0x13c   : > { %v924_v51 = vpop.f32.mrf.mxu2  ;;  %v1462_v12 = vadd.s32 %v1461_v19, %v1452_v28 }
 0x13d   : > { %1162 = vst.msk [vmem:[%s2438_s18 + $0x14] sm:$0xf] %vm1156_vm11, %v1151_v32  ;;  %v1568_v47 = vsel %vm1558_vm7, %v1553_v50, 0.0  ;;  %v1590_v2 = vmul.f32 %v1553_v50, %v1141_v45  ;;  %v940_v20 = vadd.f32 %v924_v51, %v826_v61  ;;  %v1516_v7 = vsel %vm2634_vm4, %v1506_v55, %v1436_v42  ;;  %v1131_v61 = vpop.f32.mrf.mxu0 }
 0x13e   : > { %v1569_v23 = vadd.f32 %v1568_v47, %v1567_v56  ;;  %v1463_v0 = vshrl.u32 %v1462_v12, 3  ;;  %v1874_v56 = vsel %vm1525_vm3, 1.0, %v1954_v31  ;;  %vm1526_vm8 = vcmp.lt.s32.totalorder %v1516_v7, 8 }
 0x13f   : > { %v1604_v10 = vsel %vm1558_vm7, %v1590_v2, 0.0  ;;  %v1062_v44 = vadd.f32 %v1046_v26, %v940_v20  ;;  %v815_v46 = vpop.f32.mrf.mxu1  ;;  %v1051_v58 = vpop.f32.mrf.mxu3  ;;  %v1875_v32 = vsel %vm1526_vm8, 1.0, %v1954_v31 }
 0x140   : > { %v1605_v1 = vadd.f32 %v1604_v10, %v1603_v60  ;;  %v1464_v54 = vmul.u32 10, %v1463_v0  ;;  %v828_v36 = vadd.f32 %v815_v46, %v2349_v52  ;;  %v1625_v46 = vld [vmem:[%s2596_s21 + $0x1] sm:$0x1] }
 0x141   : > { %v1142_v48 = vadd.f32 %v1126_v59, %v1062_v44 }
 0x142   : > { %v1465_v57 = vsub.s32 %v2558_v62, %v1464_v54 }
 0x143   : > { %v1152_v8 = vpack.c.bf16 %v1142_v48, %v1142_v48  ;;  %v1554_v13 = vmul.f32 %v1873_v39, %v1142_v48 }
 0x144   : > { %v926_v33 = vpop.f32.mrf.mxu2  ;;  %vm1477_vm5 = vcmp.ne.s32.totalorder %v1465_v57, 0  ;;  %vm1487_vm6 = vcmp.lt.s32.totalorder %v1465_v57, 0  ;;  %v1507_v59 = vadd.s32 10, %v1465_v57 }
 0x145   : > { %1163 = vst.msk [vmem:[%s2438_s18 + $0x18] sm:$0xf] %vm1156_vm11, %v1152_v8  ;;  %v1570_v38 = vsel %vm1558_vm7, %v1554_v13, 0.0  ;;  %v1591_v24 = vmul.f32 %v1554_v13, %v1142_v48  ;;  %v941_v49 = vadd.f32 %v926_v33, %v827_v16  ;;  %vm1497_vm9 = vmand %vm1487_vm6, %vm1477_vm5  ;;  %v1133_v10 = vpop.f32.mrf.mxu0 }
 0x146   : > { %v1571_v6 = vadd.f32 %v1570_v38, %v1569_v23  ;;  %v1517_v4 = vsel %vm1497_vm9, %v1507_v59, %v1465_v57  ;;  %v1621_v38 = vld [vmem:[%s2596_s21] sm:$0x1] }
 0x147   : > { %v1606_v43 = vsel %vm1558_vm7, %v1591_v24, 0.0  ;;  %v1063_v18 = vadd.f32 %v1048_v41, %v941_v49  ;;  %v817_v53 = vpop.f32.mrf.mxu1  ;;  %vm1527_vm10 = vcmp.lt.s32.totalorder %v1517_v4, 8  ;;  %v1053_v23 = vpop.f32.mrf.mxu3 }
 0x148   : > { %v1607_v30 = vadd.f32 %v1606_v43, %v1605_v1  ;;  %v829_v5 = vadd.f32 %v817_v53, %v2397_v14  ;;  %v1876_v14 = vsel %vm1527_vm10, 1.0, %v1954_v31 }
 0x149   : > { %v1143_v40 = vadd.f32 %v1128_v22, %v1063_v18 }
 0x14b   : > { %v1153_v11 = vpack.c.bf16 %v1143_v40, %v1143_v40  ;;  %v1555_v60 = vmul.f32 %v1874_v56, %v1143_v40 }
 0x14c   : > { %v929_v26 = vpop.f32.mrf.mxu2 }
 0x14d   : > { %1164 = vst.msk [vmem:[%s2438_s18 + $0x1c] sm:$0xf] %vm1156_vm11, %v1153_v11  ;;  %v1572_v63 = vsel %vm1558_vm7, %v1555_v60, 0.0  ;;  %v1592_v45 = vmul.f32 %v1555_v60, %v1143_v40  ;;  %v942_v3 = vadd.f32 %v929_v26, %v828_v36 }
 0x14e   : > { %v1573_v62 = vadd.f32 %v1572_v63, %v1571_v6 }
 0x14f   : > { %v1608_v15 = vsel %vm1558_vm7, %v1592_v45, 0.0  ;;  %v1064_v52 = vadd.f32 %v1051_v58, %v942_v3 }
 0x150   : > { %v1609_v29 = vadd.f32 %v1608_v15, %v1607_v30 }
 0x151   : > { %v1144_v50 = vadd.f32 %v1131_v61, %v1064_v52 }
 0x153   : > { %v1154_v51 = vpack.c.bf16 %v1144_v50, %v1144_v50  ;;  %v1556_v35 = vmul.f32 %v1875_v32, %v1144_v50 }
 0x154   : > { %v931_v17 = vpop.f32.mrf.mxu2 }
 0x155   : > { %1165 = vst.msk [vmem:[%s2438_s18 + $0x20] sm:$0xf] %vm1156_vm11, %v1154_v51  ;;  %v1574_v47 = vsel %vm1558_vm7, %v1556_v35, 0.0  ;;  %v1593_v2 = vmul.f32 %v1556_v35, %v1144_v50  ;;  %v943_v20 = vadd.f32 %v931_v17, %v829_v5 }
 0x156   : > { %v1575_v21 = vadd.f32 %v1574_v47, %v1573_v62 }
 0x157   : > { %v1610_v27 = vsel %vm1558_vm7, %v1593_v2, 0.0  ;;  %v1065_v28 = vadd.f32 %v1053_v23, %v943_v20 }
 0x158   : > { %v1611_v34 = vadd.f32 %v1610_v27, %v1609_v29 }
 0x159   : > { %v1145_v44 = vadd.f32 %v1133_v10, %v1065_v28 }
 0x15b   : > { %v1155_v9 = vpack.c.bf16 %v1145_v44, %v1145_v44  ;;  %v1557_v1 = vmul.f32 %v1876_v14, %v1145_v44 }
 0x15d   : > { %1166 = vst.msk [vmem:[%s2438_s18 + $0x24] sm:$0xf] %vm1156_vm11, %v1155_v9  ;;  %v1576_v39 = vsel %vm1558_vm7, %v1557_v1, 0.0  ;;  %v1594_v42 = vmul.f32 %v1557_v1, %v1145_v44  ;;  %vm1623_vm11 = vcmask 122880  }
 0x15e   : > { %v1577_v19 = vadd.f32 %v1576_v39, %v1575_v21 }
 0x15f   : > { %v1612_v48 = vsel %vm1558_vm7, %v1594_v42, 0.0 }
 0x160   : > { %v1578_v41 = vrot.slane %v1577_v19, 4  ;;  %v1613_v25 = vadd.f32 %v1612_v48, %v1611_v34 }
 0x162   : > { %v1579_v12 = vadd.f32 %v1578_v41, %v1577_v19  ;;  %v1614_v16 = vrot.slane %v1613_v25, 4 }
 0x164   : > { %v1580_v31 = vrot.slane %v1579_v12, 2  ;;  %v1615_v8 = vadd.f32 %v1614_v16, %v1613_v25 }
 0x166   : > { %v1581_v13 = vadd.f32 %v1580_v31, %v1579_v12  ;;  %v1616_v22 = vrot.slane %v1615_v8, 2 }
 0x168   : > { %v1582_v33 = vrot.slane %v1581_v13, 1  ;;  %v1617_v0 = vadd.f32 %v1616_v22, %v1615_v8 }
 0x16a   : > { %v1583_v24 = vadd.f32 %v1582_v33, %v1581_v13  ;;  %v1618_v49 = vrot.slane %v1617_v0, 1 }
 0x16c   : > { %v1619_v6 = vadd.f32 %v1618_v49, %v1617_v0  ;;  %v1622_v55 = vadd.f32 %v1621_v38, %v1583_v24 }
 0x16e   : > { %1624 = vst.msk [vmem:[%s2596_s21] sm:$0x1] %vm1623_vm11, %v1622_v55  ;;  %v1626_v54 = vadd.f32 %v1625_v46, %v1619_v6 }
 0x170   : > { %1627 = vst.msk [vmem:[%s2596_s21 + $0x1] sm:$0x1] %vm1623_vm11, %v1626_v54 }
 0x171 PF: > { %s14_s14 = sadd.s32 1, %s1951_s14   ;;  %s2707_s12 = smov %s1947_s13 }
 0x172   : > { %p11_p5 = scmp.ge.s32.totalorder %s14_s14, 4   ;;  %s2708_s13 = smov %s2710_s15 }
 0x174   :  { %13 = sbr.rel (!%p11_p5) target bundleno = 2 (0x2), region = 82 }

// kernel: _lambda_.6
= control target key start
LH: loop header
LB: loop body
LE: loop exit
PB: predicated region body
PF: predicated region fallthrough
CT: control target
= control target key end

     0   :  { %s5555_s12 = smov 0   ;;  %s5557_s13 = smov 0   ;;  %s7642_s0 = inlined_call_operand.vmem [shape: bf16[2,1,342,8], index: 0, kind: input, shape index: {}]   ;;  %s7643_s1 = inlined_call_operand.vmem [shape: bf16[9,8,8], index: 1, kind: input, shape index: {}]   ;;  %s7644_s2 = inlined_call_operand.vmem [shape: bf16[2,1,288,8], index: 2, kind: output, shape index: {0}]   ;;  %s7645_s3 = inlined_call_operand.vmem [shape: f32[2,2,8], index: 3, kind: output, shape index: {1}]  }
   0x1   :  { %s5559_s14 = smov 0  }
   0x2 LB: > { %s33_s15 = sadd.s32 1, %s5527_s13  ;;  %p4989_p0 = scmp.ge.s32.totalorder %s5531_s14, 1  ;;  %s5531_s14 = sphi %s5559_s14, %s14_s14   ;;  %s5527_s13 = sphi %s5557_s13, %s7777_s13   ;;  %s5523_s12 = sphi %s5555_s12, %s7776_s12  }
   0x3   : > { %p35_p1 = scmp.ge.s32.totalorder %s33_s15, 2  ;;  %p173_p2 = scmp.lt.s32.totalorder %s5531_s14, 3 }
   0x5   : > { %s7779_s15 = smov (%p35_p1, %s33_s15), 0  ;;  %p174_p3 = pnand %p4989_p0, %p173_p2 }
   0x7   : > { %177 = sbr.rel (%p174_p3) target bundleno = 886 (0x376), region = 28 }
   0xc   : > { %v264_v0 = vld [vmem:[%s7643_s1] sm:$0xf]  ;;  %vm421_vm0 = vcmask 1043456   ;;  %p212_p4 = scmp.lt.s32.totalorder %s5523_s12, 1  ;;  %v4993_v2 = vld [vmem:[%s7643_s1 + $0x4] sm:$0xf] }
   0xd   : > { %v498_v1 = vsel %vm421_vm0, %v264_v0, 0  ;;  %v423_v3 = vsel %vm421_vm0, %v4993_v2, 0  ;;  %v5096_v4 = vld [vmem:[%s7643_s1 + $0x10] sm:$0xf]  ;;  %v5106_v5 = vld [vmem:[%s7643_s1 + $0x14] sm:$0xf] }
   0xe   : > { %507 = vmatpush.bf16.msra.mxu1 %v498_v1  ;;  %s7781_s12 = smov (!%p212_p4, %s5523_s12), 1  ;;  %5465 = vmatpush.bf16.msra.mxu3 %v498_v1  ;;  %v996_v6 = vsel %vm421_vm0, %v5096_v4, 0  ;;  %v1124_v7 = vsel %vm421_vm0, %v5106_v5, 0  ;;  %v5044_v8 = vld [vmem:[%s7643_s1 + $0x8] sm:$0xf]  ;;  %vm393_vm1 = vcmask 64512  }
   0xf   : > { %432 = vmatpush.bf16.msra.mxu0 %v423_v3  ;;  %5464 = vmatpush.bf16.msra.mxu2 %v423_v3  ;;  %v5054_v9 = vld [vmem:[%s7643_s1 + $0xc] sm:$0xf]  ;;  %s5466_s28 = smul.u32 172, %s7781_s12  ;;  %v608_v10 = vsel %vm421_vm0, %v5044_v8, 0  ;;  %vm316_vm2 = vsmask.f32 7424 }
  0x10   : > { %v798_v11 = vsel %vm421_vm0, %v5054_v9, 0  ;;  %v5116_v57 = vld [vmem:[%s7643_s1 + $0x18] sm:$0xf]  ;;  %v5158_v58 = vld [vmem:[%s7643_s1 + $0x1c] sm:$0xf]  ;;  %vm560_vm3 = vcmask 1046528  }
  0x11   : > { %s5603_s4 = scalar_lea.vmem %s7642_s0, %s5466_s28  ;;  %v1314_v60 = vsel %vm421_vm0, %v5116_v57, 0  ;;  %v1512_v61 = vsel %vm421_vm0, %v5158_v58, 0  ;;  %vm1076_vm4 = vcmask 1045504   ;;  %vm878_vm5 = vsmask.f32 6400  ;;  %s5467_s7 = smul.u32 144, %s7781_s12 }
  0x12   : > { %1133 = vmatpush.bf16.msrb.mxu1 %v1124_v7  ;;  %807 = vmatpush.bf16.msrb.mxu3 %v798_v11  ;;  %v5450_v12 = vld [vmem:[%s5603_s4] sm:$0xff]   ;;  %v5607_v13 = vld [vmem:[%s5603_s4 + $0x8] sm:$0xff]  ;;  %v5614_v17 = vld [vmem:[%s5603_s4 + $0x30] sm:$0xff]  ;;  %vm1394_vm6 = vsmask.f32 5376  ;;  %vm1592_vm7 = vcmask 1044480  }
  0x13   : > { %1005 = vmatpush.bf16.msrb.mxu0 %v996_v6  ;;  %617 = vmatpush.bf16.msrb.mxu2 %v608_v10  ;;  %v5610_v14 = vld [vmem:[%s5603_s4 + $0x28] sm:$0xff]  ;;  %v318_v15 = vshrl.u32 %v5450_v12, 16  ;;  %v320_v16 = vshll.u32 %v5450_v12, 16  ;;  %v325_v18 = vshll.u32 %v5607_v13, 16  ;;  %v365_v22 = vshll.u32 %v5614_v17, 16  ;;  %v5630_v30 = vld [vmem:[%s5603_s4 + $0x10] sm:$0xff]  ;;  %s6365_s10 = scalar_lea.vmem %s7644_s2, %s5467_s7 }
  0x14   : > { %5035 = vmatmul.msk.bf16.vlgmr.msra.gmra.mxu1 %vm393_vm1, %v5450_v12  ;;  %5040 = vmatmul.msk.bf16.vlgmr.msra.gmra.mxu3 %vm393_vm1, %v5610_v14  ;;  %v357_v19 = vshll.u32 %v5610_v14, 16  ;;  %v361_v20 = vshrl.u32 %v5610_v14, 16  ;;  %v5633_v31 = vld [vmem:[%s5603_s4 + $0x38] sm:$0xff]  ;;  %v329_v32 = vshrl.u32 %v5607_v13, 16  ;;  %v333_v33 = vshll.u32 %v5630_v30, 16  ;;  %v5651_v43 = vld [vmem:[%s5603_s4 + $0x40] sm:$0xff] }
  0x15   : > { %v322_v21 = vrot.slane %v320_v16, 1  ;;  %v327_v23 = vrot.slane %v325_v18, 1  ;;  %v367_v26 = vrot.slane %v365_v22, 1  ;;  %v369_v34 = vshrl.u32 %v5614_v17, 16  ;;  %v5648_v42 = vld [vmem:[%s5603_s4 + $0x18] sm:$0xff]  ;;  %v5667_v56 = vld [vmem:[%s5603_s4 + $0x20] sm:$0xff] }
  0x16   : > { %v5622_v24 = vrot.slane %v357_v19, 1  ;;  %v373_v35 = vshll.u32 %v5633_v31, 16  ;;  %v335_v37 = vrot.slane %v333_v33, 1  ;;  %v337_v44 = vshrl.u32 %v5630_v30, 16  ;;  %v265_v52 = vld [vmem:[%s5603_s4 + $0x48] sm:$0x1]  ;;  %1521 = vmatpush.bf16.msra.mxu3 %v1512_v61 }
  0x17   : > { %v323_v25 = vor.u32 %v322_v21, %v318_v15  ;;  %v331_v36 = vor.u32 %v329_v32, %v327_v23  ;;  %v371_v38 = vor.u32 %v369_v34, %v367_v26  ;;  %v341_v45 = vshll.u32 %v5648_v42, 16  ;;  %v682_v2 = vld [vmem:[%s5603_s4 + $0x8] sm:$0xe]  ;;  %v683_v3 = vld [vmem:[%s5603_s4 + $0xc] sm:$0xf]  ;;  %v5409_v16 = vld [vmem:[%s5603_s4 + $0x10] sm:$0xff] }
  0x18   : > { %v363_v27 = vor.u32 %v361_v20, %v5622_v24  ;;  %v375_v39 = vrot.slane %v373_v35, 1  ;;  %v377_v46 = vshrl.u32 %v5633_v31, 16  ;;  %v381_v47 = vshll.u32 %v5651_v43, 16  ;;  %v5168_v19 = vld [vmem:[%s7643_s1 + $0x20] sm:$0xf] }
  0x19   : > { %v328_v28 = vsel %vm316_vm2, %v323_v25, %v327_v23  ;;  %v336_v40 = vsel %vm316_vm2, %v331_v36, %v335_v37  ;;  %v339_v48 = vor.u32 %v337_v44, %v335_v37  ;;  %v343_v49 = vrot.slane %v341_v45, 1  ;;  %v5196_v21 = vld [vmem:[%s7643_s1 + $0x4] sm:$0xf]  ;;  %v1070_v33 = vld [vmem:[%s5603_s4 + $0x8] sm:$0xc] }
  0x1a   : > { %5026 = vmatmul.msk.bf16.vlgmr.msra.gmra.mxu0 %vm393_vm1, %v328_v28  ;;  %v368_v29 = vsel %vm316_vm2, %v363_v27, %v367_v26  ;;  %v376_v41 = vsel %vm316_vm2, %v371_v38, %v375_v39  ;;  %v379_v50 = vor.u32 %v377_v46, %v375_v39  ;;  %v383_v51 = vrot.slane %v381_v47, 1  ;;  %v5457_v26 = vld [vmem:[%s5603_s4] sm:$0xf0]  ;;  %v5458_v27 = vld [vmem:[%s5603_s4] sm:$0xe] }
  0x1b   : > { %5031 = vmatmul.msk.bf16.vlgmr.msra.gmra.mxu2 %vm393_vm1, %v368_v29  ;;  %v344_v53 = vsel %vm316_vm2, %v339_v48, %v343_v49  ;;  %v305_v55 = vunpack.c.l.b16 %v265_v52  ;;  %v345_v62 = vshrl.u32 %v5648_v42, 16  ;;  %v349_v63 = vshll.u32 %v5667_v56, 16 }
  0x1c   : > { %v384_v54 = vsel %vm316_vm2, %v379_v50, %v383_v51  ;;  %1323 = vmatpush.bf16.msra.mxu2 %v1314_v60  ;;  %v385_v0 = vshrl.u32 %v5651_v43, 16  ;;  %v722_v8 = vunpack.c.l.b16 %v682_v2  ;;  %v723_v9 = vunpack.c.l.b16 %v683_v3  ;;  %v5411_v60 = vld [vmem:[%s5603_s4 + $0x20] sm:$0xff] }
  0x1d   : > { %v5675_v59 = vpack.c.b16 %v305_v55, %v305_v55  ;;  %v347_v4 = vor.u32 %v345_v62, %v343_v49  ;;  %v351_v5 = vrot.slane %v349_v63, 1  ;;  %v562_v12 = vrot.slane %v5607_v13, 1 }
  0x1e   : > { %v387_v6 = vor.u32 %v385_v0, %v383_v51  ;;  %v564_v15 = vrot.slane %v5630_v30, 1  ;;  %v741_v18 = vpack.c.b16 %v723_v9, %v722_v8  ;;  %v2729_v22 = vsel %vm421_vm0, %v5196_v21, 0 }
  0x1f   : > { %v389_v1 = vshll.u32 %v5675_v59, 16  ;;  %v352_v10 = vsel %vm316_vm2, %v347_v4, %v351_v5  ;;  %v752_v25 = vrot.slane %v5409_v16, 1  ;;  %2738 = vmatpush.bf16.msra.mxu1 %v2729_v22  ;;  %v353_v28 = vshrl.u32 %v5667_v56, 16  ;;  %v5749_v22 = vld [vmem:[%s5603_s4 + $0x30] sm:$0xff] }
  0x20   : > { %v565_v20 = vsel %vm560_vm3, %v562_v12, %v564_v15  ;;  %v751_v23 = vrot.slane %v741_v18, 1  ;;  %v5459_v29 = vor.u32 %v5458_v27, %v5457_v26  ;;  %v1074_v36 = vunpack.c.l.b16 %v1070_v33 }
  0x21   : > { %v391_v7 = vrot.slane %v389_v1, 1  ;;  %v355_v34 = vor.u32 %v353_v28, %v351_v5  ;;  %v883_v44 = vshll.u32 %v741_v18, 16  ;;  %v888_v45 = vshrl.u32 %v5409_v16, 16 }
  0x22   : > { %v753_v32 = vsel %vm560_vm3, %v751_v23, %v752_v25  ;;  %v561_v35 = vrot.slane %v5459_v29, 1  ;;  %v1075_v39 = vpack.c.b16 %v723_v9, %v1074_v36  ;;  %v891_v46 = vshll.u32 %v5409_v16, 16  ;;  %v5412_v9 = vld [vmem:[%s5603_s4 + $0x28] sm:$0xff] }
  0x23   : > { %v392_v11 = vsel %vm316_vm2, %v387_v6, %v391_v7  ;;  %v360_v37 = vsel %vm316_vm2, %v355_v34, %v5622_v24  ;;  %v1078_v48 = vrot.slane %v5409_v16, 2  ;;  %v885_v51 = vrot.slane %v883_v44, 2  ;;  %v5764_v44 = vld [vmem:[%s5603_s4 + $0x38] sm:$0xff] }
  0x24   : > { %5036 = vmatmul.msk.bf16.gmra.mxu1 %vm393_vm1, %v5607_v13  ;;  %5041 = vmatmul.msk.bf16.gmra.mxu3 %vm393_vm1, %v5614_v17  ;;  %v1640_v13 = vsel %vm421_vm0, %v5168_v19, 0  ;;  %v563_v38 = vsel %vm560_vm3, %v561_v35, %v562_v12  ;;  %v1077_v47 = vrot.slane %v1075_v39, 2  ;;  %v890_v24 = vrot.slane %v888_v45, 1 }
  0x25   : > { %1649 = vmatpush.bf16.msra.mxu0 %v1640_v13  ;;  %v893_v52 = vrot.slane %v891_v46, 2  ;;  %v756_v0 = vrot.slane %v5411_v60, 1  ;;  %v566_v6 = vrot.slane %v5648_v42, 1  ;;  %v1082_v12 = vrot.slane %v5411_v60, 2 }
  0x26   : > { %v758_v16 = vrot.slane %v5412_v9, 1  ;;  %v915_v23 = vshrl.u32 %v5412_v9, 16  ;;  %v1084_v26 = vrot.slane %v5412_v9, 2  ;;  %v760_v27 = vrot.slane %v5749_v22, 1 }
  0x27   : > { %v894_v57 = vor.u32 %v893_v52, %v890_v24  ;;  %v567_v8 = vsel %vm560_vm3, %v564_v15, %v566_v6  ;;  %v568_v15 = vrot.slane %v5667_v56, 1  ;;  %v570_v35 = vrot.slane %v5610_v14, 1 }
  0x28   : > { %v917_v28 = vrot.slane %v915_v23, 1  ;;  %v761_v33 = vsel %vm560_vm3, %v758_v16, %v760_v27  ;;  %v924_v45 = vshrl.u32 %v5749_v22, 16  ;;  %v927_v46 = vshll.u32 %v5749_v22, 16 }
  0x29   : > { %v569_v21 = vsel %vm560_vm3, %v566_v6, %v568_v15  ;;  %v1086_v14 = vrot.slane %v5749_v22, 2  ;;  %v936_v6 = vshll.u32 %v5764_v44, 16 }
  0x2a   : > { %5027 = vmatmul.msk.bf16.gmra.mxu0 %vm393_vm1, %v336_v40  ;;  %v5410_v40 = vld [vmem:[%s5603_s4 + $0x18] sm:$0xff]  ;;  %v926_v24 = vrot.slane %v924_v45, 1  ;;  %v929_v52 = vrot.slane %v927_v46, 2 }
  0x2b   : > { %5032 = vmatmul.msk.bf16.gmra.mxu2 %vm393_vm1, %v376_v41  ;;  %v880_v41 = vshrl.u32 %v741_v18, 16  ;;  %v754_v49 = vrot.slane %v5410_v40, 1  ;;  %v897_v61 = vshrl.u32 %v5410_v40, 16  ;;  %v900_v62 = vshll.u32 %v5410_v40, 16 }
  0x2c   : > { %v1080_v63 = vrot.slane %v5410_v40, 2 }
  0x2d   : > { %v882_v50 = vrot.slane %v880_v41, 1  ;;  %v899_v1 = vrot.slane %v897_v61, 1  ;;  %v902_v2 = vrot.slane %v900_v62, 2  ;;  %v757_v4 = vsel %vm560_vm3, %v754_v49, %v756_v0 }
  0x2e   : > { %v1081_v3 = vsel %vm1076_vm4, %v1078_v48, %v1080_v63  ;;  %v571_v41 = vsel %vm560_vm3, %v568_v15, %v570_v35 }
  0x2f   : > { %v886_v55 = vor.u32 %v885_v51, %v882_v50  ;;  %v903_v5 = vor.u32 %v902_v2, %v899_v1 }
  0x31   : > { %v895_v58 = vsel %vm878_vm5, %v886_v55, %v894_v57  ;;  %v904_v7 = vsel %vm878_vm5, %v894_v57, %v903_v5  ;;  %v1087_v55 = vsel %vm1076_vm4, %v1084_v26, %v1086_v14 }
  0x34   : > { %5037 = vmatmul.msk.bf16.gmra.mxu1 %vm393_vm1, %v5630_v30  ;;  %5042 = vmatmul.msk.bf16.gmra.mxu3 %vm393_vm1, %v5633_v31 }
  0x3a   : > { %5028 = vmatmul.msk.bf16.gmra.mxu0 %vm393_vm1, %v344_v53  ;;  %v1079_v53 = vsel %vm1076_vm4, %v1077_v47, %v1078_v48  ;;  %v762_v47 = vrot.slane %v5764_v44, 1 }
  0x3b   : > { %5033 = vmatmul.msk.bf16.gmra.mxu2 %vm393_vm1, %v384_v54  ;;  %v755_v54 = vsel %vm560_vm3, %v752_v25, %v754_v49  ;;  %v918_v25 = vshll.u32 %v5412_v9, 16 }
  0x3c   : > { %v763_v57 = vsel %vm560_vm3, %v760_v27, %v762_v47 }
  0x3d   : > { %v920_v29 = vrot.slane %v918_v25, 2 }
  0x3f   : > { %v921_v34 = vor.u32 %v920_v29, %v917_v28 }
  0x44   : > { %5038 = vmatmul.msk.bf16.gmra.mxu1 %vm393_vm1, %v5648_v42  ;;  %5043 = vmatmul.msk.bf16.gmra.mxu3 %vm393_vm1, %v5651_v43  ;;  %v1083_v42 = vsel %vm1076_vm4, %v1080_v63, %v1082_v12 }
  0x4a   : > { %5029 = vmatmul.msk.bf16.gmra.mxu0 %vm393_vm1, %v352_v10  ;;  %v906_v10 = vshrl.u32 %v5411_v60, 16 }
  0x4b   : > { %5034 = vmatmul.msk.bf16.gmra.mxu2 %vm393_vm1, %v392_v11  ;;  %v909_v11 = vshll.u32 %v5411_v60, 16  ;;  %v572_v60 = vrot.slane %v5614_v17, 1  ;;  %v933_v17 = vshrl.u32 %v5764_v44, 16 }
  0x4c   : > { %v908_v18 = vrot.slane %v906_v10, 1 }
  0x4d   : > { %v911_v19 = vrot.slane %v909_v11, 2 }
  0x4f   : > { %v912_v30 = vor.u32 %v911_v19, %v908_v18  ;;  %v938_v18 = vrot.slane %v936_v6, 2 }
  0x51   : > { %v913_v13 = vsel %vm878_vm5, %v903_v5, %v912_v30  ;;  %v5788_v5 = vld [vmem:[%s5603_s4 + $0x40] sm:$0xff] }
  0x54   : > { %5039 = vmatmul.msk.bf16.gmra.mxu1 %vm393_vm1, %v5667_v56  ;;  %5087 = vmatmul.msk.bf16.vlgmr.msrb.gmra.mxu3 %vm393_vm1, %v753_v32  ;;  %v1085_v56 = vsel %vm1076_vm4, %v1082_v12, %v1084_v26 }
  0x5a   : > { %5030 = vmatmul.msk.bf16.gmra.mxu0 %vm393_vm1, %v360_v37  ;;  %v922_v37 = vsel %vm878_vm5, %v912_v30, %v921_v34 }
  0x5b   : > { %5045 = vmatmul.msk.bf16.vlgmr.msrb.gmra.mxu2 %vm393_vm1, %v563_v38 }
  0x64   : > { %5107 = vmatmul.msk.bf16.vlgmr.msrb.gmra.mxu1 %vm393_vm1, %v1079_v53  ;;  %5088 = vmatmul.msk.bf16.gmra.mxu3 %vm393_vm1, %v755_v54 }
  0x6a   : > { %5097 = vmatmul.msk.bf16.vlgmr.msrb.gmra.mxu0 %vm393_vm1, %v895_v58  ;;  %v930_v58 = vor.u32 %v929_v52, %v926_v24 }
  0x6b   : > { %5046 = vmatmul.msk.bf16.gmra.mxu2 %vm393_vm1, %v565_v20  ;;  %v759_v20 = vsel %vm560_vm3, %v756_v0, %v758_v16  ;;  %v935_v16 = vrot.slane %v933_v17, 1 }
  0x6c   : > { %v931_v0 = vsel %vm878_vm5, %v921_v34, %v930_v58 }
  0x6d   : > { %v939_v15 = vor.u32 %v938_v18, %v935_v16 }
  0x6f   : > { %v940_v25 = vsel %vm878_vm5, %v930_v58, %v939_v15 }
  0x74   : > { %5108 = vmatmul.msk.bf16.gmra.mxu1 %vm393_vm1, %v1081_v3  ;;  %5089 = vmatmul.msk.bf16.gmra.mxu3 %vm393_vm1, %v757_v4  ;;  %v573_v4 = vsel %vm560_vm3, %v570_v35, %v572_v60 }
  0x7a   : > { %5098 = vmatmul.msk.bf16.gmra.mxu0 %vm393_vm1, %v904_v7  ;;  %v1088_v7 = vrot.slane %v5764_v44, 2 }
  0x7b   : > { %5047 = vmatmul.msk.bf16.gmra.mxu2 %vm393_vm1, %v567_v8  ;;  %v764_v8 = vrot.slane %v5788_v5, 1 }
  0x7d   : > { %v765_v30 = vsel %vm560_vm3, %v762_v47, %v764_v8  ;;  %v700_v47 = vld [vmem:[%s5603_s4 + $0x50] sm:$0x1] }
  0x84   : > { %5109 = vmatmul.msk.bf16.gmra.mxu1 %vm393_vm1, %v1083_v42  ;;  %5090 = vmatmul.msk.bf16.gmra.mxu3 %vm393_vm1, %v759_v20  ;;  %v1089_v20 = vsel %vm1076_vm4, %v1086_v14, %v1088_v7 }
  0x8a   : > { %5099 = vmatmul.msk.bf16.gmra.mxu0 %vm393_vm1, %v913_v13  ;;  %v574_v13 = vrot.slane %v5633_v31, 1  ;;  %v942_v31 = vshrl.u32 %v5788_v5, 16 }
  0x8b   : > { %5048 = vmatmul.msk.bf16.gmra.mxu2 %vm393_vm1, %v569_v21 }
  0x8c   : > { %v575_v29 = vsel %vm560_vm3, %v572_v60, %v574_v13 }
  0x91   : > { %v509_v32 = vpop.f32.mrf.mxu1 }
  0x94   : > { %5110 = vmatmul.msk.bf16.gmra.mxu1 %vm393_vm1, %v1085_v56  ;;  %5091 = vmatmul.msk.bf16.gmra.mxu3 %vm393_vm1, %v761_v33  ;;  %v945_v56 = vshll.u32 %v5788_v5, 16  ;;  %v1090_v33 = vrot.slane %v5788_v5, 2 }
  0x96   : > { %v1091_v46 = vsel %vm1076_vm4, %v1088_v7, %v1090_v33 }
  0x97   : > { %v434_v36 = vpop.f32.mrf.mxu0  ;;  %v534_v38 = vpop.f32.mrf.mxu3 }
  0x98   : > { %v5760_v39 = vadd.f32 %v509_v32, %v434_v36  ;;  %v5812_v32 = vld [vmem:[%s5603_s4 + $0x48] sm:$0xff] }
  0x99   : > { %v511_v40 = vpop.f32.mrf.mxu1  ;;  %v766_v34 = vrot.slane %v5812_v32, 1 }
  0x9a   : > { %5100 = vmatmul.msk.bf16.gmra.mxu0 %vm393_vm1, %v922_v37 }
  0x9b   : > { %5049 = vmatmul.msk.bf16.gmra.mxu2 %vm393_vm1, %v571_v41  ;;  %v947_v41 = vrot.slane %v945_v56, 2  ;;  %v767_v14 = vsel %vm560_vm3, %v764_v8, %v766_v34 }
  0x9e   : > { %v459_v48 = vpop.f32.mrf.mxu2 }
  0x9f   : > { %v436_v49 = vpop.f32.mrf.mxu0  ;;  %v5772_v50 = vadd.f32 %v534_v38, %v459_v48  ;;  %v536_v51 = vpop.f32.mrf.mxu3 }
  0xa0   : > { %v5774_v53 = vadd.f32 %v511_v40, %v436_v49  ;;  %v944_v40 = vrot.slane %v942_v31, 1  ;;  %v576_v49 = vrot.slane %v5651_v43, 1  ;;  %v951_v43 = vshrl.u32 %v5812_v32, 16 }
  0xa1   : > { %v514_v54 = vpop.f32.mrf.mxu1  ;;  %v578_v31 = vrot.slane %v5675_v59, 1 }
  0xa2   : > { %v948_v48 = vor.u32 %v947_v41, %v944_v40 }
  0xa3   : > { %v579_v59 = vsel %vm560_vm3, %v576_v49, %v578_v31 }
  0xa4   : > { %5111 = vmatmul.msk.bf16.gmra.mxu1 %vm393_vm1, %v1087_v55  ;;  %5092 = vmatmul.msk.bf16.gmra.mxu3 %vm393_vm1, %v763_v57  ;;  %v949_v55 = vsel %vm878_vm5, %v939_v15, %v948_v48  ;;  %v5247_v15 = vld [vmem:[%s7643_s1 + $0x8] sm:$0xf] }
  0xa6   : > { %v461_v61 = vpop.f32.mrf.mxu2 }
  0xa7   : > { %v439_v62 = vpop.f32.mrf.mxu0  ;;  %v5781_v63 = vadd.f32 %v536_v51, %v461_v61  ;;  %v539_v1 = vpop.f32.mrf.mxu3  ;;  %v740_v51 = vunpack.c.l.b16 %v700_v47  ;;  %v577_v61 = vsel %vm560_vm3, %v574_v13, %v576_v49  ;;  %v5299_v49 = vld [vmem:[%s7643_s1 + $0x10] sm:$0xf] }
  0xa8   : > { %v5784_v2 = vadd.f32 %v514_v54, %v439_v62 }
  0xa9   : > { %v516_v3 = vpop.f32.mrf.mxu1  ;;  %v750_v62 = vpack.c.b16 %v740_v51, %v740_v51 }
  0xaa   : > { %5101 = vmatmul.msk.bf16.gmra.mxu0 %vm393_vm1, %v931_v0  ;;  %v1198_v0 = vld [vmem:[%s5603_s4 + $0x10] sm:$0xc] }
  0xab   : > { %5050 = vmatmul.msk.bf16.gmra.mxu2 %vm393_vm1, %v573_v4  ;;  %v1092_v4 = vrot.slane %v5812_v32, 2  ;;  %v768_v5 = vrot.slane %v750_v62, 1  ;;  %v1238_v17 = vunpack.c.l.b16 %v1198_v0 }
  0xad   : > { %v769_v13 = vsel %vm560_vm3, %v766_v34, %v768_v5 }
  0xae   : > { %v464_v9 = vpop.f32.mrf.mxu2 }
  0xaf   : > { %v441_v10 = vpop.f32.mrf.mxu0  ;;  %v5796_v11 = vadd.f32 %v539_v1, %v464_v9  ;;  %v541_v12 = vpop.f32.mrf.mxu3  ;;  %v5839_v1 = vld [vmem:[%s5603_s4 + $0x14] sm:$0xf] }
  0xb0   : > { %v5798_v19 = vadd.f32 %v516_v3, %v441_v10  ;;  %v954_v3 = vshll.u32 %v5812_v32, 16  ;;  %v1239_v6 = vunpack.c.l.b16 %v5839_v1 }
  0xb1   : > { %v519_v42 = vpop.f32.mrf.mxu1 }
  0xb2   : > { %v956_v16 = vrot.slane %v954_v3, 2 }
  0xb4   : > { %5112 = vmatmul.msk.bf16.gmra.mxu1 %vm393_vm1, %v1089_v20  ;;  %5093 = vmatmul.msk.bf16.gmra.mxu3 %vm393_vm1, %v765_v30  ;;  %v1093_v20 = vsel %vm1076_vm4, %v1090_v33, %v1092_v4  ;;  %v2574_v30 = vld [vmem:[%s7643_s1] sm:$0xf] }
  0xb6   : > { %v466_v21 = vpop.f32.mrf.mxu2 }
  0xb7   : > { %v444_v22 = vpop.f32.mrf.mxu0  ;;  %v5805_v23 = vadd.f32 %v541_v12, %v466_v21  ;;  %v544_v26 = vpop.f32.mrf.mxu3  ;;  %v953_v12 = vrot.slane %v951_v43, 1  ;;  %v872_v21 = vld [vmem:[%s5603_s4 + $0x50] sm:$0x3]  ;;  %v3297_v43 = vsel %vm421_vm0, %v5299_v49, 0 }
  0xb8   : > { %v5808_v27 = vadd.f32 %v519_v42, %v444_v22  ;;  %v5862_v22 = vld [vmem:[%s5603_s4 + $0x18] sm:$0xff]  ;;  %v876_v56 = vunpack.c.l.b16 %v872_v21  ;;  %3306 = vmatpush.bf16.msrb.mxu1 %v3297_v43  ;;  %v5460_v21 = vld [vmem:[%s5603_s4 + $0x48] sm:$0xff]  }
  0xb9   : > { %v521_v28 = vpop.f32.mrf.mxu1  ;;  %v1268_v31 = vrot.slane %v5862_v22, 2  ;;  %v2628_v32 = vshll.u32 %v5460_v21, 16 }
  0xba   : > { %5102 = vmatmul.msk.bf16.gmra.mxu0 %vm393_vm1, %v940_v25  ;;  %v5866_v25 = vpack.c.b16 %v1239_v6, %v1238_v17  ;;  %v877_v51 = vpack.c.b16 %v876_v56, %v876_v56  ;;  %v5909_v56 = vld [vmem:[%s5603_s4 + $0x50] sm:$0xff] }
  0xbb   : > { %5051 = vmatmul.msk.bf16.gmra.mxu2 %vm393_vm1, %v575_v29  ;;  %v957_v29 = vor.u32 %v956_v16, %v953_v12 }
  0xbc   : > { %v1396_v33 = vshrl.u32 %v5866_v25, 16  ;;  %v1399_v34 = vshll.u32 %v5866_v25, 16  ;;  %v1094_v0 = vrot.slane %v877_v51, 2 }
  0xbe   : > { %v469_v35 = vpop.f32.mrf.mxu2 }
  0xbf   : > { %v446_v36 = vpop.f32.mrf.mxu0  ;;  %v5820_v37 = vadd.f32 %v544_v26, %v469_v35  ;;  %v546_v38 = vpop.f32.mrf.mxu3  ;;  %v2804_v26 = vsel %vm421_vm0, %v2574_v30, 0  ;;  %v1404_v35 = vshrl.u32 %v5862_v22, 16  ;;  %v1095_v30 = vsel %vm1076_vm4, %v1092_v4, %v1094_v0 }
  0xc0   : > { %v5822_v44 = vadd.f32 %v521_v28, %v446_v36  ;;  %v2912_v28 = vsel %vm421_vm0, %v5247_v15, 0  ;;  %2813 = vmatpush.bf16.msrb.mxu2 %v2804_v26  ;;  %v1407_v36 = vshll.u32 %v5862_v22, 16  ;;  %v5902_v26 = vld [vmem:[%s5603_s4 + $0x20] sm:$0xff] }
  0xc1   : > { %v524_v45 = vpop.f32.mrf.mxu1  ;;  %2921 = vmatpush.bf16.msrb.mxu3 %v2912_v28  ;;  %v1267_v28 = vrot.slane %v5866_v25, 2  ;;  %v1413_v4 = vshrl.u32 %v5902_v26, 16  ;;  %v1270_v1 = vrot.slane %v5902_v26, 2 }
  0xc3   : > { %v1269_v25 = vsel %vm1076_vm4, %v1267_v28, %v1268_v31 }
  0xc4   : > { %5113 = vmatmul.msk.bf16.gmra.mxu1 %vm393_vm1, %v1091_v46  ;;  %5094 = vmatmul.msk.bf16.gmra.mxu3 %vm393_vm1, %v767_v14 }
  0xc6   : > { %v471_v24 = vpop.f32.mrf.mxu2 }
  0xc7   : > { %v449_v52 = vpop.f32.mrf.mxu0  ;;  %v5830_v54 = vadd.f32 %v546_v38, %v471_v24  ;;  %v549_v57 = vpop.f32.mrf.mxu3  ;;  %v1398_v24 = vrot.slane %v1396_v33, 2  ;;  %v1416_v33 = vshll.u32 %v5902_v26, 16 }
  0xc8   : > { %v5833_v58 = vadd.f32 %v524_v45, %v449_v52  ;;  %v958_v45 = vsel %vm878_vm5, %v948_v48, %v957_v29  ;;  %v1401_v52 = vrot.slane %v1399_v34, 3  ;;  %v960_v48 = vshrl.u32 %v877_v51, 16 }
  0xc9   : > { %v526_v60 = vpop.f32.mrf.mxu1 }
  0xca   : > { %5103 = vmatmul.msk.bf16.gmra.mxu0 %vm393_vm1, %v949_v55  ;;  %v1406_v55 = vrot.slane %v1404_v35, 2  ;;  %v1402_v3 = vor.u32 %v1401_v52, %v1398_v24  ;;  %v962_v12 = vrot.slane %v960_v48, 1  ;;  %v1586_v24 = vld [vmem:[%s5603_s4 + $0x10] sm:$0x8] }
  0xcb   : > { %5052 = vmatmul.msk.bf16.gmra.mxu2 %vm393_vm1, %v577_v61  ;;  %v963_v61 = vshll.u32 %v877_v51, 16  ;;  %v2633_v51 = vshll.u32 %v5909_v56, 16 }
  0xcd   : > { %v965_v16 = vrot.slane %v963_v61, 2  ;;  %v2635_v48 = vrot.slane %v2633_v51, 1 }
  0xce   : > { %v474_v7 = vpop.f32.mrf.mxu2 }
  0xcf   : > { %v451_v8 = vpop.f32.mrf.mxu0  ;;  %v5846_v9 = vadd.f32 %v549_v57, %v474_v7  ;;  %v551_v10 = vpop.f32.mrf.mxu3  ;;  %v1409_v57 = vrot.slane %v1407_v36, 3 }
  0xd0   : > { %v5848_v18 = vadd.f32 %v526_v60, %v451_v8  ;;  %v5257_v60 = vld [vmem:[%s7643_s1 + $0xc] sm:$0xf] }
  0xd1   : > { %v529_v42 = vpop.f32.mrf.mxu1  ;;  %v3101_v62 = vsel %vm421_vm0, %v5257_v60, 0  ;;  %v1410_v5 = vor.u32 %v1409_v57, %v1406_v55  ;;  %v1415_v55 = vrot.slane %v1413_v4, 2  ;;  %v1418_v57 = vrot.slane %v1416_v33, 3 }
  0xd2   : > { %3110 = vmatpush.bf16.msrb.mxu0 %v3101_v62  ;;  %v1271_v33 = vsel %vm1076_vm4, %v1268_v31, %v1270_v1 }
  0xd3   : > { %v1419_v61 = vor.u32 %v1418_v57, %v1415_v55 }
  0xd4   : > { %5114 = vmatmul.msk.bf16.gmra.mxu1 %vm393_vm1, %v1093_v20  ;;  %5095 = vmatmul.msk.bf16.gmra.mxu3 %vm393_vm1, %v769_v13  ;;  %v1411_v13 = vsel %vm1394_vm6, %v1402_v3, %v1410_v5 }
  0xd6   : > { %v476_v38 = vpop.f32.mrf.mxu2 }
  0xd7   : > { %v454_v40 = vpop.f32.mrf.mxu0  ;;  %v5877_v41 = vadd.f32 %v551_v10, %v476_v38  ;;  %v809_v46 = vpop.f32.mrf.mxu3 }
  0xd8   : > { %v5880_v14 = vadd.f32 %v529_v42, %v454_v40 }
  0xd9   : > { %v531_v47 = vpop.f32.mrf.mxu1 }
  0xda   : > { %5104 = vmatmul.msk.bf16.gmra.mxu0 %vm393_vm1, %v958_v45 }
  0xdb   : > { %5053 = vmatmul.msk.bf16.gmra.mxu2 %vm393_vm1, %v579_v59  ;;  %v2630_v59 = vrot.slane %v2628_v32, 1 }
  0xde   : > { %v619_v17 = vpop.f32.mrf.mxu2 }
  0xdf   : > { %v456_v7 = vpop.f32.mrf.mxu0  ;;  %v664_v8 = vadd.f32 %v619_v17, %v5760_v39  ;;  %v811_v10 = vpop.f32.mrf.mxu3  ;;  %v966_v39 = vor.u32 %v965_v16, %v962_v12  ;;  %v1420_v12 = vsel %vm1394_vm6, %v1410_v5, %v1419_v61  ;;  %v5928_v16 = vld [vmem:[%s5603_s4 + $0x28] sm:$0xff] }
  0xe0   : > { %v5894_v42 = vadd.f32 %v531_v47, %v456_v7  ;;  %v2626_v47 = vshrl.u32 %v5460_v21, 16  ;;  %v1425_v5 = vshll.u32 %v5928_v16, 16 }
  0xe1   : > { %v1135_v20 = vpop.f32.mrf.mxu1  ;;  %v854_v15 = vadd.f32 %v809_v46, %v664_v8  ;;  %v967_v38 = vsel %vm878_vm5, %v957_v29, %v966_v39 }
  0xe2   : > { %v2631_v29 = vor.u32 %v2630_v59, %v2626_v47 }
  0xe4   : > { %5115 = vmatmul.msk.bf16.gmra.mxu1 %vm393_vm1, %v1095_v30  ;;  %5159 = vmatmul.msk.bf16.vlgmr.msra.gmra.mxu3 %vm393_vm1, %v1411_v13  ;;  %v2636_v8 = vsel %vm316_vm2, %v2631_v29, %v2635_v48  ;;  %v1594_v30 = vrot.slane %v5862_v22, 3  ;;  %v5954_v29 = vld [vmem:[%s5603_s4 + $0x30] sm:$0xff] }
  0xe6   : > { %v621_v34 = vpop.f32.mrf.mxu2 }
  0xe7   : > { %v665_v35 = vadd.f32 %v621_v34, %v5774_v53  ;;  %v1007_v36 = vpop.f32.mrf.mxu0  ;;  %v814_v40 = vpop.f32.mrf.mxu3  ;;  %v1590_v53 = vunpack.c.l.b16 %v1586_v24  ;;  %v2637_v34 = vshrl.u32 %v5909_v56, 16 }
  0xe8   : > { %v1052_v45 = vadd.f32 %v1007_v36, %v854_v15  ;;  %v1422_v15 = vshrl.u32 %v5928_v16, 16 }
  0xe9   : > { %v1137_v46 = vpop.f32.mrf.mxu1  ;;  %v855_v52 = vadd.f32 %v811_v10, %v665_v35  ;;  %v1591_v3 = vpack.c.b16 %v1239_v6, %v1590_v53  ;;  %v5937_v6 = vld [vmem:[%s5603_s4 + $0x58] sm:$0xff] }
  0xea   : > { %5105 = vmatmul.msk.bf16.gmra.mxu0 %vm393_vm1, %v967_v38  ;;  %v5919_v60 = vadd.f32 %v1135_v20, %v1052_v45  ;;  %v2641_v35 = vshll.u32 %v5937_v6, 16  ;;  %v1424_v38 = vrot.slane %v1422_v15, 2 }
  0xeb   : > { %5149 = vmatmul.msk.bf16.vlgmr.msra.gmra.mxu2 %vm393_vm1, %v1269_v25  ;;  %v1427_v25 = vrot.slane %v1425_v5, 3 }
  0xec   : > { %v2643_v45 = vrot.slane %v2641_v35, 1 }
  0xee   : > { %v624_v62 = vpop.f32.mrf.mxu2 }
  0xef   : > { %v666_v49 = vadd.f32 %v624_v62, %v5784_v2  ;;  %v1009_v0 = vpop.f32.mrf.mxu0  ;;  %v816_v43 = vpop.f32.mrf.mxu3  ;;  %v1593_v2 = vrot.slane %v1591_v3, 3 }
  0xf0   : > { %v1053_v17 = vadd.f32 %v1009_v0, %v855_v52  ;;  %v1431_v0 = vshrl.u32 %v5954_v29, 16 }
  0xf1   : > { %v1140_v7 = vpop.f32.mrf.mxu1  ;;  %v856_v10 = vadd.f32 %v814_v40, %v666_v49  ;;  %v1595_v28 = vsel %vm1592_vm7, %v1593_v2, %v1594_v30  ;;  %v5963_v49 = vld [vmem:[%s5603_s4 + $0x60] sm:$0xff]  ;;  %v2645_v2 = vshrl.u32 %v5937_v6, 16 }
  0xf2   : > { %v5930_v20 = vadd.f32 %v1137_v46, %v1053_v17  ;;  %v1428_v46 = vor.u32 %v1427_v25, %v1424_v38  ;;  %v2649_v15 = vshll.u32 %v5963_v49, 16  ;;  %v5980_v25 = vld [vmem:[%s5603_s4 + $0x38] sm:$0xff] }
  0xf4   : > { %5229 = vmatmul.msk.bf16.vlgmr.msra.gmra.mxu1 %vm393_vm1, %v2636_v8  ;;  %5160 = vmatmul.msk.bf16.gmra.mxu3 %vm393_vm1, %v1420_v12  ;;  %v1429_v53 = vsel %vm1394_vm6, %v1419_v61, %v1428_v46 }
  0xf6   : > { %v626_v13 = vpop.f32.mrf.mxu2 }
  0xf7   : > { %v667_v21 = vadd.f32 %v626_v13, %v5798_v19  ;;  %v1012_v39 = vpop.f32.mrf.mxu0  ;;  %v819_v32 = vpop.f32.mrf.mxu3  ;;  %v2639_v19 = vor.u32 %v2637_v34, %v2635_v48  ;;  %v1596_v48 = vrot.slane %v5902_v26, 3  ;;  %v1433_v13 = vrot.slane %v1431_v0, 2 }
  0xf8   : > { %v1054_v4 = vadd.f32 %v1012_v39, %v856_v10  ;;  %v2653_v0 = vshrl.u32 %v5963_v49, 16 }
  0xf9   : > { %v1142_v22 = vpop.f32.mrf.mxu1  ;;  %v857_v36 = vadd.f32 %v816_v43, %v667_v21  ;;  %v2644_v55 = vsel %vm316_vm2, %v2639_v19, %v2643_v45  ;;  %v1434_v43 = vshll.u32 %v5954_v29, 16 }
  0xfa   : > { %5169 = vmatmul.msk.bf16.vlgmr.msra.gmra.mxu0 %vm393_vm1, %v1595_v28  ;;  %v5947_v40 = vadd.f32 %v1140_v7, %v1054_v4  ;;  %v1597_v7 = vsel %vm1592_vm7, %v1594_v30, %v1596_v48  ;;  %v2651_v30 = vrot.slane %v2649_v15, 1 }
  0xfb   : > { %5150 = vmatmul.msk.bf16.gmra.mxu2 %vm393_vm1, %v1271_v33  ;;  %v1436_v21 = vrot.slane %v1434_v43, 3 }
  0xfd   : > { %v1437_v28 = vor.u32 %v1436_v21, %v1433_v13 }
  0xfe   : > { %v629_v47 = vpop.f32.mrf.mxu2 }
  0xff   : > { %v668_v31 = vadd.f32 %v629_v47, %v5808_v27  ;;  %v1014_v59 = vpop.f32.mrf.mxu0  ;;  %v821_v51 = vpop.f32.mrf.mxu3  ;;  %v1272_v27 = vrot.slane %v5928_v16, 2  ;;  %v1438_v38 = vsel %vm1394_vm6, %v1428_v46, %v1437_v28  ;;  %v5428_v47 = vld [vmem:[%s5603_s4 + $0x68] sm:$0xff] }
 0x100   : > { %v1055_v24 = vadd.f32 %v1014_v59, %v857_v36  ;;  %v1443_v59 = vshll.u32 %v5980_v25, 16  ;;  %v2657_v43 = vshll.u32 %v5428_v47, 16 }
 0x101   : > { %v1145_v52 = vpop.f32.mrf.mxu1  ;;  %v858_v57 = vadd.f32 %v819_v32, %v668_v31  ;;  %v1273_v26 = vsel %vm1076_vm4, %v1270_v1, %v1272_v27  ;;  %v1440_v31 = vshrl.u32 %v5980_v25, 16 }
 0x102   : > { %v5956_v62 = vadd.f32 %v1142_v22, %v1055_v24 }
 0x104   : > { %5230 = vmatmul.msk.bf16.gmra.mxu1 %vm393_vm1, %v2644_v55  ;;  %5161 = vmatmul.msk.bf16.gmra.mxu3 %vm393_vm1, %v1429_v53 }
 0x106   : > { %v631_v3 = vpop.f32.mrf.mxu2 }
 0x107   : > { %v669_v61 = vadd.f32 %v631_v3, %v5822_v44  ;;  %v1017_v17 = vpop.f32.mrf.mxu0  ;;  %v824_v8 = vpop.f32.mrf.mxu3  ;;  %v2647_v44 = vor.u32 %v2645_v2, %v2643_v45  ;;  %v1598_v45 = vrot.slane %v5928_v16, 3 }
 0x108   : > { %v1056_v10 = vadd.f32 %v1017_v17, %v858_v57  ;;  %v1445_v17 = vrot.slane %v1443_v59, 3  ;;  %v2661_v59 = vshrl.u32 %v5428_v47, 16 }
 0x109   : > { %v1147_v12 = vpop.f32.mrf.mxu1  ;;  %v859_v5 = vadd.f32 %v821_v51, %v669_v61  ;;  %v2652_v35 = vsel %vm316_vm2, %v2647_v44, %v2651_v30  ;;  %v1442_v61 = vrot.slane %v1440_v31, 2  ;;  %v6003_v44 = vld [vmem:[%s5603_s4 + $0x40] sm:$0xff] }
 0x10a   : > { %5170 = vmatmul.msk.bf16.gmra.mxu0 %vm393_vm1, %v1597_v7  ;;  %v5973_v39 = vadd.f32 %v1145_v52, %v1056_v10  ;;  %v1599_v52 = vsel %vm1592_vm7, %v1596_v48, %v1598_v45  ;;  %v2659_v48 = vrot.slane %v2657_v43, 1 }
 0x10b   : > { %5151 = vmatmul.msk.bf16.gmra.mxu2 %vm393_vm1, %v1273_v26 }
 0x10e   : > { %v634_v32 = vpop.f32.mrf.mxu2 }
 0x10f   : > { %v670_v1 = vadd.f32 %v634_v32, %v5833_v58  ;;  %v1019_v4 = vpop.f32.mrf.mxu0  ;;  %v826_v22 = vpop.f32.mrf.mxu3  ;;  %v1274_v58 = vrot.slane %v5954_v29, 2 }
 0x110   : > { %v1057_v33 = vadd.f32 %v1019_v4, %v859_v5  ;;  %v1449_v4 = vshrl.u32 %v6003_v44, 16 }
 0x111   : > { %v1150_v34 = vpop.f32.mrf.mxu1  ;;  %v860_v36 = vadd.f32 %v824_v8, %v670_v1  ;;  %v1275_v16 = vsel %vm1076_vm4, %v1272_v27, %v1274_v58  ;;  %v1446_v8 = vor.u32 %v1445_v17, %v1442_v61  ;;  %v5429_v1 = vld [vmem:[%s5603_s4 + $0x70] sm:$0xff] }
 0x112   : > { %v5982_v19 = vadd.f32 %v1147_v12, %v1057_v33 }
 0x113   : > { %v1447_v21 = vsel %vm1394_vm6, %v1437_v28, %v1446_v8 }
 0x114   : > { %5231 = vmatmul.msk.bf16.gmra.mxu1 %vm393_vm1, %v2652_v35  ;;  %5162 = vmatmul.msk.bf16.gmra.mxu3 %vm393_vm1, %v1438_v38 }
 0x116   : > { %v636_v51 = vpop.f32.mrf.mxu2 }
 0x117   : > { %v671_v46 = vadd.f32 %v636_v51, %v5848_v18  ;;  %v1022_v24 = vpop.f32.mrf.mxu0  ;;  %v829_v55 = vpop.f32.mrf.mxu3  ;;  %v2655_v18 = vor.u32 %v2653_v0, %v2651_v30  ;;  %v1600_v30 = vrot.slane %v5954_v29, 3  ;;  %v2665_v51 = vshll.u32 %v5429_v1, 16  ;;  %v6023_v0 = vld [vmem:[%s5603_s4 + $0x48] sm:$0xff] }
 0x118   : > { %v1058_v57 = vadd.f32 %v1022_v24, %v860_v36  ;;  %v1451_v24 = vrot.slane %v1449_v4, 2 }
 0x119   : > { %v1152_v53 = vpop.f32.mrf.mxu1  ;;  %v861_v3 = vadd.f32 %v826_v22, %v671_v46  ;;  %v2660_v5 = vsel %vm316_vm2, %v2655_v18, %v2659_v48  ;;  %v1452_v22 = vshll.u32 %v6003_v44, 16  ;;  %v1601_v35 = vsel %vm1592_vm7, %v1598_v45, %v1600_v30 }
 0x11a   : > { %5171 = vmatmul.msk.bf16.gmra.mxu0 %vm393_vm1, %v1599_v52  ;;  %v5996_v7 = vadd.f32 %v1150_v34, %v1058_v57  ;;  %v2667_v45 = vrot.slane %v2665_v51, 1 }
 0x11b   : > { %5152 = vmatmul.msk.bf16.gmra.mxu2 %vm393_vm1, %v1275_v16  ;;  %v1454_v52 = vrot.slane %v1452_v22, 3 }
 0x11d   : > { %v1455_v57 = vor.u32 %v1454_v52, %v1451_v24  ;;  %v1751_v24 = vlaneseq  ;;  %v1280_v52 = vrot.slane %v6023_v0, 2 }
 0x11e   : > { %v639_v10 = vpop.f32.mrf.mxu2 }
 0x11f   : > { %v672_v27 = vadd.f32 %v639_v10, %v5880_v14  ;;  %v1024_v12 = vpop.f32.mrf.mxu0  ;;  %v831_v26 = vpop.f32.mrf.mxu3  ;;  %v1276_v14 = vrot.slane %v5980_v25, 2  ;;  %v1456_v18 = vsel %vm1394_vm6, %v1446_v8, %v1455_v57  ;;  %v5430_v10 = vld [vmem:[%s5603_s4 + $0x78] sm:$0xff] }
 0x120   : > { %v1059_v2 = vadd.f32 %v1024_v12, %v861_v3  ;;  %v1461_v12 = vshll.u32 %v6023_v0, 16 }
 0x121   : > { %v1155_v15 = vpop.f32.mrf.mxu1  ;;  %v862_v13 = vadd.f32 %v829_v55, %v672_v27  ;;  %v1277_v29 = vsel %vm1076_vm4, %v1274_v58, %v1276_v14  ;;  %v1458_v27 = vshrl.u32 %v6023_v0, 16 }
 0x122   : > { %v6005_v32 = vadd.f32 %v1152_v53, %v1059_v2  ;;  %v6037_v2 = vld [vmem:[%s5603_s4 + $0x80] sm:$0xff] }
 0x124   : > { %5232 = vmatmul.msk.bf16.gmra.mxu1 %vm393_vm1, %v2660_v5  ;;  %5163 = vmatmul.msk.bf16.gmra.mxu3 %vm393_vm1, %v1447_v21  ;;  %v2669_v5 = vshrl.u32 %v5429_v1, 16 }
 0x126   : > { %v641_v33 = vpop.f32.mrf.mxu2 }
 0x127   : > { %v673_v28 = vadd.f32 %v641_v33, %v5894_v42  ;;  %v1027_v34 = vpop.f32.mrf.mxu0  ;;  %v834_v36 = vpop.f32.mrf.mxu3  ;;  %v2663_v42 = vor.u32 %v2661_v59, %v2659_v48  ;;  %v1460_v33 = vrot.slane %v1458_v27, 2 }
 0x128   : > { %v1060_v38 = vadd.f32 %v1027_v34, %v862_v13  ;;  %v2673_v13 = vshll.u32 %v5430_v10, 16 }
 0x129   : > { %v1157_v31 = vpop.f32.mrf.mxu1  ;;  %v863_v46 = vadd.f32 %v831_v26, %v673_v28  ;;  %v2668_v61 = vsel %vm316_vm2, %v2663_v42, %v2667_v45  ;;  %v1278_v26 = vrot.slane %v6003_v44, 2  ;;  %v1463_v28 = vrot.slane %v1461_v12, 3  ;;  %v6064_v12 = vld [vmem:[%s5603_s4 + $0x88] sm:$0xff] }
 0x12a   : > { %5172 = vmatmul.msk.bf16.gmra.mxu0 %vm393_vm1, %v1601_v35  ;;  %v6018_v55 = vadd.f32 %v1155_v15, %v1060_v38  ;;  %v6040_v15 = vld [vmem:[%s5603_s4 + $0x50] sm:$0xff]  ;;  %v2677_v38 = vshrl.u32 %v5430_v10, 16 }
 0x12b   : > { %5153 = vmatmul.msk.bf16.gmra.mxu2 %vm393_vm1, %v1277_v29  ;;  %v1467_v59 = vshrl.u32 %v6040_v15, 16  ;;  %v1470_v1 = vshll.u32 %v6040_v15, 16 }
 0x12e   : > { %v644_v53 = vpop.f32.mrf.mxu2 }
 0x12f   : > { %v674_v16 = vadd.f32 %v644_v53, %v5772_v50  ;;  %v1029_v58 = vpop.f32.mrf.mxu0  ;;  %v836_v47 = vpop.f32.mrf.mxu3  ;;  %v1602_v50 = vrot.slane %v5980_v25, 3 }
 0x130   : > { %v1061_v43 = vadd.f32 %v1029_v58, %v863_v46  ;;  %v1464_v46 = vor.u32 %v1463_v28, %v1460_v33  ;;  %v1472_v58 = vrot.slane %v1470_v1, 3  ;;  %v1606_v33 = vrot.slane %v6023_v0, 3 }
 0x131   : > { %v1160_v3 = vpop.f32.mrf.mxu1  ;;  %v864_v17 = vadd.f32 %v834_v36, %v674_v16  ;;  %v1603_v25 = vsel %vm1592_vm7, %v1600_v30, %v1602_v50  ;;  %v1279_v36 = vsel %vm1076_vm4, %v1276_v14, %v1278_v26  ;;  %v2675_v30 = vrot.slane %v2673_v13, 1 }
 0x132   : > { %v6028_v48 = vadd.f32 %v1157_v31, %v1061_v43  ;;  %v2681_v31 = vshll.u32 %v6037_v2, 16  ;;  %v1604_v14 = vrot.slane %v6003_v44, 3  ;;  %v1469_v16 = vrot.slane %v1467_v59, 2 }
 0x133   : > { %v2679_v42 = vor.u32 %v2677_v38, %v2675_v30  ;;  %v1465_v10 = vsel %vm1394_vm6, %v1455_v57, %v1464_v46  ;;  %v2685_v28 = vshrl.u32 %v6037_v2, 16  ;;  %v1282_v1 = vrot.slane %v6040_v15, 2 }
 0x134   : > { %5233 = vmatmul.msk.bf16.gmra.mxu1 %vm393_vm1, %v2668_v61  ;;  %5164 = vmatmul.msk.bf16.gmra.mxu3 %vm393_vm1, %v1456_v18  ;;  %v2683_v53 = vrot.slane %v2681_v31, 1  ;;  %v1605_v27 = vsel %vm1592_vm7, %v1602_v50, %v1604_v14 }
 0x136   : > { %v646_v8 = vpop.f32.mrf.mxu2 }
 0x137   : > { %v675_v21 = vadd.f32 %v646_v8, %v5781_v63  ;;  %v1032_v4 = vpop.f32.mrf.mxu0  ;;  %v839_v22 = vpop.f32.mrf.mxu3  ;;  %v2671_v63 = vor.u32 %v2669_v5, %v2667_v45 }
 0x138   : > { %v1062_v34 = vadd.f32 %v1032_v4, %v864_v17 }
 0x139   : > { %v1162_v35 = vpop.f32.mrf.mxu1  ;;  %v865_v29 = vadd.f32 %v836_v47, %v675_v21  ;;  %v6054_v47 = vshrl.u32 %v1751_v24, 7  ;;  %v2676_v45 = vsel %vm316_vm2, %v2671_v63, %v2675_v30  ;;  %v1281_v21 = vsel %vm1076_vm4, %v1278_v26, %v1280_v52 }
 0x13a   : > { %5173 = vmatmul.msk.bf16.gmra.mxu0 %vm393_vm1, %v1603_v25  ;;  %v6049_v51 = vadd.f32 %v1160_v3, %v1062_v34  ;;  %v1388_v3 = vld [vmem:[%s5603_s4 + $0x58] sm:$0x7]  ;;  %v1473_v25 = vor.u32 %v1472_v58, %v1469_v16  ;;  %v2689_v26 = vshll.u32 %v6064_v12, 16 }
 0x13b   : > { %5154 = vmatmul.msk.bf16.gmra.mxu2 %vm393_vm1, %v1279_v36  ;;  %v1392_v8 = vunpack.c.l.b16 %v1388_v3  ;;  %v1773_v4 = vand.u32 65535, %v6054_v47  ;;  %v1774_v34 = vshrl.u32 %v6054_v47, 16 }
 0x13c   : > { %v6088_v58 = vsel %vm1394_vm6, %v1464_v46, %v1473_v25 }
 0x13d   : > { %v6074_v50 = vpack.c.b16 %v1392_v8, %v1392_v8  ;;  %v1777_v36 = vmul.u32 58254, %v1773_v4  ;;  %v1776_v59 = vmul.u32 14564, %v1773_v4  ;;  %v1778_v63 = vmul.u32 14564, %v1774_v34 }
 0x13e   : > { %v649_v43 = vpop.f32.mrf.mxu2  ;;  %v2691_v8 = vrot.slane %v2689_v26, 1  ;;  %v6112_v26 = vadd.s32 8, %v6054_v47 }
 0x13f   : > { %v676_v61 = vadd.f32 %v649_v43, %v5796_v11  ;;  %v1034_v17 = vpop.f32.mrf.mxu0  ;;  %v841_v18 = vpop.f32.mrf.mxu3  ;;  %v6070_v11 = vsel %vm316_vm2, %v2679_v42, %v2683_v53  ;;  %v1476_v31 = vshrl.u32 %v6074_v50, 16  ;;  %v1780_v30 = vshll.u32 %v1777_v36, 16 }
 0x140   : > { %v1063_v5 = vadd.f32 %v1034_v17, %v865_v29  ;;  %v1216_v29 = vld [vmem:[%s5603_s4 + $0x58] sm:$0x3]  ;;  %v1779_v42 = vmul.u32 58254, %v1774_v34  ;;  %v1782_v43 = vshll.u32 %v1778_v63, 16  ;;  %7684 = vst [vmem:[#allocation2_spill] sm:$0xff] %v6112_v26 }
 0x141   : > { %v1165_v13 = vpop.f32.mrf.mxu1  ;;  %v866_v57 = vadd.f32 %v839_v22, %v676_v61  ;;  %v1479_v22 = vshll.u32 %v6074_v50, 16  ;;  %v1256_v2 = vunpack.c.l.b16 %v1216_v29  ;;  %v1478_v24 = vrot.slane %v1476_v31, 2 }
 0x142   : > { %v6078_v38 = vadd.f32 %v1162_v35, %v1063_v5  ;;  %vm1784_vm8 = vc.u32 %v1776_v59, %v1780_v30  ;;  %v7652_v5 = vmov 0  }
 0x143   : > { %v1481_v35 = vrot.slane %v1479_v22, 3  ;;  %v1785_v4 = vsel %vm1784_vm8, 1, %v7652_v5  ;;  %v1266_v34 = vpack.c.b16 %v1256_v2, %v1256_v2 }
 0x144   : > { %5234 = vmatmul.msk.bf16.gmra.mxu1 %vm393_vm1, %v2676_v45  ;;  %5165 = vmatmul.msk.bf16.gmra.mxu3 %vm393_vm1, %v1465_v10  ;;  %v1786_v45 = vadd.s32 %v1780_v30, %v1776_v59  ;;  %v2687_v10 = vor.u32 %v2685_v28, %v2683_v53  ;;  %v1787_v29 = vadd.s32 %v1785_v4, %v1779_v42  ;;  %v1781_v53 = vshrl.u32 %v1777_v36, 16  ;;  %v2575_v28 = vld [vmem:[%s5603_s4 + $0x90] sm:$0x1] }
 0x145   : > { %v1482_v59 = vor.u32 %v1481_v35, %v1478_v24  ;;  %v1783_v36 = vshrl.u32 %v1778_v63, 16  ;;  %v1608_v30 = vrot.slane %v6040_v15, 3  ;;  %v1802_v24 = vand.u32 65535, %v6112_v26 }
 0x146   : > { %v651_v16 = vpop.f32.mrf.mxu2  ;;  %vm1788_vm9 = vc.u32 %v1786_v45, %v1782_v43  ;;  %v1803_v35 = vshrl.u32 %v6112_v26, 16 }
 0x147   : > { %v677_v3 = vadd.f32 %v651_v16, %v5805_v23  ;;  %v1037_v61 = vpop.f32.mrf.mxu0  ;;  %v844_v17 = vpop.f32.mrf.mxu3  ;;  %v6099_v23 = vsel %vm1592_vm7, %v1604_v14, %v1606_v33  ;;  %v6118_v14 = vsel %vm316_vm2, %v2687_v10, %v2691_v8  ;;  %v6124_v42 = vsel %vm1394_vm6, %v1473_v25, %v1482_v59 }
 0x148   : > { %v1064_v31 = vadd.f32 %v1037_v61, %v866_v57  ;;  %v6107_v57 = vsel %vm1076_vm4, %v1280_v52, %v1282_v1  ;;  %v1284_v52 = vrot.slane %v1266_v34, 2  ;;  %v1805_v45 = vmul.u32 14564, %v1802_v24 }
 0x149   : > { %v6092_v22 = vpop.f32.mrf.mxu1  ;;  %v867_v46 = vadd.f32 %v841_v18, %v677_v3  ;;  %v1789_v18 = vsel %vm1788_vm9, 1, %v7652_v5  ;;  %v1806_v63 = vmul.u32 58254, %v1802_v24  ;;  %v6131_v3 = vmul.u32 14564, %v1803_v35 }
 0x14a   : > { %5174 = vmatmul.msk.bf16.gmra.mxu0 %vm393_vm1, %v1605_v27  ;;  %v6114_v44 = vadd.f32 %v1165_v13, %v1064_v31  ;;  %v2614_v27 = vunpack.c.l.b16 %v2575_v28  ;;  %v1791_v2 = vadd.s32 %v1789_v18, %v1787_v29  ;;  %v1808_v61 = vmul.u32 58254, %v1803_v35 }
 0x14b   : > { %5155 = vmatmul.msk.bf16.gmra.mxu2 %vm393_vm1, %v1281_v21  ;;  %v6129_v21 = vadd.s32 16, %v6054_v47  ;;  %v2693_v34 = vshrl.u32 %v6064_v12, 16  ;;  %v1809_v28 = vshll.u32 %v1806_v63, 16  ;;  %v1811_v18 = vshll.u32 %v6131_v3, 16 }
 0x14c   : > { %7685 = vst [vmem:[#allocation3_spill] sm:$0xff] %v6114_v44  ;;  %v6126_v13 = vpack.c.b16 %v2614_v27, %v2614_v27  ;;  %v1792_v16 = vadd.s32 %v1791_v2, %v1781_v53  ;;  %v6147_v12 = vsel %vm1592_vm7, %v1606_v33, %v1608_v30  ;;  %v5461_v33 = vld [vmem:[%s5603_s4 + $0x48] sm:$0xf0] }
 0x14d   : > { %7687 = vst [vmem:[#allocation5_spill] sm:$0xff] %v6129_v21  ;;  %v1831_v27 = vand.u32 65535, %v6129_v21  ;;  %vm1813_vm10 = vc.u32 %v1805_v45, %v1809_v28 }
 0x14e   : > { %7686 = vst [vmem:[#allocation4_spill] sm:$0xff] %v6126_v13  ;;  %v654_v43 = vpop.f32.mrf.mxu2  ;;  %v2697_v25 = vshll.u32 %v6126_v13, 16  ;;  %v1793_v29 = vadd.s32 %v1792_v16, %v1783_v36  ;;  %v1832_v36 = vshrl.u32 %v6129_v21, 16  ;;  %v1810_v16 = vshrl.u32 %v1806_v63, 16 }
 0x14f   : > { %v678_v10 = vadd.f32 %v654_v43, %v5820_v37  ;;  %v1039_v4 = vpop.f32.mrf.mxu0  ;;  %v846_v31 = vpop.f32.mrf.mxu3  ;;  %v2695_v37 = vor.u32 %v2693_v34, %v2691_v8  ;;  %v1814_v43 = vsel %vm1813_vm10, 1, %v7652_v5 }
 0x150   : > { %v6136_v59 = vadd.f32 %v1039_v4, %v867_v46  ;;  %v2699_v24 = vrot.slane %v2697_v25, 1  ;;  %v1794_v35 = vshrl.u32 %v1793_v29, 4  ;;  %v1815_v46 = vadd.s32 %v1809_v28, %v1805_v45  ;;  %v5462_v45 = vld [vmem:[%s5603_s4 + $0x48] sm:$0xe] }
 0x151   : > { %v6138_v53 = vpop.f32.mrf.mxu1  ;;  %v868_v2 = vadd.f32 %v844_v17, %v678_v10  ;;  %v6155_v17 = vsel %vm1076_vm4, %v1282_v1, %v1284_v52  ;;  %v1816_v10 = vadd.s32 %v1814_v43, %v1808_v61  ;;  %v5463_v1 = vor.u32 %v5462_v45, %v5461_v33  ;;  %v6182_v45 = vld [vmem:[%s5603_s4 + $0x54] sm:$0xf] }
 0x152   : > { %7688 = vst [vmem:[#allocation6_spill] sm:$0xff] %v6138_v53  ;;  %v1795_v8 = vmul.u32 18, %v1794_v35  ;;  %v6161_v0 = vsel %vm316_vm2, %v2695_v37, %v2699_v24  ;;  %vm1817_vm11 = vc.u32 %v1815_v46, %v1811_v18  ;;  %v1812_v52 = vshrl.u32 %v6131_v3, 16 }
 0x153   : > { %v1818_v63 = vsel %vm1817_vm11, 1, %v7652_v5  ;;  %v6170_v29 = vmul.u32 14564, %v1832_v36  ;;  %v1837_v28 = vmul.u32 58254, %v1832_v36  ;;  %v2986_v36 = vld [vmem:[%s5603_s4 + $0x50] sm:$0xe]  ;;  %7691 = vst [vmem:[#allocation9_spill] sm:$0xff] %v6182_v45 }
 0x154   : > { %5235 = vmatmul.msk.bf16.gmra.mxu1 %vm393_vm1, %v6070_v11  ;;  %5166 = vmatmul.msk.bf16.gmra.mxu3 %vm393_vm1, %v6088_v58  ;;  %v6165_v11 = vmul.u32 58254, %v1831_v27  ;;  %v1796_v4 = vsub.s32 %v6054_v47, %v1795_v8  ;;  %v1820_v25 = vadd.s32 %v1818_v63, %v1816_v10  ;;  %v1834_v58 = vmul.u32 14564, %v1831_v27 }
 0x155   : > { %v1610_v27 = vrot.slane %v6074_v50, 3  ;;  %v2865_v8 = vrot.slane %v5463_v1, 1  ;;  %v3025_v10 = vunpack.c.l.b16 %v2986_v36  ;;  %v7646_v63 = vunpack.c.l.b16 %v6182_v45 }
 0x156   : > { %v656_v34 = vpop.f32.mrf.mxu2  ;;  %vm2292_vm12 = vcmp.ne.s32.totalorder %v1796_v4, 0  ;;  %vm2310_vm13 = vcmp.lt.s32.totalorder %v1796_v4, 0  ;;  %v1838_v24 = vshll.u32 %v6165_v11, 16  ;;  %v2346_v46 = vadd.s32 18, %v1796_v4 }
 0x157   : > { %v679_v37 = vadd.f32 %v656_v34, %v5830_v54  ;;  %v1042_v61 = vpop.f32.mrf.mxu0  ;;  %v849_v18 = vpop.f32.mrf.mxu3  ;;  %vm2328_vm14 = vmand %vm2310_vm13, %vm2292_vm12  ;;  %v7647_v54 = vrot.slane %v5909_v56, 1  ;;  %v1821_v33 = vadd.s32 %v1820_v25, %v1810_v16  ;;  %v6188_v34 = vadd.s32 24, %v6054_v47 }
 0x158   : > { %v6174_v35 = vadd.f32 %v1042_v61, %v868_v2  ;;  %v2364_v2 = vsel %vm2328_vm14, %v2346_v46, %v1796_v4  ;;  %v6207_v4 = vld [vmem:[%s5603_s4 + $0x58] sm:$0xff]  ;;  %v1839_v1 = vshrl.u32 %v6165_v11, 16  ;;  %v1840_v25 = vshll.u32 %v6170_v29, 16 }
 0x159   : > { %v6176_v3 = vpop.f32.mrf.mxu1  ;;  %v869_v43 = vadd.f32 %v846_v31, %v679_v37  ;;  %7692 = vst [vmem:[#allocation10_spill] sm:$0xff] %v6188_v34  ;;  %vm6192_vm15 = vcmp.lt.s32.totalorder %v2364_v2, 16  ;;  %v6199_v31 = vsel %vm1592_vm7, %v1608_v30, %v1610_v27  ;;  %v1822_v16 = vadd.s32 %v1821_v33, %v1812_v52 }
 0x15a   : > { %7689 = vst [vmem:[#allocation7_spill] sm:$0xff] %v6174_v35  ;;  %5175 = vmatmul.msk.bf16.gmra.mxu0 %vm393_vm1, %v6099_v23  ;;  %v6204_v23 = vsel %vm560_vm3, %v2865_v8, %v7647_v54  ;;  %v1841_v15 = vshrl.u32 %v6170_v29, 16  ;;  %v3189_v37 = vshrl.u32 %v6207_v4, 16  ;;  %v3192_v61 = vshll.u32 %v6207_v4, 16 }
 0x15b   : > { %7690 = vst [vmem:[#allocation8_spill] sm:$0xff] %v6176_v3  ;;  %5156 = vmatmul.msk.bf16.gmra.mxu2 %vm393_vm1, %v6107_v57  ;;  %v6211_v57 = vpack.c.b16 %v7646_v63, %v3025_v10  ;;  %v1823_v30 = vshrl.u32 %v1822_v16, 4  ;;  %vm1842_vm2 = vc.u32 %v1834_v58, %v1838_v24  ;;  %v1844_v36 = vadd.s32 %v1838_v24, %v1834_v58 }
 0x15c   : > { %v1843_v8 = vsel %vm1842_vm2, 1, %v7652_v5  ;;  %v3191_v29 = vrot.slane %v3189_v37, 1  ;;  %v3194_v16 = vrot.slane %v3192_v61, 2  ;;  %v1860_v24 = vand.u32 65535, %v6188_v34 }
 0x15d   : > { %v3181_v52 = vshrl.u32 %v6211_v57, 16  ;;  %v3184_v27 = vshll.u32 %v6211_v57, 16  ;;  %v1824_v2 = vmul.u32 18, %v1823_v30  ;;  %v1845_v3 = vadd.s32 %v1843_v8, %v1837_v28 }
 0x15e   : > { %v659_v46 = vpop.f32.mrf.mxu2  ;;  %v6227_v44 = vor.u32 %v3194_v16, %v3191_v29  ;;  %vm1846_vm8 = vc.u32 %v1844_v36, %v1840_v25  ;;  %v1861_v30 = vshrl.u32 %v6188_v34, 16  ;;  %v6245_v25 = vmul.u32 58254, %v1860_v24 }
 0x15f   : > { %v680_v11 = vadd.f32 %v659_v46, %v5846_v9  ;;  %v1044_v33 = vpop.f32.mrf.mxu0  ;;  %v851_v10 = vpop.f32.mrf.mxu3  ;;  %v3183_v45 = vrot.slane %v3181_v52, 1  ;;  %v3186_v13 = vrot.slane %v3184_v27, 2  ;;  %v1825_v35 = vsub.s32 %v6112_v26, %v1824_v2 }
 0x160   : > { %v6222_v63 = vadd.f32 %v1044_v33, %v869_v43  ;;  %v1847_v9 = vsel %vm1846_vm8, 1, %v7652_v5  ;;  %v1863_v61 = vmul.u32 14564, %v1860_v24  ;;  %v1866_v46 = vmul.u32 58254, %v1861_v30 }
 0x161   : > { %v6224_v54 = vpop.f32.mrf.mxu1  ;;  %v870_v53 = vadd.f32 %v849_v18, %v680_v11  ;;  %v3187_v58 = vor.u32 %v3186_v13, %v3183_v45  ;;  %vm2293_vm9 = vcmp.ne.s32.totalorder %v1825_v35, 0  ;;  %vm2311_vm10 = vcmp.lt.s32.totalorder %v1825_v35, 0 }
 0x162   : > { %v2347_v43 = vadd.s32 18, %v1825_v35  ;;  %v1849_v28 = vadd.s32 %v1847_v9, %v1845_v3  ;;  %v7655_v18 = vmov 0.0   ;;  %vm2329_vm11 = vmand %vm2311_vm10, %vm2293_vm9  ;;  %v1867_v50 = vshll.u32 %v6245_v25, 16 }
 0x163   : > { %v6239_v13 = vsel %vm6192_vm15, 1.0, %v7655_v18  ;;  %v6243_v45 = vsel %vm878_vm5, %v3187_v58, %v6227_v44  ;;  %v1868_v27 = vshrl.u32 %v6245_v25, 16  ;;  %v6256_v8 = vadd.s32 32, %v6054_v47 }
 0x164   : > { %5236 = vmatmul.msk.bf16.gmra.mxu1 %vm393_vm1, %v6118_v14  ;;  %5167 = vmatmul.msk.bf16.gmra.mxu3 %vm393_vm1, %v6124_v42  ;;  %v6247_v14 = vmul.u32 14564, %v1861_v30  ;;  %v2365_v37 = vsel %vm2329_vm11, %v2347_v43, %v1825_v35  ;;  %v1850_v3 = vadd.s32 %v1849_v28, %v1839_v1  ;;  %v5309_v35 = vld [vmem:[%s7643_s1 + $0x14] sm:$0xf]  ;;  %v5319_v1 = vld [vmem:[%s7643_s1 + $0x18] sm:$0xf]  ;;  %v7651_v29 = vrot.slane %v5937_v6, 1 }
 0x165   : > { %vm6249_vm12 = vcmp.lt.s32.totalorder %v2365_v37, 16  ;;  %v3612_v24 = vsel %vm421_vm0, %v5319_v1, 0  ;;  %v3054_v30 = vrot.slane %v6211_v57, 1  ;;  %v7697_v25 = vrot.slane %v5909_v56, 1 }
 0x166   : > { %v661_v42 = vpop.f32.mrf.mxu2  ;;  %v1851_v2 = vadd.s32 %v1850_v3, %v1841_v15  ;;  %v1869_v16 = vshll.u32 %v6247_v14, 16  ;;  %v6277_v15 = vsel %vm6249_vm12, 1.0, %v7655_v18  ;;  %3621 = vmatpush.bf16.msra.mxu3 %v3612_v24  ;;  %vm1871_vm13 = vc.u32 %v1863_v61, %v1867_v50 }
 0x167   : > { %v681_v36 = vadd.f32 %v661_v42, %v5877_v41  ;;  %v1047_v11 = vpop.f32.mrf.mxu0  ;;  %v1523_v33 = vpop.f32.mrf.mxu3  ;;  %v3423_v41 = vsel %vm421_vm0, %v5309_v35, 0  ;;  %v6287_v57 = vsel %vm560_vm3, %v7697_v25, %v7651_v29  ;;  %v1889_v37 = vand.u32 65535, %v6256_v8 }
 0x168   : > { %v6267_v58 = vadd.f32 %v1047_v11, %v870_v53  ;;  %3432 = vmatpush.bf16.msra.mxu2 %v3423_v41  ;;  %v1852_v28 = vshrl.u32 %v1851_v2, 4  ;;  %v7650_v53 = vrot.slane %v6207_v4, 1  ;;  %v1870_v42 = vshrl.u32 %v6247_v14, 16 }
 0x169   : > { %v6269_v9 = vpop.f32.mrf.mxu1  ;;  %v871_v43 = vadd.f32 %v851_v10, %v681_v36  ;;  %v1873_v10 = vadd.s32 %v1867_v50, %v1863_v61  ;;  %v1872_v52 = vsel %vm1871_vm13, 1, %v7652_v5  ;;  %v1890_v36 = vshrl.u32 %v6256_v8, 16 }
 0x16a   : > { %5176 = vmatmul.msk.bf16.gmra.mxu0 %vm393_vm1, %v6147_v12  ;;  %v1853_v3 = vmul.u32 18, %v1852_v28  ;;  %v6295_v12 = vld [vmem:[%s5603_s4 + $0x60] sm:$0xff]  ;;  %v6301_v56 = vsel %vm560_vm3, %v3054_v30, %v7650_v53  ;;  %v1874_v61 = vadd.s32 %v1872_v52, %v1866_v46  ;;  %v6303_v50 = vmul.u32 58254, %v1889_v37 }
 0x16b   : > { %5157 = vmatmul.msk.bf16.gmra.mxu2 %vm393_vm1, %v6155_v17  ;;  %vm1875_vm14 = vc.u32 %v1873_v10, %v1869_v16  ;;  %v3198_v14 = vshrl.u32 %v6295_v12, 16  ;;  %v3201_v35 = vshll.u32 %v6295_v12, 16  ;;  %v1892_v41 = vmul.u32 14564, %v1889_v37  ;;  %v5361_v10 = vld [vmem:[%s7643_s1 + $0x1c] sm:$0xf] }
 0x16c   : > { %v1854_v17 = vsub.s32 %v6129_v21, %v1853_v3  ;;  %v1876_v11 = vsel %vm1875_vm14, 1, %v7652_v5  ;;  %v6309_v24 = vmul.u32 14564, %v1890_v36  ;;  %v1896_v30 = vshll.u32 %v6303_v50, 16 }
 0x16d   : > { %v1878_v2 = vadd.s32 %v1876_v11, %v1874_v61  ;;  %v3808_v37 = vsel %vm421_vm0, %v5361_v10, 0  ;;  %v5371_v61 = vld [vmem:[%s7643_s1 + $0x20] sm:$0xf]  ;;  %v3200_v11 = vrot.slane %v3198_v14, 1  ;;  %vm1732_vm9 = vcmask 60416  }
 0x16e   : > { %v1325_v1 = vpop.f32.mrf.mxu2  ;;  %vm2294_vm15 = vcmp.ne.s32.totalorder %v1854_v17, 0  ;;  %vm2312_vm2 = vcmp.lt.s32.totalorder %v1854_v17, 0  ;;  %v2348_v25 = vadd.s32 18, %v1854_v17  ;;  %3817 = vmatpush.bf16.msra.mxu0 %v3808_v37  ;;  %v3934_v53 = vsel %vm421_vm0, %v5371_v61, 0 }
 0x16f   : > { %v1049_v28 = vpop.f32.mrf.mxu0  ;;  %v1370_v46 = vadd.f32 %v1325_v1, %v5919_v60  ;;  %v1525_v16 = vpop.f32.mrf.mxu3  ;;  %vm2330_vm8 = vmand %vm2312_vm2, %vm2294_vm15  ;;  %v1879_v60 = vadd.s32 %v1878_v2, %v1868_v27  ;;  %v3203_v29 = vrot.slane %v3201_v35, 2  ;;  %v1895_v5 = vmul.u32 58254, %v1890_v36  ;;  %3943 = vmatpush.bf16.msra.mxu1 %v3934_v53 }
 0x170   : > { %v6316_v3 = vadd.f32 %v1049_v28, %v871_v43  ;;  %v2366_v1 = vsel %vm2330_vm8, %v2348_v25, %v1854_v17  ;;  %v1898_v10 = vshll.u32 %v6309_v24, 16  ;;  %v1897_v17 = vshrl.u32 %v6303_v50, 16 }
 0x171   : > { %v6318_v52 = vpop.f32.mrf.mxu1  ;;  %v1568_v43 = vadd.f32 %v1523_v33, %v1370_v46  ;;  %vm2384_vm10 = vcmp.lt.s32.totalorder %v2366_v1, 16  ;;  %v1880_v28 = vadd.s32 %v1879_v60, %v1870_v42  ;;  %v6331_v14 = vor.u32 %v3203_v29, %v3200_v11 }
 0x172   : > { %v6329_v27 = vsel %vm2384_vm10, 1.0, %v7655_v18  ;;  %vm1900_vm0 = vc.u32 %v1892_v41, %v1896_v30  ;;  %v7698_v36 = vmov 0   ;;  %v1902_v42 = vadd.s32 %v1896_v30, %v1892_v41 }
 0x173   : > { %v1881_v33 = vshrl.u32 %v1880_v28, 4  ;;  %v1901_v53 = vsel %vm1900_vm0, 1, %v7698_v36  ;;  %v6338_v35 = vadd.s32 40, %v6054_v47  ;;  %v1899_v29 = vshrl.u32 %v6309_v24, 16 }
 0x174   : > { %5237 = vmatmul.msk.bf16.gmra.mxu1 %vm393_vm1, %v6161_v0  ;;  %5248 = vmatmul.msk.bf16.vlgmr.msrb.gmra.mxu3 %vm393_vm1, %v6204_v23  ;;  %v6344_v0 = vsel %vm878_vm5, %v6227_v44, %v6331_v14  ;;  %v1903_v50 = vadd.s32 %v1901_v53, %v1895_v5  ;;  %v6348_v2 = vadd.s32 48, %v6054_v47  ;;  %vm1904_vm11 = vc.u32 %v1902_v42, %v1898_v10 }
 0x175   : > { %v1882_v46 = vmul.u32 18, %v1881_v33  ;;  %v1918_v41 = vand.u32 65535, %v6338_v35  ;;  %v1919_v30 = vshrl.u32 %v6338_v35, 16  ;;  %v1905_v44 = vsel %vm1904_vm11, 1, %v7698_v36 }
 0x176   : > { %v1327_v23 = vpop.f32.mrf.mxu2  ;;  %v7654_v60 = vrot.slane %v5963_v49, 1  ;;  %v7658_v5 = vrot.slane %v6295_v12, 1  ;;  %v1907_v28 = vadd.s32 %v1905_v44, %v1903_v50  ;;  %v6360_v10 = vadd.s32 56, %v6054_v47 }
 0x177   : > { %v1371_v25 = vadd.f32 %v1327_v23, %v5930_v20  ;;  %v1651_v37 = vpop.f32.mrf.mxu0  ;;  %v1528_v61 = vpop.f32.mrf.mxu3  ;;  %v1883_v1 = vsub.s32 %v6188_v34, %v1882_v46  ;;  %v7700_v33 = vrot.slane %v5937_v6, 1  ;;  %v1921_v53 = vmul.u32 14564, %v1918_v41 }
 0x178   : > { %v1696_v24 = vadd.f32 %v1651_v37, %v1568_v43  ;;  %v1922_v42 = vmul.u32 58254, %v1918_v41  ;;  %v7703_v41 = vrot.slane %v6207_v4, 1  ;;  %v1923_v37 = vmul.u32 14564, %v1919_v30 }
 0x179   : > { %v6356_v11 = vpop.f32.mrf.mxu1  ;;  %v1569_v20 = vadd.f32 %v1525_v16, %v1371_v25  ;;  %v6372_v43 = vsel %vm560_vm3, %v7700_v33, %v7654_v60  ;;  %vm2295_vm12 = vcmp.ne.s32.totalorder %v1883_v1, 0  ;;  %vm2313_vm13 = vcmp.lt.s32.totalorder %v1883_v1, 0  ;;  %v5494_v16 = vld [vmem:[%s5603_s4 + $0x48] sm:$0xff]  }
 0x17a   : > { %7699 = vst [vmem:[#allocation11_spill] sm:$0xff] %v6356_v11  ;;  %v1714_v50 = vpack.c.bf16 %v1696_v24, %v1696_v24  ;;  %v2436_v23 = vmul.f32 %v6239_v13, %v1696_v24  ;;  %5177 = vmatmul.msk.bf16.gmra.mxu0 %vm393_vm1, %v6199_v31  ;;  %vm6379_vm14 = vmand %vm2313_vm13, %vm2295_vm12  ;;  %v2349_v46 = vadd.s32 18, %v1883_v1  ;;  %v1908_v25 = vadd.s32 %v1907_v28, %v1897_v17  ;;  %v6394_v60 = vld [vmem:[%s5603_s4 + $0x68] sm:$0xff] }
 0x17b   : > { %5238 = vmatmul.msk.bf16.vlgmr.msrb.gmra.mxu2 %vm393_vm1, %v5494_v16  ;;  %v6388_v13 = vsel %vm560_vm3, %v7703_v41, %v7658_v5  ;;  %v1924_v33 = vmul.u32 58254, %v1919_v30  ;;  %v1925_v16 = vshll.u32 %v1922_v42, 16  ;;  %v1926_v18 = vshrl.u32 %v1922_v42, 16 }
 0x17c   : > { %1733 = vst.msk [vmem:[%s6365_s10] sm:$0xf] %vm1732_vm9, %v1714_v50  ;;  %v2454_v31 = vsel %vm393_vm1, %v2436_v23, 0.0  ;;  %v2496_v44 = vmul.f32 %v2436_v23, %v1696_v24  ;;  %v2367_v17 = vsel %vm6379_vm14, %v2349_v46, %v1883_v1  ;;  %v1909_v28 = vadd.s32 %v1908_v25, %v1899_v29 }
 0x17d   : > { %v1927_v34 = vshll.u32 %v1923_v37, 16  ;;  %vm2385_vm15 = vcmp.lt.s32.totalorder %v2367_v17, 16  ;;  %v1928_v41 = vshrl.u32 %v1923_v37, 16  ;;  %vm1929_vm2 = vc.u32 %v1921_v53, %v1925_v16 }
 0x17e   : > { %v1330_v4 = vpop.f32.mrf.mxu2  ;;  %v1931_v5 = vadd.s32 %v1925_v16, %v1921_v53  ;;  %v2514_v50 = vsel %vm393_vm1, %v2496_v44, 0.0  ;;  %v1910_v23 = vshrl.u32 %v1909_v28, 4  ;;  %v1930_v26 = vsel %vm1929_vm2, 1, %v7698_v36 }
 0x17f   : > { %v1372_v21 = vadd.f32 %v1330_v4, %v5947_v40  ;;  %v1653_v24 = vpop.f32.mrf.mxu0  ;;  %v1530_v30 = vpop.f32.mrf.mxu3  ;;  %v1932_v29 = vadd.s32 %v1930_v26, %v1924_v33  ;;  %v3207_v1 = vshrl.u32 %v6394_v60, 16  ;;  %v7704_v42 = vmov 0.0  }
 0x180   : > { %v1697_v11 = vadd.f32 %v1653_v24, %v1569_v20  ;;  %vm1933_vm8 = vc.u32 %v1931_v5, %v1927_v34  ;;  %v6405_v46 = vsel %vm2385_vm15, 1.0, %v7704_v42  ;;  %v1911_v53 = vmul.u32 18, %v1910_v23 }
 0x181   : > { %v6401_v6 = vpop.f32.mrf.mxu1  ;;  %v1934_v25 = vsel %vm1933_vm8, 1, %v7698_v36  ;;  %v3210_v40 = vshll.u32 %v6394_v60, 16  ;;  %v3209_v20 = vrot.slane %v3207_v1, 1  ;;  %v1570_v26 = vadd.f32 %v1528_v61, %v1372_v21 }
 0x182   : > { %v1715_v37 = vpack.c.bf16 %v1697_v11, %v1697_v11  ;;  %v2437_v44 = vmul.f32 %v6277_v15, %v1697_v11  ;;  %v1936_v16 = vadd.s32 %v1934_v25, %v1932_v29  ;;  %v1912_v34 = vsub.s32 %v6256_v8, %v1911_v53 }
 0x183   : > { %v3212_v5 = vrot.slane %v3210_v40, 2  ;;  %v1947_v33 = vand.u32 65535, %v6348_v2  ;;  %v1948_v4 = vshrl.u32 %v6348_v2, 16  ;;  %v1976_v1 = vand.u32 65535, %v6360_v10 }
 0x184   : > { %5300 = vmatmul.msk.bf16.vlgmr.msrb.gmra.mxu1 %vm393_vm1, %v6243_v45  ;;  %1734 = vst.msk [vmem:[%s6365_s10 + $0x4] sm:$0xf] %vm1732_vm9, %v1715_v37  ;;  %v2455_v17 = vsel %vm393_vm1, %v2437_v44, 0.0  ;;  %v2497_v28 = vmul.f32 %v2437_v44, %v1697_v11  ;;  %5249 = vmatmul.msk.bf16.gmra.mxu3 %vm393_vm1, %v6287_v57  ;;  %v1937_v15 = vadd.s32 %v1936_v16, %v1926_v18  ;;  %vm2296_vm10 = vcmp.ne.s32.totalorder %v1912_v34, 0 }
 0x185   : > { %v2456_v24 = vadd.f32 %v2455_v17, %v2454_v31  ;;  %vm2314_vm0 = vcmp.lt.s32.totalorder %v1912_v34, 0  ;;  %v2350_v21 = vadd.s32 18, %v1912_v34  ;;  %v6421_v29 = vor.u32 %v3212_v5, %v3209_v20  ;;  %v5495_v17 = vld [vmem:[%s5603_s4 + $0x50] sm:$0xff] }
 0x186   : > { %v2515_v45 = vsel %vm393_vm1, %v2497_v28, 0.0  ;;  %v1332_v61 = vpop.f32.mrf.mxu2  ;;  %vm2332_vm11 = vmand %vm2314_vm0, %vm2296_vm10  ;;  %v1938_v23 = vadd.s32 %v1937_v15, %v1928_v41  ;;  %v1951_v31 = vmul.u32 58254, %v1947_v33  ;;  %v1950_v16 = vmul.u32 14564, %v1947_v33 }
 0x187   : > { %v2516_v11 = vadd.f32 %v2515_v45, %v2514_v50  ;;  %v1373_v53 = vadd.f32 %v1332_v61, %v5956_v62  ;;  %v1656_v57 = vpop.f32.mrf.mxu0  ;;  %v1533_v18 = vpop.f32.mrf.mxu3  ;;  %v2368_v25 = vsel %vm2332_vm11, %v2350_v21, %v1912_v34  ;;  %v6433_v62 = vsel %vm878_vm5, %v6331_v14, %v6421_v29 }
 0x188   : > { %v1698_v40 = vadd.f32 %v1656_v57, %v1570_v26  ;;  %vm2386_vm12 = vcmp.lt.s32.totalorder %v2368_v25, 16  ;;  %v1939_v44 = vshrl.u32 %v1938_v23, 4  ;;  %v1952_v50 = vmul.u32 14564, %v1948_v4 }
 0x189   : > { %v6425_v37 = vpop.f32.mrf.mxu1  ;;  %v1571_v41 = vadd.f32 %v1530_v30, %v1373_v53  ;;  %v6428_v20 = vsel %vm2386_vm12, 1.0, %v7704_v42  ;;  %v1954_v33 = vshll.u32 %v1951_v31, 16  ;;  %v1953_v30 = vmul.u32 58254, %v1948_v4  ;;  %v6446_v53 = vld [vmem:[%s5603_s4 + $0x68] sm:$0xff] }
 0x18a   : > { %v1716_v34 = vpack.c.bf16 %v1698_v40, %v1698_v40  ;;  %v2438_v5 = vmul.f32 %v6329_v27, %v1698_v40  ;;  %5290 = vmatmul.msk.bf16.vlgmr.msrb.gmra.mxu0 %vm393_vm1, %v6301_v56  ;;  %v1940_v26 = vmul.u32 18, %v1939_v44  ;;  %v1955_v28 = vshrl.u32 %v1951_v31, 16 }
 0x18b   : > { %5239 = vmatmul.msk.bf16.gmra.mxu2 %vm393_vm1, %v5495_v17  ;;  %v1956_v15 = vshll.u32 %v1952_v50, 16  ;;  %v1957_v21 = vshrl.u32 %v1952_v50, 16  ;;  %vm1958_vm13 = vc.u32 %v1950_v16, %v1954_v33  ;;  %v1960_v23 = vadd.s32 %v1954_v33, %v1950_v16 }
 0x18c   : > { %1735 = vst.msk [vmem:[%s6365_s10 + $0x8] sm:$0xf] %vm1732_vm9, %v1716_v34  ;;  %v2457_v14 = vsel %vm393_vm1, %v2438_v5, 0.0  ;;  %v2498_v45 = vmul.f32 %v2438_v5, %v1698_v40  ;;  %v1941_v27 = vsub.s32 %v6338_v35, %v1940_v26  ;;  %v1959_v56 = vsel %vm1958_vm13, 1, %v7698_v36 }
 0x18d   : > { %v2458_v61 = vadd.f32 %v2457_v14, %v2456_v24  ;;  %v7662_v57 = vrot.slane %v6446_v53, 1  ;;  %v1961_v24 = vadd.s32 %v1959_v56, %v1953_v30  ;;  %vm1962_vm8 = vc.u32 %v1960_v23, %v1956_v15  ;;  %v6458_v14 = vld [vmem:[%s5603_s4 + $0x70] sm:$0xff] }
 0x18e   : > { %v2517_v4 = vsel %vm393_vm1, %v2498_v45, 0.0  ;;  %v1335_v25 = vpop.f32.mrf.mxu2  ;;  %vm2297_vm14 = vcmp.ne.s32.totalorder %v1941_v27, 0  ;;  %vm2315_vm15 = vcmp.lt.s32.totalorder %v1941_v27, 0  ;;  %v2351_v31 = vadd.s32 18, %v1941_v27 }
 0x18f   : > { %v2518_v44 = vadd.f32 %v2517_v4, %v2516_v11  ;;  %v1374_v40 = vadd.f32 %v1335_v25, %v5973_v39  ;;  %v1658_v50 = vpop.f32.mrf.mxu0  ;;  %v6451_v34 = vpop.f32.mrf.mxu3  ;;  %vm2333_vm2 = vmand %vm2315_vm15, %vm2297_vm14  ;;  %v1963_v33 = vsel %vm1962_vm8, 1, %v7698_v36  ;;  %v7661_v17 = vrot.slane %v6394_v60, 1 }
 0x190   : > { %v1699_v16 = vadd.f32 %v1658_v50, %v1571_v41  ;;  %v2369_v26 = vsel %vm2333_vm2, %v2351_v31, %v1941_v27  ;;  %v1965_v11 = vadd.s32 %v1963_v33, %v1961_v24  ;;  %v7705_v39 = vrot.slane %v5963_v49, 1 }
 0x191   : > { %v6453_v5 = vpop.f32.mrf.mxu1  ;;  %vm2387_vm10 = vcmp.lt.s32.totalorder %v2369_v26, 16  ;;  %v1977_v41 = vshrl.u32 %v6360_v10, 16  ;;  %v1572_v27 = vadd.f32 %v1533_v18, %v1374_v40  ;;  %v1979_v4 = vmul.u32 14564, %v1976_v1 }
 0x192   : > { %v6465_v30 = vsel %vm560_vm3, %v7705_v39, %v7662_v57  ;;  %v1717_v15 = vpack.c.bf16 %v1699_v16, %v1699_v16  ;;  %v2439_v45 = vmul.f32 %v6405_v46, %v1699_v16  ;;  %v6470_v56 = vsel %vm2387_vm10, 1.0, %v7704_v42 }
 0x193   : > { %v1966_v23 = vadd.s32 %v1965_v11, %v1955_v28  ;;  %v1980_v49 = vmul.u32 58254, %v1976_v1  ;;  %v6478_v25 = vmul.u32 14564, %v1977_v41  ;;  %v3216_v31 = vshrl.u32 %v6458_v14, 16 }
 0x194   : > { %5301 = vmatmul.msk.bf16.gmra.mxu1 %vm393_vm1, %v6344_v0  ;;  %1736 = vst.msk [vmem:[%s6365_s10 + $0xc] sm:$0xf] %vm1732_vm9, %v1717_v15  ;;  %v2459_v46 = vsel %vm393_vm1, %v2439_v45, 0.0  ;;  %v2499_v18 = vmul.f32 %v2439_v45, %v1699_v16  ;;  %5250 = vmatmul.msk.bf16.gmra.mxu3 %vm393_vm1, %v6372_v43  ;;  %v7706_v0 = vrot.slane %v6295_v12, 1  ;;  %v1982_v50 = vmul.u32 58254, %v1977_v41 }
 0x195   : > { %v2460_v1 = vadd.f32 %v2459_v46, %v2458_v61  ;;  %v1967_v40 = vadd.s32 %v1966_v23, %v1957_v21  ;;  %v1983_v24 = vshll.u32 %v1980_v49, 16  ;;  %v1984_v16 = vshrl.u32 %v1980_v49, 16 }
 0x196   : > { %v6490_v28 = vsel %vm560_vm3, %v7706_v0, %v7661_v17  ;;  %v2519_v26 = vsel %vm393_vm1, %v2499_v18, 0.0  ;;  %v1337_v33 = vpop.f32.mrf.mxu2  ;;  %v1985_v11 = vshll.u32 %v6478_v25, 16  ;;  %v1986_v43 = vshrl.u32 %v6478_v25, 16 }
 0x197   : > { %v2520_v39 = vadd.f32 %v2519_v26, %v2518_v44  ;;  %v1661_v15 = vpop.f32.mrf.mxu0  ;;  %v1538_v12 = vpop.f32.mrf.mxu3  ;;  %v1968_v45 = vshrl.u32 %v1967_v40, 4  ;;  %vm1987_vm0 = vc.u32 %v1979_v4, %v1983_v24  ;;  %v3218_v0 = vrot.slane %v3216_v31, 1  ;;  %v5497_v31 = vld [vmem:[%s5603_s4 + $0x58] sm:$0xff] }
 0x198   : > { %v1700_v17 = vadd.f32 %v1661_v15, %v1572_v27  ;;  %v1988_v21 = vsel %vm1987_vm0, 1, %v7698_v36  ;;  %v1989_v41 = vadd.s32 %v1983_v24, %v1979_v4  ;;  %v3219_v23 = vshll.u32 %v6458_v14, 16 }
 0x199   : > { %v6496_v61 = vpop.f32.mrf.mxu1  ;;  %v1375_v49 = vadd.f32 %v1337_v33, %v5982_v19  ;;  %v1969_v46 = vmul.u32 18, %v1968_v45  ;;  %v1990_v25 = vadd.s32 %v1988_v21, %v1982_v50  ;;  %v6502_v44 = vadd.s32 64, %v6054_v47 }
 0x19a   : > { %v1718_v18 = vpack.c.bf16 %v1700_v17, %v1700_v17  ;;  %v2440_v40 = vmul.f32 %v6428_v20, %v1700_v17  ;;  %5291 = vmatmul.msk.bf16.gmra.mxu0 %vm393_vm1, %v6388_v13  ;;  %vm1991_vm11 = vc.u32 %v1989_v41, %v1985_v11  ;;  %v3221_v27 = vrot.slane %v3219_v23, 2 }
 0x19b   : > { %5240 = vmatmul.msk.bf16.gmra.mxu2 %vm393_vm1, %v5497_v31  ;;  %v1970_v4 = vsub.s32 %v6348_v2, %v1969_v46  ;;  %v1992_v19 = vsel %vm1991_vm11, 1, %v7698_v36  ;;  %v2005_v50 = vand.u32 65535, %v6502_v44  ;;  %v2006_v24 = vshrl.u32 %v6502_v44, 16 }
 0x19c   : > { %1737 = vst.msk [vmem:[%s6365_s10 + $0x10] sm:$0xf] %vm1732_vm9, %v1718_v18  ;;  %v2461_v20 = vsel %vm393_vm1, %v2440_v40, 0.0  ;;  %v2500_v26 = vmul.f32 %v2440_v40, %v1700_v17  ;;  %v1994_v33 = vadd.s32 %v1992_v19, %v1990_v25  ;;  %v6516_v13 = vor.u32 %v3221_v27, %v3218_v0 }
 0x19d   : > { %v2462_v11 = vadd.f32 %v2461_v20, %v2460_v1  ;;  %vm2298_vm12 = vcmp.ne.s32.totalorder %v1970_v4, 0  ;;  %vm2316_vm13 = vcmp.lt.s32.totalorder %v1970_v4, 0  ;;  %v2352_v15 = vadd.s32 18, %v1970_v4 }
 0x19e   : > { %v2521_v45 = vsel %vm393_vm1, %v2500_v26, 0.0  ;;  %v1340_v21 = vpop.f32.mrf.mxu2  ;;  %v1573_v41 = vadd.f32 %v6451_v34, %v1375_v49  ;;  %vm2334_vm14 = vmand %vm2316_vm13, %vm2298_vm12  ;;  %v1995_v23 = vadd.s32 %v1994_v33, %v1984_v16  ;;  %v2008_v46 = vmul.u32 14564, %v2005_v50 }
 0x19f   : > { %v2522_v31 = vadd.f32 %v2521_v45, %v2520_v39  ;;  %v1376_v18 = vadd.f32 %v1340_v21, %v5996_v7  ;;  %v1663_v57 = vpop.f32.mrf.mxu0  ;;  %v1540_v17 = vpop.f32.mrf.mxu3  ;;  %v2370_v25 = vsel %vm2334_vm14, %v2352_v15, %v1970_v4  ;;  %v2009_v0 = vmul.u32 58254, %v2005_v50 }
 0x1a0   : > { %v1701_v40 = vadd.f32 %v1663_v57, %v1573_v41  ;;  %vm2388_vm15 = vcmp.lt.s32.totalorder %v2370_v25, 16  ;;  %v1996_v27 = vadd.s32 %v1995_v23, %v1986_v43  ;;  %v2010_v19 = vmul.u32 14564, %v2006_v24  ;;  %v6546_v25 = vld [vmem:[%s5603_s4 + $0x78] sm:$0xff] }
 0x1a1   : > { %v6521_v1 = vpop.f32.mrf.mxu1  ;;  %v1574_v20 = vadd.f32 %v1538_v12, %v1376_v18  ;;  %v6526_v34 = vsel %vm878_vm5, %v6421_v29, %v6516_v13  ;;  %v2011_v16 = vmul.u32 58254, %v2006_v24  ;;  %v2012_v39 = vshll.u32 %v2009_v0, 16 }
 0x1a2   : > { %v1719_v7 = vpack.c.bf16 %v1701_v40, %v1701_v40  ;;  %v2441_v49 = vmul.f32 %v6470_v56, %v1701_v40  ;;  %v5184_v4 = vsel %vm2388_vm15, 1.0, %v7704_v42  ;;  %v1997_v57 = vshrl.u32 %v1996_v27, 4 }
 0x1a3   : > { %v2013_v43 = vshrl.u32 %v2009_v0, 16  ;;  %v2014_v50 = vshll.u32 %v2010_v19, 16  ;;  %vm2016_vm2 = vc.u32 %v2008_v46, %v2012_v39  ;;  %v2018_v12 = vadd.s32 %v2012_v39, %v2008_v46 }
 0x1a4   : > { %5302 = vmatmul.msk.bf16.gmra.mxu1 %vm393_vm1, %v6433_v62  ;;  %1738 = vst.msk [vmem:[%s6365_s10 + $0x14] sm:$0xf] %vm1732_vm9, %v1719_v7  ;;  %v2463_v29 = vsel %vm393_vm1, %v2441_v49, 0.0  ;;  %v2501_v24 = vmul.f32 %v2441_v49, %v1701_v40  ;;  %5251 = vmatmul.msk.bf16.gmra.mxu3 %vm393_vm1, %v6465_v30  ;;  %v1998_v56 = vmul.u32 18, %v1997_v57  ;;  %v2017_v26 = vsel %vm2016_vm2, 1, %v7698_v36  ;;  %v6539_v62 = vld [vmem:[%s5603_s4 + $0x70] sm:$0xff] }
 0x1a5   : > { %v2464_v33 = vadd.f32 %v2463_v29, %v2462_v11  ;;  %v2019_v15 = vadd.s32 %v2017_v26, %v2011_v16  ;;  %vm2020_vm8 = vc.u32 %v2018_v12, %v2014_v50  ;;  %v7664_v45 = vrot.slane %v6539_v62, 1 }
 0x1a6   : > { %v2523_v21 = vsel %vm393_vm1, %v2501_v24, 0.0  ;;  %v1342_v41 = vpop.f32.mrf.mxu2  ;;  %v1999_v23 = vsub.s32 %v6360_v10, %v1998_v56  ;;  %v2015_v46 = vshrl.u32 %v2010_v19, 16  ;;  %v2021_v18 = vsel %vm2020_vm8, 1, %v7698_v36  ;;  %v5499_v24 = vld [vmem:[%s5603_s4 + $0x60] sm:$0xff] }
 0x1a7   : > { %v2524_v30 = vadd.f32 %v2523_v21, %v2522_v31  ;;  %v1377_v0 = vadd.f32 %v1342_v41, %v6005_v32  ;;  %v1666_v11 = vpop.f32.mrf.mxu0  ;;  %v6549_v40 = vpop.f32.mrf.mxu3  ;;  %v2023_v27 = vadd.s32 %v2021_v18, %v2019_v15  ;;  %v7663_v16 = vrot.slane %v6458_v14, 1 }
 0x1a8   : > { %v1702_v39 = vadd.f32 %v1666_v11, %v1574_v20  ;;  %vm2299_vm10 = vcmp.ne.s32.totalorder %v1999_v23, 0  ;;  %vm2317_vm0 = vcmp.lt.s32.totalorder %v1999_v23, 0  ;;  %v2353_v19 = vadd.s32 18, %v1999_v23 }
 0x1a9   : > { %v6552_v7 = vpop.f32.mrf.mxu1  ;;  %v1575_v49 = vadd.f32 %v1540_v17, %v1377_v0  ;;  %vm2335_vm11 = vmand %vm2317_vm0, %vm2299_vm10  ;;  %v2024_v57 = vadd.s32 %v2023_v27, %v2013_v43  ;;  %v7707_v32 = vrot.slane %v6446_v53, 1  ;;  %v6560_v50 = vadd.s32 72, %v6054_v47 }
 0x1aa   : > { %v1720_v12 = vpack.c.bf16 %v1702_v39, %v1702_v39  ;;  %v2442_v20 = vmul.f32 %v5184_v4, %v1702_v39  ;;  %5292 = vmatmul.msk.bf16.gmra.mxu0 %vm393_vm1, %v6490_v28  ;;  %v2371_v29 = vsel %vm2335_vm11, %v2353_v19, %v1999_v23  ;;  %v3225_v17 = vshrl.u32 %v6546_v25, 16 }
 0x1ab   : > { %v2875_v31 = vsel %vm560_vm3, %v7707_v32, %v7664_v45  ;;  %7708 = vst [vmem:[#allocation12_spill] sm:$0xff] %v6560_v50  ;;  %5241 = vmatmul.msk.bf16.gmra.mxu2 %vm393_vm1, %v5499_v24  ;;  %vm2389_vm12 = vcmp.lt.s32.totalorder %v2371_v29, 16  ;;  %v2025_v43 = vadd.s32 %v2024_v57, %v2015_v46  ;;  %v2034_v56 = vand.u32 65535, %v6560_v50 }
 0x1ac   : > { %v2035_v26 = vshrl.u32 %v6560_v50, 16  ;;  %1739 = vst.msk [vmem:[%s6365_s10 + $0x18] sm:$0xf] %vm1732_vm9, %v1720_v12  ;;  %v2465_v15 = vsel %vm393_vm1, %v2442_v20, 0.0  ;;  %v2502_v4 = vmul.f32 %v2442_v20, %v1702_v39  ;;  %v5185_v21 = vsel %vm2389_vm12, 1.0, %v7704_v42 }
 0x1ad   : > { %v7709_v28 = vrot.slane %v6394_v60, 1  ;;  %v2466_v23 = vadd.f32 %v2465_v15, %v2464_v33  ;;  %v2026_v46 = vshrl.u32 %v2025_v43, 4  ;;  %v2037_v18 = vmul.u32 14564, %v2034_v56 }
 0x1ae   : > { %v2038_v0 = vmul.u32 58254, %v2034_v56  ;;  %v2525_v11 = vsel %vm393_vm1, %v2502_v4, 0.0  ;;  %v1345_v27 = vpop.f32.mrf.mxu2  ;;  %v2039_v19 = vmul.u32 14564, %v2035_v26  ;;  %v3227_v57 = vrot.slane %v3225_v17, 1 }
 0x1af   : > { %v6578_v41 = vsel %vm560_vm3, %v7709_v28, %v7663_v16  ;;  %v3228_v39 = vshll.u32 %v6546_v25, 16  ;;  %v2526_v32 = vadd.f32 %v2525_v11, %v2524_v30  ;;  %v1668_v12 = vpop.f32.mrf.mxu0  ;;  %v1545_v20 = vpop.f32.mrf.mxu3  ;;  %v2027_v29 = vmul.u32 18, %v2026_v46 }
 0x1b0   : > { %v2040_v24 = vmul.u32 58254, %v2035_v26  ;;  %v2041_v60 = vshll.u32 %v2038_v0, 16  ;;  %v1378_v28 = vadd.f32 %v1345_v27, %v6018_v55  ;;  %v1703_v16 = vadd.f32 %v1668_v12, %v1575_v49 }
 0x1b1   : > { %v6583_v33 = vpop.f32.mrf.mxu1  ;;  %v2042_v43 = vshrl.u32 %v2038_v0, 16  ;;  %v2043_v56 = vshll.u32 %v2039_v19, 16  ;;  %v2028_v15 = vsub.s32 %v6502_v44, %v2027_v29  ;;  %v2044_v4 = vshrl.u32 %v2039_v19, 16 }
 0x1b2   : > { %vm2045_vm13 = vc.u32 %v2037_v18, %v2041_v60  ;;  %v2047_v17 = vadd.s32 %v2041_v60, %v2037_v18  ;;  %v1721_v45 = vpack.c.bf16 %v1703_v16, %v1703_v16  ;;  %v2443_v30 = vmul.f32 %v5185_v21, %v1703_v16 }
 0x1b3   : > { %v2046_v11 = vsel %vm2045_vm13, 1, %v7698_v36  ;;  %v3230_v46 = vrot.slane %v3228_v39, 2  ;;  %vm2300_vm14 = vcmp.ne.s32.totalorder %v2028_v15, 0  ;;  %vm2318_vm15 = vcmp.lt.s32.totalorder %v2028_v15, 0 }
 0x1b4   : > { %5303 = vmatmul.msk.bf16.gmra.mxu1 %vm393_vm1, %v6526_v34  ;;  %v2354_v55 = vadd.s32 18, %v2028_v15  ;;  %v2048_v49 = vadd.s32 %v2046_v11, %v2040_v24  ;;  %1740 = vst.msk [vmem:[%s6365_s10 + $0x1c] sm:$0xf] %vm1732_vm9, %v1721_v45  ;;  %v2467_v26 = vsel %vm393_vm1, %v2443_v30, 0.0  ;;  %v2503_v0 = vmul.f32 %v2443_v30, %v1703_v16  ;;  %vm2336_vm2 = vmand %vm2318_vm15, %vm2300_vm14  ;;  %5252 = vmatmul.msk.bf16.gmra.mxu3 %vm393_vm1, %v2875_v31 }
 0x1b5   : > { %vm2049_vm8 = vc.u32 %v2047_v17, %v2043_v56  ;;  %v6593_v21 = vor.u32 %v3230_v46, %v3227_v57  ;;  %v2468_v18 = vadd.f32 %v2467_v26, %v2466_v23  ;;  %v6597_v34 = vadd.s32 80, %v6054_v47 }
 0x1b6   : > { %v2372_v27 = vsel %vm2336_vm2, %v2354_v55, %v2028_v15  ;;  %v2050_v19 = vsel %vm2049_vm8, 1, %v7698_v36  ;;  %v2527_v39 = vsel %vm393_vm1, %v2503_v0, 0.0  ;;  %v1347_v12 = vpop.f32.mrf.mxu2  ;;  %v1576_v45 = vadd.f32 %v6549_v40, %v1378_v28 }
 0x1b7   : > { %7710 = vst [vmem:[#allocation13_spill] sm:$0xff] %v6597_v34  ;;  %vm2390_vm10 = vcmp.lt.s32.totalorder %v2372_v27, 16  ;;  %v2052_v16 = vadd.s32 %v2050_v19, %v2048_v49  ;;  %v2528_v29 = vadd.f32 %v2527_v39, %v2526_v32  ;;  %v1379_v31 = vadd.f32 %v1347_v12, %v6028_v48  ;;  %v1671_v57 = vpop.f32.mrf.mxu0  ;;  %v1548_v17 = vpop.f32.mrf.mxu3  ;;  %v6609_v32 = vld [vmem:[%s5603_s4 + $0x78] sm:$0xff] }
 0x1b8   : > { %v5186_v23 = vsel %vm2390_vm10, 1.0, %v7704_v42  ;;  %v2063_v24 = vand.u32 65535, %v6597_v34  ;;  %v1704_v60 = vadd.f32 %v1671_v57, %v1576_v45  ;;  %v2064_v15 = vshrl.u32 %v6597_v34, 16  ;;  %v6625_v57 = vld [vmem:[%s5603_s4 + $0x80] sm:$0xff] }
 0x1b9   : > { %v2053_v56 = vadd.s32 %v2052_v16, %v2042_v43  ;;  %v3232_v30 = vsel %vm878_vm5, %v6516_v13, %v6593_v21  ;;  %v7666_v48 = vrot.slane %v6609_v32, 1  ;;  %v6612_v55 = vpop.f32.mrf.mxu1  ;;  %v1577_v13 = vadd.f32 %v1545_v20, %v1379_v31 }
 0x1ba   : > { %v2066_v40 = vmul.u32 14564, %v2063_v24  ;;  %v2067_v28 = vmul.u32 58254, %v2063_v24  ;;  %v1722_v11 = vpack.c.bf16 %v1704_v60, %v1704_v60  ;;  %v2444_v46 = vmul.f32 %v5186_v23, %v1704_v60  ;;  %5293 = vmatmul.msk.bf16.gmra.mxu0 %vm393_vm1, %v6578_v41 }
 0x1bb   : > { %v2054_v43 = vadd.s32 %v2053_v56, %v2044_v4  ;;  %v2068_v49 = vmul.u32 14564, %v2064_v15  ;;  %5242 = vmatmul.msk.bf16.gmra.mxu2 %vm393_vm1, %v6446_v53  ;;  %v2069_v26 = vmul.u32 58254, %v2064_v15  ;;  %v7665_v27 = vrot.slane %v6546_v25, 1 }
 0x1bc   : > { %v2070_v0 = vshll.u32 %v2067_v28, 16  ;;  %1741 = vst.msk [vmem:[%s6365_s10 + $0x20] sm:$0xf] %vm1732_vm9, %v1722_v11  ;;  %v2469_v19 = vsel %vm393_vm1, %v2444_v46, 0.0  ;;  %v2504_v39 = vmul.f32 %v2444_v46, %v1704_v60  ;;  %v2071_v41 = vshrl.u32 %v2067_v28, 16 }
 0x1bd   : > { %v2055_v12 = vshrl.u32 %v2054_v43, 4  ;;  %v2072_v45 = vshll.u32 %v2068_v49, 16  ;;  %v6622_v16 = vadd.f32 %v2469_v19, %v2468_v18  ;;  %v7711_v24 = vrot.slane %v6539_v62, 1 }
 0x1be   : > { %vm2074_vm0 = vc.u32 %v2066_v40, %v2070_v0  ;;  %v2076_v4 = vadd.s32 %v2070_v0, %v2066_v40  ;;  %v2529_v53 = vsel %vm393_vm1, %v2504_v39, 0.0  ;;  %v1350_v20 = vpop.f32.mrf.mxu2  ;;  %v6640_v43 = vadd.s32 88, %v6054_v47 }
 0x1bf   : > { %v2056_v31 = vmul.u32 18, %v2055_v12  ;;  %v2075_v23 = vsel %vm2074_vm0, 1, %v7698_v36  ;;  %v2877_v60 = vsel %vm560_vm3, %v7711_v24, %v7666_v48  ;;  %v6634_v56 = vadd.f32 %v2529_v53, %v2528_v29  ;;  %v1673_v15 = vpop.f32.mrf.mxu0 }
 0x1c0   : > { %v1380_v18 = vadd.f32 %v1350_v20, %v6049_v51  ;;  %v2077_v40 = vadd.s32 %v2075_v23, %v2069_v26  ;;  %vm2078_vm11 = vc.u32 %v2076_v4, %v2072_v45  ;;  %v1705_v28 = vadd.f32 %v1673_v15, %v1577_v13  ;;  %7712 = vst [vmem:[#allocation14_spill] sm:$0xff] %v6640_v43  ;;  %v1550_v13 = vpop.f32.mrf.mxu3 }
 0x1c1   : > { %v2057_v11 = vsub.s32 %v6560_v50, %v2056_v31  ;;  %v2079_v46 = vsel %vm2078_vm11, 1, %v7698_v36  ;;  %v2073_v0 = vshrl.u32 %v2068_v49, 16  ;;  %v3234_v39 = vshrl.u32 %v6625_v57, 16  ;;  %v6654_v31 = vpop.f32.mrf.mxu1 }
 0x1c2   : > { %v2081_v19 = vadd.s32 %v2079_v46, %v2077_v40  ;;  %v3237_v29 = vshll.u32 %v6625_v57, 16  ;;  %v1723_v12 = vpack.c.bf16 %v1705_v28, %v1705_v28  ;;  %v7713_v45 = vrot.slane %v6458_v14, 1 }
 0x1c3   : > { %vm2301_vm12 = vcmp.ne.s32.totalorder %v2057_v11, 0  ;;  %vm2319_vm13 = vcmp.lt.s32.totalorder %v2057_v11, 0  ;;  %v2355_v51 = vadd.s32 18, %v2057_v11  ;;  %v2092_v4 = vand.u32 65535, %v6640_v43 }
 0x1c4   : > { %vm2337_vm14 = vmand %vm2319_vm13, %vm2301_vm12  ;;  %5304 = vmatmul.msk.bf16.gmra.mxu1 %vm393_vm1, %v3232_v30  ;;  %v2082_v26 = vadd.s32 %v2081_v19, %v2071_v41  ;;  %v3064_v49 = vsel %vm560_vm3, %v7713_v45, %v7665_v27  ;;  %v2093_v53 = vshrl.u32 %v6640_v43, 16  ;;  %1742 = vst.msk [vmem:[%s6365_s10 + $0x24] sm:$0xf] %vm1732_vm9, %v1723_v12  ;;  %v1578_v23 = vadd.f32 %v1548_v17, %v1380_v18 }
 0x1c5   : > { %v2373_v20 = vsel %vm2337_vm14, %v2355_v51, %v2057_v11  ;;  %5253 = vmatmul.msk.bf16.gmra.mxu3 %vm393_vm1, %v2877_v60  ;;  %v3236_v30 = vrot.slane %v3234_v39, 1  ;;  %v3239_v41 = vrot.slane %v3237_v29, 2  ;;  %v2096_v15 = vmul.u32 58254, %v2092_v4 }
 0x1c6   : > { %vm2391_vm15 = vcmp.lt.s32.totalorder %v2373_v20, 16  ;;  %v2083_v24 = vadd.s32 %v2082_v26, %v2073_v0  ;;  %v6659_v14 = vadd.f32 %v6092_v22, %v6136_v59  ;;  %v1352_v46 = vpop.f32.mrf.mxu2  ;;  %v2095_v19 = vmul.u32 14564, %v2092_v4 }
 0x1c7   : > { %v5187_v40 = vsel %vm2391_vm15, 1.0, %v7704_v42  ;;  %v2097_v12 = vmul.u32 14564, %v2093_v53  ;;  %v6663_v11 = vadd.s32 96, %v6054_v47  ;;  %v1676_v18 = vpop.f32.mrf.mxu0  ;;  %v2098_v39 = vmul.u32 58254, %v2093_v53 }
 0x1c8   : > { %v2445_v17 = vmul.f32 %v5187_v40, %v1705_v28  ;;  %v2084_v60 = vshrl.u32 %v2083_v24, 4  ;;  %v2099_v29 = vshll.u32 %v2096_v15, 16  ;;  %v1381_v0 = vadd.f32 %v1352_v46, %v6078_v38 }
 0x1c9   : > { %7714 = vst [vmem:[#allocation15_spill] sm:$0xff] %v6663_v11  ;;  %v1706_v51 = vadd.f32 %v1676_v18, %v1578_v23  ;;  %v2101_v26 = vshll.u32 %v2097_v12, 16  ;;  %v6666_v45 = vor.u32 %v3239_v41, %v3236_v30  ;;  %v2100_v20 = vshrl.u32 %v2096_v15, 16  ;;  %v1553_v15 = vpop.f32.mrf.mxu3  ;;  %v6681_v46 = vpop.f32.mrf.mxu1  ;;  %v7715_v18 = vld [vmem:[#allocation3_spill] sm:$0xff] }
 0x1ca   : > { %v2471_v22 = vsel %vm393_vm1, %v2445_v17, 0.0  ;;  %v2505_v59 = vmul.f32 %v2445_v17, %v1705_v28  ;;  %v2085_v4 = vmul.u32 18, %v2084_v60  ;;  %5294 = vmatmul.msk.bf16.gmra.mxu0 %vm393_vm1, %v3064_v49  ;;  %vm2103_vm2 = vc.u32 %v2095_v19, %v2099_v29 }
 0x1cb   : > { %v2472_v27 = vadd.f32 %v2471_v22, %v6622_v16  ;;  %v1724_v48 = vpack.c.bf16 %v1706_v51, %v1706_v51  ;;  %v2105_v53 = vadd.s32 %v2099_v29, %v2095_v19  ;;  %5243 = vmatmul.msk.bf16.gmra.mxu2 %vm393_vm1, %v6539_v62  ;;  %v2102_v23 = vshrl.u32 %v2097_v12, 16 }
 0x1cc   : > { %v2531_v24 = vsel %vm393_vm1, %v2505_v59, 0.0  ;;  %v2086_v38 = vsub.s32 %v6597_v34, %v2085_v4  ;;  %v2104_v30 = vsel %vm2103_vm2, 1, %v7698_v36  ;;  %v2121_v49 = vand.u32 65535, %v6663_v11 }
 0x1cd   : > { %v2532_v28 = vadd.f32 %v2531_v24, %v6634_v56  ;;  %1743 = vst.msk [vmem:[%s6365_s10 + $0x28] sm:$0xf] %vm1732_vm9, %v1724_v48  ;;  %v2106_v16 = vadd.s32 %v2104_v30, %v2098_v39  ;;  %vm2107_vm8 = vc.u32 %v2105_v53, %v2101_v26  ;;  %v1579_v19 = vadd.f32 %v1550_v13, %v1381_v0  ;;  %v6692_v24 = vld [vmem:[%s5603_s4 + $0x80] sm:$0xff] }
 0x1ce   : > { %vm2302_vm10 = vcmp.ne.s32.totalorder %v2086_v38, 0  ;;  %vm2320_vm0 = vcmp.lt.s32.totalorder %v2086_v38, 0  ;;  %v2356_v41 = vadd.s32 18, %v2086_v38  ;;  %v2108_v40 = vsel %vm2107_vm8, 1, %v7698_v36  ;;  %v1355_v62 = vpop.f32.mrf.mxu2 }
 0x1cf   : > { %vm2338_vm11 = vmand %vm2320_vm0, %vm2302_vm10  ;;  %v2110_v12 = vadd.s32 %v2108_v40, %v2106_v16  ;;  %v2122_v56 = vshrl.u32 %v6663_v11, 16  ;;  %v2125_v48 = vmul.u32 58254, %v2121_v49  ;;  %v1382_v60 = vadd.f32 %v1355_v62, %v7715_v18  ;;  %v1678_v39 = vpop.f32.mrf.mxu0 }
 0x1d0   : > { %v2374_v17 = vsel %vm2338_vm11, %v2356_v41, %v2086_v38  ;;  %v3241_v29 = vsel %vm878_vm5, %v6593_v21, %v6666_v45  ;;  %v2124_v26 = vmul.u32 14564, %v2121_v49  ;;  %v6688_v22 = vadd.f32 %v1678_v39, %v1579_v19 }
 0x1d1   : > { %vm2392_vm12 = vcmp.lt.s32.totalorder %v2374_v17, 16  ;;  %v2111_v59 = vadd.s32 %v2110_v12, %v2100_v20  ;;  %v2126_v4 = vmul.u32 14564, %v2122_v56  ;;  %v2127_v0 = vmul.u32 58254, %v2122_v56 }
 0x1d2   : > { %v5188_v13 = vsel %vm2392_vm12, 1.0, %v7704_v42  ;;  %v2128_v53 = vshll.u32 %v2125_v48, 16  ;;  %v2878_v38 = vrot.slane %v6692_v24, 1  ;;  %v1725_v16 = vpack.c.bf16 %v6688_v22, %v6688_v22 }
 0x1d3   : > { %v2446_v30 = vmul.f32 %v5188_v13, %v1706_v51  ;;  %v2112_v21 = vadd.s32 %v2111_v59, %v2102_v23  ;;  %v3065_v49 = vrot.slane %v6625_v57, 1  ;;  %v2129_v20 = vshrl.u32 %v2125_v48, 16 }
 0x1d4   : > { %5305 = vmatmul.msk.bf16.gmra.mxu1 %vm393_vm1, %v3241_v29  ;;  %v2130_v41 = vshll.u32 %v2126_v4, 16  ;;  %vm2132_vm13 = vc.u32 %v2124_v26, %v2128_v53  ;;  %v2134_v40 = vadd.s32 %v2128_v53, %v2124_v26  ;;  %1744 = vst.msk [vmem:[%s6365_s10 + $0x2c] sm:$0xf] %vm1732_vm9, %v1725_v16  ;;  %v7716_v23 = vrot.slane %v6609_v32, 1 }
 0x1d5   : > { %v2473_v62 = vsel %vm393_vm1, %v2446_v30, 0.0  ;;  %v2506_v19 = vmul.f32 %v2446_v30, %v1706_v51  ;;  %v2113_v12 = vshrl.u32 %v2112_v21, 4  ;;  %v2133_v56 = vsel %vm2132_vm13, 1, %v7698_v36 }
 0x1d6   : > { %v6703_v17 = vadd.f32 %v2473_v62, %v2472_v27  ;;  %v2135_v18 = vadd.s32 %v2133_v56, %v2127_v0  ;;  %vm2136_vm14 = vc.u32 %v2134_v40, %v2130_v41  ;;  %v2879_v48 = vsel %vm560_vm3, %v7716_v23, %v2878_v38  ;;  %v1357_v26 = vpop.f32.mrf.mxu2  ;;  %v1555_v27 = vpop.f32.mrf.mxu3  ;;  %v7719_v62 = vld [vmem:[#allocation7_spill] sm:$0xff]  ;;  %v7721_v23 = vld [vmem:[#allocation8_spill] sm:$0xff] }
 0x1d7   : > { %v2533_v39 = vsel %vm393_vm1, %v2506_v19, 0.0  ;;  %v2114_v29 = vmul.u32 18, %v2113_v12  ;;  %v1580_v51 = vadd.f32 %v1553_v15, %v1382_v60  ;;  %v2137_v59 = vsel %vm2136_vm14, 1, %v7698_v36  ;;  %5254 = vmatmul.msk.bf16.gmra.mxu3 %vm393_vm1, %v2879_v48  ;;  %v1681_v53 = vpop.f32.mrf.mxu0  ;;  %v6719_v40 = vpop.f32.mrf.mxu1  ;;  %v7720_v19 = vld [vmem:[#allocation6_spill] sm:$0xff] }
 0x1d8   : > { %v2534_v13 = vadd.f32 %v2533_v39, %v2532_v28  ;;  %v2131_v0 = vshrl.u32 %v2126_v4, 16  ;;  %v2139_v30 = vadd.s32 %v2137_v59, %v2135_v18  ;;  %v7717_v16 = vrot.slane %v6546_v25, 1 }
 0x1d9   : > { %v2115_v41 = vsub.s32 %v6640_v43, %v2114_v29  ;;  %v1383_v15 = vadd.f32 %v1357_v26, %v6659_v14  ;;  %v6722_v60 = vadd.f32 %v1681_v53, %v1580_v51  ;;  %v6725_v28 = vadd.s32 104, %v6054_v47  ;;  %v6741_v26 = vld [vmem:[%s5603_s4 + $0x88] sm:$0xff] }
 0x1da   : > { %v3066_v21 = vsel %vm560_vm3, %v7717_v16, %v3065_v49  ;;  %v2140_v4 = vadd.s32 %v2139_v30, %v2129_v20  ;;  %v1194_v12 = vadd.f32 %v7720_v19, %v7719_v62  ;;  %v1195_v48 = vadd.f32 %v7721_v23, %v6222_v63 }
 0x1db   : > { %7718 = vst [vmem:[#allocation3_spill] sm:$0xff] %v6725_v28  ;;  %vm2303_vm15 = vcmp.ne.s32.totalorder %v2115_v41, 0  ;;  %vm2321_vm2 = vcmp.lt.s32.totalorder %v2115_v41, 0  ;;  %v2357_v25 = vadd.s32 18, %v2115_v41  ;;  %v1726_v56 = vpack.c.bf16 %v6722_v60, %v6722_v60  ;;  %5295 = vmatmul.msk.bf16.gmra.mxu0 %vm393_vm1, %v3066_v21  ;;  %5244 = vmatmul.msk.bf16.gmra.mxu2 %vm393_vm1, %v6609_v32 }
 0x1dc   : > { %vm2339_vm8 = vmand %vm2321_vm2, %vm2303_vm15  ;;  %v2141_v14 = vadd.s32 %v2140_v4, %v2131_v0  ;;  %v2150_v18 = vand.u32 65535, %v6725_v28  ;;  %v2151_v20 = vshrl.u32 %v6725_v28, 16  ;;  %v1581_v29 = vadd.f32 %v1555_v27, %v1383_v15 }
 0x1dd   : > { %v2375_v39 = vsel %vm2339_vm8, %v2357_v25, %v2115_v41  ;;  %1745 = vst.msk [vmem:[%s6365_s10 + $0x30] sm:$0xf] %vm1732_vm9, %v1726_v56  ;;  %v6744_v51 = vadd.s32 112, %v6054_v47  ;;  %v6748_v59 = vadd.f32 %v6224_v54, %v6267_v58  ;;  %v3243_v27 = vshrl.u32 %v6741_v26, 16 }
 0x1de   : > { %vm2393_vm10 = vcmp.lt.s32.totalorder %v2375_v39, 16  ;;  %v2142_v32 = vshrl.u32 %v2141_v14, 4  ;;  %v2153_v53 = vmul.u32 14564, %v2150_v18  ;;  %v2154_v0 = vmul.u32 58254, %v2150_v18  ;;  %v1360_v63 = vpop.f32.mrf.mxu2  ;;  %v1558_v23 = vpop.f32.mrf.mxu3 }
 0x1df   : > { %7722 = vst [vmem:[#allocation7_spill] sm:$0xff] %v6744_v51  ;;  %v5189_v30 = vsel %vm2393_vm10, 1.0, %v7704_v42  ;;  %v2155_v16 = vmul.u32 14564, %v2151_v20  ;;  %v2156_v21 = vmul.u32 58254, %v2151_v20  ;;  %v1384_v4 = vadd.f32 %v1360_v63, %v1194_v12  ;;  %v1683_v62 = vpop.f32.mrf.mxu0 }
 0x1e0   : > { %v2447_v41 = vmul.f32 %v5189_v30, %v6688_v22  ;;  %v2143_v15 = vmul.u32 18, %v2142_v32  ;;  %v2157_v19 = vshll.u32 %v2154_v0, 16  ;;  %v6753_v25 = vadd.f32 %v1683_v62, %v1581_v29  ;;  %v6759_v32 = vpop.f32.mrf.mxu1 }
 0x1e1   : > { %v2158_v54 = vshrl.u32 %v2154_v0, 16  ;;  %v2159_v58 = vshll.u32 %v2155_v16, 16  ;;  %v2160_v56 = vshrl.u32 %v2155_v16, 16  ;;  %v3246_v62 = vshll.u32 %v6741_v26, 16 }
 0x1e2   : > { %v2475_v14 = vsel %vm393_vm1, %v2447_v41, 0.0  ;;  %v2507_v18 = vmul.f32 %v2447_v41, %v6688_v22  ;;  %v2144_v20 = vsub.s32 %v6663_v11, %v2143_v15  ;;  %vm2161_vm0 = vc.u32 %v2153_v53, %v2157_v19 }
 0x1e3   : > { %v2476_v39 = vadd.f32 %v2475_v14, %v6703_v17  ;;  %v1727_v12 = vpack.c.bf16 %v6753_v25, %v6753_v25  ;;  %v2162_v29 = vsel %vm2161_vm0, 1, %v7698_v36  ;;  %v2163_v0 = vadd.s32 %v2157_v19, %v2153_v53 }
 0x1e4   : > { %v2535_v30 = vsel %vm393_vm1, %v2507_v18, 0.0  ;;  %vm2304_vm11 = vcmp.ne.s32.totalorder %v2144_v20, 0  ;;  %vm2322_vm12 = vcmp.lt.s32.totalorder %v2144_v20, 0  ;;  %v2358_v63 = vadd.s32 18, %v2144_v20 }
 0x1e5   : > { %v2536_v22 = vadd.f32 %v2535_v30, %v2534_v13  ;;  %vm2340_vm13 = vmand %vm2322_vm12, %vm2304_vm11  ;;  %1746 = vst.msk [vmem:[%s6365_s10 + $0x34] sm:$0xf] %vm1732_vm9, %v1727_v12  ;;  %v2164_v16 = vadd.s32 %v2162_v29, %v2156_v21  ;;  %vm2165_vm14 = vc.u32 %v2163_v0, %v2159_v58  ;;  %v3245_v17 = vrot.slane %v3243_v27, 1 }
 0x1e6   : > { %v2376_v41 = vsel %vm2340_vm13, %v2358_v63, %v2144_v20  ;;  %v2166_v15 = vsel %vm2165_vm14, 1, %v7698_v36  ;;  %v1582_v14 = vadd.f32 %v1558_v23, %v1384_v4  ;;  %v1362_v19 = vpop.f32.mrf.mxu2  ;;  %v2179_v18 = vand.u32 65535, %v6744_v51  ;;  %v6780_v23 = vld [vmem:[%s5603_s4 + $0x88] sm:$0xff] }
 0x1e7   : > { %vm2394_vm15 = vcmp.lt.s32.totalorder %v2376_v41, 16  ;;  %v2168_v53 = vadd.s32 %v2166_v15, %v2164_v16  ;;  %v2180_v13 = vshrl.u32 %v6744_v51, 16  ;;  %v3248_v12 = vrot.slane %v3246_v62, 2  ;;  %v1686_v58 = vpop.f32.mrf.mxu0 }
 0x1e8   : > { %v5190_v30 = vsel %vm2394_vm15, 1.0, %v7704_v42  ;;  %v1385_v21 = vadd.f32 %v1362_v19, %v1195_v48  ;;  %v6774_v27 = vadd.f32 %v6269_v9, %v6316_v3  ;;  %v6777_v4 = vadd.f32 %v1686_v58, %v1582_v14 }
 0x1e9   : > { %v2448_v20 = vmul.f32 %v5190_v30, %v6722_v60  ;;  %v2169_v29 = vadd.s32 %v2168_v53, %v2158_v54  ;;  %v7668_v0 = vrot.slane %v6780_v23, 1  ;;  %v6783_v63 = vor.u32 %v3248_v12, %v3245_v17  ;;  %v1560_v17 = vpop.f32.mrf.mxu3 }
 0x1ea   : > { %v2182_v16 = vmul.u32 14564, %v2179_v18  ;;  %v2183_v41 = vmul.u32 58254, %v2179_v18  ;;  %v2184_v48 = vmul.u32 14564, %v2180_v13  ;;  %v1728_v54 = vpack.c.bf16 %v6777_v4, %v6777_v4 }
 0x1eb   : > { %v2477_v15 = vsel %vm393_vm1, %v2448_v20, 0.0  ;;  %v2508_v9 = vmul.f32 %v2448_v20, %v6722_v60  ;;  %v2170_v3 = vadd.s32 %v2169_v29, %v2160_v56  ;;  %v3250_v14 = vsel %vm878_vm5, %v6666_v45, %v6783_v63  ;;  %5245 = vmatmul.msk.bf16.gmra.mxu2 %vm393_vm1, %v6692_v24  ;;  %v6797_v60 = vpop.f32.mrf.mxu1 }
 0x1ec   : > { %v6789_v62 = vadd.f32 %v2477_v15, %v2476_v39  ;;  %v2185_v53 = vmul.u32 58254, %v2180_v13  ;;  %v2186_v19 = vshll.u32 %v2183_v41, 16  ;;  %5306 = vmatmul.msk.bf16.gmra.mxu1 %vm393_vm1, %v3250_v14  ;;  %1747 = vst.msk [vmem:[%s6365_s10 + $0x38] sm:$0xf] %vm1732_vm9, %v1728_v54  ;;  %v2187_v56 = vshrl.u32 %v2183_v41, 16 }
 0x1ed   : > { %v2537_v18 = vsel %vm393_vm1, %v2508_v9, 0.0  ;;  %v2171_v30 = vshrl.u32 %v2170_v3, 4  ;;  %v2188_v39 = vshll.u32 %v2184_v48, 16  ;;  %v2881_v13 = vsel %vm560_vm3, %v2878_v38, %v7668_v0 }
 0x1ee   : > { %v6802_v12 = vadd.f32 %v2537_v18, %v2536_v22  ;;  %vm2190_vm2 = vc.u32 %v2182_v16, %v2186_v19  ;;  %v2192_v45 = vadd.s32 %v2186_v19, %v2182_v16  ;;  %5255 = vmatmul.msk.bf16.gmra.mxu3 %vm393_vm1, %v2881_v13  ;;  %v7667_v29 = vrot.slane %v6741_v26, 1  ;;  %v1365_v15 = vpop.f32.mrf.mxu2  ;;  %v6831_v18 = vld [vmem:[%s5603_s4 + $0x90] sm:$0xff] }
 0x1ef   : > { %v2172_v58 = vmul.u32 18, %v2171_v30  ;;  %v2191_v20 = vsel %vm2190_vm2, 1, %v7698_v36  ;;  %v1583_v41 = vadd.f32 %v1560_v17, %v1385_v21  ;;  %v2189_v9 = vshrl.u32 %v2184_v48, 16  ;;  %v1688_v16 = vpop.f32.mrf.mxu0 }
 0x1f0   : > { %v2193_v22 = vadd.s32 %v2191_v20, %v2185_v53  ;;  %vm2194_vm8 = vc.u32 %v2192_v45, %v2188_v39  ;;  %v6813_v3 = vadd.s32 120, %v6054_v47  ;;  %v3068_v54 = vsel %vm560_vm3, %v3065_v49, %v7667_v29 }
 0x1f1   : > { %v2173_v24 = vsub.s32 %v6725_v28, %v2172_v58  ;;  %v2195_v38 = vsel %vm2194_vm8, 1, %v7698_v36  ;;  %v6822_v14 = vadd.f32 %v1688_v16, %v1583_v41  ;;  %5296 = vmatmul.msk.bf16.gmra.mxu0 %vm393_vm1, %v3068_v54  ;;  %v1386_v48 = vadd.f32 %v1365_v15, %v6748_v59  ;;  %v1563_v41 = vpop.f32.mrf.mxu3 }
 0x1f2   : > { %7723 = vst [vmem:[#allocation6_spill] sm:$0xff] %v6813_v3  ;;  %v2197_v21 = vadd.s32 %v2195_v38, %v2193_v22  ;;  %v2208_v17 = vand.u32 65535, %v6813_v3  ;;  %v2209_v53 = vshrl.u32 %v6813_v3, 16  ;;  %v3252_v58 = vshrl.u32 %v6831_v18, 16 }
 0x1f3   : > { %vm2305_vm10 = vcmp.ne.s32.totalorder %v2173_v24, 0  ;;  %vm2323_vm0 = vcmp.lt.s32.totalorder %v2173_v24, 0  ;;  %v2359_v19 = vadd.s32 18, %v2173_v24  ;;  %v1729_v57 = vpack.c.bf16 %v6822_v14, %v6822_v14  ;;  %v6838_v54 = vpop.f32.mrf.mxu1 }
 0x1f4   : > { %vm2341_vm11 = vmand %vm2323_vm0, %vm2305_vm10  ;;  %v2198_v49 = vadd.s32 %v2197_v21, %v2187_v56  ;;  %v2211_v30 = vmul.u32 14564, %v2208_v17  ;;  %v2212_v39 = vmul.u32 58254, %v2208_v17  ;;  %v2213_v45 = vmul.u32 14564, %v2209_v53 }
 0x1f5   : > { %v2377_v13 = vsel %vm2341_vm11, %v2359_v19, %v2173_v24  ;;  %1748 = vst.msk [vmem:[%s6365_s10 + $0x3c] sm:$0xf] %vm1732_vm9, %v1729_v57  ;;  %v2214_v59 = vmul.u32 58254, %v2209_v53  ;;  %v3255_v20 = vshll.u32 %v6831_v18, 16  ;;  %v3254_v17 = vrot.slane %v3252_v58, 1 }
 0x1f6   : > { %vm2395_vm12 = vcmp.lt.s32.totalorder %v2377_v13, 16  ;;  %v2199_v15 = vadd.s32 %v2198_v49, %v2189_v9  ;;  %v2215_v22 = vshll.u32 %v2212_v39, 16  ;;  %v2216_v16 = vshrl.u32 %v2212_v39, 16  ;;  %v1367_v24 = vpop.f32.mrf.mxu2 }
 0x1f7   : > { %v5191_v38 = vsel %vm2395_vm12, 1.0, %v7704_v42  ;;  %v2217_v56 = vshll.u32 %v2213_v45, 16  ;;  %v2218_v21 = vshrl.u32 %v2213_v45, 16  ;;  %v1691_v29 = vpop.f32.mrf.mxu0  ;;  %v3257_v9 = vrot.slane %v3255_v20, 2 }
 0x1f8   : > { %v2449_v19 = vmul.f32 %v5191_v38, %v6753_v25  ;;  %v2200_v53 = vshrl.u32 %v2199_v15, 4  ;;  %vm2219_vm13 = vc.u32 %v2211_v30, %v2215_v22  ;;  %v2221_v57 = vadd.s32 %v2215_v22, %v2211_v30 }
 0x1f9   : > { %v2220_v13 = vsel %vm2219_vm13, 1, %v7698_v36  ;;  %v1387_v49 = vadd.f32 %v1367_v24, %v6774_v27  ;;  %v1584_v39 = vadd.f32 %v1563_v41, %v1386_v48  ;;  %v6846_v38 = vor.u32 %v3257_v9, %v3254_v17  ;;  %v7725_v41 = vld [vmem:[#allocation4_spill] sm:$0xff] }
 0x1fa   : > { %v2479_v0 = vsel %vm393_vm1, %v2449_v19, 0.0  ;;  %v2509_v28 = vmul.f32 %v2449_v19, %v6753_v25  ;;  %v2201_v11 = vmul.u32 18, %v2200_v53  ;;  %v2222_v45 = vadd.s32 %v2220_v13, %v2214_v59 }
 0x1fb   : > { %v2480_v58 = vadd.f32 %v2479_v0, %v6789_v62  ;;  %vm2223_vm14 = vc.u32 %v2221_v57, %v2217_v56  ;;  %v6848_v15 = vadd.f32 %v1691_v29, %v1584_v39  ;;  %v6854_v48 = vadd.s32 128, %v6054_v47  ;;  %5246 = vmatmul.msk.bf16.gmra.mxu2 %vm393_vm1, %v6780_v23  ;;  %v6871_v57 = vpop.f32.mrf.mxu1 }
 0x1fc   : > { %v2539_v30 = vsel %vm393_vm1, %v2509_v28, 0.0  ;;  %v2202_v20 = vsub.s32 %v6744_v51, %v2201_v11  ;;  %v2224_v27 = vsel %vm2223_vm14, 1, %v7698_v36  ;;  %v3259_v62 = vsel %vm878_vm5, %v6783_v63, %v6846_v38  ;;  %v1565_v63 = vpop.f32.mrf.mxu3 }
 0x1fd   : > { %7724 = vst [vmem:[#allocation8_spill] sm:$0xff] %v6854_v48  ;;  %v2540_v25 = vadd.f32 %v2539_v30, %v6802_v12  ;;  %v2226_v0 = vadd.s32 %v2224_v27, %v2222_v45  ;;  %v1730_v28 = vpack.c.bf16 %v6848_v15, %v6848_v15  ;;  %5307 = vmatmul.msk.bf16.gmra.mxu1 %vm393_vm1, %v3259_v62  ;;  %v2237_v29 = vand.u32 65535, %v6854_v48 }
 0x1fe   : > { %vm2306_vm15 = vcmp.ne.s32.totalorder %v2202_v20, 0  ;;  %vm2324_vm2 = vcmp.lt.s32.totalorder %v2202_v20, 0  ;;  %v2360_v11 = vadd.s32 18, %v2202_v20  ;;  %v2238_v12 = vshrl.u32 %v6854_v48, 16 }
 0x1ff   : > { %vm2342_vm8 = vmand %vm2324_vm2, %vm2306_vm15  ;;  %v2227_v59 = vadd.s32 %v2226_v0, %v2216_v16  ;;  %1749 = vst.msk [vmem:[%s6365_s10 + $0x40] sm:$0xf] %vm1732_vm9, %v1730_v28  ;;  %v2882_v22 = vrot.slane %v7725_v41, 1  ;;  %v2240_v17 = vmul.u32 14564, %v2237_v29  ;;  %v2241_v24 = vmul.u32 58254, %v2237_v29  ;;  %v1693_v39 = vpop.f32.mrf.mxu0 }
 0x200   : > { %v2378_v56 = vsel %vm2342_vm8, %v2360_v11, %v2202_v20  ;;  %v3069_v19 = vrot.slane %v6831_v18, 1  ;;  %v2242_v13 = vmul.u32 14564, %v2238_v12  ;;  %v1585_v9 = vadd.f32 %v1565_v63, %v1387_v49 }
 0x201   : > { %vm2396_vm10 = vcmp.lt.s32.totalorder %v2378_v56, 16  ;;  %v2228_v53 = vadd.s32 %v2227_v59, %v2218_v21  ;;  %v2243_v45 = vmul.u32 58254, %v2238_v12  ;;  %v2244_v30 = vshll.u32 %v2241_v24, 16 }
 0x202   : > { %v5192_v16 = vsel %vm2396_vm10, 1.0, %v7704_v42  ;;  %v7726_v27 = vrot.slane %v6780_v23, 1  ;;  %v2245_v28 = vshrl.u32 %v2241_v24, 16  ;;  %v2246_v11 = vshll.u32 %v2242_v13, 16 }
 0x203   : > { %v2450_v0 = vmul.f32 %v5192_v16, %v6777_v4  ;;  %v2229_v62 = vshrl.u32 %v2228_v53, 4  ;;  %vm2248_vm0 = vc.u32 %v2240_v17, %v2244_v30  ;;  %v2250_v21 = vadd.s32 %v2244_v30, %v2240_v17 }
 0x204   : > { %v2883_v20 = vsel %vm560_vm3, %v7726_v27, %v2882_v22  ;;  %v7727_v49 = vrot.slane %v6741_v26, 1  ;;  %v6884_v59 = vadd.f32 %v1693_v39, %v1585_v9  ;;  %v2249_v22 = vsel %vm2248_vm0, 1, %v7698_v36 }
 0x205   : > { %5256 = vmatmul.msk.bf16.gmra.mxu3 %vm393_vm1, %v2883_v20  ;;  %v2481_v23 = vsel %vm393_vm1, %v2450_v0, 0.0  ;;  %v2510_v12 = vmul.f32 %v2450_v0, %v6777_v4  ;;  %v2230_v41 = vmul.u32 18, %v2229_v62  ;;  %v2251_v63 = vadd.s32 %v2249_v22, %v2243_v45  ;;  %v6902_v62 = vpop.f32.mrf.mxu1 }
 0x206   : > { %v3070_v29 = vsel %vm560_vm3, %v7727_v49, %v3069_v19  ;;  %v2482_v56 = vadd.f32 %v2481_v23, %v2480_v58  ;;  %vm2252_vm11 = vc.u32 %v2250_v21, %v2246_v11  ;;  %v1731_v17 = vpack.c.bf16 %v6884_v59, %v6884_v59 }
 0x207   : > { %5297 = vmatmul.msk.bf16.gmra.mxu0 %vm393_vm1, %v3070_v29  ;;  %v2541_v24 = vsel %vm393_vm1, %v2510_v12, 0.0  ;;  %v2231_v53 = vsub.s32 %v6813_v3, %v2230_v41  ;;  %v2253_v9 = vsel %vm2252_vm11, 1, %v7698_v36  ;;  %v6896_v39 = vadd.s32 136, %v6054_v47 }
 0x208   : > { %v2542_v4 = vadd.f32 %v2541_v24, %v2540_v25  ;;  %v2247_v16 = vshrl.u32 %v2242_v13, 16  ;;  %v2255_v30 = vadd.s32 %v2253_v9, %v2251_v63  ;;  %1750 = vst.msk [vmem:[%s6365_s10 + $0x44] sm:$0xf] %vm1732_vm9, %v1731_v17  ;;  %v2923_v13 = vpop.f32.mrf.mxu3 }
 0x209   : > { %7728 = vst [vmem:[#allocation4_spill] sm:$0xff] %v6896_v39  ;;  %vm2307_vm12 = vcmp.ne.s32.totalorder %v2231_v53, 0  ;;  %vm2325_vm13 = vcmp.lt.s32.totalorder %v2231_v53, 0  ;;  %v2361_v58 = vadd.s32 18, %v2231_v53  ;;  %v2266_v45 = vand.u32 65535, %v6896_v39 }
 0x20a   : > { %vm2343_vm14 = vmand %vm2325_vm13, %vm2307_vm12  ;;  %v2256_v27 = vadd.s32 %v2255_v30, %v2245_v28  ;;  %v2267_v20 = vshrl.u32 %v6896_v39, 16 }
 0x20b   : > { %v2379_v0 = vsel %vm2343_vm14, %v2361_v58, %v2231_v53  ;;  %v2269_v11 = vmul.u32 14564, %v2266_v45  ;;  %v2270_v21 = vmul.u32 58254, %v2266_v45 }
 0x20c   : > { %vm2397_vm15 = vcmp.lt.s32.totalorder %v2379_v0, 16  ;;  %v2257_v25 = vadd.s32 %v2256_v27, %v2247_v16  ;;  %v2271_v49 = vmul.u32 14564, %v2267_v20  ;;  %v2272_v23 = vmul.u32 58254, %v2267_v20 }
 0x20d   : > { %v5193_v29 = vsel %vm2397_vm15, 1.0, %v7704_v42  ;;  %v2273_v12 = vshll.u32 %v2270_v21, 16  ;;  %v2274_v30 = vshrl.u32 %v2270_v21, 16  ;;  %v2815_v21 = vpop.f32.mrf.mxu2 }
 0x20e   : > { %v2451_v41 = vmul.f32 %v5193_v29, %v6822_v14  ;;  %v2258_v22 = vshrl.u32 %v2257_v25, 4  ;;  %v2275_v63 = vshll.u32 %v2271_v49, 16  ;;  %v6912_v29 = vpop.f32.mrf.mxu1 }
 0x20f   : > { %vm2277_vm2 = vc.u32 %v2269_v11, %v2273_v12  ;;  %v2279_v28 = vadd.s32 %v2273_v12, %v2269_v11  ;;  %v2276_v11 = vshrl.u32 %v2271_v49, 16  ;;  %v3004_v12 = vld [vmem:[%s5603_s4 + $0x98] sm:$0x1]  ;;  %v3112_v49 = vpop.f32.mrf.mxu0 }
 0x210   : > { %v2483_v17 = vsel %vm393_vm1, %v2451_v41, 0.0  ;;  %v2511_v24 = vmul.f32 %v2451_v41, %v6822_v14  ;;  %v2259_v53 = vmul.u32 18, %v2258_v22  ;;  %v2278_v9 = vsel %vm2277_vm2, 1, %v7698_v36 }
 0x211   : > { %v2484_v16 = vadd.f32 %v2483_v17, %v2482_v56  ;;  %v2280_v58 = vadd.s32 %v2278_v9, %v2272_v23  ;;  %vm2281_vm8 = vc.u32 %v2279_v28, %v2275_v63  ;;  %v3175_v23 = vld [vmem:[%s5603_s4 + $0x98] sm:$0x3]  ;;  %v2816_v22 = vadd.f32 %v2815_v21, %v6318_v52  ;;  %v3497_v17 = vld [vmem:[%s5603_s4 + $0x58] sm:$0xc] }
 0x212   : > { %v2543_v45 = vsel %vm393_vm1, %v2511_v24, 0.0  ;;  %v2260_v27 = vsub.s32 %v6854_v48, %v2259_v53  ;;  %v2282_v20 = vsel %vm2281_vm8, 1, %v7698_v36  ;;  %v3178_v63 = vunpack.c.l.b16 %v3175_v23  ;;  %v6919_v24 = vld [vmem:[%s5603_s4 + $0x5c] sm:$0xf]  ;;  %v6922_v53 = vld [vmem:[%s5603_s4 + $0x60] sm:$0xff] }
 0x213   : > { %v2544_v0 = vadd.f32 %v2543_v45, %v2542_v4  ;;  %v2284_v25 = vadd.s32 %v2282_v20, %v2280_v58  ;;  %v2925_v4 = vpop.f32.mrf.mxu3  ;;  %v3043_v28 = vunpack.c.l.b16 %v3004_v12  ;;  %v7671_v58 = vunpack.c.l.b16 %v6919_v24  ;;  %v7731_v48 = vld [vmem:[#allocation9_spill] sm:$0xff] }
 0x214   : > { %vm2308_vm10 = vcmp.ne.s32.totalorder %v2260_v27, 0  ;;  %vm2326_vm0 = vcmp.lt.s32.totalorder %v2260_v27, 0  ;;  %v2362_v14 = vadd.s32 18, %v2260_v27  ;;  %v2968_v52 = vadd.f32 %v2923_v13, %v2816_v22 }
 0x215   : > { %vm2344_vm11 = vmand %vm2326_vm0, %vm2308_vm10  ;;  %v2285_v56 = vadd.s32 %v2284_v25, %v2274_v30  ;;  %v3536_v30 = vunpack.c.l.b16 %v3497_v17  ;;  %v3053_v20 = vpack.c.b16 %v3043_v28, %v3043_v28  ;;  %v3371_v17 = vld [vmem:[%s5603_s4 + $0x50] sm:$0xc] }
 0x216   : > { %v2380_v41 = vsel %vm2344_vm11, %v2362_v14, %v2260_v27  ;;  %v6926_v27 = vpack.c.b16 %v3178_v63, %v3178_v63  ;;  %v6944_v23 = vpop.f32.mrf.mxu1 }
 0x217   : > { %vm2398_vm12 = vcmp.lt.s32.totalorder %v2380_v41, 16  ;;  %v2286_v9 = vadd.s32 %v2285_v56, %v2276_v11  ;;  %v3555_v21 = vpack.c.b16 %v7671_v58, %v3536_v30  ;;  %v6934_v56 = vadd.f32 %v3112_v49, %v2968_v52 }
 0x218   : > { %v5194_v45 = vsel %vm2398_vm12, 1.0, %v7704_v42  ;;  %v3261_v12 = vshrl.u32 %v6926_v27, 16  ;;  %v3264_v11 = vshll.u32 %v6926_v27, 16  ;;  %v3071_v41 = vrot.slane %v3053_v20, 1  ;;  %v2817_v20 = vpop.f32.mrf.mxu2 }
 0x219   : > { %v2452_v25 = vmul.f32 %v5194_v45, %v6848_v15  ;;  %v2287_v14 = vshrl.u32 %v2286_v9, 4  ;;  %v3565_v28 = vrot.slane %v3555_v21, 2 }
 0x21a   : > { %v3263_v45 = vrot.slane %v3261_v12, 1  ;;  %v3266_v30 = vrot.slane %v3264_v11, 2  ;;  %v3072_v58 = vsel %vm560_vm3, %v3069_v19, %v3071_v41  ;;  %v7730_v11 = vld [vmem:[#allocation11_spill] sm:$0xff]  ;;  %v6953_v19 = vld [vmem:[%s5603_s4 + $0x58] sm:$0xff]  ;;  %v3695_v41 = vshll.u32 %v3555_v21, 16 }
 0x21b   : > { %v2485_v63 = vsel %vm393_vm1, %v2452_v25, 0.0  ;;  %v2512_v13 = vmul.f32 %v2452_v25, %v6848_v15  ;;  %v2288_v22 = vmul.u32 18, %v2287_v14  ;;  %5298 = vmatmul.msk.bf16.gmra.mxu0 %vm393_vm1, %v3072_v58  ;;  %v7729_v15 = vrot.slane %v6922_v53, 2 }
 0x21c   : > { %v2486_v9 = vadd.f32 %v2485_v63, %v2484_v16  ;;  %v3374_v25 = vunpack.c.l.b16 %v3371_v17  ;;  %v3267_v12 = vor.u32 %v3266_v30, %v3263_v45  ;;  %v2818_v63 = vadd.f32 %v2817_v20, %v7730_v11  ;;  %v6965_v11 = vld [vmem:[%s5603_s4 + $0x68] sm:$0xff] }
 0x21d   : > { %v2545_v49 = vsel %vm393_vm1, %v2512_v13, 0.0  ;;  %v2289_v52 = vsub.s32 %v6896_v39, %v2288_v22  ;;  %v3567_v16 = vsel %vm1076_vm4, %v3565_v28, %v7729_v15  ;;  %v2928_v13 = vpop.f32.mrf.mxu3  ;;  %v3114_v22 = vpop.f32.mrf.mxu0  ;;  %v3882_v39 = vld [vmem:[%s5603_s4 + $0x58] sm:$0x8]  ;;  %v7732_v28 = vunpack.c.l.b16 %v7731_v48 }
 0x21e   : > { %v2546_v14 = vadd.f32 %v2545_v49, %v2544_v0  ;;  %5352 = vmatmul.msk.bf16.vlgmr.msra.gmra.mxu3 %vm393_vm1, %v3567_v16  ;;  %v3268_v0 = vsel %vm878_vm5, %v6846_v38, %v3267_v12  ;;  %v2969_v45 = vadd.f32 %v2925_v4, %v2818_v63  ;;  %v3885_v20 = vunpack.c.l.b16 %v3882_v39  ;;  %v6974_v63 = vpop.f32.mrf.mxu1 }
 0x21f   : > { %vm2309_vm3 = vcmp.ne.s32.totalorder %v2289_v52, 0  ;;  %vm2327_vm13 = vcmp.lt.s32.totalorder %v2289_v52, 0  ;;  %v2363_v58 = vadd.s32 18, %v2289_v52  ;;  %v3375_v17 = vpack.c.b16 %v7732_v28, %v3374_v25  ;;  %5308 = vmatmul.msk.bf16.gmra.mxu1 %vm393_vm1, %v3268_v0 }
 0x220   : > { %vm2345_vm14 = vmand %vm2327_vm13, %vm2309_vm3  ;;  %v3692_v15 = vshrl.u32 %v3555_v21, 16  ;;  %v6962_v16 = vadd.f32 %v3114_v22, %v2969_v45  ;;  %v7733_v25 = vrot.slane %v6953_v19, 2  ;;  %v3700_v39 = vshrl.u32 %v6922_v53, 16  ;;  %v2820_v12 = vpop.f32.mrf.mxu2 }
 0x221   : > { %v2381_v30 = vsel %vm2345_vm14, %v2363_v58, %v2289_v52  ;;  %v3376_v49 = vrot.slane %v3375_v17, 2  ;;  %v3697_v52 = vrot.slane %v3695_v41, 3  ;;  %v7734_v22 = vunpack.c.l.b16 %v6919_v24 }
 0x222   : > { %vm2399_vm15 = vcmp.lt.s32.totalorder %v2381_v30, 16  ;;  %v3694_v38 = vrot.slane %v3692_v15, 2  ;;  %v3703_v58 = vshll.u32 %v6922_v53, 16  ;;  %v2821_v45 = vadd.f32 %v2820_v12, %v6401_v6 }
 0x223   : > { %v5195_v48 = vsel %vm2399_vm15, 1.0, %v7704_v42  ;;  %v3378_v28 = vsel %vm1076_vm4, %v3376_v49, %v7733_v25  ;;  %v3886_v21 = vpack.c.b16 %v7734_v22, %v3885_v20  ;;  %v3568_v41 = vrot.slane %v6965_v11, 2 }
 0x224   : > { %v2453_v4 = vmul.f32 %v5195_v48, %v6884_v59  ;;  %5310 = vmatmul.msk.bf16.vlgmr.msra.gmra.mxu2 %vm393_vm1, %v3378_v28  ;;  %v3698_v48 = vor.u32 %v3697_v52, %v3694_v38  ;;  %v3702_v25 = vrot.slane %v3700_v39, 2  ;;  %v3705_v28 = vrot.slane %v3703_v58, 3 }
 0x225   : > { %v2930_v30 = vpop.f32.mrf.mxu3  ;;  %v3117_v49 = vpop.f32.mrf.mxu0  ;;  %v2970_v20 = vadd.f32 %v2928_v13, %v2821_v45  ;;  %v3887_v51 = vrot.slane %v3886_v21, 3 }
 0x226   : > { %v2487_v17 = vsel %vm393_vm1, %v2453_v4, 0.0  ;;  %v2513_v0 = vmul.f32 %v2453_v4, %v6884_v59  ;;  %v3706_v3 = vor.u32 %v3705_v28, %v3702_v25  ;;  %v3888_v59 = vrot.slane %v6922_v53, 3  ;;  %v6995_v52 = vpop.f32.mrf.mxu1 }
 0x227   : > { %v6983_v15 = vadd.f32 %v2487_v17, %v2486_v9  ;;  %v6989_v6 = vadd.f32 %v3117_v49, %v2970_v20  ;;  %v7737_v4 = vrot.slane %v6922_v53, 2  ;;  %v3709_v17 = vshrl.u32 %v6965_v11, 16 }
 0x228   : > { %v2547_v24 = vsel %vm393_vm1, %v2513_v0, 0.0  ;;  %v3707_v12 = vsel %vm1394_vm6, %v3698_v48, %v3706_v3  ;;  %v2822_v38 = vpop.f32.mrf.mxu2  ;;  %v3889_v39 = vsel %vm1592_vm7, %v3887_v51, %v3888_v59  ;;  %v3712_v0 = vshll.u32 %v6965_v11, 16 }
 0x229   : > { %7735 = vst [vmem:[#allocation11_spill] sm:$0xff] %v6983_v15  ;;  %v6986_v22 = vadd.f32 %v2547_v24, %v2546_v14  ;;  %v3569_v9 = vsel %vm1076_vm4, %v7737_v4, %v3568_v41  ;;  %v5504_v14 = vld [vmem:[%s5603_s4 + $0x60] sm:$0xff]  ;;  %v2823_v21 = vadd.f32 %v2822_v38, %v6425_v37  ;;  %v7738_v49 = vrot.slane %v6953_v19, 2  ;;  %v7011_v37 = vld [vmem:[%s5603_s4 + $0x70] sm:$0xff] }
 0x22a   : > { %v3379_v13 = vrot.slane %v5504_v14, 2  ;;  %v3711_v51 = vrot.slane %v3709_v17, 2  ;;  %v3714_v28 = vrot.slane %v3712_v0, 3  ;;  %v3570_v19 = vrot.slane %v7011_v37, 2 }
 0x22b   : > { %7736 = vst [vmem:[#allocation9_spill] sm:$0xff] %v6986_v22  ;;  %5362 = vmatmul.msk.bf16.vlgmr.msra.gmra.mxu0 %vm393_vm1, %v3707_v12  ;;  %v2971_v45 = vadd.f32 %v2930_v30, %v2823_v21  ;;  %v3890_v14 = vrot.slane %v6965_v11, 3 }
 0x22c   : > { %v3380_v48 = vsel %vm1076_vm4, %v7738_v49, %v3379_v13  ;;  %v3715_v12 = vor.u32 %v3714_v28, %v3711_v51 }
 0x22d   : > { %v2933_v58 = vpop.f32.mrf.mxu3  ;;  %v3119_v53 = vpop.f32.mrf.mxu0  ;;  %v3891_v49 = vsel %vm1592_vm7, %v3888_v59, %v3890_v14  ;;  %v7037_v59 = vld [vmem:[%s5603_s4 + $0x78] sm:$0xff] }
 0x22e   : > { %5353 = vmatmul.msk.bf16.gmra.mxu3 %vm393_vm1, %v3569_v9  ;;  %v7008_v25 = vadd.f32 %v3119_v53, %v2971_v45  ;;  %v7014_v20 = vpop.f32.mrf.mxu1  ;;  %v3716_v21 = vsel %vm1394_vm6, %v3706_v3, %v3715_v12  ;;  %v3571_v53 = vsel %vm1076_vm4, %v3568_v41, %v3570_v19  ;;  %v3718_v3 = vshrl.u32 %v7011_v37, 16 }
 0x22f   : > { %5372 = vmatmul.msk.bf16.vlgmr.msra.gmra.mxu1 %vm393_vm1, %v3889_v39  ;;  %v3721_v41 = vshll.u32 %v7011_v37, 16 }
 0x230   : > { %v2825_v24 = vpop.f32.mrf.mxu2 }
 0x231   : > { %v2826_v30 = vadd.f32 %v2825_v24, %v6453_v5  ;;  %v5505_v5 = vld [vmem:[%s5603_s4 + $0x68] sm:$0xff] }
 0x232   : > { %v3381_v45 = vrot.slane %v5505_v5, 2  ;;  %v3572_v5 = vrot.slane %v7037_v59, 2 }
 0x233   : > { %v2972_v38 = vadd.f32 %v2933_v58, %v2826_v30  ;;  %v3720_v30 = vrot.slane %v3718_v3, 2 }
 0x234   : > { %5311 = vmatmul.msk.bf16.gmra.mxu2 %vm393_vm1, %v3380_v48  ;;  %v3382_v28 = vsel %vm1076_vm4, %v3379_v13, %v3381_v45  ;;  %v3573_v3 = vsel %vm1076_vm4, %v3570_v19, %v3572_v5  ;;  %v3730_v19 = vshll.u32 %v7037_v59, 16 }
 0x235   : > { %v2935_v4 = vpop.f32.mrf.mxu3  ;;  %v3122_v9 = vpop.f32.mrf.mxu0 }
 0x236   : > { %v7019_v39 = vadd.f32 %v3122_v9, %v2972_v38  ;;  %v7023_v0 = vpop.f32.mrf.mxu1  ;;  %v3723_v9 = vrot.slane %v3721_v41, 3 }
 0x238   : > { %v2827_v17 = vpop.f32.mrf.mxu2 }
 0x239   : > { %v2828_v58 = vadd.f32 %v2827_v17, %v6496_v61  ;;  %v3724_v17 = vor.u32 %v3723_v9, %v3720_v30 }
 0x23b   : > { %5363 = vmatmul.msk.bf16.gmra.mxu0 %vm393_vm1, %v3716_v21  ;;  %v2973_v51 = vadd.f32 %v2935_v4, %v2828_v58 }
 0x23d   : > { %v2938_v11 = vpop.f32.mrf.mxu3  ;;  %v3124_v48 = vpop.f32.mrf.mxu0 }
 0x23e   : > { %5354 = vmatmul.msk.bf16.gmra.mxu3 %vm393_vm1, %v3571_v53  ;;  %v7034_v24 = vadd.f32 %v3124_v48, %v2973_v51  ;;  %v7040_v38 = vpop.f32.mrf.mxu1  ;;  %v3725_v48 = vsel %vm1394_vm6, %v3715_v12, %v3724_v17  ;;  %v3727_v12 = vshrl.u32 %v7037_v59, 16 }
 0x23f   : > { %5373 = vmatmul.msk.bf16.gmra.mxu1 %vm393_vm1, %v3891_v49  ;;  %v3892_v49 = vrot.slane %v7011_v37, 3 }
 0x240   : > { %v2830_v61 = vpop.f32.mrf.mxu2 }
 0x241   : > { %v2831_v21 = vadd.f32 %v2830_v61, %v6521_v1  ;;  %v5506_v1 = vld [vmem:[%s5603_s4 + $0x70] sm:$0xff]  ;;  %v3893_v30 = vsel %vm1592_vm7, %v3890_v14, %v3892_v49  ;;  %v7063_v14 = vld [vmem:[%s5603_s4 + $0x80] sm:$0xff] }
 0x243   : > { %v2974_v13 = vadd.f32 %v2938_v11, %v2831_v21 }
 0x244   : > { %5312 = vmatmul.msk.bf16.gmra.mxu2 %vm393_vm1, %v3382_v28  ;;  %v3383_v28 = vrot.slane %v5506_v1, 2 }
 0x245   : > { %v2940_v53 = vpop.f32.mrf.mxu3  ;;  %v3127_v4 = vpop.f32.mrf.mxu0 }
 0x246   : > { %v7045_v58 = vadd.f32 %v3127_v4, %v2974_v13  ;;  %v7049_v51 = vpop.f32.mrf.mxu1  ;;  %v3384_v21 = vsel %vm1076_vm4, %v3381_v45, %v3383_v28  ;;  %v3729_v13 = vrot.slane %v3727_v12, 2 }
 0x248   : > { %v2832_v41 = vpop.f32.mrf.mxu2 }
 0x249   : > { %v2833_v11 = vadd.f32 %v2832_v41, %v6552_v7 }
 0x24b   : > { %5364 = vmatmul.msk.bf16.gmra.mxu0 %vm393_vm1, %v3725_v48  ;;  %v2975_v61 = vadd.f32 %v2940_v53, %v2833_v11  ;;  %v3732_v48 = vrot.slane %v3730_v19, 3 }
 0x24d   : > { %v2943_v37 = vpop.f32.mrf.mxu3  ;;  %v3129_v9 = vpop.f32.mrf.mxu0  ;;  %v3733_v11 = vor.u32 %v3732_v48, %v3729_v13 }
 0x24e   : > { %5355 = vmatmul.msk.bf16.gmra.mxu3 %vm393_vm1, %v3573_v3  ;;  %v7060_v4 = vadd.f32 %v3129_v9, %v2975_v61  ;;  %v7066_v3 = vpop.f32.mrf.mxu1  ;;  %v3894_v9 = vrot.slane %v7037_v59, 3 }
 0x24f   : > { %5374 = vmatmul.msk.bf16.gmra.mxu1 %vm393_vm1, %v3893_v30  ;;  %v3574_v30 = vrot.slane %v7063_v14, 2  ;;  %v3734_v19 = vsel %vm1394_vm6, %v3724_v17, %v3733_v11  ;;  %v3736_v17 = vshrl.u32 %v7063_v14, 16 }
 0x250   : > { %v2835_v7 = vpop.f32.mrf.mxu2  ;;  %v3895_v13 = vsel %vm1592_vm7, %v3892_v49, %v3894_v9  ;;  %v7089_v49 = vld [vmem:[%s5603_s4 + $0x88] sm:$0xff] }
 0x251   : > { %v2836_v41 = vadd.f32 %v2835_v7, %v6583_v33  ;;  %v3575_v61 = vsel %vm1076_vm4, %v3572_v5, %v3574_v30  ;;  %v5507_v33 = vld [vmem:[%s5603_s4 + $0x78] sm:$0xff]  ;;  %v3739_v5 = vshll.u32 %v7063_v14, 16 }
 0x252   : > { %v3385_v7 = vrot.slane %v5507_v33, 2 }
 0x253   : > { %v2976_v45 = vadd.f32 %v2943_v37, %v2836_v41  ;;  %v3741_v33 = vrot.slane %v3739_v5, 3 }
 0x254   : > { %5313 = vmatmul.msk.bf16.gmra.mxu2 %vm393_vm1, %v3384_v21 }
 0x255   : > { %v2945_v1 = vpop.f32.mrf.mxu3  ;;  %v3132_v53 = vpop.f32.mrf.mxu0 }
 0x256   : > { %v7071_v12 = vadd.f32 %v3132_v53, %v2976_v45  ;;  %v7075_v22 = vpop.f32.mrf.mxu1  ;;  %v3386_v53 = vsel %vm1076_vm4, %v3383_v28, %v3385_v7 }
 0x258   : > { %v2837_v21 = vpop.f32.mrf.mxu2 }
 0x259   : > { %v2838_v37 = vadd.f32 %v2837_v21, %v6612_v55 }
 0x25b   : > { %5365 = vmatmul.msk.bf16.gmra.mxu0 %vm393_vm1, %v3734_v19  ;;  %v2977_v41 = vadd.f32 %v2945_v1, %v2838_v37  ;;  %v3738_v19 = vrot.slane %v3736_v17, 2 }
 0x25d   : > { %v2948_v59 = vpop.f32.mrf.mxu3  ;;  %v3134_v48 = vpop.f32.mrf.mxu0  ;;  %v3742_v37 = vor.u32 %v3741_v33, %v3738_v19 }
 0x25e   : > { %5356 = vmatmul.msk.bf16.gmra.mxu3 %vm393_vm1, %v3575_v61  ;;  %v7086_v45 = vadd.f32 %v3134_v48, %v2977_v41  ;;  %v7092_v61 = vpop.f32.mrf.mxu1  ;;  %v3896_v48 = vrot.slane %v7063_v14, 3 }
 0x25f   : > { %5375 = vmatmul.msk.bf16.gmra.mxu1 %vm393_vm1, %v3895_v13  ;;  %v3576_v13 = vrot.slane %v7089_v49, 2  ;;  %v3743_v5 = vsel %vm1394_vm6, %v3733_v11, %v3742_v37  ;;  %v3745_v11 = vshrl.u32 %v7089_v49, 16 }
 0x260   : > { %v2840_v55 = vpop.f32.mrf.mxu2  ;;  %v3897_v19 = vsel %vm1592_vm7, %v3894_v9, %v3896_v48  ;;  %v7115_v9 = vld [vmem:[%s5603_s4 + $0x90] sm:$0xff] }
 0x261   : > { %v2841_v21 = vadd.f32 %v2840_v55, %v6654_v31  ;;  %v3577_v41 = vsel %vm1076_vm4, %v3574_v30, %v3576_v13  ;;  %v5508_v31 = vld [vmem:[%s5603_s4 + $0x80] sm:$0xff]  ;;  %v3748_v30 = vshll.u32 %v7089_v49, 16 }
 0x262   : > { %v3387_v55 = vrot.slane %v5508_v31, 2 }
 0x263   : > { %v2978_v28 = vadd.f32 %v2948_v59, %v2841_v21  ;;  %v3750_v31 = vrot.slane %v3748_v30, 3 }
 0x264   : > { %5314 = vmatmul.msk.bf16.gmra.mxu2 %vm393_vm1, %v3386_v53 }
 0x265   : > { %v2950_v15 = vpop.f32.mrf.mxu3  ;;  %v3137_v1 = vpop.f32.mrf.mxu0 }
 0x266   : > { %v7097_v17 = vadd.f32 %v3137_v1, %v2978_v28  ;;  %v7101_v43 = vpop.f32.mrf.mxu1  ;;  %v3388_v1 = vsel %vm1076_vm4, %v3385_v7, %v3387_v55  ;;  %v3898_v7 = vrot.slane %v7089_v49, 3 }
 0x268   : > { %v2842_v53 = vpop.f32.mrf.mxu2 }
 0x269   : > { %v2843_v59 = vadd.f32 %v2842_v53, %v6681_v46 }
 0x26b   : > { %5366 = vmatmul.msk.bf16.gmra.mxu0 %vm393_vm1, %v3743_v5  ;;  %v2979_v21 = vadd.f32 %v2950_v15, %v2843_v59  ;;  %v3747_v5 = vrot.slane %v3745_v11, 2 }
 0x26d   : > { %v2953_v14 = vpop.f32.mrf.mxu3  ;;  %v3139_v33 = vpop.f32.mrf.mxu0  ;;  %v3751_v15 = vor.u32 %v3750_v31, %v3747_v5 }
 0x26e   : > { %5357 = vmatmul.msk.bf16.gmra.mxu3 %vm393_vm1, %v3577_v41  ;;  %v7112_v28 = vadd.f32 %v3139_v33, %v2979_v21  ;;  %v7118_v41 = vpop.f32.mrf.mxu1 }
 0x26f   : > { %5376 = vmatmul.msk.bf16.gmra.mxu1 %vm393_vm1, %v3897_v19  ;;  %7739 = vst [vmem:[#allocation16_spill] sm:$0xff] %v7118_v41  ;;  %v3578_v19 = vrot.slane %v7115_v9, 2  ;;  %v3752_v11 = vsel %vm1394_vm6, %v3742_v37, %v3751_v15  ;;  %v3757_v37 = vshll.u32 %v7115_v9, 16 }
 0x270   : > { %v2845_v46 = vpop.f32.mrf.mxu2 }
 0x271   : > { %v2846_v53 = vadd.f32 %v2845_v46, %v6719_v40  ;;  %v3579_v30 = vsel %vm1076_vm4, %v3576_v13, %v3578_v19  ;;  %v3389_v40 = vrot.slane %v6741_v26, 2 }
 0x273   : > { %v2980_v59 = vadd.f32 %v2953_v14, %v2846_v53  ;;  %v3390_v46 = vsel %vm1076_vm4, %v3387_v55, %v3389_v40  ;;  %v7141_v53 = vld [vmem:[%s5603_s4 + $0x98] sm:$0xff]  ;;  %v7681_v55 = vrot.slane %v7115_v9, 3 }
 0x274   : > { %5315 = vmatmul.msk.bf16.gmra.mxu2 %vm393_vm1, %v3388_v1  ;;  %v3899_v1 = vsel %vm1592_vm7, %v3896_v48, %v3898_v7 }
 0x275   : > { %v2955_v34 = vpop.f32.mrf.mxu3  ;;  %v3142_v50 = vpop.f32.mrf.mxu0 }
 0x276   : > { %v7123_v33 = vadd.f32 %v3142_v50, %v2980_v59  ;;  %v3754_v50 = vshrl.u32 %v7115_v9, 16  ;;  %v7134_v31 = vpop.f32.mrf.mxu1 }
 0x277   : > { %7741 = vst [vmem:[#allocation18_spill] sm:$0xff] %v7134_v31 }
 0x278   : > { %7740 = vst [vmem:[#allocation17_spill] sm:$0xff] %v7123_v33  ;;  %v2847_v21 = vpop.f32.mrf.mxu2  ;;  %v3756_v48 = vrot.slane %v3754_v50, 2 }
 0x279   : > { %v2848_v5 = vadd.f32 %v2847_v21, %v6759_v32  ;;  %v3759_v32 = vrot.slane %v3757_v37, 3 }
 0x27b   : > { %5367 = vmatmul.msk.bf16.gmra.mxu0 %vm393_vm1, %v3752_v11  ;;  %v2981_v13 = vadd.f32 %v2955_v34, %v2848_v5  ;;  %v3760_v31 = vor.u32 %v3759_v32, %v3756_v48  ;;  %v3580_v34 = vrot.slane %v7141_v53, 2 }
 0x27d   : > { %v2958_v14 = vpop.f32.mrf.mxu3  ;;  %v3144_v49 = vpop.f32.mrf.mxu0  ;;  %v3761_v50 = vsel %vm1394_vm6, %v3751_v15, %v3760_v31  ;;  %v3581_v37 = vsel %vm1076_vm4, %v3578_v19, %v3580_v34  ;;  %v3763_v15 = vshrl.u32 %v7141_v53, 16  ;;  %v3766_v19 = vshll.u32 %v7141_v53, 16 }
 0x27e   : > { %5358 = vmatmul.msk.bf16.gmra.mxu3 %vm393_vm1, %v3579_v30  ;;  %v7138_v26 = vadd.f32 %v3144_v49, %v2981_v13  ;;  %v7147_v5 = vpop.f32.mrf.mxu1  ;;  %v3515_v13 = vld [vmem:[%s5603_s4 + $0xa0] sm:$0x3] }
 0x27f   : > { %5377 = vmatmul.msk.bf16.gmra.mxu1 %vm393_vm1, %v3899_v1  ;;  %7743 = vst [vmem:[#allocation20_spill] sm:$0xff] %v7147_v5 }
 0x280   : > { %7742 = vst [vmem:[#allocation19_spill] sm:$0xff] %v7138_v26  ;;  %v2850_v59 = vpop.f32.mrf.mxu2 }
 0x281   : > { %v2851_v11 = vadd.f32 %v2850_v59, %v6797_v60  ;;  %v3901_v60 = vsel %vm1592_vm7, %v3898_v7, %v7681_v55  ;;  %v3554_v59 = vunpack.c.l.b16 %v3515_v13  ;;  %v7171_v13 = vadd.s32 144, %v6054_v47 }
 0x283   : > { %v2982_v1 = vadd.f32 %v2958_v14, %v2851_v11  ;;  %v7682_v14 = vrot.slane %v6831_v18, 2 }
 0x284   : > { %5316 = vmatmul.msk.bf16.gmra.mxu2 %vm393_vm1, %v3390_v46 }
 0x285   : > { %v2960_v30 = vpop.f32.mrf.mxu3  ;;  %v3147_v21 = vpop.f32.mrf.mxu0  ;;  %v3392_v7 = vsel %vm1076_vm4, %v3389_v40, %v7682_v14 }
 0x286   : > { %v7149_v49 = vadd.f32 %v3147_v21, %v2982_v1  ;;  %v7173_v55 = vpop.f32.mrf.mxu1 }
 0x287   : > { %7746 = vst [vmem:[#allocation23_spill] sm:$0xff] %v7173_v55  ;;  %v7683_v55 = vrot.slane %v7141_v53, 3 }
 0x288   : > { %7744 = vst [vmem:[#allocation21_spill] sm:$0xff] %v7149_v49  ;;  %v2852_v46 = vpop.f32.mrf.mxu2 }
 0x289   : > { %v2853_v48 = vadd.f32 %v2852_v46, %v6838_v54  ;;  %v3765_v54 = vrot.slane %v3763_v15, 2  ;;  %v3768_v46 = vrot.slane %v3766_v19, 3 }
 0x28b   : > { %5368 = vmatmul.msk.bf16.gmra.mxu0 %vm393_vm1, %v3761_v50  ;;  %v2983_v21 = vadd.f32 %v2960_v30, %v2853_v48  ;;  %v3564_v50 = vpack.c.b16 %v3554_v59, %v3554_v59  ;;  %v4066_v48 = vshrl.u32 %v7171_v13, 16 }
 0x28d   : > { %v2963_v32 = vpop.f32.mrf.mxu3  ;;  %v3149_v11 = vpop.f32.mrf.mxu0  ;;  %v4070_v47 = vmul.u32 14564, %v4066_v48  ;;  %v4071_v5 = vmul.u32 58254, %v4066_v48 }
 0x28e   : > { %5359 = vmatmul.msk.bf16.gmra.mxu3 %vm393_vm1, %v3581_v37  ;;  %v7167_v1 = vadd.f32 %v3149_v11, %v2983_v21  ;;  %v3686_v37 = vld [vmem:[%s5603_s4 + $0xa0] sm:$0x7]  ;;  %v3582_v11 = vrot.slane %v3564_v50, 2  ;;  %v7179_v21 = vor.u32 %v3768_v46, %v3765_v54  ;;  %v3393_v50 = vrot.slane %v6926_v27, 2  ;;  %s4992_s4 = sshll.u32 %s7781_s12, 1 }
 0x28f   : > { %5378 = vmatmul.msk.bf16.gmra.mxu1 %vm393_vm1, %v3901_v60  ;;  %v4065_v60 = vand.u32 65535, %v7171_v13  ;;  %v3689_v59 = vunpack.c.l.b16 %v3686_v37  ;;  %v4074_v49 = vshll.u32 %v4070_v47, 16  ;;  %s7581_s16 = scalar_lea.vmem %s7645_s3, %s4992_s4 }
 0x290   : > { %7745 = vst [vmem:[#allocation22_spill] sm:$0xff] %v7167_v1  ;;  %v2855_v30 = vpop.f32.mrf.mxu2  ;;  %v3583_v41 = vsel %vm1076_vm4, %v3580_v34, %v3582_v11 }
 0x291   : > { %v2856_v40 = vadd.f32 %v2855_v30, %v6871_v57  ;;  %v4068_v19 = vmul.u32 14564, %v4065_v60  ;;  %v4069_v14 = vmul.u32 58254, %v4065_v60  ;;  %v3770_v57 = vsel %vm1394_vm6, %v3760_v31, %v7179_v21 }
 0x292   : > { %v7186_v54 = vpack.c.b16 %v3689_v59, %v3689_v59 }
 0x293   : > { %v2984_v1 = vadd.f32 %v2963_v32, %v2856_v40  ;;  %v7748_v32 = vld [vmem:[#allocation2_spill] sm:$0xff]  ;;  %v4073_v60 = vshrl.u32 %v4069_v14, 16 }
 0x294   : > { %5317 = vmatmul.msk.bf16.gmra.mxu2 %vm393_vm1, %v3392_v7  ;;  %v4072_v7 = vshll.u32 %v4069_v14, 16  ;;  %v7191_v30 = vadd.s32 144, %v7748_v32  ;;  %v3772_v40 = vshrl.u32 %v7186_v54, 16  ;;  %v3775_v34 = vshll.u32 %v7186_v54, 16 }
 0x295   : > { %v2965_v15 = vpop.f32.mrf.mxu3  ;;  %v7750_v14 = vrot.slane %v7115_v9, 3 }
 0x296   : > { %vm4076_vm5 = vc.u32 %v4068_v19, %v4072_v7  ;;  %v4078_v37 = vadd.s32 %v4072_v7, %v4068_v19  ;;  %v4094_v31 = vand.u32 65535, %v7191_v30  ;;  %v4075_v7 = vshrl.u32 %v4070_v47, 16 }
 0x297   : > { %v4077_v48 = vsel %vm4076_vm5, 1, %v7698_v36  ;;  %v3903_v59 = vsel %vm1592_vm7, %v7750_v14, %v7683_v55  ;;  %v3774_v33 = vrot.slane %v3772_v40, 2  ;;  %v3777_v9 = vrot.slane %v3775_v34, 3 }
 0x298   : > { %v3152_v26 = vpop.f32.mrf.mxu0  ;;  %v2857_v11 = vpop.f32.mrf.mxu2  ;;  %v4079_v27 = vadd.s32 %v4077_v48, %v4071_v5  ;;  %vm4080_vm2 = vc.u32 %v4078_v37, %v4074_v49  ;;  %v4098_v37 = vmul.u32 58254, %v4094_v31  ;;  %v7751_v48 = vrot.slane %v6831_v18, 2 }
 0x299   : > { %v7188_v46 = vadd.f32 %v3152_v26, %v2984_v1  ;;  %v4095_v26 = vshrl.u32 %v7191_v30, 16  ;;  %v2858_v19 = vadd.f32 %v2857_v11, %v6902_v62  ;;  %v4081_v5 = vsel %vm4080_vm2, 1, %v7698_v36 }
 0x29a   : > { %v4083_v49 = vadd.s32 %v4081_v5, %v4079_v27  ;;  %v3353_v27 = vadd.f32 %v6912_v29, %v6934_v56  ;;  %v3904_v40 = vrot.slane %v7186_v54, 3  ;;  %v4102_v29 = vshrl.u32 %v4098_v37, 16 }
 0x29b   : > { %7747 = vst [vmem:[#allocation24_spill] sm:$0xff] %v7188_v46  ;;  %5369 = vmatmul.msk.bf16.gmra.mxu0 %vm393_vm1, %v3770_v57  ;;  %v4097_v57 = vmul.u32 14564, %v4094_v31  ;;  %v4099_v32 = vmul.u32 14564, %v4095_v26  ;;  %v2985_v46 = vadd.f32 %v2965_v15, %v2858_v19  ;;  %v4100_v11 = vmul.u32 58254, %v4095_v26  ;;  %v7752_v26 = vld [vmem:[#allocation5_spill] sm:$0xff] }
 0x29c   : > { %v7199_v1 = vpop.f32.mrf.mxu1  ;;  %v4084_v62 = vadd.s32 %v4083_v49, %v4073_v60  ;;  %v3354_v31 = vadd.f32 %v6944_v23, %v6962_v16  ;;  %v3778_v60 = vor.u32 %v3777_v9, %v3774_v33  ;;  %v7229_v16 = vadd.f32 %v6974_v63, %v6989_v6 }
 0x29d   : > { %7749 = vst [vmem:[#allocation2_spill] sm:$0xff] %v7199_v1  ;;  %v3394_v1 = vsel %vm1076_vm4, %v7751_v48, %v3393_v50  ;;  %v4103_v47 = vshll.u32 %v4099_v32, 16  ;;  %v7236_v49 = vadd.f32 %v6995_v52, %v7008_v25  ;;  %v7753_v63 = vrot.slane %v7141_v53, 3 }
 0x29e   : > { %5360 = vmatmul.msk.bf16.gmra.mxu3 %vm393_vm1, %v3583_v41  ;;  %v4101_v41 = vshll.u32 %v4098_v37, 16  ;;  %v4085_v50 = vadd.s32 %v4084_v62, %v4075_v7  ;;  %v4104_v7 = vshrl.u32 %v4099_v32, 16 }
 0x29f   : > { %5379 = vmatmul.msk.bf16.gmra.mxu1 %vm393_vm1, %v3903_v59  ;;  %v7223_v59 = vadd.s32 144, %v7752_v26  ;;  %v3905_v6 = vsel %vm1592_vm7, %v7753_v63, %v3904_v40 }
 0x2a0   : > { %v3154_v55 = vpop.f32.mrf.mxu0  ;;  %vm4105_vm4 = vc.u32 %v4097_v57, %v4101_v41  ;;  %v4107_v15 = vadd.s32 %v4101_v41, %v4097_v57  ;;  %v4086_v19 = vshrl.u32 %v4085_v50, 4  ;;  %v3779_v41 = vsel %vm1394_vm6, %v7179_v21, %v3778_v60 }
 0x2a1   : > { %v3623_v14 = vpop.f32.mrf.mxu3  ;;  %v7217_v18 = vadd.f32 %v3154_v55, %v2985_v46  ;;  %v4106_v34 = vsel %vm4105_vm4, 1, %v7698_v36  ;;  %v4123_v54 = vand.u32 65535, %v7223_v59  ;;  %v4124_v33 = vshrl.u32 %v7223_v59, 16 }
 0x2a2   : > { %v4108_v56 = vadd.s32 %v4106_v34, %v4100_v11  ;;  %vm4109_vm8 = vc.u32 %v4107_v15, %v4103_v47 }
 0x2a3   : > { %v4110_v55 = vsel %vm4109_vm8, 1, %v7698_v36  ;;  %v4126_v37 = vmul.u32 14564, %v4123_v54  ;;  %v4127_v48 = vmul.u32 58254, %v4123_v54  ;;  %v4128_v9 = vmul.u32 14564, %v4124_v33 }
 0x2a4   : > { %5318 = vmatmul.msk.bf16.gmra.mxu2 %vm393_vm1, %v3394_v1  ;;  %v7225_v23 = vpop.f32.mrf.mxu1  ;;  %v4087_v1 = vmul.u32 18, %v4086_v19  ;;  %v4112_v5 = vadd.s32 %v4110_v55, %v4108_v56  ;;  %v4129_v15 = vmul.u32 58254, %v4124_v33 }
 0x2a5   : > { %v4130_v52 = vshll.u32 %v4127_v48, 16  ;;  %v4132_v25 = vshll.u32 %v4128_v9, 16  ;;  %v4131_v53 = vshrl.u32 %v4127_v48, 16  ;;  %v4133_v56 = vshrl.u32 %v4128_v9, 16 }
 0x2a6   : > { %v4088_v11 = vsub.s32 %v7171_v13, %v4087_v1  ;;  %v4113_v32 = vadd.s32 %v4112_v5, %v4102_v29 }
 0x2a7   : > { %v3434_v46 = vpop.f32.mrf.mxu2  ;;  %vm4134_vm7 = vc.u32 %v4126_v37, %v4130_v52  ;;  %v4136_v40 = vadd.s32 %v4130_v52, %v4126_v37  ;;  %v7261_v52 = vadd.f32 %v7023_v0, %v7034_v24 }
 0x2a8   : > { %v3479_v57 = vadd.f32 %v3434_v46, %v3353_v27  ;;  %v3819_v50 = vpop.f32.mrf.mxu0  ;;  %vm4584_vm10 = vcmp.ne.s32.totalorder %v4088_v11, 0  ;;  %vm4602_vm0 = vcmp.lt.s32.totalorder %v4088_v11, 0  ;;  %v4638_v27 = vadd.s32 18, %v4088_v11 }
 0x2a9   : > { %v3625_v62 = vpop.f32.mrf.mxu3  ;;  %v4114_v34 = vadd.s32 %v4113_v32, %v4104_v7  ;;  %vm4620_vm11 = vmand %vm4602_vm0, %vm4584_vm10  ;;  %v4135_v21 = vsel %vm4134_vm7, 1, %v7698_v36  ;;  %vm4138_vm12 = vc.u32 %v4136_v40, %v4132_v25  ;;  %v7257_v32 = vadd.f32 %v7014_v20, %v7019_v39 }
 0x2aa   : > { %v3668_v47 = vadd.f32 %v3623_v14, %v3479_v57  ;;  %v4656_v19 = vsel %vm4620_vm11, %v4638_v27, %v4088_v11  ;;  %v7754_v14 = vld [vmem:[#allocation10_spill] sm:$0xff]  ;;  %v4137_v55 = vadd.s32 %v4135_v21, %v4129_v15  ;;  %v4139_v7 = vsel %vm4138_vm12, 1, %v7698_v36 }
 0x2ab   : > { %5370 = vmatmul.msk.bf16.gmra.mxu0 %vm393_vm1, %v3779_v41  ;;  %v4115_v13 = vshrl.u32 %v4114_v34, 4  ;;  %v7247_v60 = vadd.s32 144, %v7754_v14  ;;  %vm4674_vm6 = vcmp.lt.s32.totalorder %v4656_v19, 16 }
 0x2ac   : > { %v3864_v26 = vadd.f32 %v3819_v50, %v3668_v47  ;;  %v3945_v29 = vpop.f32.mrf.mxu1  ;;  %v5381_v46 = vsel %vm4674_vm6, 1.0, %v7704_v42  ;;  %v4141_v57 = vadd.s32 %v4139_v7, %v4137_v55 }
 0x2ad   : > { %v4116_v1 = vmul.u32 18, %v4115_v13  ;;  %v4152_v37 = vand.u32 65535, %v7247_v60  ;;  %v4153_v48 = vshrl.u32 %v7247_v60, 16 }
 0x2ae   : > { %v3990_v33 = vadd.f32 %v3945_v29, %v3864_v26  ;;  %v4142_v15 = vadd.s32 %v4141_v57, %v4131_v53 }
 0x2af   : > { %v3436_v54 = vpop.f32.mrf.mxu2  ;;  %5380 = vmatmul.msk.bf16.gmra.mxu1 %vm393_vm1, %v3905_v6  ;;  %v4117_v41 = vsub.s32 %v7191_v30, %v4116_v1  ;;  %v4155_v25 = vmul.u32 14564, %v4152_v37  ;;  %v4157_v20 = vmul.u32 14564, %v4153_v48  ;;  %v4158_v26 = vmul.u32 58254, %v4153_v48 }
 0x2b0   : > { %v3480_v5 = vadd.f32 %v3436_v54, %v3354_v31  ;;  %v4008_v63 = vpack.c.bf16 %v3990_v33, %v3990_v33  ;;  %v4728_v9 = vmul.f32 %v5381_v46, %v3990_v33  ;;  %v3821_v50 = vpop.f32.mrf.mxu0  ;;  %v4156_v31 = vmul.u32 58254, %v4152_v37 }
 0x2b1   : > { %v3628_v11 = vpop.f32.mrf.mxu3  ;;  %vm4585_vm3 = vcmp.ne.s32.totalorder %v4117_v41, 0  ;;  %vm4603_vm13 = vcmp.lt.s32.totalorder %v4117_v41, 0  ;;  %v4639_v30 = vadd.s32 18, %v4117_v41  ;;  %v4143_v34 = vadd.s32 %v4142_v15, %v4133_v56 }
 0x2b2   : > { %v3669_v47 = vadd.f32 %v3625_v62, %v3480_v5  ;;  %4026 = vst.msk [vmem:[%s6365_s10 + $0x48] sm:$0xf] %vm1732_vm9, %v4008_v63  ;;  %v4788_v6 = vmul.f32 %v4728_v9, %v3990_v33  ;;  %vm4621_vm14 = vmand %vm4603_vm13, %vm4585_vm3  ;;  %v4746_v39 = vsel %vm393_vm1, %v4728_v9, 0.0  ;;  %v4159_v53 = vshll.u32 %v4156_v31, 16 }
 0x2b3   : > { %v4657_v0 = vsel %vm4621_vm14, %v4639_v30, %v4117_v41  ;;  %v4144_v24 = vshrl.u32 %v4143_v34, 4  ;;  %v4160_v19 = vshrl.u32 %v4156_v31, 16  ;;  %v4161_v13 = vshll.u32 %v4157_v20, 16 }
 0x2b4   : > { %v3865_v27 = vadd.f32 %v3821_v50, %v3669_v47  ;;  %v4806_v62 = vsel %vm393_vm1, %v4788_v6, 0.0  ;;  %v3947_v40 = vpop.f32.mrf.mxu1  ;;  %vm4675_vm15 = vcmp.lt.s32.totalorder %v4657_v0, 16  ;;  %vm4163_vm5 = vc.u32 %v4155_v25, %v4159_v53 }
 0x2b5   : > { %v4165_v29 = vadd.s32 %v4159_v53, %v4155_v25  ;;  %v5382_v55 = vsel %vm4675_vm15, 1.0, %v7704_v42  ;;  %v4145_v54 = vmul.u32 18, %v4144_v24  ;;  %v4164_v33 = vsel %vm4163_vm5, 1, %v7698_v36 }
 0x2b6   : > { %v3991_v14 = vadd.f32 %v3947_v40, %v3865_v27  ;;  %v4166_v5 = vadd.s32 %v4164_v33, %v4158_v26  ;;  %v7273_v9 = vadd.s32 144, %v6256_v8  ;;  %v4162_v47 = vshrl.u32 %v4157_v20, 16 }
 0x2b7   : > { %v3439_v21 = vpop.f32.mrf.mxu2  ;;  %vm4167_vm2 = vc.u32 %v4165_v29, %v4161_v13  ;;  %v4146_v48 = vsub.s32 %v7223_v59, %v4145_v54  ;;  %v7283_v34 = vadd.f32 %v7040_v38, %v7045_v58  ;;  %v7287_v20 = vadd.f32 %v7049_v51, %v7060_v4 }
 0x2b8   : > { %v3481_v56 = vadd.f32 %v3439_v21, %v7229_v16  ;;  %v4009_v46 = vpack.c.bf16 %v3991_v14, %v3991_v14  ;;  %v4729_v1 = vmul.f32 %v5382_v55, %v3991_v14  ;;  %v3824_v37 = vpop.f32.mrf.mxu0  ;;  %v4168_v63 = vsel %vm4167_vm2, 1, %v7698_v36 }
 0x2b9   : > { %v3630_v7 = vpop.f32.mrf.mxu3  ;;  %v4170_v50 = vadd.s32 %v4168_v63, %v4166_v5  ;;  %vm4586_vm4 = vcmp.ne.s32.totalorder %v4146_v48, 0  ;;  %vm4604_vm8 = vcmp.lt.s32.totalorder %v4146_v48, 0  ;;  %v4640_v59 = vadd.s32 18, %v4146_v48 }
 0x2ba   : > { %v3670_v57 = vadd.f32 %v3628_v11, %v3481_v56  ;;  %4027 = vst.msk [vmem:[%s6365_s10 + $0x4c] sm:$0xf] %vm1732_vm9, %v4009_v46  ;;  %v4747_v16 = vsel %vm393_vm1, %v4729_v1, 0.0  ;;  %v4789_v41 = vmul.f32 %v4729_v1, %v3991_v14  ;;  %vm4622_vm10 = vmand %vm4604_vm8, %vm4586_vm4  ;;  %v4181_v25 = vand.u32 65535, %v7273_v9 }
 0x2bb   : > { %v4748_v15 = vadd.f32 %v4747_v16, %v4746_v39  ;;  %v4171_v6 = vadd.s32 %v4170_v50, %v4160_v19  ;;  %v4182_v30 = vshrl.u32 %v7273_v9, 16  ;;  %v4658_v53 = vsel %vm4622_vm10, %v4640_v59, %v4146_v48 }
 0x2bc   : > { %v3866_v31 = vadd.f32 %v3824_v37, %v3670_v57  ;;  %v4807_v11 = vsel %vm393_vm1, %v4789_v41, 0.0  ;;  %v3950_v27 = vpop.f32.mrf.mxu1  ;;  %v4184_v0 = vmul.u32 14564, %v4181_v25  ;;  %vm4676_vm0 = vcmp.lt.s32.totalorder %v4658_v53, 16 }
 0x2bd   : > { %v4808_v8 = vadd.f32 %v4807_v11, %v4806_v62  ;;  %v4172_v40 = vadd.s32 %v4171_v6, %v4162_v47  ;;  %v4185_v62 = vmul.u32 58254, %v4181_v25  ;;  %v7290_v19 = vmul.u32 14564, %v4182_v30 }
 0x2be   : > { %v3992_v26 = vadd.f32 %v3950_v27, %v3866_v31  ;;  %v5383_v38 = vsel %vm4676_vm0, 1.0, %v7704_v42  ;;  %v7295_v51 = vadd.f32 %v7066_v3, %v7071_v12  ;;  %v4187_v56 = vmul.u32 58254, %v4182_v30 }
 0x2bf   : > { %v3441_v39 = vpop.f32.mrf.mxu2  ;;  %v4173_v21 = vshrl.u32 %v4172_v40, 4  ;;  %v4188_v55 = vshll.u32 %v4185_v62, 16  ;;  %v4189_v54 = vshrl.u32 %v4185_v62, 16  ;;  %v4190_v33 = vshll.u32 %v7290_v19, 16 }
 0x2c0   : > { %v3482_v24 = vadd.f32 %v3441_v39, %v7236_v49  ;;  %v4010_v13 = vpack.c.bf16 %v3992_v26, %v3992_v26  ;;  %v4730_v4 = vmul.f32 %v5383_v38, %v3992_v26  ;;  %v3826_v29 = vpop.f32.mrf.mxu0  ;;  %v7301_v46 = vadd.s32 144, %v6338_v35 }
 0x2c1   : > { %v3633_v58 = vpop.f32.mrf.mxu3  ;;  %v4174_v49 = vmul.u32 18, %v4173_v21  ;;  %vm4192_vm11 = vc.u32 %v4184_v0, %v4188_v55  ;;  %v4194_v37 = vadd.s32 %v4188_v55, %v4184_v0  ;;  %v4191_v53 = vshrl.u32 %v7290_v19, 16 }
 0x2c2   : > { %v3671_v14 = vadd.f32 %v3630_v7, %v3482_v24  ;;  %4028 = vst.msk [vmem:[%s6365_s10 + $0x50] sm:$0xf] %vm1732_vm9, %v4010_v13  ;;  %v4749_v1 = vsel %vm393_vm1, %v4730_v4, 0.0  ;;  %v4790_v5 = vmul.f32 %v4730_v4, %v3992_v26  ;;  %v4193_v7 = vsel %vm4192_vm11, 1, %v7698_v36 }
 0x2c3   : > { %v4750_v3 = vadd.f32 %v4749_v1, %v4748_v15  ;;  %v4175_v12 = vsub.s32 %v7247_v60, %v4174_v49  ;;  %v4195_v16 = vadd.s32 %v4193_v7, %v4187_v56  ;;  %v4210_v41 = vand.u32 65535, %v7301_v46 }
 0x2c4   : > { %v3867_v57 = vadd.f32 %v3826_v29, %v3671_v14  ;;  %v4809_v48 = vsel %vm393_vm1, %v4790_v5, 0.0  ;;  %v3952_v63 = vpop.f32.mrf.mxu1  ;;  %v4211_v35 = vshrl.u32 %v7301_v46, 16  ;;  %vm4196_vm3 = vc.u32 %v4194_v37, %v4190_v33 }
 0x2c5   : > { %v4810_v47 = vadd.f32 %v4809_v48, %v4808_v8  ;;  %vm4587_vm7 = vcmp.ne.s32.totalorder %v4175_v12, 0  ;;  %vm4605_vm6 = vcmp.lt.s32.totalorder %v4175_v12, 0  ;;  %v4641_v60 = vadd.s32 18, %v4175_v12 }
 0x2c6   : > { %v3993_v31 = vadd.f32 %v3952_v63, %v3867_v57  ;;  %vm4623_vm12 = vmand %vm4605_vm6, %vm4587_vm7  ;;  %v4213_v11 = vmul.u32 14564, %v4210_v41  ;;  %v4197_v25 = vsel %vm4196_vm3, 1, %v7698_v36  ;;  %v4214_v27 = vmul.u32 58254, %v4210_v41 }
 0x2c7   : > { %v3444_v50 = vpop.f32.mrf.mxu2  ;;  %v4215_v30 = vmul.u32 14564, %v4211_v35  ;;  %v4659_v39 = vsel %vm4623_vm12, %v4641_v60, %v4175_v12  ;;  %v4199_v40 = vadd.s32 %v4197_v25, %v4195_v16  ;;  %v7316_v24 = vadd.f32 %v7075_v22, %v7086_v45 }
 0x2c8   : > { %v3483_v15 = vadd.f32 %v3444_v50, %v7257_v32  ;;  %v4011_v59 = vpack.c.bf16 %v3993_v31, %v3993_v31  ;;  %v3829_v8 = vpop.f32.mrf.mxu0  ;;  %vm4677_vm13 = vcmp.lt.s32.totalorder %v4659_v39, 16  ;;  %v4216_v32 = vmul.u32 58254, %v4211_v35 }
 0x2c9   : > { %v3635_v6 = vpop.f32.mrf.mxu3  ;;  %v4217_v0 = vshll.u32 %v4214_v27, 16  ;;  %v5384_v62 = vsel %vm4677_vm13, 1.0, %v7704_v42  ;;  %v4200_v38 = vadd.s32 %v4199_v40, %v4189_v54  ;;  %v4219_v21 = vshll.u32 %v4215_v30, 16 }
 0x2ca   : > { %v3672_v26 = vadd.f32 %v3633_v58, %v3483_v15  ;;  %4029 = vst.msk [vmem:[%s6365_s10 + $0x54] sm:$0xf] %vm1732_vm9, %v4011_v59  ;;  %v4731_v4 = vmul.f32 %v5384_v62, %v3993_v31  ;;  %v7320_v19 = vadd.s32 144, %v6348_v2  ;;  %v4218_v56 = vshrl.u32 %v4214_v27, 16 }
 0x2cb   : > { %vm4221_vm14 = vc.u32 %v4213_v11, %v4217_v0  ;;  %v4223_v58 = vadd.s32 %v4217_v0, %v4213_v11  ;;  %v4201_v29 = vadd.s32 %v4200_v38, %v4191_v53  ;;  %v4220_v55 = vshrl.u32 %v4215_v30, 16 }
 0x2cc   : > { %v3868_v13 = vadd.f32 %v3829_v8, %v3672_v26  ;;  %v3955_v14 = vpop.f32.mrf.mxu1  ;;  %v4222_v49 = vsel %vm4221_vm14, 1, %v7698_v36  ;;  %v4751_v22 = vsel %vm393_vm1, %v4731_v4, 0.0  ;;  %v4791_v45 = vmul.f32 %v4731_v4, %v3993_v31 }
 0x2cd   : > { %v4224_v54 = vadd.s32 %v4222_v49, %v4216_v32  ;;  %v7326_v5 = vadd.f32 %v4751_v22, %v4750_v3  ;;  %v4202_v2 = vshrl.u32 %v4201_v29, 4  ;;  %vm4225_vm15 = vc.u32 %v4223_v58, %v4219_v21 }
 0x2ce   : > { %v7324_v1 = vadd.f32 %v3955_v14, %v3868_v13  ;;  %v4811_v12 = vsel %vm393_vm1, %v4791_v45, 0.0  ;;  %v4226_v48 = vsel %vm4225_vm15, 1, %v7698_v36  ;;  %v4239_v63 = vand.u32 65535, %v7320_v19 }
 0x2cf   : > { %v3446_v33 = vpop.f32.mrf.mxu2  ;;  %v7334_v16 = vadd.f32 %v4811_v12, %v4810_v47  ;;  %v4203_v41 = vmul.u32 18, %v4202_v2  ;;  %v4228_v50 = vadd.s32 %v4226_v48, %v4224_v54  ;;  %v7341_v60 = vadd.f32 %v7092_v61, %v7097_v17 }
 0x2d0   : > { %v3484_v57 = vadd.f32 %v3446_v33, %v7261_v52  ;;  %v4012_v7 = vpack.c.bf16 %v7324_v1, %v7324_v1  ;;  %v3831_v3 = vpop.f32.mrf.mxu0  ;;  %v4240_v52 = vshrl.u32 %v7320_v19, 16  ;;  %v4242_v31 = vmul.u32 14564, %v4239_v63 }
 0x2d1   : > { %v3638_v37 = vpop.f32.mrf.mxu3  ;;  %v4243_v15 = vmul.u32 58254, %v4239_v63  ;;  %v4204_v11 = vsub.s32 %v7273_v9, %v4203_v41  ;;  %v4229_v25 = vadd.s32 %v4228_v50, %v4218_v56  ;;  %v7346_v47 = vadd.f32 %v7101_v43, %v7112_v28 }
 0x2d2   : > { %v3673_v35 = vadd.f32 %v3635_v6, %v3484_v57  ;;  %4030 = vst.msk [vmem:[%s6365_s10 + $0x58] sm:$0xf] %vm1732_vm9, %v4012_v7  ;;  %v4244_v6 = vmul.u32 14564, %v4240_v52  ;;  %v4245_v27 = vmul.u32 58254, %v4240_v52  ;;  %v7349_v39 = vadd.s32 144, %v6360_v10 }
 0x2d3   : > { %v4246_v30 = vshll.u32 %v4243_v15, 16  ;;  %vm4588_vm5 = vcmp.ne.s32.totalorder %v4204_v11, 0  ;;  %vm4606_vm2 = vcmp.lt.s32.totalorder %v4204_v11, 0  ;;  %v4642_v26 = vadd.s32 18, %v4204_v11 }
 0x2d4   : > { %v3869_v59 = vadd.f32 %v3831_v3, %v3673_v35  ;;  %v3957_v8 = vpop.f32.mrf.mxu1  ;;  %v4230_v61 = vadd.s32 %v4229_v25, %v4220_v55  ;;  %vm4624_vm4 = vmand %vm4606_vm2, %vm4588_vm5  ;;  %v4247_v53 = vshrl.u32 %v4243_v15, 16  ;;  %v4248_v40 = vshll.u32 %v4244_v6, 16 }
 0x2d5   : > { %vm4250_vm8 = vc.u32 %v4242_v31, %v4246_v30  ;;  %v4660_v43 = vsel %vm4624_vm4, %v4642_v26, %v4204_v11  ;;  %v4252_v13 = vadd.s32 %v4246_v30, %v4242_v31  ;;  %v4268_v29 = vand.u32 65535, %v7349_v39 }
 0x2d6   : > { %v7351_v9 = vadd.f32 %v3957_v8, %v3869_v59  ;;  %v4231_v32 = vshrl.u32 %v4230_v61, 4  ;;  %v4251_v10 = vsel %vm4250_vm8, 1, %v7698_v36  ;;  %vm4678_vm10 = vcmp.lt.s32.totalorder %v4660_v43, 16 }
 0x2d7   : > { %v3449_v17 = vpop.f32.mrf.mxu2  ;;  %v4253_v38 = vadd.s32 %v4251_v10, %v4245_v27  ;;  %v5385_v21 = vsel %vm4678_vm10, 1.0, %v7704_v42  ;;  %vm4254_vm0 = vc.u32 %v4252_v13, %v4248_v40  ;;  %v4269_v55 = vshrl.u32 %v7349_v39, 16 }
 0x2d8   : > { %v3485_v28 = vadd.f32 %v3449_v17, %v7283_v34  ;;  %v4013_v0 = vpack.c.bf16 %v7351_v9, %v7351_v9  ;;  %v4232_v4 = vmul.u32 18, %v4231_v32  ;;  %v3834_v14 = vpop.f32.mrf.mxu0  ;;  %v4732_v56 = vmul.f32 %v5385_v21, %v7324_v1 }
 0x2d9   : > { %v3640_v62 = vpop.f32.mrf.mxu3  ;;  %v4249_v34 = vshrl.u32 %v4244_v6, 16  ;;  %v4255_v45 = vsel %vm4254_vm0, 1, %v7698_v36  ;;  %v4271_v33 = vmul.u32 14564, %v4268_v29  ;;  %v4272_v12 = vmul.u32 58254, %v4268_v29 }
 0x2da   : > { %v3674_v58 = vadd.f32 %v3638_v37, %v3485_v28  ;;  %4031 = vst.msk [vmem:[%s6365_s10 + $0x5c] sm:$0xf] %vm1732_vm9, %v4013_v0  ;;  %v4233_v49 = vsub.s32 %v7301_v46, %v4232_v4  ;;  %v4753_v54 = vsel %vm393_vm1, %v4732_v56, 0.0  ;;  %v4792_v57 = vmul.f32 %v4732_v56, %v7324_v1 }
 0x2db   : > { %v4257_v2 = vadd.s32 %v4255_v45, %v4253_v38  ;;  %v4754_v7 = vadd.f32 %v4753_v54, %v7326_v5  ;;  %v4273_v3 = vmul.u32 14564, %v4269_v55  ;;  %v4274_v31 = vmul.u32 58254, %v4269_v55 }
 0x2dc   : > { %v3870_v22 = vadd.f32 %v3834_v14, %v3674_v58  ;;  %vm4589_vm11 = vcmp.ne.s32.totalorder %v4233_v49, 0  ;;  %vm4607_vm7 = vcmp.lt.s32.totalorder %v4233_v49, 0  ;;  %v4643_v37 = vadd.s32 18, %v4233_v49  ;;  %v3960_v48 = vpop.f32.mrf.mxu1 }
 0x2dd   : > { %v4813_v63 = vsel %vm393_vm1, %v4792_v57, 0.0  ;;  %vm4625_vm6 = vmand %vm4607_vm7, %vm4589_vm11  ;;  %v4258_v35 = vadd.s32 %v4257_v2, %v4247_v53  ;;  %v4275_v11 = vshll.u32 %v4272_v12, 16  ;;  %v4276_v30 = vshrl.u32 %v4272_v12, 16  ;;  %v7755_v12 = vld [vmem:[#allocation12_spill] sm:$0xff] }
 0x2de   : > { %v7369_v41 = vadd.f32 %v3960_v48, %v3870_v22  ;;  %v4814_v50 = vadd.f32 %v4813_v63, %v7334_v16  ;;  %v4661_v1 = vsel %vm4625_vm6, %v4643_v37, %v4233_v49  ;;  %v4277_v26 = vshll.u32 %v4273_v3, 16  ;;  %v7757_v37 = vld [vmem:[#allocation16_spill] sm:$0xff] }
 0x2df   : > { %v3451_v46 = vpop.f32.mrf.mxu2  ;;  %vm4679_vm12 = vcmp.lt.s32.totalorder %v4661_v1, 16  ;;  %v4259_v15 = vadd.s32 %v4258_v35, %v4249_v34  ;;  %vm4279_vm3 = vc.u32 %v4271_v33, %v4275_v11  ;;  %v4281_v53 = vadd.s32 %v4275_v11, %v4271_v33 }
 0x2e0   : > { %v3486_v52 = vadd.f32 %v3451_v46, %v7287_v20  ;;  %v4014_v5 = vpack.c.bf16 %v7369_v41, %v7369_v41  ;;  %v5386_v59 = vsel %vm4679_vm12, 1.0, %v7704_v42  ;;  %v3836_v27 = vpop.f32.mrf.mxu0  ;;  %v4278_v20 = vshrl.u32 %v4273_v3, 16 }
 0x2e1   : > { %v3643_v25 = vpop.f32.mrf.mxu3  ;;  %v4733_v8 = vmul.f32 %v5386_v59, %v7351_v9  ;;  %v4260_v16 = vshrl.u32 %v4259_v15, 4  ;;  %v4280_v17 = vsel %vm4279_vm3, 1, %v7698_v36  ;;  %v7381_v40 = vadd.s32 144, %v6502_v44 }
 0x2e2   : > { %v3675_v6 = vadd.f32 %v3640_v62, %v3486_v52  ;;  %4032 = vst.msk [vmem:[%s6365_s10 + $0x60] sm:$0xf] %vm1732_vm9, %v4014_v5  ;;  %v4282_v10 = vadd.s32 %v4280_v17, %v4274_v31  ;;  %vm4283_vm13 = vc.u32 %v4281_v53, %v4277_v26 }
 0x2e3   : > { %v4755_v43 = vsel %vm393_vm1, %v4733_v8, 0.0  ;;  %v4793_v28 = vmul.f32 %v4733_v8, %v7351_v9  ;;  %v4261_v32 = vmul.u32 18, %v4260_v16  ;;  %v4297_v13 = vand.u32 65535, %v7381_v40 }
 0x2e4   : > { %v3871_v61 = vadd.f32 %v3836_v27, %v3675_v6  ;;  %v4756_v0 = vadd.f32 %v4755_v43, %v4754_v7  ;;  %v3962_v62 = vpop.f32.mrf.mxu1  ;;  %v4298_v38 = vshrl.u32 %v7381_v40, 16  ;;  %v4284_v14 = vsel %vm4283_vm13, 1, %v7698_v36  ;;  %v7756_v7 = vld [vmem:[#allocation17_spill] sm:$0xff] }
 0x2e5   : > { %v4815_v21 = vsel %vm393_vm1, %v4793_v28, 0.0  ;;  %v4262_v4 = vsub.s32 %v7320_v19, %v4261_v32  ;;  %v4286_v56 = vadd.s32 %v4284_v14, %v4282_v10  ;;  %v4300_v34 = vmul.u32 14564, %v4297_v13 }
 0x2e6   : > { %v7389_v44 = vadd.f32 %v3962_v62, %v3871_v61  ;;  %v4816_v9 = vadd.f32 %v4815_v21, %v4814_v50  ;;  %v4301_v33 = vmul.u32 58254, %v4297_v13  ;;  %v4302_v54 = vmul.u32 14564, %v4298_v38 }
 0x2e7   : > { %v3454_v58 = vpop.f32.mrf.mxu2  ;;  %vm4590_vm14 = vcmp.ne.s32.totalorder %v4262_v4, 0  ;;  %vm4608_vm15 = vcmp.lt.s32.totalorder %v4262_v4, 0  ;;  %v4644_v55 = vadd.s32 18, %v4262_v4  ;;  %v4287_v22 = vadd.s32 %v4286_v56, %v4276_v30  ;;  %v7758_v56 = vld [vmem:[#allocation19_spill] sm:$0xff] }
 0x2e8   : > { %v3487_v29 = vadd.f32 %v3454_v58, %v7295_v51  ;;  %v4015_v49 = vpack.c.bf16 %v7389_v44, %v7389_v44  ;;  %vm4626_vm5 = vmand %vm4608_vm15, %vm4590_vm14  ;;  %v3839_v45 = vpop.f32.mrf.mxu0  ;;  %v4303_v2 = vmul.u32 58254, %v4298_v38  ;;  %v7398_v51 = vadd.s32 144, %v7755_v12 }
 0x2e9   : > { %v4662_v57 = vsel %vm4626_vm5, %v4644_v55, %v4262_v4  ;;  %v7402_v48 = vadd.f32 %v7757_v37, %v7756_v7  ;;  %v4288_v63 = vadd.s32 %v4287_v22, %v4278_v20  ;;  %v3645_v46 = vpop.f32.mrf.mxu3  ;;  %v4304_v3 = vshll.u32 %v4301_v33, 16 }
 0x2ea   : > { %v3676_v19 = vadd.f32 %v3643_v25, %v3487_v29  ;;  %4033 = vst.msk [vmem:[%s6365_s10 + $0x64] sm:$0xf] %vm1732_vm9, %v4015_v49  ;;  %vm4680_vm2 = vcmp.lt.s32.totalorder %v4662_v57, 16  ;;  %v4305_v1 = vshrl.u32 %v4301_v33, 16  ;;  %v4306_v52 = vshll.u32 %v4302_v54, 16 }
 0x2eb   : > { %v5387_v50 = vsel %vm4680_vm2, 1.0, %v7704_v42  ;;  %v4307_v31 = vshrl.u32 %v4302_v54, 16  ;;  %v4289_v15 = vshrl.u32 %v4288_v63, 4  ;;  %vm4308_vm4 = vc.u32 %v4300_v34, %v4304_v3 }
 0x2ec   : > { %v3872_v35 = vadd.f32 %v3839_v45, %v3676_v19  ;;  %v4734_v5 = vmul.f32 %v5387_v50, %v7369_v41  ;;  %v3965_v11 = vpop.f32.mrf.mxu1  ;;  %v4310_v59 = vadd.s32 %v4304_v3, %v4300_v34  ;;  %v4309_v27 = vsel %vm4308_vm4, 1, %v7698_v36  ;;  %v7760_v45 = vld [vmem:[#allocation13_spill] sm:$0xff] }
 0x2ed   : > { %v4326_v30 = vand.u32 65535, %v7398_v51  ;;  %v4327_v26 = vshrl.u32 %v7398_v51, 16  ;;  %v4290_v20 = vmul.u32 18, %v4289_v15  ;;  %v4311_v43 = vadd.s32 %v4309_v27, %v4303_v2 }
 0x2ee   : > { %v7406_v6 = vadd.f32 %v3965_v11, %v3872_v35  ;;  %v4757_v8 = vsel %vm393_vm1, %v4734_v5, 0.0  ;;  %v4794_v16 = vmul.f32 %v4734_v5, %v7369_v41  ;;  %vm4312_vm8 = vc.u32 %v4310_v59, %v4306_v52 }
 0x2ef   : > { %v3456_v25 = vpop.f32.mrf.mxu2  ;;  %v4758_v17 = vadd.f32 %v4757_v8, %v4756_v0  ;;  %v4291_v32 = vsub.s32 %v7349_v39, %v4290_v20  ;;  %v4313_v10 = vsel %vm4312_vm8, 1, %v7698_v36  ;;  %v4329_v21 = vmul.u32 14564, %v4326_v30  ;;  %v7759_v39 = vld [vmem:[#allocation18_spill] sm:$0xff] }
 0x2f0   : > { %v3488_v61 = vadd.f32 %v3456_v25, %v7316_v24  ;;  %v4016_v53 = vpack.c.bf16 %v7406_v6, %v7406_v6  ;;  %v4817_v28 = vsel %vm393_vm1, %v4794_v16, 0.0  ;;  %v3841_v13 = vpop.f32.mrf.mxu0  ;;  %v4315_v41 = vadd.s32 %v4313_v10, %v4311_v43 }
 0x2f1   : > { %v4818_v38 = vadd.f32 %v4817_v28, %v4816_v9  ;;  %v4330_v24 = vmul.u32 58254, %v4326_v30  ;;  %vm4591_vm10 = vcmp.ne.s32.totalorder %v4291_v32, 0  ;;  %vm4609_vm0 = vcmp.lt.s32.totalorder %v4291_v32, 0  ;;  %v3648_v9 = vpop.f32.mrf.mxu3 }
 0x2f2   : > { %v3677_v62 = vadd.f32 %v3645_v46, %v3488_v61  ;;  %4034 = vst.msk [vmem:[%s6365_s10 + $0x68] sm:$0xf] %vm1732_vm9, %v4016_v53  ;;  %v4645_v0 = vadd.s32 18, %v4291_v32  ;;  %vm4627_vm11 = vmand %vm4609_vm0, %vm4591_vm10  ;;  %v4316_v58 = vadd.s32 %v4315_v41, %v4305_v1  ;;  %v4331_v14 = vmul.u32 14564, %v4327_v26 }
 0x2f3   : > { %v4333_v29 = vshll.u32 %v4330_v24, 16  ;;  %v7423_v34 = vadd.f32 %v7759_v39, %v7758_v56  ;;  %v4332_v22 = vmul.u32 58254, %v4327_v26  ;;  %v4334_v19 = vshrl.u32 %v4330_v24, 16 }
 0x2f4   : > { %v3873_v4 = vadd.f32 %v3841_v13, %v3677_v62  ;;  %v4663_v55 = vsel %vm4627_vm11, %v4645_v0, %v4291_v32  ;;  %v3967_v49 = vpop.f32.mrf.mxu1  ;;  %v7426_v33 = vadd.s32 144, %v7760_v45  ;;  %v4317_v54 = vadd.s32 %v4316_v58, %v4307_v31 }
 0x2f5   : > { %vm4681_vm7 = vcmp.lt.s32.totalorder %v4663_v55, 16  ;;  %v4335_v12 = vshll.u32 %v4331_v14, 16  ;;  %v4336_v63 = vshrl.u32 %v4331_v14, 16  ;;  %vm4337_vm6 = vc.u32 %v4329_v21, %v4333_v29 }
 0x2f6   : > { %v7428_v2 = vadd.f32 %v3967_v49, %v3873_v4  ;;  %v5388_v7 = vsel %vm4681_vm7, 1.0, %v7704_v42  ;;  %v4318_v35 = vshrl.u32 %v4317_v54, 4  ;;  %v4338_v50 = vsel %vm4337_vm6, 1, %v7698_v36  ;;  %v7761_v49 = vld [vmem:[#allocation14_spill] sm:$0xff] }
 0x2f7   : > { %v3459_v57 = vpop.f32.mrf.mxu2  ;;  %v4735_v46 = vmul.f32 %v5388_v7, %v7389_v44  ;;  %v4339_v1 = vadd.s32 %v4333_v29, %v4329_v21  ;;  %v4340_v52 = vadd.s32 %v4338_v50, %v4332_v22  ;;  %v4355_v15 = vand.u32 65535, %v7426_v33 }
 0x2f8   : > { %v3489_v37 = vadd.f32 %v3459_v57, %v7341_v60  ;;  %v4017_v3 = vpack.c.bf16 %v7428_v2, %v7428_v2  ;;  %v3844_v5 = vpop.f32.mrf.mxu0  ;;  %v4319_v59 = vmul.u32 18, %v4318_v35  ;;  %v4356_v25 = vshrl.u32 %v7426_v33, 16 }
 0x2f9   : > { %v4759_v11 = vsel %vm393_vm1, %v4735_v46, 0.0  ;;  %v4795_v60 = vmul.f32 %v4735_v46, %v7389_v44  ;;  %vm4341_vm12 = vc.u32 %v4339_v1, %v4335_v12  ;;  %v4358_v26 = vmul.u32 14564, %v4355_v15  ;;  %v3650_v41 = vpop.f32.mrf.mxu3 }
 0x2fa   : > { %v3678_v31 = vadd.f32 %v3648_v9, %v3489_v37  ;;  %4035 = vst.msk [vmem:[%s6365_s10 + $0x6c] sm:$0xf] %vm1732_vm9, %v4017_v3  ;;  %v4760_v27 = vadd.f32 %v4759_v11, %v4758_v17  ;;  %v4320_v16 = vsub.s32 %v7381_v40, %v4319_v59  ;;  %v4342_v20 = vsel %vm4341_vm12, 1, %v7698_v36 }
 0x2fb   : > { %v4819_v8 = vsel %vm393_vm1, %v4795_v60, 0.0  ;;  %v4359_v61 = vmul.u32 58254, %v4355_v15  ;;  %v4344_v43 = vadd.s32 %v4342_v20, %v4340_v52  ;;  %v4360_v44 = vmul.u32 14564, %v4356_v25  ;;  %v7763_v15 = vld [vmem:[#allocation20_spill] sm:$0xff] }
 0x2fc   : > { %v3874_v30 = vadd.f32 %v3844_v5, %v3678_v31  ;;  %v4820_v53 = vadd.f32 %v4819_v8, %v4818_v38  ;;  %v3970_v28 = vpop.f32.mrf.mxu1  ;;  %v4361_v32 = vmul.u32 58254, %v4356_v25  ;;  %vm4592_vm3 = vcmp.ne.s32.totalorder %v4320_v16, 0  ;;  %v7762_v5 = vld [vmem:[#allocation21_spill] sm:$0xff] }
 0x2fd   : > { %vm4610_vm13 = vcmp.lt.s32.totalorder %v4320_v16, 0  ;;  %v4646_v10 = vadd.s32 18, %v4320_v16  ;;  %v4345_v13 = vadd.s32 %v4344_v43, %v4334_v19  ;;  %v4362_v21 = vshll.u32 %v4359_v61, 16 }
 0x2fe   : > { %v7445_v17 = vadd.f32 %v3970_v28, %v3874_v30  ;;  %vm4628_vm14 = vmand %vm4610_vm13, %vm4592_vm3  ;;  %v4363_v24 = vshrl.u32 %v4359_v61, 16  ;;  %v4364_v4 = vshll.u32 %v4360_v44, 16  ;;  %v4365_v58 = vshrl.u32 %v4360_v44, 16 }
 0x2ff   : > { %v3461_v62 = vpop.f32.mrf.mxu2  ;;  %v4664_v0 = vsel %vm4628_vm14, %v4646_v10, %v4320_v16  ;;  %v4346_v14 = vadd.s32 %v4345_v13, %v4336_v63  ;;  %vm4366_vm5 = vc.u32 %v4358_v26, %v4362_v21  ;;  %v4368_v29 = vadd.s32 %v4362_v21, %v4358_v26 }
 0x300   : > { %v3490_v40 = vadd.f32 %v3461_v62, %v7346_v47  ;;  %v4018_v38 = vpack.c.bf16 %v7445_v17, %v7445_v17  ;;  %vm4682_vm15 = vcmp.lt.s32.totalorder %v4664_v0, 16  ;;  %v3846_v56 = vpop.f32.mrf.mxu0  ;;  %v4367_v55 = vsel %vm4366_vm5, 1, %v7698_v36  ;;  %v7764_v62 = vld [vmem:[#allocation15_spill] sm:$0xff] }
 0x301   : > { %v5389_v39 = vsel %vm4682_vm15, 1.0, %v7704_v42  ;;  %v7455_v9 = vadd.s32 144, %v7761_v49  ;;  %v4347_v19 = vshrl.u32 %v4346_v14, 4  ;;  %v4369_v45 = vadd.s32 %v4367_v55, %v4361_v32  ;;  %v3653_v61 = vpop.f32.mrf.mxu3 }
 0x302   : > { %4036 = vst.msk [vmem:[%s6365_s10 + $0x70] sm:$0xf] %vm1732_vm9, %v4018_v38  ;;  %v3679_v47 = vadd.f32 %v3650_v41, %v3490_v40  ;;  %v4736_v22 = vmul.f32 %v5389_v39, %v7406_v6  ;;  %vm4370_vm2 = vc.u32 %v4368_v29, %v4364_v4  ;;  %v7467_v11 = vadd.f32 %v7763_v15, %v7762_v5 }
 0x303   : > { %v4371_v54 = vsel %vm4370_vm2, 1, %v7698_v36  ;;  %v4384_v12 = vand.u32 65535, %v7455_v9  ;;  %v4385_v7 = vshrl.u32 %v7455_v9, 16  ;;  %v4348_v46 = vmul.u32 18, %v4347_v19 }
 0x304   : > { %v3875_v57 = vadd.f32 %v3846_v56, %v3679_v47  ;;  %v4761_v37 = vsel %vm393_vm1, %v4736_v22, 0.0  ;;  %v4796_v63 = vmul.f32 %v4736_v22, %v7406_v6  ;;  %v4373_v35 = vadd.s32 %v4371_v54, %v4369_v45  ;;  %v3972_v3 = vpop.f32.mrf.mxu1 }
 0x305   : > { %v4762_v50 = vadd.f32 %v4761_v37, %v4760_v27  ;;  %v4388_v31 = vmul.u32 58254, %v4384_v12  ;;  %v4349_v59 = vsub.s32 %v7398_v51, %v4348_v46  ;;  %v4387_v26 = vmul.u32 14564, %v4384_v12 }
 0x306   : > { %v7463_v52 = vadd.f32 %v3972_v3, %v3875_v57  ;;  %v4821_v60 = vsel %vm393_vm1, %v4796_v63, 0.0  ;;  %v4374_v25 = vadd.s32 %v4373_v35, %v4363_v24  ;;  %v4389_v8 = vmul.u32 14564, %v4385_v7 }
 0x307   : > { %v3464_v1 = vpop.f32.mrf.mxu2  ;;  %v4822_v30 = vadd.f32 %v4821_v60, %v4820_v53  ;;  %vm4593_vm4 = vcmp.ne.s32.totalorder %v4349_v59, 0  ;;  %vm4611_vm8 = vcmp.lt.s32.totalorder %v4349_v59, 0  ;;  %v4647_v16 = vadd.s32 18, %v4349_v59 }
 0x308   : > { %v3491_v6 = vadd.f32 %v3464_v1, %v7402_v48  ;;  %v4019_v27 = vpack.c.bf16 %v7463_v52, %v7463_v52  ;;  %v4375_v20 = vadd.s32 %v4374_v25, %v4365_v58  ;;  %v3849_v43 = vpop.f32.mrf.mxu0  ;;  %vm4629_vm10 = vmand %vm4611_vm8, %vm4593_vm4  ;;  %v4390_v28 = vmul.u32 58254, %v4385_v7 }
 0x309   : > { %v4391_v51 = vshll.u32 %v4388_v31, 16  ;;  %v4392_v44 = vshrl.u32 %v4388_v31, 16  ;;  %v4393_v32 = vshll.u32 %v4389_v8, 16  ;;  %v4665_v48 = vsel %vm4629_vm10, %v4647_v16, %v4349_v59  ;;  %v3655_v35 = vpop.f32.mrf.mxu3 }
 0x30a   : > { %4037 = vst.msk [vmem:[%s6365_s10 + $0x74] sm:$0xf] %vm1732_vm9, %v4019_v27  ;;  %v4376_v53 = vshrl.u32 %v4375_v20, 4  ;;  %v3680_v10 = vadd.f32 %v3653_v61, %v3491_v6  ;;  %v7477_v13 = vadd.s32 144, %v7764_v62  ;;  %vm4683_vm0 = vcmp.lt.s32.totalorder %v4665_v48, 16  ;;  %v7765_v61 = vld [vmem:[#allocation3_spill] sm:$0xff] }
 0x30b   : > { %v4394_v41 = vshrl.u32 %v4389_v8, 16  ;;  %vm4395_vm11 = vc.u32 %v4387_v26, %v4391_v51  ;;  %v4397_v40 = vadd.s32 %v4391_v51, %v4387_v26  ;;  %v5390_v21 = vsel %vm4683_vm0, 1.0, %v7704_v42 }
 0x30c   : > { %v4377_v24 = vmul.u32 18, %v4376_v53  ;;  %v4396_v0 = vsel %vm4395_vm11, 1, %v7698_v36  ;;  %v3876_v38 = vadd.f32 %v3849_v43, %v3680_v10  ;;  %v4737_v4 = vmul.f32 %v5390_v21, %v7428_v2  ;;  %v3975_v14 = vpop.f32.mrf.mxu1 }
 0x30d   : > { %v4398_v58 = vadd.s32 %v4396_v0, %v4390_v28  ;;  %vm4399_vm7 = vc.u32 %v4397_v40, %v4393_v32  ;;  %v4413_v56 = vand.u32 65535, %v7477_v13  ;;  %v4414_v54 = vshrl.u32 %v7477_v13, 16 }
 0x30e   : > { %v4378_v39 = vsub.s32 %v7426_v33, %v4377_v24  ;;  %v4400_v55 = vsel %vm4399_vm7, 1, %v7698_v36  ;;  %v7486_v49 = vadd.f32 %v3975_v14, %v3876_v38  ;;  %v4763_v22 = vsel %vm393_vm1, %v4737_v4, 0.0  ;;  %v7767_v14 = vld [vmem:[#allocation23_spill] sm:$0xff] }
 0x30f   : > { %v3466_v29 = vpop.f32.mrf.mxu2  ;;  %v4797_v19 = vmul.f32 %v4737_v4, %v7428_v2  ;;  %v4402_v45 = vadd.s32 %v4400_v55, %v4398_v58  ;;  %v4764_v57 = vadd.f32 %v4763_v22, %v4762_v50  ;;  %v4416_v37 = vmul.u32 14564, %v4413_v56  ;;  %v7766_v58 = vld [vmem:[#allocation22_spill] sm:$0xff] }
 0x310   : > { %v3492_v47 = vadd.f32 %v3466_v29, %v7423_v34  ;;  %vm4594_vm6 = vcmp.ne.s32.totalorder %v4378_v39, 0  ;;  %vm4612_vm12 = vcmp.lt.s32.totalorder %v4378_v39, 0  ;;  %v4648_v12 = vadd.s32 18, %v4378_v39  ;;  %v3851_v1 = vpop.f32.mrf.mxu0 }
 0x311   : > { %v4823_v33 = vsel %vm393_vm1, %v4797_v19, 0.0  ;;  %vm4630_vm3 = vmand %vm4612_vm12, %vm4594_vm6  ;;  %v4403_v7 = vadd.s32 %v4402_v45, %v4392_v44  ;;  %v4020_v34 = vpack.c.bf16 %v7486_v49, %v7486_v49  ;;  %v4417_v2 = vmul.u32 58254, %v4413_v56 }
 0x312   : > { %v4824_v63 = vadd.f32 %v4823_v33, %v4822_v30  ;;  %v4666_v46 = vsel %vm4630_vm3, %v4648_v12, %v4378_v39  ;;  %v4418_v3 = vmul.u32 14564, %v4414_v54  ;;  %v4419_v31 = vmul.u32 58254, %v4414_v54  ;;  %v7768_v12 = vld [vmem:[#allocation7_spill] sm:$0xff] }
 0x313   : > { %vm4684_vm13 = vcmp.lt.s32.totalorder %v4666_v46, 16  ;;  %v4404_v50 = vadd.s32 %v4403_v7, %v4394_v41  ;;  %4038 = vst.msk [vmem:[%s6365_s10 + $0x78] sm:$0xf] %vm1732_vm9, %v4020_v34  ;;  %v3681_v5 = vadd.f32 %v3655_v35, %v3492_v47  ;;  %v4420_v60 = vshll.u32 %v4417_v2, 16 }
 0x314   : > { %v5391_v15 = vsel %vm4684_vm13, 1.0, %v7704_v42  ;;  %v4421_v59 = vshrl.u32 %v4417_v2, 16  ;;  %v4422_v25 = vshll.u32 %v4418_v3, 16  ;;  %v4423_v30 = vshrl.u32 %v4418_v3, 16  ;;  %v3977_v48 = vpop.f32.mrf.mxu1 }
 0x315   : > { %v4738_v6 = vmul.f32 %v5391_v15, %v7445_v17  ;;  %v4405_v27 = vshrl.u32 %v4404_v50, 4  ;;  %v3877_v8 = vadd.f32 %v3851_v1, %v3681_v5  ;;  %vm4424_vm14 = vc.u32 %v4416_v37, %v4420_v60 }
 0x316   : > { %v4426_v16 = vadd.s32 %v4420_v60, %v4416_v37  ;;  %v7500_v43 = vadd.s32 144, %v7765_v61  ;;  %v4425_v32 = vsel %vm4424_vm14, 1, %v7698_v36  ;;  %v3368_v29 = vadd.f32 %v7767_v14, %v7766_v58 }
 0x317   : > { %v3469_v26 = vpop.f32.mrf.mxu2  ;;  %v4765_v28 = vsel %vm393_vm1, %v4738_v6, 0.0  ;;  %v4798_v51 = vmul.f32 %v4738_v6, %v7445_v17  ;;  %v4406_v44 = vmul.u32 18, %v4405_v27  ;;  %v4427_v10 = vadd.s32 %v4425_v32, %v4419_v31 }
 0x318   : > { %v3493_v20 = vadd.f32 %v3469_v26, %v7467_v11  ;;  %v4766_v53 = vadd.f32 %v4765_v28, %v4764_v57  ;;  %vm4428_vm15 = vc.u32 %v4426_v16, %v4422_v25  ;;  %v7505_v62 = vadd.f32 %v3977_v48, %v3877_v8  ;;  %v3854_v57 = vpop.f32.mrf.mxu0 }
 0x319   : > { %v4825_v41 = vsel %vm393_vm1, %v4798_v51, 0.0  ;;  %v4407_v11 = vsub.s32 %v7455_v9, %v4406_v44  ;;  %v4429_v40 = vsel %vm4428_vm15, 1, %v7698_v36  ;;  %v4442_v21 = vand.u32 65535, %v7500_v43  ;;  %v3658_v9 = vpop.f32.mrf.mxu3 }
 0x31a   : > { %v4826_v24 = vadd.f32 %v4825_v41, %v4824_v63  ;;  %v4431_v17 = vadd.s32 %v4429_v40, %v4427_v10  ;;  %v4021_v0 = vpack.c.bf16 %v7505_v62, %v7505_v62  ;;  %v4443_v38 = vshrl.u32 %v7500_v43, 16  ;;  %v7769_v10 = vld [vmem:[#allocation24_spill] sm:$0xff]  ;;  %v7770_v41 = vld [vmem:[#allocation2_spill] sm:$0xff] }
 0x31b   : > { %vm4595_vm5 = vcmp.ne.s32.totalorder %v4407_v11, 0  ;;  %vm4613_vm2 = vcmp.lt.s32.totalorder %v4407_v11, 0  ;;  %v4649_v4 = vadd.s32 18, %v4407_v11  ;;  %v4445_v39 = vmul.u32 14564, %v4442_v21 }
 0x31c   : > { %vm4631_vm4 = vmand %vm4613_vm2, %vm4595_vm5  ;;  %v4432_v56 = vadd.s32 %v4431_v17, %v4421_v59  ;;  %4039 = vst.msk [vmem:[%s6365_s10 + $0x7c] sm:$0xf] %vm1732_vm9, %v4021_v0  ;;  %v4446_v55 = vmul.u32 58254, %v4442_v21  ;;  %v4447_v47 = vmul.u32 14564, %v4443_v38  ;;  %v4448_v19 = vmul.u32 58254, %v4443_v38  ;;  %v3980_v5 = vpop.f32.mrf.mxu1 }
 0x31d   : > { %v4667_v22 = vsel %vm4631_vm4, %v4649_v4, %v4407_v11  ;;  %v3682_v54 = vadd.f32 %v3658_v9, %v3493_v20  ;;  %v7519_v33 = vadd.s32 144, %v7768_v12  ;;  %v3369_v11 = vadd.f32 %v7770_v41, %v7769_v10 }
 0x31e   : > { %vm4685_vm8 = vcmp.lt.s32.totalorder %v4667_v22, 16  ;;  %v4433_v7 = vadd.s32 %v4432_v56, %v4423_v30  ;;  %v4449_v34 = vshll.u32 %v4446_v55, 16  ;;  %v4450_v37 = vshrl.u32 %v4446_v55, 16  ;;  %v7771_v22 = vld [vmem:[#allocation6_spill] sm:$0xff] }
 0x31f   : > { %v3471_v45 = vpop.f32.mrf.mxu2  ;;  %v5392_v63 = vsel %vm4685_vm8, 1.0, %v7704_v42  ;;  %v4451_v46 = vshll.u32 %v4447_v47, 16  ;;  %v4452_v35 = vshrl.u32 %v4447_v47, 16  ;;  %v3878_v15 = vadd.f32 %v3854_v57, %v3682_v54 }
 0x320   : > { %v3494_v2 = vadd.f32 %v3471_v45, %v3368_v29  ;;  %v4739_v3 = vmul.f32 %v5392_v63, %v7463_v52  ;;  %v4434_v1 = vshrl.u32 %v4433_v7, 4  ;;  %vm4453_vm10 = vc.u32 %v4445_v39, %v4449_v34 }
 0x321   : > { %v4455_v50 = vadd.s32 %v4449_v34, %v4445_v39  ;;  %v4454_v31 = vsel %vm4453_vm10, 1, %v7698_v36  ;;  %v4471_v60 = vand.u32 65535, %v7519_v33  ;;  %v4472_v59 = vshrl.u32 %v7519_v33, 16  ;;  %v3660_v21 = vpop.f32.mrf.mxu3 }
 0x322   : > { %v4767_v25 = vsel %vm393_vm1, %v4739_v3, 0.0  ;;  %v4799_v6 = vmul.f32 %v4739_v3, %v7463_v52  ;;  %v4435_v27 = vmul.u32 18, %v4434_v1  ;;  %v4456_v30 = vadd.s32 %v4454_v31, %v4448_v19 }
 0x323   : > { %v4768_v26 = vadd.f32 %v4767_v25, %v4766_v53  ;;  %vm4457_vm0 = vc.u32 %v4455_v50, %v4451_v46  ;;  %v7528_v8 = vadd.f32 %v3980_v5, %v3878_v15  ;;  %v4474_v16 = vmul.u32 14564, %v4471_v60 }
 0x324   : > { %v4827_v20 = vsel %vm393_vm1, %v4799_v6, 0.0  ;;  %v4436_v61 = vsub.s32 %v7477_v13, %v4435_v27  ;;  %v4458_v28 = vsel %vm4457_vm0, 1, %v7698_v36  ;;  %v4475_v51 = vmul.u32 58254, %v4471_v60  ;;  %v3982_v12 = vpop.f32.mrf.mxu1 }
 0x325   : > { %v4828_v44 = vadd.f32 %v4827_v20, %v4826_v24  ;;  %v4460_v32 = vadd.s32 %v4458_v28, %v4456_v30  ;;  %v4022_v52 = vpack.c.bf16 %v7528_v8, %v7528_v8  ;;  %v4476_v48 = vmul.u32 14564, %v4472_v59  ;;  %v3856_v24 = vpop.f32.mrf.mxu0 }
 0x326   : > { %vm4596_vm11 = vcmp.ne.s32.totalorder %v4436_v61, 0  ;;  %vm4614_vm7 = vcmp.lt.s32.totalorder %v4436_v61, 0  ;;  %v4650_v53 = vadd.s32 18, %v4436_v61  ;;  %v4477_v13 = vmul.u32 58254, %v4472_v59 }
 0x327   : > { %vm4632_vm6 = vmand %vm4614_vm7, %vm4596_vm11  ;;  %v4461_v40 = vadd.s32 %v4460_v32, %v4450_v37  ;;  %4040 = vst.msk [vmem:[%s6365_s10 + $0x80] sm:$0xf] %vm1732_vm9, %v4022_v52  ;;  %v4478_v17 = vshll.u32 %v4475_v51, 16  ;;  %v4480_v0 = vshll.u32 %v4476_v48, 16  ;;  %v4479_v4 = vshrl.u32 %v4475_v51, 16  ;;  %v3474_v55 = vpop.f32.mrf.mxu2 }
 0x328   : > { %v4668_v38 = vsel %vm4632_vm6, %v4650_v53, %v4436_v61  ;;  %v4481_v58 = vshrl.u32 %v4476_v48, 16  ;;  %v3683_v14 = vadd.f32 %v3660_v21, %v3494_v2  ;;  %v7542_v19 = vadd.s32 144, %v7771_v22 }
 0x329   : > { %vm4686_vm12 = vcmp.lt.s32.totalorder %v4668_v38, 16  ;;  %v4462_v29 = vadd.s32 %v4461_v40, %v4452_v35  ;;  %vm4482_vm3 = vc.u32 %v4474_v16, %v4478_v17  ;;  %v4484_v56 = vadd.s32 %v4478_v17, %v4474_v16  ;;  %v3663_v32 = vpop.f32.mrf.mxu3 }
 0x32a   : > { %v5393_v9 = vsel %vm4686_vm12, 1.0, %v7704_v42  ;;  %v4483_v39 = vsel %vm4482_vm3, 1, %v7698_v36  ;;  %v3879_v47 = vadd.f32 %v3856_v24, %v3683_v14  ;;  %v4500_v37 = vand.u32 65535, %v7542_v19 }
 0x32b   : > { %v4740_v45 = vmul.f32 %v5393_v9, %v7486_v49  ;;  %v4463_v54 = vshrl.u32 %v4462_v29, 4  ;;  %v4485_v57 = vadd.s32 %v4483_v39, %v4477_v13  ;;  %vm4486_vm13 = vc.u32 %v4484_v56, %v4480_v0  ;;  %v7772_v13 = vld [vmem:[#allocation8_spill] sm:$0xff] }
 0x32c   : > { %v4487_v7 = vsel %vm4486_vm13, 1, %v7698_v36  ;;  %v7546_v34 = vadd.f32 %v3982_v12, %v3879_v47  ;;  %v4501_v63 = vshrl.u32 %v7542_v19, 16  ;;  %v4503_v31 = vmul.u32 14564, %v4500_v37 }
 0x32d   : > { %v4769_v46 = vsel %vm393_vm1, %v4740_v45, 0.0  ;;  %v4800_v35 = vmul.f32 %v4740_v45, %v7486_v49  ;;  %v4464_v2 = vmul.u32 18, %v4463_v54  ;;  %v4489_v3 = vadd.s32 %v4487_v7, %v4485_v57  ;;  %v3859_v48 = vpop.f32.mrf.mxu0 }
 0x32e   : > { %v4770_v1 = vadd.f32 %v4769_v46, %v4768_v26  ;;  %v4023_v50 = vpack.c.bf16 %v7546_v34, %v7546_v34  ;;  %v4504_v5 = vmul.u32 58254, %v4500_v37  ;;  %v4505_v25 = vmul.u32 14564, %v4501_v63 }
 0x32f   : > { %v4829_v15 = vsel %vm393_vm1, %v4800_v35, 0.0  ;;  %v4465_v60 = vsub.s32 %v7500_v43, %v4464_v2  ;;  %v4490_v59 = vadd.s32 %v4489_v3, %v4479_v4  ;;  %v3495_v27 = vadd.f32 %v3474_v55, %v3369_v11  ;;  %v3476_v10 = vpop.f32.mrf.mxu2  ;;  %v3985_v4 = vpop.f32.mrf.mxu1 }
 0x330   : > { %v4830_v6 = vadd.f32 %v4829_v15, %v4828_v44  ;;  %4041 = vst.msk [vmem:[%s6365_s10 + $0x84] sm:$0xf] %vm1732_vm9, %v4023_v50  ;;  %v4506_v30 = vmul.u32 58254, %v4501_v63  ;;  %v4507_v49 = vshll.u32 %v4504_v5, 16  ;;  %v4509_v20 = vshll.u32 %v4505_v25, 16 }
 0x331   : > { %vm4597_vm14 = vcmp.ne.s32.totalorder %v4465_v60, 0  ;;  %vm4615_vm15 = vcmp.lt.s32.totalorder %v4465_v60, 0  ;;  %v4651_v26 = vadd.s32 18, %v4465_v60  ;;  %v4491_v16 = vadd.s32 %v4490_v59, %v4481_v58 }
 0x332   : > { %vm4633_vm5 = vmand %vm4615_vm15, %vm4597_vm14  ;;  %vm4511_vm2 = vc.u32 %v4503_v31, %v4507_v49  ;;  %v4513_v61 = vadd.s32 %v4507_v49, %v4503_v31  ;;  %v3370_v28 = vadd.f32 %v7225_v23, %v7217_v18  ;;  %v4508_v44 = vshrl.u32 %v4504_v5, 16  ;;  %v3665_v31 = vpop.f32.mrf.mxu3 }
 0x333   : > { %v4669_v43 = vsel %vm4633_vm5, %v4651_v26, %v4465_v60  ;;  %v4492_v51 = vshrl.u32 %v4491_v16, 4  ;;  %v4512_v52 = vsel %vm4511_vm2, 1, %v7698_v36  ;;  %v3684_v41 = vadd.f32 %v3663_v32, %v3495_v27 }
 0x334   : > { %vm4687_vm4 = vcmp.lt.s32.totalorder %v4669_v43, 16  ;;  %v4514_v53 = vadd.s32 %v4512_v52, %v4506_v30  ;;  %vm4515_vm8 = vc.u32 %v4513_v61, %v4509_v20  ;;  %v7564_v18 = vadd.s32 144, %v7772_v13 }
 0x335   : > { %v5394_v11 = vsel %vm4687_vm4, 1.0, %v7704_v42  ;;  %v4493_v40 = vmul.u32 18, %v4492_v51  ;;  %v4516_v21 = vsel %vm4515_vm8, 1, %v7698_v36  ;;  %v4510_v17 = vshrl.u32 %v4505_v25, 16  ;;  %v3861_v15 = vpop.f32.mrf.mxu0  ;;  %v7773_v25 = vld [vmem:[#allocation4_spill] sm:$0xff] }
 0x336   : > { %v4741_v23 = vmul.f32 %v5394_v11, %v7505_v62  ;;  %v4518_v0 = vadd.s32 %v4516_v21, %v4514_v53  ;;  %v3880_v24 = vadd.f32 %v3859_v48, %v3684_v41  ;;  %v3496_v58 = vadd.f32 %v3476_v10, %v3370_v28 }
 0x337   : > { %v4494_v38 = vsub.s32 %v7519_v33, %v4493_v40  ;;  %v4529_v14 = vand.u32 65535, %v7564_v18  ;;  %v4530_v29 = vshrl.u32 %v7564_v18, 16  ;;  %vm244_vm6 = vcmask 58368   ;;  %v3987_v51 = vpop.f32.mrf.mxu1 }
 0x338   : > { %v4771_v56 = vsel %vm393_vm1, %v4741_v23, 0.0  ;;  %v4801_v9 = vmul.f32 %v4741_v23, %v7505_v62  ;;  %v4519_v39 = vadd.s32 %v4518_v0, %v4508_v44  ;;  %v7573_v55 = vadd.f32 %v3985_v4, %v3880_v24  ;;  %245 = vst.msk [vmem:[%s7581_s16] sm:$0x3] %vm244_vm6, %v7704_v42 }
 0x339   : > { %v4772_v47 = vadd.f32 %v4771_v56, %v4770_v1  ;;  %vm4598_vm10 = vcmp.ne.s32.totalorder %v4494_v38, 0  ;;  %vm4616_vm0 = vcmp.lt.s32.totalorder %v4494_v38, 0  ;;  %v4652_v22 = vadd.s32 18, %v4494_v38 }
 0x33a   : > { %v4831_v33 = vsel %vm393_vm1, %v4801_v9, 0.0  ;;  %vm4634_vm11 = vmand %vm4616_vm0, %vm4598_vm10  ;;  %v4520_v45 = vadd.s32 %v4519_v39, %v4510_v17  ;;  %v4024_v54 = vpack.c.bf16 %v7573_v55, %v7573_v55  ;;  %v4532_v57 = vmul.u32 14564, %v4529_v14 }
 0x33b   : > { %v4832_v62 = vadd.f32 %v4831_v33, %v4830_v6  ;;  %v4670_v12 = vsel %vm4634_vm11, %v4652_v22, %v4494_v38  ;;  %v4533_v7 = vmul.u32 58254, %v4529_v14  ;;  %v4534_v37 = vmul.u32 14564, %v4530_v29 }
 0x33c   : > { %vm4688_vm7 = vcmp.lt.s32.totalorder %v4670_v12, 16  ;;  %v4521_v63 = vshrl.u32 %v4520_v45, 4  ;;  %4042 = vst.msk [vmem:[%s6365_s10 + $0x88] sm:$0xf] %vm1732_vm9, %v4024_v54  ;;  %v4535_v35 = vmul.u32 58254, %v4530_v29  ;;  %v3685_v59 = vadd.f32 %v3665_v31, %v3496_v58  ;;  %v7774_v31 = vld [vmem:[#allocation11_spill] sm:$0xff] }
 0x33d   : > { %v5395_v46 = vsel %vm4688_vm7, 1.0, %v7704_v42  ;;  %v4536_v2 = vshll.u32 %v4533_v7, 16  ;;  %v4538_v3 = vshll.u32 %v4534_v37, 16  ;;  %v4537_v5 = vshrl.u32 %v4533_v7, 16 }
 0x33e   : > { %v4742_v1 = vmul.f32 %v5395_v46, %v7528_v8  ;;  %v4522_v50 = vmul.u32 18, %v4521_v63  ;;  %v7590_v6 = vadd.s32 144, %v7773_v25  ;;  %v3881_v61 = vadd.f32 %v3861_v15, %v3685_v59 }
 0x33f   : > { %vm4540_vm12 = vc.u32 %v4532_v57, %v4536_v2  ;;  %v4542_v60 = vadd.s32 %v4536_v2, %v4532_v57  ;;  %v4539_v48 = vshrl.u32 %v4534_v37, 16 }
 0x340   : > { %v4773_v27 = vsel %vm393_vm1, %v4742_v1, 0.0  ;;  %v4802_v30 = vmul.f32 %v4742_v1, %v7528_v8  ;;  %v4523_v49 = vsub.s32 %v7542_v19, %v4522_v50  ;;  %v4541_v26 = vsel %vm4540_vm12, 1, %v7698_v36 }
 0x341   : > { %v4774_v16 = vadd.f32 %v4773_v27, %v4772_v47  ;;  %v4543_v20 = vadd.s32 %v4541_v26, %v4535_v35  ;;  %vm4544_vm3 = vc.u32 %v4542_v60, %v4538_v3  ;;  %v7598_v8 = vadd.f32 %v3987_v51, %v3881_v61  ;;  %v7775_v27 = vld [vmem:[#allocation9_spill] sm:$0xff] }
 0x342   : > { %v4833_v28 = vsel %vm393_vm1, %v4802_v30, 0.0  ;;  %vm4599_vm13 = vcmp.ne.s32.totalorder %v4523_v49, 0  ;;  %vm4617_vm14 = vcmp.lt.s32.totalorder %v4523_v49, 0  ;;  %v4653_v43 = vadd.s32 18, %v4523_v49 }
 0x343   : > { %v4834_v32 = vadd.f32 %v4833_v28, %v4832_v62  ;;  %vm4635_vm15 = vmand %vm4617_vm14, %vm4599_vm13  ;;  %v4545_v44 = vsel %vm4544_vm3, 1, %v7698_v36  ;;  %v4558_v19 = vand.u32 65535, %v7590_v6  ;;  %v4559_v10 = vshrl.u32 %v7590_v6, 16 }
 0x344   : > { %v4671_v52 = vsel %vm4635_vm15, %v4653_v43, %v4523_v49  ;;  %v4547_v53 = vadd.s32 %v4545_v44, %v4543_v20  ;;  %v4025_v41 = vpack.c.bf16 %v7598_v8, %v7598_v8  ;;  %v2549_v30 = vrot.slane %v7775_v27, 4 }
 0x345   : > { %vm4689_vm5 = vcmp.lt.s32.totalorder %v4671_v52, 16  ;;  %v4561_v11 = vmul.u32 14564, %v4558_v19  ;;  %v4562_v40 = vmul.u32 58254, %v4558_v19  ;;  %v4563_v23 = vmul.u32 14564, %v4559_v10 }
 0x346   : > { %v5396_v21 = vsel %vm4689_vm5, 1.0, %v7704_v42  ;;  %v4548_v13 = vadd.s32 %v4547_v53, %v4537_v5  ;;  %4043 = vst.msk [vmem:[%s6365_s10 + $0x8c] sm:$0xf] %vm1732_vm9, %v4025_v41  ;;  %v4564_v0 = vmul.u32 58254, %v4559_v10  ;;  %v2489_v5 = vrot.slane %v7774_v31, 4 }
 0x347   : > { %v4743_v17 = vmul.f32 %v5396_v21, %v7546_v34  ;;  %v4565_v24 = vshll.u32 %v4562_v40, 16  ;;  %v4567_v4 = vshll.u32 %v4563_v23, 16  ;;  %v4566_v22 = vshrl.u32 %v4562_v40, 16 }
 0x348   : > { %v4549_v38 = vadd.s32 %v4548_v13, %v4539_v48  ;;  %v4568_v62 = vshrl.u32 %v4563_v23, 16  ;;  %v2490_v26 = vadd.f32 %v2489_v5, %v7774_v31 }
 0x349   : > { %v4775_v58 = vsel %vm393_vm1, %v4743_v17, 0.0  ;;  %v4803_v14 = vmul.f32 %v4743_v17, %v7546_v34  ;;  %vm4569_vm2 = vc.u32 %v4561_v11, %v4565_v24  ;;  %v4571_v29 = vadd.s32 %v4565_v24, %v4561_v11 }
 0x34a   : > { %v4776_v56 = vadd.f32 %v4775_v58, %v4774_v16  ;;  %v4550_v9 = vshrl.u32 %v4549_v38, 4  ;;  %v4570_v39 = vsel %vm4569_vm2, 1, %v7698_v36  ;;  %v2550_v16 = vadd.f32 %v2549_v30, %v7775_v27  ;;  %v4848_v38 = vld [vmem:[%s7581_s16] sm:$0x1] }
 0x34b   : > { %v4835_v47 = vsel %vm393_vm1, %v4803_v14, 0.0  ;;  %v4572_v33 = vadd.s32 %v4570_v39, %v4564_v0  ;;  %vm4573_vm4 = vc.u32 %v4571_v29, %v4567_v4  ;;  %v2491_v28 = vrot.slane %v2490_v26, 2  ;;  %v4852_v29 = vld [vmem:[%s7581_s16 + $0x1] sm:$0x1] }
 0x34c   : > { %v4836_v45 = vadd.f32 %v4835_v47, %v4834_v32  ;;  %v4551_v54 = vmul.u32 18, %v4550_v9  ;;  %v4574_v57 = vsel %vm4573_vm4, 1, %v7698_v36  ;;  %v2551_v32 = vrot.slane %v2550_v16, 2 }
 0x34d   : > { %v4576_v12 = vadd.s32 %v4574_v57, %v4572_v33  ;;  %v2492_v52 = vadd.f32 %v2491_v28, %v2490_v26 }
 0x34e   : > { %v4552_v7 = vsub.s32 %v7564_v18, %v4551_v54 }
 0x34f   : > { %v4577_v34 = vadd.s32 %v4576_v12, %v4566_v22  ;;  %v2493_v11 = vrot.slane %v2492_v52, 1 }
 0x350   : > { %vm4600_vm9 = vcmp.ne.s32.totalorder %v4552_v7, 0  ;;  %vm4618_vm8 = vcmp.lt.s32.totalorder %v4552_v7, 0  ;;  %v4654_v37 = vadd.s32 18, %v4552_v7 }
 0x351   : > { %vm4636_vm10 = vmand %vm4618_vm8, %vm4600_vm9  ;;  %v4578_v63 = vadd.s32 %v4577_v34, %v4568_v62  ;;  %v2494_v17 = vadd.f32 %v2493_v11, %v2492_v52 }
 0x352   : > { %v4672_v46 = vsel %vm4636_vm10, %v4654_v37, %v4552_v7 }
 0x353   : > { %vm4690_vm0 = vcmp.lt.s32.totalorder %v4672_v46, 16  ;;  %v4579_v35 = vshrl.u32 %v4578_v63, 4 }
 0x354   : > { %v5397_v2 = vsel %vm4690_vm0, 1.0, %v7704_v42 }
 0x355   : > { %v4744_v3 = vmul.f32 %v5397_v2, %v7573_v55  ;;  %v4580_v1 = vmul.u32 18, %v4579_v35 }
 0x357   : > { %v4777_v36 = vsel %vm393_vm1, %v4744_v3, 0.0  ;;  %v4804_v50 = vmul.f32 %v4744_v3, %v7573_v55  ;;  %v4581_v18 = vsub.s32 %v7590_v6, %v4580_v1 }
 0x358   : > { %v4778_v15 = vadd.f32 %v4777_v36, %v4776_v56 }
 0x359   : > { %v4837_v60 = vsel %vm393_vm1, %v4804_v50, 0.0  ;;  %vm4601_vm11 = vcmp.ne.s32.totalorder %v4581_v18, 0  ;;  %vm4619_vm7 = vcmp.lt.s32.totalorder %v4581_v18, 0  ;;  %v4655_v59 = vadd.s32 18, %v4581_v18 }
 0x35a   : > { %v4838_v25 = vadd.f32 %v4837_v60, %v4836_v45  ;;  %vm4637_vm6 = vmand %vm4619_vm7, %vm4601_vm11 }
 0x35b   : > { %v4673_v49 = vsel %vm4637_vm6, %v4655_v59, %v4581_v18 }
 0x35c   : > { %vm4691_vm12 = vcmp.lt.s32.totalorder %v4673_v49, 16 }
 0x35d   : > { %v5398_v55 = vsel %vm4691_vm12, 1.0, %v7704_v42  ;;  %v2552_v42 = vadd.f32 %v2551_v32, %v2550_v16 }
 0x35e   : > { %v4745_v6 = vmul.f32 %v5398_v55, %v7598_v8 }
 0x360   : > { %v4779_v20 = vsel %vm393_vm1, %v4745_v6, 0.0  ;;  %v4805_v61 = vmul.f32 %v4745_v6, %v7598_v8  ;;  %v2553_v8 = vrot.slane %v2552_v42, 1 }
 0x361   : > { %v4780_v43 = vadd.f32 %v4779_v20, %v4778_v15 }
 0x362   : > { %v4839_v51 = vsel %vm393_vm1, %v4805_v61, 0.0  ;;  %v2554_v4 = vadd.f32 %v2553_v8, %v2552_v42  ;;  %vm4850_vm1 = vcmask 57344  }
 0x363   : > { %v4781_v44 = vrot.slane %v4780_v43, 4  ;;  %v4840_v19 = vadd.f32 %v4839_v51, %v4838_v25 }
 0x365   : > { %v4782_v48 = vadd.f32 %v4781_v44, %v4780_v43  ;;  %v4841_v53 = vrot.slane %v4840_v19, 4 }
 0x367   : > { %v4783_v10 = vrot.slane %v4782_v48, 2  ;;  %v4842_v41 = vadd.f32 %v4841_v53, %v4840_v19 }
 0x369   : > { %v4784_v40 = vadd.f32 %v4783_v10, %v4782_v48  ;;  %v4843_v21 = vrot.slane %v4842_v41, 2 }
 0x36b   : > { %v4785_v13 = vrot.slane %v4784_v40, 1  ;;  %v4844_v23 = vadd.f32 %v4843_v21, %v4842_v41 }
 0x36d   : > { %v4786_v0 = vadd.f32 %v4785_v13, %v4784_v40  ;;  %v4845_v24 = vrot.slane %v4844_v23, 1 }
 0x36f   : > { %v4787_v58 = vadd.f32 %v4786_v0, %v2494_v17  ;;  %v4846_v14 = vadd.f32 %v4845_v24, %v4844_v23 }
 0x371   : > { %v4847_v56 = vadd.f32 %v4846_v14, %v2554_v4  ;;  %v4849_v9 = vadd.f32 %v4848_v38, %v4787_v58 }
 0x373   : > { %4851 = vst.msk [vmem:[%s7581_s16] sm:$0x1] %vm4850_vm1, %v4849_v9  ;;  %v4853_v39 = vadd.f32 %v4852_v29, %v4847_v56 }
 0x375   : > { %4854 = vst.msk [vmem:[%s7581_s16 + $0x1] sm:$0x1] %vm4850_vm1, %v4853_v39 }
 0x376 PF: > { %s14_s14 = sadd.s32 1, %s5531_s14   ;;  %s7776_s12 = smov %s5527_s13 }
 0x377   : > { %p11_p5 = scmp.ge.s32.totalorder %s14_s14, 4   ;;  %s7777_s13 = smov %s7779_s15 }
 0x379   :  { %13 = sbr.rel (!%p11_p5) target bundleno = 2 (0x2), region = 82 }

</bundles_post_ra>
